<compile_context>
chip_gen: v7x
topology: tpu7x:2x2x1
jax: 0.10.0
libtpu: 0.0.40
codegen_flags: <defaults>
</compile_context>

<pallas_src>
import functools

import jax
import jax.numpy as jnp
from jax.experimental import pallas as pl
from jax.experimental.pallas import tpu as pltpu


# ----------------------------------------------------------------------------
# Generic GEMM kernel (used only for the stem now; fc moved to plain XLA)
# ----------------------------------------------------------------------------
def _mm_bias_act_kernel(x_ref, w_ref, b_ref, o_ref, *, act):
    """y = act(x @ w + b); BN scale pre-folded into w (bf16), f32 accumulate."""
    x = x_ref[...].astype(w_ref.dtype)
    y = jnp.dot(x, w_ref[...], preferred_element_type=jnp.float32)
    y = y + b_ref[...]
    if act == "silu":
        y = y * jax.nn.sigmoid(y)
    o_ref[...] = y.astype(o_ref.dtype)


def matmul_bias_act(x, w, b, act="none", out_dtype=jnp.float32, tm=256):
    M, K = x.shape
    N = w.shape[1]
    if M <= tm:
        tm = M
        Mp = M
    else:
        Mp = pl.cdiv(M, tm) * tm
    if Mp != M:                       # masked/padded remainder tile (robust M)
        x = jnp.pad(x, ((0, Mp - M), (0, 0)))
    out = pl.pallas_call(
        functools.partial(_mm_bias_act_kernel, act=act),
        out_shape=jax.ShapeDtypeStruct((Mp, N), out_dtype),
        grid=(Mp // tm,),
        in_specs=[
            pl.BlockSpec((tm, K), lambda i: (i, 0)),
            pl.BlockSpec((K, N), lambda i: (0, 0)),
            pl.BlockSpec((1, N), lambda i: (0, 0)),
        ],
        out_specs=pl.BlockSpec((tm, N), lambda i: (i, 0)),
        compiler_params=pltpu.CompilerParams(dimension_semantics=("parallel",)),
    )(x, w, b)
    return out if Mp == M else out[:M]


# ----------------------------------------------------------------------------
# Block 1: fully fused  dw3x3 s1 + BN + SiLU + SE + excite + (pw.exp) GEMM
# ----------------------------------------------------------------------------
def _block1_kernel(xp_ref, w_ref, b_ref, sw1_ref, sb1_ref, sw2_ref, sb2_ref,
                   mw_ref, mb_ref, o_ref, *, H, W):
    """Per image: depthwise 3x3 stride-1 (BN folded) + SiLU, SE squeeze + FCs,
    then the excite multiply folded into the (pw 32->16 . exp 16->96) GEMM +
    SiLU.  The depthwise activation never leaves VMEM."""
    w = w_ref[...]                                         # (9, C) f32
    C = w.shape[-1]
    acc = jnp.zeros((H, W, C), jnp.float32)
    for di in range(3):
        for dj in range(3):
            tap = xp_ref[0, di:di + H, dj:dj + W, :].astype(jnp.float32)
            acc = acc + tap * w[di * 3 + dj]
    y = acc + b_ref[0]
    y = y * jax.nn.sigmoid(y)                              # SiLU, (H, W, C) f32

    # SE: squeeze (global mean) -> fc1 + SiLU -> fc2 + sigmoid.
    pooled = jnp.sum(jnp.sum(y, axis=0), axis=0)[None, :] * (1.0 / (H * W))
    h = jnp.dot(pooled, sw1_ref[...], preferred_element_type=jnp.float32)
    h = h + sb1_ref[...]
    h = h * jax.nn.sigmoid(h)
    s = jnp.dot(h, sw2_ref[...], preferred_element_type=jnp.float32)
    s = jax.nn.sigmoid(s + sb2_ref[...])                   # (1, C)

    # Excite folded into the pointwise GEMM: z = silu((y * s) @ Wm + bm).
    y2 = y.reshape(H * W, C) * s                           # (HW, C) f32
    z = jnp.dot(y2.astype(mw_ref.dtype), mw_ref[...],
                preferred_element_type=jnp.float32) + mb_ref[...]
    z = z * jax.nn.sigmoid(z)
    o_ref[0] = z.astype(o_ref.dtype)                       # (HW, N) bf16


def block1_fused(x, w, b, sw1, sb1, sw2, sb2, mw, mb):
    """x: (B,H,W,C) bf16 -> (B, H*W, N) bf16 with N = mw.shape[1]."""
    B, H, W, C = x.shape
    Cr = sw1.shape[1]
    N = mw.shape[1]
    # TODO(synk): the halo pad is a small extra HBM round trip; at production
    # resolutions emit the padded layout directly from the stem GEMM.
    xp = jnp.pad(x, ((0, 0), (1, 1), (1, 1), (0, 0)))
    return pl.pallas_call(
        functools.partial(_block1_kernel, H=H, W=W),
        out_shape=jax.ShapeDtypeStruct((B, H * W, N), jnp.bfloat16),
        grid=(B,),
        in_specs=[
            pl.BlockSpec((1, H + 2, W + 2, C), lambda i: (i, 0, 0, 0)),
            pl.BlockSpec((9, C), lambda i: (0, 0)),
            pl.BlockSpec((1, C), lambda i: (0, 0)),
            pl.BlockSpec((C, Cr), lambda i: (0, 0)),
            pl.BlockSpec((1, Cr), lambda i: (0, 0)),
            pl.BlockSpec((Cr, C), lambda i: (0, 0)),
            pl.BlockSpec((1, C), lambda i: (0, 0)),
            pl.BlockSpec((C, N), lambda i: (0, 0)),
            pl.BlockSpec((1, N), lambda i: (0, 0)),
        ],
        out_specs=pl.BlockSpec((1, H * W, N), lambda i: (i, 0, 0)),
        compiler_params=pltpu.CompilerParams(dimension_semantics=("parallel",)),
    )(xp, w, b, sw1, sb1, sw2, sb2, mw, mb)


# ----------------------------------------------------------------------------
# Block 2: fully fused  dw3x3 s2 + BN + SiLU + SE + excite + (pw.head) GEMM
#          + SiLU + global average pool
# ----------------------------------------------------------------------------
def _block2_kernel(p00_ref, p01_ref, p10_ref, p11_ref, w_ref, b_ref,
                   sw1_ref, sb1_ref, sw2_ref, sb2_ref, hw_ref, hb_ref,
                   o_ref, *, Ho, Wo):
    """Depthwise 3x3 stride-2 via 4-phase decomposition (+BN, SiLU), SE, then
    excite folded into the (pw 96->24 . head 24->1280) GEMM + SiLU and the
    global average pool - the (HW,1280) head activation stays in VMEM."""
    phase_refs = ((p00_ref, p01_ref), (p10_ref, p11_ref))
    w = w_ref[...]                                         # (9, C) f32
    C = w.shape[-1]
    acc = jnp.zeros((Ho, Wo, C), jnp.float32)
    for di in range(3):
        for dj in range(3):
            ph = phase_refs[di % 2][dj % 2]
            oa, ob = di // 2, dj // 2
            tap = ph[0, oa:oa + Ho, ob:ob + Wo, :].astype(jnp.float32)
            acc = acc + tap * w[di * 3 + dj]
    y = acc + b_ref[0]
    y = y * jax.nn.sigmoid(y)                              # (Ho, Wo, C) f32

    pooled = jnp.sum(jnp.sum(y, axis=0), axis=0)[None, :] * (1.0 / (Ho * Wo))
    h = jnp.dot(pooled, sw1_ref[...], preferred_element_type=jnp.float32)
    h = h + sb1_ref[...]
    h = h * jax.nn.sigmoid(h)
    s = jnp.dot(h, sw2_ref[...], preferred_element_type=jnp.float32)
    s = jax.nn.sigmoid(s + sb2_ref[...])                   # (1, C)

    # Excite + folded head GEMM + SiLU + global average pool.
    y2 = y.reshape(Ho * Wo, C) * s                         # (HW, C) f32
    z = jnp.dot(y2.astype(hw_ref.dtype), hw_ref[...],
                preferred_element_type=jnp.float32) + hb_ref[...]
    z = z * jax.nn.sigmoid(z)                              # (HW, 1280) f32
    feat = jnp.sum(z, axis=0, keepdims=True) * (1.0 / (Ho * Wo))
    o_ref[0] = feat.astype(o_ref.dtype)                    # (1, 1280)


def block2_fused(x, w, b, sw1, sb1, sw2, sb2, hw, hb):
    """x: (B,H,W,C) bf16 -> pooled head features (B, 1, N) f32."""
    B, H, W, C = x.shape
    Ho, Wo = H // 2, W // 2
    Cr = sw1.shape[1]
    N = hw.shape[1]
    # TODO(synk): pad + 4 strided phase slices re-materialize the block-2 input
    # in HBM (bf16 so it's half the old cost); at production sizes emit the
    # phase layout directly from block 1 or do the phase split in-kernel.
    xp = jnp.pad(x, ((0, 0), (1, 1), (1, 1), (0, 0)))
    p00 = xp[:, 0::2, 0::2, :]
    p01 = xp[:, 0::2, 1::2, :]
    p10 = xp[:, 1::2, 0::2, :]
    p11 = xp[:, 1::2, 1::2, :]
    Hp, Wp = p00.shape[1], p00.shape[2]
    phase_spec = pl.BlockSpec((1, Hp, Wp, C), lambda i: (i, 0, 0, 0))
    return pl.pallas_call(
        functools.partial(_block2_kernel, Ho=Ho, Wo=Wo),
        out_shape=jax.ShapeDtypeStruct((B, 1, N), jnp.float32),
        grid=(B,),
        in_specs=[phase_spec, phase_spec, phase_spec, phase_spec,
                  pl.BlockSpec((9, C), lambda i: (0, 0)),
                  pl.BlockSpec((1, C), lambda i: (0, 0)),
                  pl.BlockSpec((C, Cr), lambda i: (0, 0)),
                  pl.BlockSpec((1, Cr), lambda i: (0, 0)),
                  pl.BlockSpec((Cr, C), lambda i: (0, 0)),
                  pl.BlockSpec((1, C), lambda i: (0, 0)),
                  pl.BlockSpec((C, N), lambda i: (0, 0)),
                  pl.BlockSpec((1, N), lambda i: (0, 0))],
        out_specs=pl.BlockSpec((1, 1, N), lambda i: (i, 0, 0)),
        compiler_params=pltpu.CompilerParams(dimension_semantics=("parallel",)),
    )(p00, p01, p10, p11, w, b, sw1, sb1, sw2, sb2, hw, hb)


# ----------------------------------------------------------------------------
# Plain-JAX glue (stem im2col, parameter creation, inference-time folding)
# ----------------------------------------------------------------------------
def extract_patches(x, k, stride, pad):
    """x: (B,H,W,C) -> (B,Ho,Wo,k*k,C). Only used for the tiny 3-channel stem."""
    B, H, W, C = x.shape
    xp = jnp.pad(x, ((0, 0), (pad, pad), (pad, pad), (0, 0)))
    Ho = (H + 2 * pad - k) // stride + 1
    Wo = (W + 2 * pad - k) // stride + 1
    taps = []
    for di in range(k):
        for dj in range(k):
            taps.append(xp[:, di:di + stride * Ho:stride,
                           dj:dj + stride * Wo:stride, :])
    return jnp.stack(taps, axis=3)


def _init(key, shape, scale=0.1):
    return scale * jax.random.normal(key, shape, dtype=jnp.float32)


def make_params(key, num_classes):
    """Raw (unfused) parameters; BN is a per-channel (scale, bias) affine."""
    ks = iter(jax.random.split(key, 64))
    p = {}

    def bn(c):
        return (1.0 + _init(next(ks), (1, c), 0.05), _init(next(ks), (1, c), 0.05))

    def se(c, cr):
        return dict(w1=_init(next(ks), (c, cr)), b1=_init(next(ks), (1, cr), 0.05),
                    w2=_init(next(ks), (cr, c)), b2=_init(next(ks), (1, c), 0.05))

    p["stem_w"] = _init(next(ks), (9 * 3, 32))
    p["stem_scale"], p["stem_bias"] = bn(32)
    p["b1_dw_w"] = _init(next(ks), (9, 32))
    p["b1_dw_scale"], p["b1_dw_bias"] = bn(32)
    p["b1_se"] = se(32, 8)
    p["b1_pw_w"] = _init(next(ks), (32, 16))
    p["b1_pw_scale"], p["b1_pw_bias"] = bn(16)
    p["b2_exp_w"] = _init(next(ks), (16, 96))
    p["b2_exp_scale"], p["b2_exp_bias"] = bn(96)
    p["b2_dw_w"] = _init(next(ks), (9, 96))
    p["b2_dw_scale"], p["b2_dw_bias"] = bn(96)
    p["b2_se"] = se(96, 24)
    p["b2_pw_w"] = _init(next(ks), (96, 24))
    p["b2_pw_scale"], p["b2_pw_bias"] = bn(24)
    p["head_w"] = _init(next(ks), (24, 1280), 0.05)
    p["head_scale"], p["head_bias"] = bn(1280)
    p["fc_w"] = _init(next(ks), (1280, num_classes), 0.05)
    p["fc_b"] = _init(next(ks), (1, num_classes), 0.05)
    return p


def fold_params(p):
    """Inference-time folding: BN scales into weights, act='none' pointwise
    GEMMs into their successors, GEMM weights to bf16 (f32 accumulation),
    stem K padded 27 -> 32."""
    f = {}
    # stem (pad K from 27 to 32 with zero rows)
    stem_w = p["stem_w"] * p["stem_scale"]                 # (27, 32)
    stem_w = jnp.pad(stem_w, ((0, 32 - stem_w.shape[0]), (0, 0)))
    f["stem_w"] = stem_w.astype(jnp.bfloat16)              # (32, 32)
    f["stem_b"] = p["stem_bias"]
    # block 1 depthwise + SE (kept f32 - tiny)
    f["dw1_w"] = p["b1_dw_w"] * p["b1_dw_scale"]
    f["dw1_b"] = p["b1_dw_bias"]
    f["se1"] = p["b1_se"]
    # fold b1_pw (no act) into b2_exp:  silu((x*se) @ Wc + bc)
    w1f = p["b1_pw_w"] * p["b1_pw_scale"]                  # (32, 16)
    w2f = p["b2_exp_w"] * p["b2_exp_scale"]                # (16, 96)
    f["mb_w"] = (w1f @ w2f).astype(jnp.bfloat16)           # (32, 96)
    f["mb_b"] = p["b1_pw_bias"] @ w2f + p["b2_exp_bias"]
    # block 2 depthwise + SE
    f["dw2_w"] = p["b2_dw_w"] * p["b2_dw_scale"]
    f["dw2_b"] = p["b2_dw_bias"]
    f["se2"] = p["b2_se"]
    # fold b2_pw (no act) into the head conv:  silu((x*se) @ Wh + bh)
    wpf = p["b2_pw_w"] * p["b2_pw_scale"]                  # (96, 24)
    whf = p["head_w"] * p["head_scale"]                    # (24, 1280)
    f["head_w"] = (wpf @ whf).astype(jnp.bfloat16)         # (96, 1280)
    f["head_b"] = p["b2_pw_bias"] @ whf + p["head_bias"]
    # classifier (plain XLA, f32)
    f["fc_w"] = p["fc_w"]
    f["fc_b"] = p["fc_b"]
    return f


def efficientnet_forward(x_nchw, f):
    x = jnp.transpose(x_nchw, (0, 2, 3, 1)).astype(jnp.float32)   # NCHW -> NHWC
    B, H, W, Cin = x.shape

    # --- stem: 3x3 s2 conv 3->32 (+folded BN, SiLU) via tiny im2col GEMM -----
    patches = extract_patches(x, 3, 2, 1)                  # (B, H/2, W/2, 9, 3)
    Ho, Wo = patches.shape[1], patches.shape[2]
    K = 9 * Cin
    Kp = f["stem_w"].shape[0]                              # 32 (padded K)
    pm = patches.reshape(B * Ho * Wo, K)
    pm = jnp.pad(pm, ((0, 0), (0, Kp - K))).astype(jnp.bfloat16)
    y = matmul_bias_act(pm, f["stem_w"], f["stem_b"], "silu",
                        out_dtype=jnp.bfloat16, tm=256)    # (B*HW, 32) bf16
    x = y.reshape(B, Ho, Wo, 32)

    # --- block 1: ONE fused kernel (dw s1 + BN + SiLU + SE + excite + GEMM) --
    y = block1_fused(x, f["dw1_w"], f["dw1_b"],
                     f["se1"]["w1"], f["se1"]["b1"],
                     f["se1"]["w2"], f["se1"]["b2"],
                     f["mb_w"], f["mb_b"])                 # (B, HW, 96) bf16
    x = y.reshape(B, Ho, Wo, 96)

    # --- block 2: ONE fused kernel (dw s2 + BN + SiLU + SE + excite + head
    #     GEMM + SiLU + global average pool) --------------------------------
    feat = block2_fused(x, f["dw2_w"], f["dw2_b"],
                        f["se2"]["w1"], f["se2"]["b1"],
                        f["se2"]["w2"], f["se2"]["b2"],
                        f["head_w"], f["head_b"])          # (B, 1, 1280) f32
    feat = feat.reshape(B, 1280)                           # == squeeze()

    # --- self.fc = nn.Linear(1280, num_classes): tiny -> plain XLA -----------
    out = feat @ f["fc_w"] + f["fc_b"]
    return out                                             # (B, num_classes)


if __name__ == "__main__":
    key = jax.random.PRNGKey(0)
    k_params, k_x = jax.random.split(key)

    num_classes = 10
    params = fold_params(make_params(k_params, num_classes))
    x = jax.random.normal(k_x, (2, 3, 32, 32), dtype=jnp.float32)  # NCHW like torch

    fwd = jax.jit(efficientnet_forward)
    out = fwd(x, params)
    jax.block_until_ready(out)

    assert out.shape == (2, num_classes), out.shape
    assert jnp.all(jnp.isfinite(out))
    print("KERNEL_OK")
</pallas_src>

<mosaic_0001>
module attributes {stable_mosaic.version = 11 : i64} {
  func.func @_mm_bias_act_kernel(%arg0: i32, %arg1: memref<256x32xbf16, #tpu.memory_space<vmem>>, %arg2: memref<32x32xbf16, #tpu.memory_space<vmem>>, %arg3: memref<1x32xf32, #tpu.memory_space<vmem>>, %arg4: memref<256x32xbf16, #tpu.memory_space<vmem>>) attributes {dimension_semantics = [#tpu.dimension_semantics<parallel>], iteration_bounds = array<i64: 2>, scalar_prefetch = 0 : i64, scratch_operands = 0 : i64, tpu.core_type = #tpu.core_type<tc>, window_params = [{transform_indices = @transform_0, window_bounds = array<i64: 256, 32>}, {pipeline_mode = #tpu.pipeline_mode<synchronous>, transform_indices = @transform_1, window_bounds = array<i64: 32, 32>}, {pipeline_mode = #tpu.pipeline_mode<synchronous>, transform_indices = @transform_2, window_bounds = array<i64: 1, 32>}, {transform_indices = @transform_3, window_bounds = array<i64: 256, 32>}]} {
    %c0 = arith.constant 0 : index
    %c0_0 = arith.constant 0 : index
    %0 = vector.load %arg1[%c0, %c0_0] : memref<256x32xbf16, #tpu.memory_space<vmem>>, vector<256x32xbf16>
    %c0_1 = arith.constant 0 : index
    %c0_2 = arith.constant 0 : index
    %1 = vector.load %arg2[%c0_1, %c0_2] : memref<32x32xbf16, #tpu.memory_space<vmem>>, vector<32x32xbf16>
    %cst = arith.constant dense<0.000000e+00> : vector<256x32xf32>
    %2 = tpu.matmul %0, %1, %cst {dimension_numbers = #tpu.dot_dimension_numbers<[1], [0], [0], [1], [0, 0, 1, 1], [], []>} : vector<256x32xbf16>, vector<32x32xbf16>, vector<256x32xf32> -> vector<256x32xf32>
    %c0_3 = arith.constant 0 : index
    %c0_4 = arith.constant 0 : index
    %3 = vector.load %arg3[%c0_3, %c0_4] : memref<1x32xf32, #tpu.memory_space<vmem>>, vector<1x32xf32>
    %4 = vector.broadcast %3 : vector<1x32xf32> to vector<256x32xf32>
    %5 = arith.addf %2, %4 : vector<256x32xf32>
    %6 = arith.negf %5 : vector<256x32xf32>
    %7 = math.exp %6 : vector<256x32xf32>
    %cst_5 = arith.constant 1.000000e+00 : f32
    %8 = vector.broadcast %cst_5 : f32 to vector<256x32xf32>
    %9 = arith.addf %8, %7 : vector<256x32xf32>
    %10 = arith.divf %8, %9 : vector<256x32xf32>
    %11 = arith.mulf %5, %10 : vector<256x32xf32>
    %12 = arith.truncf %11 : vector<256x32xf32> to vector<256x32xbf16>
    %c0_6 = arith.constant 0 : index
    %c0_7 = arith.constant 0 : index
    %13 = vector.load %arg4[%c0_6, %c0_7] : memref<256x32xbf16, #tpu.memory_space<vmem>>, vector<256x32xbf16>
    tpu.vector_store %arg4[%c0_6, %c0_7], %12 {strides = array<i32>} : memref<256x32xbf16, #tpu.memory_space<vmem>>, vector<256x32xbf16>,
    return
  }
  func.func @transform_0(%arg0: i32) -> (i32, i32) {
    %c0_i32 = arith.constant 0 : i32
    %c0_i32_0 = arith.constant 0 : i32
    return %arg0, %c0_i32 : i32, i32
  }
  func.func @transform_1(%arg0: i32) -> (i32, i32) {
    %c0_i32 = arith.constant 0 : i32
    %c0_i32_0 = arith.constant 0 : i32
    %c0_i32_1 = arith.constant 0 : i32
    return %c0_i32, %c0_i32_0 : i32, i32
  }
  func.func @transform_2(%arg0: i32) -> (i32, i32) {
    %c0_i32 = arith.constant 0 : i32
    %c0_i32_0 = arith.constant 0 : i32
    %c0_i32_1 = arith.constant 0 : i32
    return %c0_i32, %c0_i32_0 : i32, i32
  }
  func.func @transform_3(%arg0: i32) -> (i32, i32) {
    %c0_i32 = arith.constant 0 : i32
    %c0_i32_0 = arith.constant 0 : i32
    return %arg0, %c0_i32 : i32, i32
  }
}

module attributes {stable_mosaic.version = 11 : i64} {
  func.func @_block1_kernel(%arg0: i32, %arg1: memref<1x18x18x32xbf16, #tpu.memory_space<vmem>>, %arg2: memref<9x32xf32, #tpu.memory_space<vmem>>, %arg3: memref<1x32xf32, #tpu.memory_space<vmem>>, %arg4: memref<32x8xf32, #tpu.memory_space<vmem>>, %arg5: memref<1x8xf32, #tpu.memory_space<vmem>>, %arg6: memref<8x32xf32, #tpu.memory_space<vmem>>, %arg7: memref<1x32xf32, #tpu.memory_space<vmem>>, %arg8: memref<32x96xbf16, #tpu.memory_space<vmem>>, %arg9: memref<1x96xf32, #tpu.memory_space<vmem>>, %arg10: memref<1x256x96xbf16, #tpu.memory_space<vmem>>) attributes {dimension_semantics = [#tpu.dimension_semantics<parallel>], iteration_bounds = array<i64: 2>, scalar_prefetch = 0 : i64, scratch_operands = 0 : i64, tpu.core_type = #tpu.core_type<tc>, window_params = [{transform_indices = @transform_0, window_bounds = array<i64: 1, 18, 18, 32>}, {pipeline_mode = #tpu.pipeline_mode<synchronous>, transform_indices = @transform_1, window_bounds = array<i64: 9, 32>}, {pipeline_mode = #tpu.pipeline_mode<synchronous>, transform_indices = @transform_2, window_bounds = array<i64: 1, 32>}, {pipeline_mode = #tpu.pipeline_mode<synchronous>, transform_indices = @transform_3, window_bounds = array<i64: 32, 8>}, {pipeline_mode = #tpu.pipeline_mode<synchronous>, transform_indices = @transform_4, window_bounds = array<i64: 1, 8>}, {pipeline_mode = #tpu.pipeline_mode<synchronous>, transform_indices = @transform_5, window_bounds = array<i64: 8, 32>}, {pipeline_mode = #tpu.pipeline_mode<synchronous>, transform_indices = @transform_6, window_bounds = array<i64: 1, 32>}, {pipeline_mode = #tpu.pipeline_mode<synchronous>, transform_indices = @transform_7, window_bounds = array<i64: 32, 96>}, {pipeline_mode = #tpu.pipeline_mode<synchronous>, transform_indices = @transform_8, window_bounds = array<i64: 1, 96>}, {transform_indices = @transform_9, window_bounds = array<i64: 1, 256, 96>}]} {
    %c0 = arith.constant 0 : index
    %c0_0 = arith.constant 0 : index
    %0 = vector.load %arg2[%c0, %c0_0] : memref<9x32xf32, #tpu.memory_space<vmem>>, vector<9x32xf32>
    %cst = arith.constant 0.000000e+00 : f32
    %1 = vector.broadcast %cst : f32 to vector<16x16x32xf32>
    %c0_1 = arith.constant 0 : index
    %c0_2 = arith.constant 0 : index
    %c0_3 = arith.constant 0 : index
    %c0_4 = arith.constant 0 : index
    %2 = vector.load %arg1[%c0_1, %c0_2, %c0_3, %c0_4] : memref<1x18x18x32xbf16, #tpu.memory_space<vmem>>, vector<1x16x16x32xbf16>
    %3 = vector.shape_cast %2 : vector<1x16x16x32xbf16> to vector<16x16x32xbf16>
    %4 = arith.extf %3 : vector<16x16x32xbf16> to vector<16x16x32xf32>
    %5 = vector.extract_strided_slice %0 {offsets = [0, 0], sizes = [1, 32], strides = [1, 1]} : vector<9x32xf32> to vector<1x32xf32>
    %6 = vector.shape_cast %5 : vector<1x32xf32> to vector<32xf32>
    %7 = vector.shape_cast %6 : vector<32xf32> to vector<1x1x32xf32>
    %8 = vector.broadcast %7 : vector<1x1x32xf32> to vector<16x16x32xf32>
    %9 = arith.mulf %4, %8 : vector<16x16x32xf32>
    %10 = arith.addf %1, %9 : vector<16x16x32xf32>
    %c0_5 = arith.constant 0 : index
    %c0_6 = arith.constant 0 : index
    %c1 = arith.constant 1 : index
    %c0_7 = arith.constant 0 : index
    %11 = vector.load %arg1[%c0_5, %c0_6, %c1, %c0_7] : memref<1x18x18x32xbf16, #tpu.memory_space<vmem>>, vector<1x16x16x32xbf16>
    %12 = vector.shape_cast %11 : vector<1x16x16x32xbf16> to vector<16x16x32xbf16>
    %13 = arith.extf %12 : vector<16x16x32xbf16> to vector<16x16x32xf32>
    %14 = vector.extract_strided_slice %0 {offsets = [1, 0], sizes = [1, 32], strides = [1, 1]} : vector<9x32xf32> to vector<1x32xf32>
    %15 = vector.shape_cast %14 : vector<1x32xf32> to vector<32xf32>
    %16 = vector.shape_cast %15 : vector<32xf32> to vector<1x1x32xf32>
    %17 = vector.broadcast %16 : vector<1x1x32xf32> to vector<16x16x32xf32>
    %18 = arith.mulf %13, %17 : vector<16x16x32xf32>
    %19 = arith.addf %10, %18 : vector<16x16x32xf32>
    %c0_8 = arith.constant 0 : index
    %c0_9 = arith.constant 0 : index
    %c2 = arith.constant 2 : index
    %c0_10 = arith.constant 0 : index
    %20 = vector.load %arg1[%c0_8, %c0_9, %c2, %c0_10] : memref<1x18x18x32xbf16, #tpu.memory_space<vmem>>, vector<1x16x16x32xbf16>
    %21 = vector.shape_cast %20 : vector<1x16x16x32xbf16> to vector<16x16x32xbf16>
    %22 = arith.extf %21 : vector<16x16x32xbf16> to vector<16x16x32xf32>
    %23 = vector.extract_strided_slice %0 {offsets = [2, 0], sizes = [1, 32], strides = [1, 1]} : vector<9x32xf32> to vector<1x32xf32>
    %24 = vector.shape_cast %23 : vector<1x32xf32> to vector<32xf32>
    %25 = vector.shape_cast %24 : vector<32xf32> to vector<1x1x32xf32>
    %26 = vector.broadcast %25 : vector<1x1x32xf32> to vector<16x16x32xf32>
    %27 = arith.mulf %22, %26 : vector<16x16x32xf32>
    %28 = arith.addf %19, %27 : vector<16x16x32xf32>
    %c0_11 = arith.constant 0 : index
    %c1_12 = arith.constant 1 : index
    %c0_13 = arith.constant 0 : index
    %c0_14 = arith.constant 0 : index
    %29 = vector.load %arg1[%c0_11, %c1_12, %c0_13, %c0_14] : memref<1x18x18x32xbf16, #tpu.memory_space<vmem>>, vector<1x16x16x32xbf16>
    %30 = vector.shape_cast %29 : vector<1x16x16x32xbf16> to vector<16x16x32xbf16>
    %31 = arith.extf %30 : vector<16x16x32xbf16> to vector<16x16x32xf32>
    %32 = vector.extract_strided_slice %0 {offsets = [3, 0], sizes = [1, 32], strides = [1, 1]} : vector<9x32xf32> to vector<1x32xf32>
    %33 = vector.shape_cast %32 : vector<1x32xf32> to vector<32xf32>
    %34 = vector.shape_cast %33 : vector<32xf32> to vector<1x1x32xf32>
    %35 = vector.broadcast %34 : vector<1x1x32xf32> to vector<16x16x32xf32>
    %36 = arith.mulf %31, %35 : vector<16x16x32xf32>
    %37 = arith.addf %28, %36 : vector<16x16x32xf32>
    %c0_15 = arith.constant 0 : index
    %c1_16 = arith.constant 1 : index
    %c1_17 = arith.constant 1 : index
    %c0_18 = arith.constant 0 : index
    %38 = vector.load %arg1[%c0_15, %c1_16, %c1_17, %c0_18] : memref<1x18x18x32xbf16, #tpu.memory_space<vmem>>, vector<1x16x16x32xbf16>
    %39 = vector.shape_cast %38 : vector<1x16x16x32xbf16> to vector<16x16x32xbf16>
    %40 = arith.extf %39 : vector<16x16x32xbf16> to vector<16x16x32xf32>
    %41 = vector.extract_strided_slice %0 {offsets = [4, 0], sizes = [1, 32], strides = [1, 1]} : vector<9x32xf32> to vector<1x32xf32>
    %42 = vector.shape_cast %41 : vector<1x32xf32> to vector<32xf32>
    %43 = vector.shape_cast %42 : vector<32xf32> to vector<1x1x32xf32>
    %44 = vector.broadcast %43 : vector<1x1x32xf32> to vector<16x16x32xf32>
    %45 = arith.mulf %40, %44 : vector<16x16x32xf32>
    %46 = arith.addf %37, %45 : vector<16x16x32xf32>
    %c0_19 = arith.constant 0 : index
    %c1_20 = arith.constant 1 : index
    %c2_21 = arith.constant 2 : index
    %c0_22 = arith.constant 0 : index
    %47 = vector.load %arg1[%c0_19, %c1_20, %c2_21, %c0_22] : memref<1x18x18x32xbf16, #tpu.memory_space<vmem>>, vector<1x16x16x32xbf16>
    %48 = vector.shape_cast %47 : vector<1x16x16x32xbf16> to vector<16x16x32xbf16>
    %49 = arith.extf %48 : vector<16x16x32xbf16> to vector<16x16x32xf32>
    %50 = vector.extract_strided_slice %0 {offsets = [5, 0], sizes = [1, 32], strides = [1, 1]} : vector<9x32xf32> to vector<1x32xf32>
    %51 = vector.shape_cast %50 : vector<1x32xf32> to vector<32xf32>
    %52 = vector.shape_cast %51 : vector<32xf32> to vector<1x1x32xf32>
    %53 = vector.broadcast %52 : vector<1x1x32xf32> to vector<16x16x32xf32>
    %54 = arith.mulf %49, %53 : vector<16x16x32xf32>
    %55 = arith.addf %46, %54 : vector<16x16x32xf32>
    %c0_23 = arith.constant 0 : index
    %c2_24 = arith.constant 2 : index
    %c0_25 = arith.constant 0 : index
    %c0_26 = arith.constant 0 : index
    %56 = vector.load %arg1[%c0_23, %c2_24, %c0_25, %c0_26] : memref<1x18x18x32xbf16, #tpu.memory_space<vmem>>, vector<1x16x16x32xbf16>
    %57 = vector.shape_cast %56 : vector<1x16x16x32xbf16> to vector<16x16x32xbf16>
    %58 = arith.extf %57 : vector<16x16x32xbf16> to vector<16x16x32xf32>
    %59 = vector.extract_strided_slice %0 {offsets = [6, 0], sizes = [1, 32], strides = [1, 1]} : vector<9x32xf32> to vector<1x32xf32>
    %60 = vector.shape_cast %59 : vector<1x32xf32> to vector<32xf32>
    %61 = vector.shape_cast %60 : vector<32xf32> to vector<1x1x32xf32>
    %62 = vector.broadcast %61 : vector<1x1x32xf32> to vector<16x16x32xf32>
    %63 = arith.mulf %58, %62 : vector<16x16x32xf32>
    %64 = arith.addf %55, %63 : vector<16x16x32xf32>
    %c0_27 = arith.constant 0 : index
    %c2_28 = arith.constant 2 : index
    %c1_29 = arith.constant 1 : index
    %c0_30 = arith.constant 0 : index
    %65 = vector.load %arg1[%c0_27, %c2_28, %c1_29, %c0_30] : memref<1x18x18x32xbf16, #tpu.memory_space<vmem>>, vector<1x16x16x32xbf16>
    %66 = vector.shape_cast %65 : vector<1x16x16x32xbf16> to vector<16x16x32xbf16>
    %67 = arith.extf %66 : vector<16x16x32xbf16> to vector<16x16x32xf32>
    %68 = vector.extract_strided_slice %0 {offsets = [7, 0], sizes = [1, 32], strides = [1, 1]} : vector<9x32xf32> to vector<1x32xf32>
    %69 = vector.shape_cast %68 : vector<1x32xf32> to vector<32xf32>
    %70 = vector.shape_cast %69 : vector<32xf32> to vector<1x1x32xf32>
    %71 = vector.broadcast %70 : vector<1x1x32xf32> to vector<16x16x32xf32>
    %72 = arith.mulf %67, %71 : vector<16x16x32xf32>
    %73 = arith.addf %64, %72 : vector<16x16x32xf32>
    %c0_31 = arith.constant 0 : index
    %c2_32 = arith.constant 2 : index
    %c2_33 = arith.constant 2 : index
    %c0_34 = arith.constant 0 : index
    %74 = vector.load %arg1[%c0_31, %c2_32, %c2_33, %c0_34] : memref<1x18x18x32xbf16, #tpu.memory_space<vmem>>, vector<1x16x16x32xbf16>
    %75 = vector.shape_cast %74 : vector<1x16x16x32xbf16> to vector<16x16x32xbf16>
    %76 = arith.extf %75 : vector<16x16x32xbf16> to vector<16x16x32xf32>
    %77 = vector.extract_strided_slice %0 {offsets = [8, 0], sizes = [1, 32], strides = [1, 1]} : vector<9x32xf32> to vector<1x32xf32>
    %78 = vector.shape_cast %77 : vector<1x32xf32> to vector<32xf32>
    %79 = vector.shape_cast %78 : vector<32xf32> to vector<1x1x32xf32>
    %80 = vector.broadcast %79 : vector<1x1x32xf32> to vector<16x16x32xf32>
    %81 = arith.mulf %76, %80 : vector<16x16x32xf32>
    %82 = arith.addf %73, %81 : vector<16x16x32xf32>
    %c0_35 = arith.constant 0 : index
    %c0_36 = arith.constant 0 : index
    %83 = vector.load %arg3[%c0_35, %c0_36] : memref<1x32xf32, #tpu.memory_space<vmem>>, vector<1x32xf32>
    %84 = vector.shape_cast %83 : vector<1x32xf32> to vector<32xf32>
    %85 = vector.shape_cast %84 : vector<32xf32> to vector<1x1x32xf32>
    %86 = vector.broadcast %85 : vector<1x1x32xf32> to vector<16x16x32xf32>
    %87 = arith.addf %82, %86 : vector<16x16x32xf32>
    %88 = arith.negf %87 : vector<16x16x32xf32>
    %89 = math.exp %88 : vector<16x16x32xf32>
    %cst_37 = arith.constant 1.000000e+00 : f32
    %90 = vector.broadcast %cst_37 : f32 to vector<16x16x32xf32>
    %91 = arith.addf %90, %89 : vector<16x16x32xf32>
    %92 = arith.divf %90, %91 : vector<16x16x32xf32>
    %93 = arith.mulf %87, %92 : vector<16x16x32xf32>
    %cst_38 = arith.constant dense<0.000000e+00> : vector<16x32xf32>
    %94 = vector.multi_reduction <add>, %93, %cst_38 [0] : vector<16x16x32xf32> to vector<16x32xf32>
    %cst_39 = arith.constant dense<0.000000e+00> : vector<32xf32>
    %95 = vector.multi_reduction <add>, %94, %cst_39 [0] : vector<16x32xf32> to vector<32xf32>
    %96 = vector.shape_cast %95 : vector<32xf32> to vector<1x32xf32>
    %cst_40 = arith.constant 3.906250e-03 : f32
    %97 = vector.broadcast %cst_40 : f32 to vector<1x32xf32>
    %98 = arith.mulf %96, %97 : vector<1x32xf32>
    %c0_41 = arith.constant 0 : index
    %c0_42 = arith.constant 0 : index
    %99 = vector.load %arg4[%c0_41, %c0_42] : memref<32x8xf32, #tpu.memory_space<vmem>>, vector<32x8xf32>
    %cst_43 = arith.constant dense<0.000000e+00> : vector<1x8xf32>
    %100 = tpu.matmul %98, %99, %cst_43 {dimension_numbers = #tpu.dot_dimension_numbers<[1], [0], [0], [1], [0, 0, 1, 1], [], []>} : vector<1x32xf32>, vector<32x8xf32>, vector<1x8xf32> -> vector<1x8xf32>
    %c0_44 = arith.constant 0 : index
    %c0_45 = arith.constant 0 : index
    %101 = vector.load %arg5[%c0_44, %c0_45] : memref<1x8xf32, #tpu.memory_space<vmem>>, vector<1x8xf32>
    %102 = arith.addf %100, %101 : vector<1x8xf32>
    %103 = arith.negf %102 : vector<1x8xf32>
    %104 = math.exp %103 : vector<1x8xf32>
    %cst_46 = arith.constant 1.000000e+00 : f32
    %105 = vector.broadcast %cst_46 : f32 to vector<1x8xf32>
    %106 = arith.addf %105, %104 : vector<1x8xf32>
    %107 = arith.divf %105, %106 : vector<1x8xf32>
    %108 = arith.mulf %102, %107 : vector<1x8xf32>
    %c0_47 = arith.constant 0 : index
    %c0_48 = arith.constant 0 : index
    %109 = vector.load %arg6[%c0_47, %c0_48] : memref<8x32xf32, #tpu.memory_space<vmem>>, vector<8x32xf32>
    %cst_49 = arith.constant dense<0.000000e+00> : vector<1x32xf32>
    %110 = tpu.matmul %108, %109, %cst_49 {dimension_numbers = #tpu.dot_dimension_numbers<[1], [0], [0], [1], [0, 0, 1, 1], [], []>} : vector<1x8xf32>, vector<8x32xf32>, vector<1x32xf32> -> vector<1x32xf32>
    %c0_50 = arith.constant 0 : index
    %c0_51 = arith.constant 0 : index
    %111 = vector.load %arg7[%c0_50, %c0_51] : memref<1x32xf32, #tpu.memory_space<vmem>>, vector<1x32xf32>
    %112 = arith.addf %110, %111 : vector<1x32xf32>
    %113 = arith.negf %112 : vector<1x32xf32>
    %114 = math.exp %113 : vector<1x32xf32>
    %cst_52 = arith.constant 1.000000e+00 : f32
    %115 = vector.broadcast %cst_52 : f32 to vector<1x32xf32>
    %116 = arith.addf %115, %114 : vector<1x32xf32>
    %117 = arith.divf %115, %116 : vector<1x32xf32>
    %118 = vector.shape_cast %93 : vector<16x16x32xf32> to vector<256x32xf32>
    %119 = vector.broadcast %117 : vector<1x32xf32> to vector<256x32xf32>
    %120 = arith.mulf %118, %119 : vector<256x32xf32>
    %121 = arith.truncf %120 : vector<256x32xf32> to vector<256x32xbf16>
    %c0_53 = arith.constant 0 : index
    %c0_54 = arith.constant 0 : index
    %122 = vector.load %arg8[%c0_53, %c0_54] : memref<32x96xbf16, #tpu.memory_space<vmem>>, vector<32x96xbf16>
    %cst_55 = arith.constant dense<0.000000e+00> : vector<256x96xf32>
    %123 = tpu.matmul %121, %122, %cst_55 {dimension_numbers = #tpu.dot_dimension_numbers<[1], [0], [0], [1], [0, 0, 1, 1], [], []>} : vector<256x32xbf16>, vector<32x96xbf16>, vector<256x96xf32> -> vector<256x96xf32>
    %c0_56 = arith.constant 0 : index
    %c0_57 = arith.constant 0 : index
    %124 = vector.load %arg9[%c0_56, %c0_57] : memref<1x96xf32, #tpu.memory_space<vmem>>, vector<1x96xf32>
    %125 = vector.broadcast %124 : vector<1x96xf32> to vector<256x96xf32>
    %126 = arith.addf %123, %125 : vector<256x96xf32>
    %127 = arith.negf %126 : vector<256x96xf32>
    %128 = math.exp %127 : vector<256x96xf32>
    %cst_58 = arith.constant 1.000000e+00 : f32
    %129 = vector.broadcast %cst_58 : f32 to vector<256x96xf32>
    %130 = arith.addf %129, %128 : vector<256x96xf32>
    %131 = arith.divf %129, %130 : vector<256x96xf32>
    %132 = arith.mulf %126, %131 : vector<256x96xf32>
    %133 = arith.truncf %132 : vector<256x96xf32> to vector<256x96xbf16>
    %c0_59 = arith.constant 0 : index
    %c0_60 = arith.constant 0 : index
    %c0_61 = arith.constant 0 : index
    %134 = vector.load %arg10[%c0_59, %c0_60, %c0_61] : memref<1x256x96xbf16, #tpu.memory_space<vmem>>, vector<1x256x96xbf16>
    %135 = vector.shape_cast %134 : vector<1x256x96xbf16> to vector<256x96xbf16>
    %136 = vector.shape_cast %133 : vector<256x96xbf16> to vector<1x256x96xbf16>
    tpu.vector_store %arg10[%c0_59, %c0_60, %c0_61], %136 {strides = array<i32>} : memref<1x256x96xbf16, #tpu.memory_space<vmem>>, vector<1x256x96xbf16>,
    return
  }
  func.func @transform_0(%arg0: i32) -> (i32, i32, i32, i32) {
    %c0_i32 = arith.constant 0 : i32
    %c0_i32_0 = arith.constant 0 : i32
    %c0_i32_1 = arith.constant 0 : i32
    %c0_i32_2 = arith.constant 0 : i32
    return %arg0, %c0_i32, %c0_i32_0, %c0_i32_1 : i32, i32, i32, i32
  }
  func.func @transform_1(%arg0: i32) -> (i32, i32) {
    %c0_i32 = arith.constant 0 : i32
    %c0_i32_0 = arith.constant 0 : i32
    %c0_i32_1 = arith.constant 0 : i32
    return %c0_i32, %c0_i32_0 : i32, i32
  }
  func.func @transform_2(%arg0: i32) -> (i32, i32) {
    %c0_i32 = arith.constant 0 : i32
    %c0_i32_0 = arith.constant 0 : i32
    %c0_i32_1 = arith.constant 0 : i32
    return %c0_i32, %c0_i32_0 : i32, i32
  }
  func.func @transform_3(%arg0: i32) -> (i32, i32) {
    %c0_i32 = arith.constant 0 : i32
    %c0_i32_0 = arith.constant 0 : i32
    %c0_i32_1 = arith.constant 0 : i32
    return %c0_i32, %c0_i32_0 : i32, i32
  }
  func.func @transform_4(%arg0: i32) -> (i32, i32) {
    %c0_i32 = arith.constant 0 : i32
    %c0_i32_0 = arith.constant 0 : i32
    %c0_i32_1 = arith.constant 0 : i32
    return %c0_i32, %c0_i32_0 : i32, i32
  }
  func.func @transform_5(%arg0: i32) -> (i32, i32) {
    %c0_i32 = arith.constant 0 : i32
    %c0_i32_0 = arith.constant 0 : i32
    %c0_i32_1 = arith.constant 0 : i32
    return %c0_i32, %c0_i32_0 : i32, i32
  }
  func.func @transform_6(%arg0: i32) -> (i32, i32) {
    %c0_i32 = arith.constant 0 : i32
    %c0_i32_0 = arith.constant 0 : i32
    %c0_i32_1 = arith.constant 0 : i32
    return %c0_i32, %c0_i32_0 : i32, i32
  }
  func.func @transform_7(%arg0: i32) -> (i32, i32) {
    %c0_i32 = arith.constant 0 : i32
    %c0_i32_0 = arith.constant 0 : i32
    %c0_i32_1 = arith.constant 0 : i32
    return %c0_i32, %c0_i32_0 : i32, i32
  }
  func.func @transform_8(%arg0: i32) -> (i32, i32) {
    %c0_i32 = arith.constant 0 : i32
    %c0_i32_0 = arith.constant 0 : i32
    %c0_i32_1 = arith.constant 0 : i32
    return %c0_i32, %c0_i32_0 : i32, i32
  }
  func.func @transform_9(%arg0: i32) -> (i32, i32, i32) {
    %c0_i32 = arith.constant 0 : i32
    %c0_i32_0 = arith.constant 0 : i32
    %c0_i32_1 = arith.constant 0 : i32
    return %arg0, %c0_i32, %c0_i32_0 : i32, i32, i32
  }
}

module attributes {stable_mosaic.version = 11 : i64} {
  func.func @_block2_kernel(%arg0: i32, %arg1: memref<1x9x9x96xbf16, #tpu.memory_space<vmem>>, %arg2: memref<1x9x9x96xbf16, #tpu.memory_space<vmem>>, %arg3: memref<1x9x9x96xbf16, #tpu.memory_space<vmem>>, %arg4: memref<1x9x9x96xbf16, #tpu.memory_space<vmem>>, %arg5: memref<9x96xf32, #tpu.memory_space<vmem>>, %arg6: memref<1x96xf32, #tpu.memory_space<vmem>>, %arg7: memref<96x24xf32, #tpu.memory_space<vmem>>, %arg8: memref<1x24xf32, #tpu.memory_space<vmem>>, %arg9: memref<24x96xf32, #tpu.memory_space<vmem>>, %arg10: memref<1x96xf32, #tpu.memory_space<vmem>>, %arg11: memref<96x1280xbf16, #tpu.memory_space<vmem>>, %arg12: memref<1x1280xf32, #tpu.memory_space<vmem>>, %arg13: memref<1x1x1280xf32, #tpu.memory_space<vmem>>) attributes {dimension_semantics = [#tpu.dimension_semantics<parallel>], iteration_bounds = array<i64: 2>, scalar_prefetch = 0 : i64, scratch_operands = 0 : i64, tpu.core_type = #tpu.core_type<tc>, window_params = [{transform_indices = @transform_0, window_bounds = array<i64: 1, 9, 9, 96>}, {transform_indices = @transform_1, window_bounds = array<i64: 1, 9, 9, 96>}, {transform_indices = @transform_2, window_bounds = array<i64: 1, 9, 9, 96>}, {transform_indices = @transform_3, window_bounds = array<i64: 1, 9, 9, 96>}, {pipeline_mode = #tpu.pipeline_mode<synchronous>, transform_indices = @transform_4, window_bounds = array<i64: 9, 96>}, {pipeline_mode = #tpu.pipeline_mode<synchronous>, transform_indices = @transform_5, window_bounds = array<i64: 1, 96>}, {pipeline_mode = #tpu.pipeline_mode<synchronous>, transform_indices = @transform_6, window_bounds = array<i64: 96, 24>}, {pipeline_mode = #tpu.pipeline_mode<synchronous>, transform_indices = @transform_7, window_bounds = array<i64: 1, 24>}, {pipeline_mode = #tpu.pipeline_mode<synchronous>, transform_indices = @transform_8, window_bounds = array<i64: 24, 96>}, {pipeline_mode = #tpu.pipeline_mode<synchronous>, transform_indices = @transform_9, window_bounds = array<i64: 1, 96>}, {pipeline_mode = #tpu.pipeline_mode<synchronous>, transform_indices = @transform_10, window_bounds = array<i64: 96, 1280>}, {pipeline_mode = #tpu.pipeline_mode<synchronous>, transform_indices = @transform_11, window_bounds = array<i64: 1, 1280>}, {transform_indices = @transform_12, window_bounds = array<i64: 1, 1, 1280>}]} {
    %c0 = arith.constant 0 : index
    %c0_0 = arith.constant 0 : index
    %0 = vector.load %arg5[%c0, %c0_0] : memref<9x96xf32, #tpu.memory_space<vmem>>, vector<9x96xf32>
    %cst = arith.constant 0.000000e+00 : f32
    %1 = vector.broadcast %cst : f32 to vector<8x8x96xf32>
    %c0_1 = arith.constant 0 : index
    %c0_2 = arith.constant 0 : index
    %c0_3 = arith.constant 0 : index
    %c0_4 = arith.constant 0 : index
    %2 = vector.load %arg1[%c0_1, %c0_2, %c0_3, %c0_4] : memref<1x9x9x96xbf16, #tpu.memory_space<vmem>>, vector<1x8x8x96xbf16>
    %3 = vector.shape_cast %2 : vector<1x8x8x96xbf16> to vector<8x8x96xbf16>
    %4 = arith.extf %3 : vector<8x8x96xbf16> to vector<8x8x96xf32>
    %5 = vector.extract_strided_slice %0 {offsets = [0, 0], sizes = [1, 96], strides = [1, 1]} : vector<9x96xf32> to vector<1x96xf32>
    %6 = vector.shape_cast %5 : vector<1x96xf32> to vector<96xf32>
    %7 = vector.shape_cast %6 : vector<96xf32> to vector<1x1x96xf32>
    %8 = vector.broadcast %7 : vector<1x1x96xf32> to vector<8x8x96xf32>
    %9 = arith.mulf %4, %8 : vector<8x8x96xf32>
    %10 = arith.addf %1, %9 : vector<8x8x96xf32>
    %c0_5 = arith.constant 0 : index
    %c0_6 = arith.constant 0 : index
    %c0_7 = arith.constant 0 : index
    %c0_8 = arith.constant 0 : index
    %11 = vector.load %arg2[%c0_5, %c0_6, %c0_7, %c0_8] : memref<1x9x9x96xbf16, #tpu.memory_space<vmem>>, vector<1x8x8x96xbf16>
    %12 = vector.shape_cast %11 : vector<1x8x8x96xbf16> to vector<8x8x96xbf16>
    %13 = arith.extf %12 : vector<8x8x96xbf16> to vector<8x8x96xf32>
    %14 = vector.extract_strided_slice %0 {offsets = [1, 0], sizes = [1, 96], strides = [1, 1]} : vector<9x96xf32> to vector<1x96xf32>
    %15 = vector.shape_cast %14 : vector<1x96xf32> to vector<96xf32>
    %16 = vector.shape_cast %15 : vector<96xf32> to vector<1x1x96xf32>
    %17 = vector.broadcast %16 : vector<1x1x96xf32> to vector<8x8x96xf32>
    %18 = arith.mulf %13, %17 : vector<8x8x96xf32>
    %19 = arith.addf %10, %18 : vector<8x8x96xf32>
    %c0_9 = arith.constant 0 : index
    %c0_10 = arith.constant 0 : index
    %c1 = arith.constant 1 : index
    %c0_11 = arith.constant 0 : index
    %20 = vector.load %arg1[%c0_9, %c0_10, %c1, %c0_11] : memref<1x9x9x96xbf16, #tpu.memory_space<vmem>>, vector<1x8x8x96xbf16>
    %21 = vector.shape_cast %20 : vector<1x8x8x96xbf16> to vector<8x8x96xbf16>
    %22 = arith.extf %21 : vector<8x8x96xbf16> to vector<8x8x96xf32>
    %23 = vector.extract_strided_slice %0 {offsets = [2, 0], sizes = [1, 96], strides = [1, 1]} : vector<9x96xf32> to vector<1x96xf32>
    %24 = vector.shape_cast %23 : vector<1x96xf32> to vector<96xf32>
    %25 = vector.shape_cast %24 : vector<96xf32> to vector<1x1x96xf32>
    %26 = vector.broadcast %25 : vector<1x1x96xf32> to vector<8x8x96xf32>
    %27 = arith.mulf %22, %26 : vector<8x8x96xf32>
    %28 = arith.addf %19, %27 : vector<8x8x96xf32>
    %c0_12 = arith.constant 0 : index
    %c0_13 = arith.constant 0 : index
    %c0_14 = arith.constant 0 : index
    %c0_15 = arith.constant 0 : index
    %29 = vector.load %arg3[%c0_12, %c0_13, %c0_14, %c0_15] : memref<1x9x9x96xbf16, #tpu.memory_space<vmem>>, vector<1x8x8x96xbf16>
    %30 = vector.shape_cast %29 : vector<1x8x8x96xbf16> to vector<8x8x96xbf16>
    %31 = arith.extf %30 : vector<8x8x96xbf16> to vector<8x8x96xf32>
    %32 = vector.extract_strided_slice %0 {offsets = [3, 0], sizes = [1, 96], strides = [1, 1]} : vector<9x96xf32> to vector<1x96xf32>
    %33 = vector.shape_cast %32 : vector<1x96xf32> to vector<96xf32>
    %34 = vector.shape_cast %33 : vector<96xf32> to vector<1x1x96xf32>
    %35 = vector.broadcast %34 : vector<1x1x96xf32> to vector<8x8x96xf32>
    %36 = arith.mulf %31, %35 : vector<8x8x96xf32>
    %37 = arith.addf %28, %36 : vector<8x8x96xf32>
    %c0_16 = arith.constant 0 : index
    %c0_17 = arith.constant 0 : index
    %c0_18 = arith.constant 0 : index
    %c0_19 = arith.constant 0 : index
    %38 = vector.load %arg4[%c0_16, %c0_17, %c0_18, %c0_19] : memref<1x9x9x96xbf16, #tpu.memory_space<vmem>>, vector<1x8x8x96xbf16>
    %39 = vector.shape_cast %38 : vector<1x8x8x96xbf16> to vector<8x8x96xbf16>
    %40 = arith.extf %39 : vector<8x8x96xbf16> to vector<8x8x96xf32>
    %41 = vector.extract_strided_slice %0 {offsets = [4, 0], sizes = [1, 96], strides = [1, 1]} : vector<9x96xf32> to vector<1x96xf32>
    %42 = vector.shape_cast %41 : vector<1x96xf32> to vector<96xf32>
    %43 = vector.shape_cast %42 : vector<96xf32> to vector<1x1x96xf32>
    %44 = vector.broadcast %43 : vector<1x1x96xf32> to vector<8x8x96xf32>
    %45 = arith.mulf %40, %44 : vector<8x8x96xf32>
    %46 = arith.addf %37, %45 : vector<8x8x96xf32>
    %c0_20 = arith.constant 0 : index
    %c0_21 = arith.constant 0 : index
    %c1_22 = arith.constant 1 : index
    %c0_23 = arith.constant 0 : index
    %47 = vector.load %arg3[%c0_20, %c0_21, %c1_22, %c0_23] : memref<1x9x9x96xbf16, #tpu.memory_space<vmem>>, vector<1x8x8x96xbf16>
    %48 = vector.shape_cast %47 : vector<1x8x8x96xbf16> to vector<8x8x96xbf16>
    %49 = arith.extf %48 : vector<8x8x96xbf16> to vector<8x8x96xf32>
    %50 = vector.extract_strided_slice %0 {offsets = [5, 0], sizes = [1, 96], strides = [1, 1]} : vector<9x96xf32> to vector<1x96xf32>
    %51 = vector.shape_cast %50 : vector<1x96xf32> to vector<96xf32>
    %52 = vector.shape_cast %51 : vector<96xf32> to vector<1x1x96xf32>
    %53 = vector.broadcast %52 : vector<1x1x96xf32> to vector<8x8x96xf32>
    %54 = arith.mulf %49, %53 : vector<8x8x96xf32>
    %55 = arith.addf %46, %54 : vector<8x8x96xf32>
    %c0_24 = arith.constant 0 : index
    %c1_25 = arith.constant 1 : index
    %c0_26 = arith.constant 0 : index
    %c0_27 = arith.constant 0 : index
    %56 = vector.load %arg1[%c0_24, %c1_25, %c0_26, %c0_27] : memref<1x9x9x96xbf16, #tpu.memory_space<vmem>>, vector<1x8x8x96xbf16>
    %57 = vector.shape_cast %56 : vector<1x8x8x96xbf16> to vector<8x8x96xbf16>
    %58 = arith.extf %57 : vector<8x8x96xbf16> to vector<8x8x96xf32>
    %59 = vector.extract_strided_slice %0 {offsets = [6, 0], sizes = [1, 96], strides = [1, 1]} : vector<9x96xf32> to vector<1x96xf32>
    %60 = vector.shape_cast %59 : vector<1x96xf32> to vector<96xf32>
    %61 = vector.shape_cast %60 : vector<96xf32> to vector<1x1x96xf32>
    %62 = vector.broadcast %61 : vector<1x1x96xf32> to vector<8x8x96xf32>
    %63 = arith.mulf %58, %62 : vector<8x8x96xf32>
    %64 = arith.addf %55, %63 : vector<8x8x96xf32>
    %c0_28 = arith.constant 0 : index
    %c1_29 = arith.constant 1 : index
    %c0_30 = arith.constant 0 : index
    %c0_31 = arith.constant 0 : index
    %65 = vector.load %arg2[%c0_28, %c1_29, %c0_30, %c0_31] : memref<1x9x9x96xbf16, #tpu.memory_space<vmem>>, vector<1x8x8x96xbf16>
    %66 = vector.shape_cast %65 : vector<1x8x8x96xbf16> to vector<8x8x96xbf16>
    %67 = arith.extf %66 : vector<8x8x96xbf16> to vector<8x8x96xf32>
    %68 = vector.extract_strided_slice %0 {offsets = [7, 0], sizes = [1, 96], strides = [1, 1]} : vector<9x96xf32> to vector<1x96xf32>
    %69 = vector.shape_cast %68 : vector<1x96xf32> to vector<96xf32>
    %70 = vector.shape_cast %69 : vector<96xf32> to vector<1x1x96xf32>
    %71 = vector.broadcast %70 : vector<1x1x96xf32> to vector<8x8x96xf32>
    %72 = arith.mulf %67, %71 : vector<8x8x96xf32>
    %73 = arith.addf %64, %72 : vector<8x8x96xf32>
    %c0_32 = arith.constant 0 : index
    %c1_33 = arith.constant 1 : index
    %c1_34 = arith.constant 1 : index
    %c0_35 = arith.constant 0 : index
    %74 = vector.load %arg1[%c0_32, %c1_33, %c1_34, %c0_35] : memref<1x9x9x96xbf16, #tpu.memory_space<vmem>>, vector<1x8x8x96xbf16>
    %75 = vector.shape_cast %74 : vector<1x8x8x96xbf16> to vector<8x8x96xbf16>
    %76 = arith.extf %75 : vector<8x8x96xbf16> to vector<8x8x96xf32>
    %77 = vector.extract_strided_slice %0 {offsets = [8, 0], sizes = [1, 96], strides = [1, 1]} : vector<9x96xf32> to vector<1x96xf32>
    %78 = vector.shape_cast %77 : vector<1x96xf32> to vector<96xf32>
    %79 = vector.shape_cast %78 : vector<96xf32> to vector<1x1x96xf32>
    %80 = vector.broadcast %79 : vector<1x1x96xf32> to vector<8x8x96xf32>
    %81 = arith.mulf %76, %80 : vector<8x8x96xf32>
    %82 = arith.addf %73, %81 : vector<8x8x96xf32>
    %c0_36 = arith.constant 0 : index
    %c0_37 = arith.constant 0 : index
    %83 = vector.load %arg6[%c0_36, %c0_37] : memref<1x96xf32, #tpu.memory_space<vmem>>, vector<1x96xf32>
    %84 = vector.shape_cast %83 : vector<1x96xf32> to vector<96xf32>
    %85 = vector.shape_cast %84 : vector<96xf32> to vector<1x1x96xf32>
    %86 = vector.broadcast %85 : vector<1x1x96xf32> to vector<8x8x96xf32>
    %87 = arith.addf %82, %86 : vector<8x8x96xf32>
    %88 = arith.negf %87 : vector<8x8x96xf32>
    %89 = math.exp %88 : vector<8x8x96xf32>
    %cst_38 = arith.constant 1.000000e+00 : f32
    %90 = vector.broadcast %cst_38 : f32 to vector<8x8x96xf32>
    %91 = arith.addf %90, %89 : vector<8x8x96xf32>
    %92 = arith.divf %90, %91 : vector<8x8x96xf32>
    %93 = arith.mulf %87, %92 : vector<8x8x96xf32>
    %cst_39 = arith.constant dense<0.000000e+00> : vector<8x96xf32>
    %94 = vector.multi_reduction <add>, %93, %cst_39 [0] : vector<8x8x96xf32> to vector<8x96xf32>
    %cst_40 = arith.constant dense<0.000000e+00> : vector<96xf32>
    %95 = vector.multi_reduction <add>, %94, %cst_40 [0] : vector<8x96xf32> to vector<96xf32>
    %96 = vector.shape_cast %95 : vector<96xf32> to vector<1x96xf32>
    %cst_41 = arith.constant 1.562500e-02 : f32
    %97 = vector.broadcast %cst_41 : f32 to vector<1x96xf32>
    %98 = arith.mulf %96, %97 : vector<1x96xf32>
    %c0_42 = arith.constant 0 : index
    %c0_43 = arith.constant 0 : index
    %99 = vector.load %arg7[%c0_42, %c0_43] : memref<96x24xf32, #tpu.memory_space<vmem>>, vector<96x24xf32>
    %cst_44 = arith.constant dense<0.000000e+00> : vector<1x24xf32>
    %100 = tpu.matmul %98, %99, %cst_44 {dimension_numbers = #tpu.dot_dimension_numbers<[1], [0], [0], [1], [0, 0, 1, 1], [], []>} : vector<1x96xf32>, vector<96x24xf32>, vector<1x24xf32> -> vector<1x24xf32>
    %c0_45 = arith.constant 0 : index
    %c0_46 = arith.constant 0 : index
    %101 = vector.load %arg8[%c0_45, %c0_46] : memref<1x24xf32, #tpu.memory_space<vmem>>, vector<1x24xf32>
    %102 = arith.addf %100, %101 : vector<1x24xf32>
    %103 = arith.negf %102 : vector<1x24xf32>
    %104 = math.exp %103 : vector<1x24xf32>
    %cst_47 = arith.constant 1.000000e+00 : f32
    %105 = vector.broadcast %cst_47 : f32 to vector<1x24xf32>
    %106 = arith.addf %105, %104 : vector<1x24xf32>
    %107 = arith.divf %105, %106 : vector<1x24xf32>
    %108 = arith.mulf %102, %107 : vector<1x24xf32>
    %c0_48 = arith.constant 0 : index
    %c0_49 = arith.constant 0 : index
    %109 = vector.load %arg9[%c0_48, %c0_49] : memref<24x96xf32, #tpu.memory_space<vmem>>, vector<24x96xf32>
    %cst_50 = arith.constant dense<0.000000e+00> : vector<1x96xf32>
    %110 = tpu.matmul %108, %109, %cst_50 {dimension_numbers = #tpu.dot_dimension_numbers<[1], [0], [0], [1], [0, 0, 1, 1], [], []>} : vector<1x24xf32>, vector<24x96xf32>, vector<1x96xf32> -> vector<1x96xf32>
    %c0_51 = arith.constant 0 : index
    %c0_52 = arith.constant 0 : index
    %111 = vector.load %arg10[%c0_51, %c0_52] : memref<1x96xf32, #tpu.memory_space<vmem>>, vector<1x96xf32>
    %112 = arith.addf %110, %111 : vector<1x96xf32>
    %113 = arith.negf %112 : vector<1x96xf32>
    %114 = math.exp %113 : vector<1x96xf32>
    %cst_53 = arith.constant 1.000000e+00 : f32
    %115 = vector.broadcast %cst_53 : f32 to vector<1x96xf32>
    %116 = arith.addf %115, %114 : vector<1x96xf32>
    %117 = arith.divf %115, %116 : vector<1x96xf32>
    %118 = vector.shape_cast %93 : vector<8x8x96xf32> to vector<64x96xf32>
    %119 = vector.broadcast %117 : vector<1x96xf32> to vector<64x96xf32>
    %120 = arith.mulf %118, %119 : vector<64x96xf32>
    %121 = arith.truncf %120 : vector<64x96xf32> to vector<64x96xbf16>
    %c0_54 = arith.constant 0 : index
    %c0_55 = arith.constant 0 : index
    %122 = vector.load %arg11[%c0_54, %c0_55] : memref<96x1280xbf16, #tpu.memory_space<vmem>>, vector<96x1280xbf16>
    %cst_56 = arith.constant dense<0.000000e+00> : vector<64x1280xf32>
    %123 = tpu.matmul %121, %122, %cst_56 {dimension_numbers = #tpu.dot_dimension_numbers<[1], [0], [0], [1], [0, 0, 1, 1], [], []>} : vector<64x96xbf16>, vector<96x1280xbf16>, vector<64x1280xf32> -> vector<64x1280xf32>
    %c0_57 = arith.constant 0 : index
    %c0_58 = arith.constant 0 : index
    %124 = vector.load %arg12[%c0_57, %c0_58] : memref<1x1280xf32, #tpu.memory_space<vmem>>, vector<1x1280xf32>
    %125 = vector.broadcast %124 : vector<1x1280xf32> to vector<64x1280xf32>
    %126 = arith.addf %123, %125 : vector<64x1280xf32>
    %127 = arith.negf %126 : vector<64x1280xf32>
    %128 = math.exp %127 : vector<64x1280xf32>
    %cst_59 = arith.constant 1.000000e+00 : f32
    %129 = vector.broadcast %cst_59 : f32 to vector<64x1280xf32>
    %130 = arith.addf %129, %128 : vector<64x1280xf32>
    %131 = arith.divf %129, %130 : vector<64x1280xf32>
    %132 = arith.mulf %126, %131 : vector<64x1280xf32>
    %cst_60 = arith.constant dense<0.000000e+00> : vector<1280xf32>
    %133 = vector.multi_reduction <add>, %132, %cst_60 [0] : vector<64x1280xf32> to vector<1280xf32>
    %134 = vector.shape_cast %133 : vector<1280xf32> to vector<1x1280xf32>
    %cst_61 = arith.constant 1.562500e-02 : f32
    %135 = vector.broadcast %cst_61 : f32 to vector<1x1280xf32>
    %136 = arith.mulf %134, %135 : vector<1x1280xf32>
    %c0_62 = arith.constant 0 : index
    %c0_63 = arith.constant 0 : index
    %c0_64 = arith.constant 0 : index
    %137 = vector.load %arg13[%c0_62, %c0_63, %c0_64] : memref<1x1x1280xf32, #tpu.memory_space<vmem>>, vector<1x1x1280xf32>
    %138 = vector.shape_cast %137 : vector<1x1x1280xf32> to vector<1x1280xf32>
    %139 = vector.shape_cast %136 : vector<1x1280xf32> to vector<1x1x1280xf32>
    tpu.vector_store %arg13[%c0_62, %c0_63, %c0_64], %139 {strides = array<i32>} : memref<1x1x1280xf32, #tpu.memory_space<vmem>>, vector<1x1x1280xf32>,
    return
  }
  func.func @transform_0(%arg0: i32) -> (i32, i32, i32, i32) {
    %c0_i32 = arith.constant 0 : i32
    %c0_i32_0 = arith.constant 0 : i32
    %c0_i32_1 = arith.constant 0 : i32
    %c0_i32_2 = arith.constant 0 : i32
    return %arg0, %c0_i32, %c0_i32_0, %c0_i32_1 : i32, i32, i32, i32
  }
  func.func @transform_1(%arg0: i32) -> (i32, i32, i32, i32) {
    %c0_i32 = arith.constant 0 : i32
    %c0_i32_0 = arith.constant 0 : i32
    %c0_i32_1 = arith.constant 0 : i32
    %c0_i32_2 = arith.constant 0 : i32
    return %arg0, %c0_i32, %c0_i32_0, %c0_i32_1 : i32, i32, i32, i32
  }
  func.func @transform_2(%arg0: i32) -> (i32, i32, i32, i32) {
    %c0_i32 = arith.constant 0 : i32
    %c0_i32_0 = arith.constant 0 : i32
    %c0_i32_1 = arith.constant 0 : i32
    %c0_i32_2 = arith.constant 0 : i32
    return %arg0, %c0_i32, %c0_i32_0, %c0_i32_1 : i32, i32, i32, i32
  }
  func.func @transform_3(%arg0: i32) -> (i32, i32, i32, i32) {
    %c0_i32 = arith.constant 0 : i32
    %c0_i32_0 = arith.constant 0 : i32
    %c0_i32_1 = arith.constant 0 : i32
    %c0_i32_2 = arith.constant 0 : i32
    return %arg0, %c0_i32, %c0_i32_0, %c0_i32_1 : i32, i32, i32, i32
  }
  func.func @transform_4(%arg0: i32) -> (i32, i32) {
    %c0_i32 = arith.constant 0 : i32
    %c0_i32_0 = arith.constant 0 : i32
    %c0_i32_1 = arith.constant 0 : i32
    return %c0_i32, %c0_i32_0 : i32, i32
  }
  func.func @transform_5(%arg0: i32) -> (i32, i32) {
    %c0_i32 = arith.constant 0 : i32
    %c0_i32_0 = arith.constant 0 : i32
    %c0_i32_1 = arith.constant 0 : i32
    return %c0_i32, %c0_i32_0 : i32, i32
  }
  func.func @transform_6(%arg0: i32) -> (i32, i32) {
    %c0_i32 = arith.constant 0 : i32
    %c0_i32_0 = arith.constant 0 : i32
    %c0_i32_1 = arith.constant 0 : i32
    return %c0_i32, %c0_i32_0 : i32, i32
  }
  func.func @transform_7(%arg0: i32) -> (i32, i32) {
    %c0_i32 = arith.constant 0 : i32
    %c0_i32_0 = arith.constant 0 : i32
    %c0_i32_1 = arith.constant 0 : i32
    return %c0_i32, %c0_i32_0 : i32, i32
  }
  func.func @transform_8(%arg0: i32) -> (i32, i32) {
    %c0_i32 = arith.constant 0 : i32
    %c0_i32_0 = arith.constant 0 : i32
    %c0_i32_1 = arith.constant 0 : i32
    return %c0_i32, %c0_i32_0 : i32, i32
  }
  func.func @transform_9(%arg0: i32) -> (i32, i32) {
    %c0_i32 = arith.constant 0 : i32
    %c0_i32_0 = arith.constant 0 : i32
    %c0_i32_1 = arith.constant 0 : i32
    return %c0_i32, %c0_i32_0 : i32, i32
  }
  func.func @transform_10(%arg0: i32) -> (i32, i32) {
    %c0_i32 = arith.constant 0 : i32
    %c0_i32_0 = arith.constant 0 : i32
    %c0_i32_1 = arith.constant 0 : i32
    return %c0_i32, %c0_i32_0 : i32, i32
  }
  func.func @transform_11(%arg0: i32) -> (i32, i32) {
    %c0_i32 = arith.constant 0 : i32
    %c0_i32_0 = arith.constant 0 : i32
    %c0_i32_1 = arith.constant 0 : i32
    return %c0_i32, %c0_i32_0 : i32, i32
  }
  func.func @transform_12(%arg0: i32) -> (i32, i32, i32) {
    %c0_i32 = arith.constant 0 : i32
    %c0_i32_0 = arith.constant 0 : i32
    %c0_i32_1 = arith.constant 0 : i32
    return %arg0, %c0_i32, %c0_i32_0 : i32, i32, i32
  }
}

</mosaic_0001>

<bundles_post_ra>
// kernel: efficientnet_forward.3
= control target key start
LH: loop header
LB: loop body
LE: loop exit
PB: predicated region body
PF: predicated region fallthrough
CT: control target
= control target key end

     0   :  { %s1343_s12 = smov 0   ;;  %s1659_s0 = inlined_call_operand.vmem [shape: bf16[512,32], index: 0, kind: input, shape index: {}]   ;;  %s1660_s1 = inlined_call_operand.vmem [shape: bf16[32,32], index: 1, kind: input, shape index: {}]   ;;  %s1661_s2 = inlined_call_operand.vmem [shape: f32[1,32], index: 2, kind: input, shape index: {}]   ;;  %s1662_s3 = inlined_call_operand.vmem [shape: bf16[512,32], index: 3, kind: output, shape index: {}]  }
   0x1 LB: > { %s961_s13 = sadd.s32 4294967295, %s1321_s12   ;;  %p965_p0 = scmp.ge.s32.totalorder %s1321_s12, 1  ;;  %s1321_s12 = sphi %s1343_s12, %s13_s12  }
   0x2   : > { %p138_p1 = scmp.lt.s32.totalorder %s1321_s12, 3 }
   0x4   : > { %p139_p2 = pnand %p965_p0, %p138_p1 }
   0x5   : > { %v1169_v0 = vld [vmem:[%s1660_s1] sm:$0xff] (!%p139_p2)   ;;  %s966_s16 = sshll.u32 (!%p139_p2), %s961_s13, 5  ;;  %v1170_v1 = vld [vmem:[%s1660_s1 + $0x8] sm:$0xff] (!%p139_p2)   ;;  %vm310_vm0 = vcmask (!%p139_p2), 261120   ;;  %vm872_vm1 = vcmask (!%p139_p2), 257024  }
   0x6   : > { %142 = sbr.rel (%p139_p2) target bundleno = 322 (0x142), region = 32  ;;  %p163_p3 = scmp.lt.s32.totalorder (!%p139_p2), %s966_s16, 63  ;;  %1121 = vmatprep.subr.bf16.mxu0 (!%p139_p2), %v1169_v0  ;;  %1157 = vmatprep.subr.bf16.mxu1 (!%p139_p2), %v1169_v0  ;;  %v1402_v18 = vld [vmem:[%s1661_s2] ss:$0 sm:$0xff] (!%p139_p2) }
   0x7   : > { %1122 = vmatpush3.bf16.msra.mxu0 (!%p139_p2), %v1169_v0  ;;  %1159 = vmatpush3.bf16.msra.mxu1 (!%p139_p2), %v1169_v0 }
   0x8   : > { %1123 = vmatprep.subr.bf16.mxu0 (!%p139_p2), %v1170_v1  ;;  %1158 = vmatprep.subr.bf16.mxu1 (!%p139_p2), %v1170_v1 }
   0xb   : > { %1124 = vmatpush3.bf16.msra.mxu0 (!%p139_p2), %v1170_v1  ;;  %1160 = vmatpush3.bf16.msra.mxu1 (!%p139_p2), %v1170_v1 }
   0xd   : > { %s1664_s16 = smov (!%p163_p3, %s966_s16), 63 }
   0xe   : > { %s967_s19 = sshll.u32 %s1664_s16, 2 }
   0xf   : > { %s1365_s22 = scalar_lea.vmem %s1659_s0, %s967_s19  ;;  %s1509_s27 = scalar_lea.vmem %s1662_s3, %s967_s19 }
  0x10   : > { %v1171_v2 = vld [vmem:[%s1365_s22] sm:$0xff]   ;;  %v1173_v4 = vld [vmem:[%s1365_s22 + $0x8] sm:$0xff]   ;;  %v1175_v6 = vld [vmem:[%s1365_s22 + $0x10] sm:$0xff]  }
  0x11   : > { %v1172_v3 = vld [vmem:[%s1365_s22 + $0x40] sm:$0xff]   ;;  %1125 = vmatprep.mubr.msk.bf16.mxu0 %vm310_vm0, %v1171_v2  ;;  %v1174_v5 = vld [vmem:[%s1365_s22 + $0x48] sm:$0xff]   ;;  %v1176_v7 = vld [vmem:[%s1365_s22 + $0x50] sm:$0xff]  }
  0x12   : > { %1141 = vmatprep.mubr.msk.bf16.mxu1 %vm310_vm0, %v1172_v3  ;;  %1126 = vmatmul.mubr.msk.bf16.vlgmr.msra.gmra.mrb[0].mxu0 %vm310_vm0, %v1173_v4  ;;  %v1177_v8 = vld [vmem:[%s1365_s22 + $0x18] sm:$0xff]   ;;  %v1179_v10 = vld [vmem:[%s1365_s22 + $0x20] sm:$0xff]   ;;  %v1181_v12 = vld [vmem:[%s1365_s22 + $0x28] sm:$0xff]  }
  0x13   : > { %1142 = vmatmul.mubr.msk.bf16.vlgmr.msra.gmra.mrb[0].mxu1 %vm310_vm0, %v1174_v5  ;;  %1129 = vmatprep.mubr.msk.bf16.mxu0 %vm310_vm0, %v1175_v6  ;;  %v1178_v9 = vld [vmem:[%s1365_s22 + $0x58] sm:$0xff]   ;;  %v1180_v11 = vld [vmem:[%s1365_s22 + $0x60] sm:$0xff]   ;;  %v1182_v13 = vld [vmem:[%s1365_s22 + $0x68] sm:$0xff]  }
  0x14   : > { %1145 = vmatprep.mubr.msk.bf16.mxu1 %vm310_vm0, %v1176_v7  ;;  %v1183_v14 = vld [vmem:[%s1365_s22 + $0x30] sm:$0xff]   ;;  %v1185_v16 = vld [vmem:[%s1365_s22 + $0x38] sm:$0xff]  }
  0x15   : > { %v1184_v15 = vld [vmem:[%s1365_s22 + $0x70] sm:$0xff]   ;;  %v1186_v17 = vld [vmem:[%s1365_s22 + $0x78] sm:$0xff]  }
  0x1a   : > { %1130 = vmatmul.mubr.msk.bf16.gmra.mrb[4].mxu0 %vm310_vm0, %v1177_v8 }
  0x1b   : > { %1146 = vmatmul.mubr.msk.bf16.gmra.mrb[4].mxu1 %vm310_vm0, %v1178_v9  ;;  %1133 = vmatprep.mubr.msk.bf16.mxu0 %vm310_vm0, %v1179_v10 }
  0x1c   : > { %1149 = vmatprep.mubr.msk.bf16.mxu1 %vm310_vm0, %v1180_v11 }
  0x22   : > { %1134 = vmatmul.mubr.msk.bf16.gmra.mrb[8].mxu0 %vm310_vm0, %v1181_v12 }
  0x23   : > { %1150 = vmatmul.mubr.msk.bf16.gmra.mrb[8].mxu1 %vm310_vm0, %v1182_v13  ;;  %1137 = vmatprep.mubr.msk.bf16.mxu0 %vm310_vm0, %v1183_v14 }
  0x24   : > { %1153 = vmatprep.mubr.msk.bf16.mxu1 %vm310_vm0, %v1184_v15 }
  0x2a   : > { %1138 = vmatmul.mubr.msk.bf16.gmra.mrb[12].mxu0 %vm310_vm0, %v1185_v16 }
  0x2b   : > { %1154 = vmatmul.mubr.msk.bf16.gmra.mrb[12].mxu1 %vm310_vm0, %v1186_v17 }
  0xe5   : > { %v1127_v19 = vpop.f32.mrb[0].mxu0 }
  0xe6   : > { %v1405_v20 = vadd.f32 %v1127_v19, %v1402_v18  ;;  %v1143_v21 = vpop.f32.mrb[0].mxu1  ;;  %v393_v22 = vpop.f32.mrb[1].mxu0 }
  0xe7   : > { %v1408_v23 = vadd.f32 %v1143_v21, %v1402_v18  ;;  %v1411_v24 = vadd.f32 %v1402_v18, %v393_v22  ;;  %v457_v25 = vpop.f32.mrb[1].mxu1  ;;  %v1128_v26 = vpop.f32.mrb[2].mxu0 }
  0xe8   : > { %v1007_v27 = vmul.f32 -1.442695, %v1405_v20  ;;  %v1415_v28 = vadd.f32 %v1402_v18, %v457_v25  ;;  %v1418_v29 = vadd.f32 %v1128_v26, %v1402_v18  ;;  %v1144_v30 = vpop.f32.mrb[2].mxu1  ;;  %v396_v31 = vpop.f32.mrb[3].mxu0 }
  0xe9   : > { %v1023_v32 = vmul.f32 -1.442695, %v1408_v23  ;;  %v1005_v33 = vmul.f32 -1.442695, %v1411_v24  ;;  %v1423_v34 = vadd.f32 %v1144_v30, %v1402_v18  ;;  %v1426_v35 = vadd.f32 %v1402_v18, %v396_v31  ;;  %v460_v36 = vpop.f32.mrb[3].mxu1 }
  0xea   : > { %1187 = vpow2.f32 %v1007_v27  ;;  %v1021_v37 = vmul.f32 -1.442695, %v1415_v28  ;;  %v1008_v38 = vmul.f32 -1.442695, %v1418_v29  ;;  %v1431_v39 = vadd.f32 %v1402_v18, %v460_v36 }
  0xeb   : > { %1189 = vpow2.f32 %v1023_v32  ;;  %v1024_v40 = vmul.f32 -1.442695, %v1423_v34  ;;  %v1006_v41 = vmul.f32 -1.442695, %v1426_v35 }
  0xec   : > { %1191 = vpow2.f32 %v1005_v33  ;;  %v1022_v42 = vmul.f32 -1.442695, %v1431_v39 }
  0xed   : > { %1193 = vpow2.f32 %v1021_v37  ;;  %v1131_v43 = vpop.f32.mrb[4].mxu0 }
  0xee   : > { %1195 = vpow2.f32 %v1008_v38  ;;  %v1437_v44 = vadd.f32 %v1131_v43, %v1402_v18  ;;  %v1147_v45 = vpop.f32.mrb[4].mxu1  ;;  %v409_v46 = vpop.f32.mrb[5].mxu0 }
  0xef   : > { %1197 = vpow2.f32 %v1024_v40  ;;  %v1440_v47 = vadd.f32 %v1147_v45, %v1402_v18  ;;  %v1443_v48 = vadd.f32 %v1402_v18, %v409_v46  ;;  %v473_v49 = vpop.f32.mrb[5].mxu1  ;;  %v1132_v50 = vpop.f32.mrb[6].mxu0 }
  0xf0   : > { %1199 = vpow2.f32 %v1006_v41  ;;  %v1011_v51 = vmul.f32 -1.442695, %v1437_v44  ;;  %v1447_v52 = vadd.f32 %v1402_v18, %v473_v49  ;;  %v1450_v53 = vadd.f32 %v1132_v50, %v1402_v18  ;;  %v1148_v54 = vpop.f32.mrb[6].mxu1  ;;  %v412_v55 = vpop.f32.mrb[7].mxu0 }
  0xf1   : > { %1201 = vpow2.f32 %v1022_v42  ;;  %v1027_v56 = vmul.f32 -1.442695, %v1440_v47  ;;  %v1009_v57 = vmul.f32 -1.442695, %v1443_v48  ;;  %v476_v58 = vpop.f32.mrb[7].mxu1  ;;  %v1459_v19 = vadd.f32 %v1148_v54, %v1402_v18 }
  0xf2   : > { %1203 = vpow2.f32 %v1011_v51  ;;  %v1025_v59 = vmul.f32 -1.442695, %v1447_v52  ;;  %v1012_v60 = vmul.f32 -1.442695, %v1450_v53  ;;  %v1462_v25 = vadd.f32 %v1402_v18, %v412_v55 }
  0xf3   : > { %1205 = vpow2.f32 %v1027_v56  ;;  %v1465_v30 = vadd.f32 %v1402_v18, %v476_v58  ;;  %v1028_v41 = vmul.f32 -1.442695, %v1459_v19 }
  0xf4   : > { %v1188_v61 = vpop.eup %1187  ;;  %1207 = vpow2.f32 %v1009_v57  ;;  %v1010_v50 = vmul.f32 -1.442695, %v1462_v25 }
  0xf5   : > { %v1190_v62 = vpop.eup %1189  ;;  %v618_v63 = vadd.f32 1.0, %v1188_v61  ;;  %1209 = vpow2.f32 %v1025_v59  ;;  %v1135_v0 = vpop.f32.mrb[8].mxu0  ;;  %v1026_v58 = vmul.f32 -1.442695, %v1465_v30 }
  0xf6   : > { %v1192_v1 = vpop.eup %1191  ;;  %v634_v2 = vadd.f32 1.0, %v1190_v62  ;;  %1211 = vpow2.f32 %v1012_v60  ;;  %v1151_v3 = vpop.f32.mrb[8].mxu1  ;;  %v1468_v33 = vadd.f32 %v1135_v0, %v1402_v18 }
  0xf7   : > { %v425_v4 = vpop.f32.mrb[9].mxu0  ;;  %v1194_v5 = vpop.eup %1193  ;;  %1213 = vrcp.f32 %v618_v63  ;;  %v616_v6 = vadd.f32 1.0, %v1192_v1  ;;  %v1471_v36 = vadd.f32 %v1151_v3, %v1402_v18 }
  0xf8   : > { %v489_v7 = vpop.f32.mrb[9].mxu1  ;;  %v1136_v8 = vpop.f32.mrb[10].mxu0  ;;  %1215 = vrcp.f32 %v634_v2  ;;  %v632_v10 = vadd.f32 1.0, %v1194_v5  ;;  %v1475_v42 = vadd.f32 %v1402_v18, %v425_v4  ;;  %v1015_v0 = vmul.f32 -1.442695, %v1468_v33 }
  0xf9   : > { %v1196_v9 = vpop.eup %1195  ;;  %v1152_v11 = vpop.f32.mrb[10].mxu1  ;;  %1217 = vrcp.f32 %v616_v6  ;;  %v1481_v51 = vadd.f32 %v1402_v18, %v489_v7  ;;  %v1489_v59 = vadd.f32 %v1136_v8, %v1402_v18  ;;  %v1031_v1 = vmul.f32 -1.442695, %v1471_v36 }
  0xfa   : > { %v428_v12 = vpop.f32.mrb[11].mxu0  ;;  %v1198_v13 = vpop.eup %1197  ;;  %v619_v14 = vadd.f32 1.0, %v1196_v9  ;;  %1219 = vrcp.f32 %v632_v10  ;;  %v1013_v5 = vmul.f32 -1.442695, %v1475_v42  ;;  %v1502_v6 = vadd.f32 %v1152_v11, %v1402_v18 }
  0xfb   : > { %v1456_v15 = vpop.f32.mrb[11].mxu1  ;;  %v1200_v16 = vpop.eup %1199  ;;  %v635_v17 = vadd.f32 1.0, %v1198_v13  ;;  %v1029_v9 = vmul.f32 -1.442695, %v1481_v51 }
  0xfc   : > { %v1202_v21 = vpop.eup %1201  ;;  %1221 = vrcp.f32 %v619_v14  ;;  %v617_v22 = vadd.f32 1.0, %v1200_v16  ;;  %v1016_v14 = vmul.f32 -1.442695, %v1489_v59 }
  0xfd   : > { %v1204_v26 = vpop.eup %1203  ;;  %1223 = vrcp.f32 %v635_v17  ;;  %v633_v27 = vadd.f32 1.0, %v1202_v21  ;;  %v1139_v37 = vpop.f32.mrb[12].mxu0 }
  0xfe   : > { %v1206_v31 = vpop.eup %1205  ;;  %1225 = vrcp.f32 %v617_v22  ;;  %v622_v32 = vadd.f32 1.0, %v1204_v26  ;;  %v1155_v43 = vpop.f32.mrb[12].mxu1 }
  0xff   : > { %v1208_v38 = vpop.eup %1207  ;;  %1227 = vrcp.f32 %v633_v27  ;;  %v638_v40 = vadd.f32 1.0, %v1206_v31  ;;  %v1477_v45 = vpop.f32.mrb[13].mxu0 }
 0x100   : > { %v1210_v46 = vpop.eup %1209  ;;  %1229 = vrcp.f32 %v622_v32  ;;  %v620_v49 = vadd.f32 1.0, %v1208_v38  ;;  %v1483_v54 = vpop.f32.mrb[13].mxu1 }
 0x101   : > { %v1485_v55 = vpop.f32.mrb[14].mxu0  ;;  %v1212_v56 = vpop.eup %1211  ;;  %1231 = vrcp.f32 %v638_v40  ;;  %v636_v57 = vadd.f32 1.0, %v1210_v46  ;;  %v1537_v40 = vadd.f32 %v1155_v43, %v1402_v18 }
 0x102   : > { %v1491_v60 = vpop.f32.mrb[14].mxu1  ;;  %v1493_v61 = vpop.f32.mrb[15].mxu0  ;;  %1233 = vrcp.f32 %v620_v49  ;;  %v623_v63 = vadd.f32 1.0, %v1212_v56 }
 0x103   : > { %v1214_v62 = vpop.eup %1213  ;;  %v1497_v2 = vpop.f32.mrb[15].mxu1  ;;  %1235 = vrcp.f32 %v636_v57 }
 0x104   : > { %v1216_v3 = vpop.eup %1215  ;;  %v714_v4 = vmul.f32 %v1214_v62, %v1405_v20  ;;  %1237 = vrcp.f32 %v623_v63  ;;  %v1514_v20 = vadd.f32 %v1402_v18, %v428_v12 }
 0x105   : > { %v1218_v7 = vpop.eup %1217  ;;  %v730_v8 = vmul.f32 %v1216_v3, %v1408_v23  ;;  %1239 = vpow2.f32 %v1028_v41  ;;  %v1521_v23 = vadd.f32 %v1402_v18, %v1456_v15  ;;  %v1531_v15 = vadd.f32 %v1139_v37, %v1402_v18 }
 0x106   : > { %v1220_v10 = vpop.eup %1219  ;;  %v1073_v13 = vpack.c.bf16 %v714_v4, %v714_v4  ;;  %v712_v11 = vmul.f32 %v1218_v7, %v1411_v24  ;;  %1241 = vpow2.f32 %v1010_v50  ;;  %v1032_v24 = vmul.f32 -1.442695, %v1502_v6 }
 0x107   : > { %v1222_v16 = vpop.eup %1221  ;;  %v1089_v17 = vpack.c.bf16 %v730_v8, %v730_v8  ;;  %v728_v21 = vmul.f32 %v1220_v10, %v1415_v28  ;;  %1243 = vpow2.f32 %v1026_v58  ;;  %v1014_v37 = vmul.f32 -1.442695, %v1514_v20 }
 0x108   : > { %v1224_v12 = vpop.eup %1223  ;;  %875 = vst.msk [vmem:[%s1509_s27 + $0x8] sm:$0xf] %vm872_vm1, %v1073_v13  ;;  %v1071_v22 = vpack.c.bf16 %v712_v11, %v712_v11  ;;  %v715_v26 = vmul.f32 %v1222_v16, %v1418_v29  ;;  %1245 = vpow2.f32 %v1015_v0  ;;  %v1030_v43 = vmul.f32 -1.442695, %v1521_v23 }
 0x109   : > { %v1226_v27 = vpop.eup %1225  ;;  %891 = vst.msk [vmem:[%s1509_s27 + $0x48] sm:$0xf] %vm872_vm1, %v1089_v17  ;;  %v1087_v28 = vpack.c.bf16 %v728_v21, %v728_v21  ;;  %v731_v31 = vmul.f32 %v1224_v12, %v1423_v34  ;;  %1247 = vpow2.f32 %v1031_v1  ;;  %v1019_v58 = vmul.f32 -1.442695, %v1531_v15 }
 0x10a   : > { %v1228_v32 = vpop.eup %1227  ;;  %873 = vst.msk [vmem:[%s1509_s27] sm:$0xf] %vm872_vm1, %v1071_v22  ;;  %v1074_v38 = vpack.c.bf16 %v715_v26, %v715_v26  ;;  %v713_v29 = vmul.f32 %v1226_v27, %v1426_v35  ;;  %1249 = vpow2.f32 %v1013_v5  ;;  %v1035_v0 = vmul.f32 -1.442695, %v1537_v40 }
 0x10b   : > { %v1230_v41 = vpop.eup %1229  ;;  %889 = vst.msk [vmem:[%s1509_s27 + $0x40] sm:$0xf] %vm872_vm1, %v1087_v28  ;;  %v1090_v34 = vpack.c.bf16 %v731_v31, %v731_v31  ;;  %v729_v46 = vmul.f32 %v1228_v32, %v1431_v39  ;;  %1251 = vpow2.f32 %v1029_v9  ;;  %v1571_v31 = vadd.f32 %v1402_v18, %v1477_v45 }
 0x10c   : > { %v1232_v49 = vpop.eup %1231  ;;  %876 = vst.msk [vmem:[%s1509_s27 + $0xc] sm:$0xf] %vm872_vm1, %v1074_v38  ;;  %v1072_v50 = vpack.c.bf16 %v713_v29, %v713_v29  ;;  %v718_v35 = vmul.f32 %v1230_v41, %v1437_v44  ;;  %1253 = vpow2.f32 %v1016_v14  ;;  %v1575_v29 = vadd.f32 %v1402_v18, %v1483_v54 }
 0x10d   : > { %v1234_v56 = vpop.eup %1233  ;;  %892 = vst.msk [vmem:[%s1509_s27 + $0x4c] sm:$0xf] %vm872_vm1, %v1090_v34  ;;  %v1088_v57 = vpack.c.bf16 %v729_v46, %v729_v46  ;;  %v734_v39 = vmul.f32 %v1232_v49, %v1440_v47  ;;  %1255 = vpow2.f32 %v1032_v24  ;;  %v1579_v46 = vadd.f32 %v1485_v55, %v1402_v18 }
 0x10e   : > { %v1236_v62 = vpop.eup %1235  ;;  %874 = vst.msk [vmem:[%s1509_s27 + $0x4] sm:$0xf] %vm872_vm1, %v1072_v50  ;;  %v1077_v63 = vpack.c.bf16 %v718_v35, %v718_v35  ;;  %v716_v44 = vmul.f32 %v1234_v56, %v1443_v48  ;;  %1257 = vpow2.f32 %v1014_v37  ;;  %v1583_v45 = vadd.f32 %v1491_v60, %v1402_v18 }
 0x10f   : > { %v1238_v1 = vpop.eup %1237  ;;  %890 = vst.msk [vmem:[%s1509_s27 + $0x44] sm:$0xf] %vm872_vm1, %v1088_v57  ;;  %v1093_v3 = vpack.c.bf16 %v734_v39, %v734_v39  ;;  %v732_v47 = vmul.f32 %v1236_v62, %v1447_v52  ;;  %1259 = vpow2.f32 %v1030_v43  ;;  %v1017_v54 = vmul.f32 -1.442695, %v1571_v31 }
 0x110   : > { %v1240_v4 = vpop.eup %1239  ;;  %879 = vst.msk [vmem:[%s1509_s27 + $0x18] sm:$0xf] %vm872_vm1, %v1077_v63  ;;  %v1075_v5 = vpack.c.bf16 %v716_v44, %v716_v44  ;;  %v719_v7 = vmul.f32 %v1238_v1, %v1450_v53  ;;  %1261 = vpow2.f32 %v1019_v58  ;;  %v1588_v43 = vadd.f32 %v1402_v18, %v1493_v61 }
 0x111   : > { %v1242_v48 = vpop.eup %1241  ;;  %895 = vst.msk [vmem:[%s1509_s27 + $0x58] sm:$0xf] %vm872_vm1, %v1093_v3  ;;  %v1091_v8 = vpack.c.bf16 %v732_v47, %v732_v47  ;;  %v639_v9 = vadd.f32 1.0, %v1240_v4  ;;  %1263 = vpow2.f32 %v1035_v0  ;;  %v1033_v57 = vmul.f32 -1.442695, %v1575_v29 }
 0x112   : > { %v1244_v10 = vpop.eup %1243  ;;  %877 = vst.msk [vmem:[%s1509_s27 + $0x10] sm:$0xf] %vm872_vm1, %v1075_v5  ;;  %v1078_v52 = vpack.c.bf16 %v719_v7, %v719_v7  ;;  %v621_v13 = vadd.f32 1.0, %v1242_v48  ;;  %v1593_v39 = vadd.f32 %v1402_v18, %v1497_v2  ;;  %v1020_v62 = vmul.f32 -1.442695, %v1579_v46 }
 0x113   : > { %v1246_v11 = vpop.eup %1245  ;;  %893 = vst.msk [vmem:[%s1509_s27 + $0x50] sm:$0xf] %vm872_vm1, %v1091_v8  ;;  %1265 = vrcp.f32 %v639_v9  ;;  %v637_v14 = vadd.f32 1.0, %v1244_v10  ;;  %v1036_v44 = vmul.f32 -1.442695, %v1583_v45 }
 0x114   : > { %v1248_v53 = vpop.eup %1247  ;;  %880 = vst.msk [vmem:[%s1509_s27 + $0x1c] sm:$0xf] %vm872_vm1, %v1078_v52  ;;  %1267 = vrcp.f32 %v621_v13  ;;  %v626_v16 = vadd.f32 1.0, %v1246_v11  ;;  %v1018_v18 = vmul.f32 -1.442695, %v1588_v43 }
 0x115   : > { %v1250_v17 = vpop.eup %1249  ;;  %1269 = vrcp.f32 %v637_v14  ;;  %v642_v21 = vadd.f32 1.0, %v1248_v53  ;;  %v1034_v4 = vmul.f32 -1.442695, %v1593_v39 }
 0x116   : > { %v1252_v12 = vpop.eup %1251  ;;  %1271 = vrcp.f32 %v626_v16  ;;  %v624_v22 = vadd.f32 1.0, %v1250_v17 }
 0x117   : > { %v1254_v26 = vpop.eup %1253  ;;  %1273 = vrcp.f32 %v642_v21  ;;  %v640_v24 = vadd.f32 1.0, %v1252_v12 }
 0x118   : > { %v1256_v27 = vpop.eup %1255  ;;  %1275 = vrcp.f32 %v624_v22  ;;  %v627_v28 = vadd.f32 1.0, %v1254_v26 }
 0x119   : > { %v1258_v32 = vpop.eup %1257  ;;  %1277 = vrcp.f32 %v640_v24  ;;  %v643_v38 = vadd.f32 1.0, %v1256_v27 }
 0x11a   : > { %v1260_v41 = vpop.eup %1259  ;;  %1279 = vrcp.f32 %v627_v28  ;;  %v625_v34 = vadd.f32 1.0, %v1258_v32 }
 0x11b   : > { %v1262_v37 = vpop.eup %1261  ;;  %1281 = vrcp.f32 %v643_v38  ;;  %v641_v49 = vadd.f32 1.0, %v1260_v41 }
 0x11c   : > { %v1264_v50 = vpop.eup %1263  ;;  %1283 = vrcp.f32 %v625_v34  ;;  %v630_v35 = vadd.f32 1.0, %v1262_v37 }
 0x11d   : > { %v1266_v56 = vpop.eup %1265  ;;  %1285 = vrcp.f32 %v641_v49  ;;  %v646_v55 = vadd.f32 1.0, %v1264_v50 }
 0x11e   : > { %v1268_v60 = vpop.eup %1267  ;;  %v735_v58 = vmul.f32 %v1266_v56, %v1459_v19  ;;  %1287 = vrcp.f32 %v630_v35 }
 0x11f   : > { %v1270_v63 = vpop.eup %1269  ;;  %v717_v61 = vmul.f32 %v1268_v60, %v1462_v25  ;;  %1289 = vrcp.f32 %v646_v55 }
 0x120   : > { %v1272_v0 = vpop.eup %1271  ;;  %v1094_v1 = vpack.c.bf16 %v735_v58, %v735_v58  ;;  %v733_v3 = vmul.f32 %v1270_v63, %v1465_v30  ;;  %1291 = vpow2.f32 %v1017_v54 }
 0x121   : > { %v1274_v2 = vpop.eup %1273  ;;  %v1076_v19 = vpack.c.bf16 %v717_v61, %v717_v61  ;;  %v722_v47 = vmul.f32 %v1272_v0, %v1468_v33  ;;  %1293 = vpow2.f32 %v1033_v57 }
 0x122   : > { %v1276_v25 = vpop.eup %1275  ;;  %896 = vst.msk [vmem:[%s1509_s27 + $0x5c] sm:$0xf] %vm872_vm1, %v1094_v1  ;;  %v1092_v5 = vpack.c.bf16 %v733_v3, %v733_v3  ;;  %v738_v7 = vmul.f32 %v1274_v2, %v1471_v36  ;;  %1295 = vpow2.f32 %v1020_v62 }
 0x123   : > { %v1278_v30 = vpop.eup %1277  ;;  %878 = vst.msk [vmem:[%s1509_s27 + $0x14] sm:$0xf] %vm872_vm1, %v1076_v19  ;;  %v1081_v48 = vpack.c.bf16 %v722_v47, %v722_v47  ;;  %v720_v8 = vmul.f32 %v1276_v25, %v1475_v42  ;;  %1297 = vpow2.f32 %v1036_v44 }
 0x124   : > { %v1280_v33 = vpop.eup %1279  ;;  %894 = vst.msk [vmem:[%s1509_s27 + $0x54] sm:$0xf] %vm872_vm1, %v1092_v5  ;;  %v1097_v9 = vpack.c.bf16 %v738_v7, %v738_v7  ;;  %v736_v10 = vmul.f32 %v1278_v30, %v1481_v51  ;;  %1299 = vpow2.f32 %v1018_v18 }
 0x125   : > { %v1282_v52 = vpop.eup %1281  ;;  %883 = vst.msk [vmem:[%s1509_s27 + $0x28] sm:$0xf] %vm872_vm1, %v1081_v48  ;;  %v1079_v36 = vpack.c.bf16 %v720_v8, %v720_v8  ;;  %v723_v13 = vmul.f32 %v1280_v33, %v1489_v59  ;;  %1301 = vpow2.f32 %v1034_v4 }
 0x126   : > { %v1284_v11 = vpop.eup %1283  ;;  %899 = vst.msk [vmem:[%s1509_s27 + $0x68] sm:$0xf] %vm872_vm1, %v1097_v9  ;;  %v1095_v42 = vpack.c.bf16 %v736_v10, %v736_v10  ;;  %v739_v14 = vmul.f32 %v1282_v52, %v1502_v6 }
 0x127   : > { %v1286_v53 = vpop.eup %1285  ;;  %881 = vst.msk [vmem:[%s1509_s27 + $0x20] sm:$0xf] %vm872_vm1, %v1079_v36  ;;  %v1082_v51 = vpack.c.bf16 %v723_v13, %v723_v13  ;;  %v721_v16 = vmul.f32 %v1284_v11, %v1514_v20 }
 0x128   : > { %v1288_v17 = vpop.eup %1287  ;;  %897 = vst.msk [vmem:[%s1509_s27 + $0x60] sm:$0xf] %vm872_vm1, %v1095_v42  ;;  %v1098_v59 = vpack.c.bf16 %v739_v14, %v739_v14  ;;  %v737_v21 = vmul.f32 %v1286_v53, %v1521_v23 }
 0x129   : > { %v1290_v12 = vpop.eup %1289  ;;  %884 = vst.msk [vmem:[%s1509_s27 + $0x2c] sm:$0xf] %vm872_vm1, %v1082_v51  ;;  %v1080_v22 = vpack.c.bf16 %v721_v16, %v721_v16  ;;  %v726_v6 = vmul.f32 %v1288_v17, %v1531_v15 }
 0x12a   : > { %v1292_v26 = vpop.eup %1291  ;;  %900 = vst.msk [vmem:[%s1509_s27 + $0x6c] sm:$0xf] %vm872_vm1, %v1098_v59  ;;  %v1096_v24 = vpack.c.bf16 %v737_v21, %v737_v21  ;;  %v742_v20 = vmul.f32 %v1290_v12, %v1537_v40 }
 0x12b   : > { %v1294_v27 = vpop.eup %1293  ;;  %882 = vst.msk [vmem:[%s1509_s27 + $0x24] sm:$0xf] %vm872_vm1, %v1080_v22  ;;  %v1085_v28 = vpack.c.bf16 %v726_v6, %v726_v6  ;;  %v628_v32 = vadd.f32 1.0, %v1292_v26 }
 0x12c   : > { %v1296_v23 = vpop.eup %1295  ;;  %898 = vst.msk [vmem:[%s1509_s27 + $0x64] sm:$0xf] %vm872_vm1, %v1096_v24  ;;  %v1101_v38 = vpack.c.bf16 %v742_v20, %v742_v20  ;;  %v644_v41 = vadd.f32 1.0, %v1294_v27 }
 0x12d   : > { %v1298_v34 = vpop.eup %1297  ;;  %887 = vst.msk [vmem:[%s1509_s27 + $0x38] sm:$0xf] %vm872_vm1, %v1085_v28  ;;  %1303 = vrcp.f32 %v628_v32  ;;  %v631_v15 = vadd.f32 1.0, %v1296_v23 }
 0x12e   : > { %v1300_v37 = vpop.eup %1299  ;;  %903 = vst.msk [vmem:[%s1509_s27 + $0x78] sm:$0xf] %vm872_vm1, %v1101_v38  ;;  %1305 = vrcp.f32 %v644_v41  ;;  %v647_v40 = vadd.f32 1.0, %v1298_v34 }
 0x12f   : > { %v1302_v49 = vpop.eup %1301  ;;  %1307 = vrcp.f32 %v631_v15  ;;  %v629_v50 = vadd.f32 1.0, %v1300_v37 }
 0x130   : > { %1309 = vrcp.f32 %v647_v40  ;;  %v645_v35 = vadd.f32 1.0, %v1302_v49 }
 0x131   : > { %1311 = vrcp.f32 %v629_v50 }
 0x132   : > { %1313 = vrcp.f32 %v645_v35 }
 0x137   : > { %v1304_v54 = vpop.eup %1303 }
 0x138   : > { %v1306_v56 = vpop.eup %1305  ;;  %v724_v55 = vmul.f32 %v1304_v54, %v1571_v31 }
 0x139   : > { %v1308_v57 = vpop.eup %1307  ;;  %v740_v60 = vmul.f32 %v1306_v56, %v1575_v29 }
 0x13a   : > { %v1310_v58 = vpop.eup %1309  ;;  %v1083_v62 = vpack.c.bf16 %v724_v55, %v724_v55  ;;  %v727_v63 = vmul.f32 %v1308_v57, %v1579_v46 }
 0x13b   : > { %v1312_v61 = vpop.eup %1311  ;;  %v1099_v44 = vpack.c.bf16 %v740_v60, %v740_v60  ;;  %v743_v0 = vmul.f32 %v1310_v58, %v1583_v45 }
 0x13c   : > { %v1314_v1 = vpop.eup %1313  ;;  %885 = vst.msk [vmem:[%s1509_s27 + $0x30] sm:$0xf] %vm872_vm1, %v1083_v62  ;;  %v1086_v3 = vpack.c.bf16 %v727_v63, %v727_v63  ;;  %v725_v31 = vmul.f32 %v1312_v61, %v1588_v43 }
 0x13d   : > { %901 = vst.msk [vmem:[%s1509_s27 + $0x70] sm:$0xf] %vm872_vm1, %v1099_v44  ;;  %v1102_v29 = vpack.c.bf16 %v743_v0, %v743_v0  ;;  %v741_v18 = vmul.f32 %v1314_v1, %v1593_v39 }
 0x13e   : > { %888 = vst.msk [vmem:[%s1509_s27 + $0x3c] sm:$0xf] %vm872_vm1, %v1086_v3  ;;  %v1084_v2 = vpack.c.bf16 %v725_v31, %v725_v31 }
 0x13f   : > { %904 = vst.msk [vmem:[%s1509_s27 + $0x7c] sm:$0xf] %vm872_vm1, %v1102_v29  ;;  %v1100_v46 = vpack.c.bf16 %v741_v18, %v741_v18 }
 0x140   : > { %886 = vst.msk [vmem:[%s1509_s27 + $0x34] sm:$0xf] %vm872_vm1, %v1084_v2 }
 0x141   : > { %902 = vst.msk [vmem:[%s1509_s27 + $0x74] sm:$0xf] %vm872_vm1, %v1100_v46 }
 0x142 PF: > { %s13_s12 = sadd.s32 1, %s1321_s12  }
 0x143   : > { %p10_p4 = scmp.ge.s32.totalorder %s13_s12, 4  }
 0x145   :  { %12 = sbr.rel (!%p10_p4) target bundleno = 1 (0x1), region = 62 }

// kernel: efficientnet_forward.4
= control target key start
LH: loop header
LB: loop body
LE: loop exit
PB: predicated region body
PF: predicated region fallthrough
CT: control target
= control target key end

     0   :  { %s4457_s30 = smov 0   ;;  %s8551_s0 = inlined_call_operand.vmem [shape: bf16[2,18,18,32], index: 0, kind: input, shape index: {}]   ;;  %s8552_s1 = inlined_call_operand.vmem [shape: f32[9,32], index: 1, kind: input, shape index: {}]   ;;  %s8553_s2 = inlined_call_operand.vmem [shape: f32[1,32], index: 2, kind: input, shape index: {}]   ;;  %s8554_s3 = inlined_call_operand.vmem [shape: f32[32,8], index: 3, kind: input, shape index: {}]   ;;  %s8555_s4 = inlined_call_operand.vmem [shape: f32[1,8], index: 4, kind: input, shape index: {}]   ;;  %s8556_s5 = inlined_call_operand.vmem [shape: f32[8,32], index: 5, kind: input, shape index: {}]   ;;  %s8557_s6 = inlined_call_operand.vmem [shape: f32[1,32], index: 6, kind: input, shape index: {}]   ;;  %s8558_s7 = inlined_call_operand.vmem [shape: bf16[32,96], index: 7, kind: input, shape index: {}]   ;;  %s8559_s8 = inlined_call_operand.vmem [shape: f32[1,96], index: 8, kind: input, shape index: {}]   ;;  %s8560_s9 = inlined_call_operand.vmem [shape: bf16[2,256,96], index: 9, kind: output, shape index: {}]  }
   0x1 LB: > { %s3619_s10 = sadd.s32 4294967295, %s4402_s30   ;;  %p3623_p0 = scmp.ge.s32.totalorder %s4402_s30, 1  ;;  %s4402_s30 = sphi %s4457_s30, %s19_s30  }
   0x2   : > { %p287_p1 = scmp.lt.s32.totalorder %s4402_s30, 3 }
   0x4   : > { %p288_p2 = pnand %p3623_p0, %p287_p1 }
   0x6   : > { %291 = sbr.rel (%p288_p2) target bundleno = 1311 (0x51f), region = 56 }
   0xd   : > { %v2728_v0 = vld [vmem:[%s8554_s3] sm:$0xff]  ;;  %v2729_v1 = vld [vmem:[%s8554_s3 + $0x8] sm:$0xff]  ;;  %v2730_v2 = vld [vmem:[%s8554_s3 + $0x10] sm:$0xff]  ;;  %v4404_v3 = vmov 0.0|0.0   ;;  %vm4405_vm0 = vmmov 0   ;;  %v8562_v6 = vmov 0.0   ;;  %v400_v8 = vlaneseq }
   0xe   : > { %4107 = vmatprep.subr.bf16.mxu0 %v4404_v3  ;;  %v4108_v4 = vpack.c.bf16 %v2729_v1, %v2728_v0  ;;  %v2731_v5 = vld [vmem:[%s8554_s3 + $0x18] sm:$0xff]  ;;  %4063 = vmatprep.mubr.msk.f32.mxu0 %vm4405_vm0, %v8562_v6  ;;  %p323_p3 = scmp.lt.s32.totalorder %s3619_s10, 1  ;;  %v334_v13 = vld [vmem:[%s8552_s1] sm:$0xff]  ;;  %vm600_vm1 = vcmask 1046528   ;;  %vm877_vm2 = vcmask 1045504   ;;  %vm2655_vm3 = vcmask 261120  }
   0xf   : > { %v4111_v7 = vpack.c.bf16 %v2731_v5, %v2730_v2  ;;  %v4483_v9 = vshrl.u32 %v400_v8, 7  ;;  %vm2815_vm4 = vcmask 64512   ;;  %vm3531_vm5 = vcmask 781312  }
  0x10   : > { %4109 = vmatpush3.bf16.msra.mxu0 %v4108_v4  ;;  %s9654_s10 = smov (!%p323_p3, %s3619_s10), 1 }
  0x11   : > { %4110 = vmatprep.subr.bf16.mxu0 %v4404_v3  ;;  %s4117_s19 = smul.u32 216, %s9654_s10  ;;  %8765 = vst [vmem:[#allocation2_spill] sm:$0xff] %v4483_v9  ;;  %v8561_v10 = vsub.s32 0, %v4483_v9  ;;  %v502_v11 = vsub.s32 1, %v4483_v9  ;;  %v779_v12 = vsub.s32 2, %v4483_v9  ;;  %v1089_v14 = vsub.s32 3, %v4483_v9 }
  0x12   : > { %v1189_v15 = vsub.s32 4, %v4483_v9  ;;  %s3878_s24 = sshll.u32 %s9654_s10, 7 }
  0x13   : > { %s4488_s22 = scalar_lea.vmem %s8551_s0, %s4117_s19  ;;  %v4509_v21 = vrot.slane %v334_v13, %v8561_v10  ;;  %v4511_v22 = vrot.slane %v334_v13, %v502_v11  ;;  %v4513_v23 = vrot.slane %v334_v13, %v779_v12  ;;  %v4521_v28 = vrot.slane %v334_v13, %v1089_v14  ;;  %s8394_s26 = scalar_lea.vmem %s8560_s9, %s3878_s24 }
  0x14   : > { %4112 = vmatpush3.bf16.msra.mxu0 %v4111_v7  ;;  %v4499_v16 = vld [vmem:[%s4488_s22] sm:$0xff]   ;;  %v4007_v17 = vld [vmem:[%s4488_s22 + $0x18] sm:$0xff]   ;;  %v4008_v18 = vld [vmem:[%s4488_s22 + $0x30] sm:$0xff]   ;;  %v4523_v29 = vrot.slane %v334_v13, %v1189_v15 }
  0x15   : > { %4066 = vmatprep.subr.mxu0 %v8562_v6  ;;  %v4504_v19 = vld [vmem:[%s4488_s22 + $0xc] sm:$0xff]   ;;  %8766 = vst [vmem:[#allocation3_spill] sm:$0xff] %v4513_v23  ;;  %v8567_v24 = vunpack.c.l.bf16 %v4499_v16  ;;  %v4517_v25 = vunpack.c.h.bf16 %v4499_v16  ;;  %v4010_v26 = vld [vmem:[%s4488_s22 + $0x60] sm:$0xff]   ;;  %v4011_v27 = vld [vmem:[%s4488_s22 + $0x78] sm:$0xff]   ;;  %v4525_v30 = vunpack.c.l.bf16 %v4007_v17  ;;  %v4527_v31 = vunpack.c.h.bf16 %v4007_v17 }
  0x16   : > { %v4009_v20 = vld [vmem:[%s4488_s22 + $0x48] sm:$0xff]   ;;  %8768 = vst [vmem:[#allocation5_spill] sm:$0xff] %v4521_v28  ;;  %8769 = vst [vmem:[#allocation6_spill] sm:$0xff] %v4523_v29  ;;  %v4532_v33 = vunpack.c.l.bf16 %v4008_v18  ;;  %v4534_v34 = vunpack.c.h.bf16 %v4008_v18  ;;  %v4012_v35 = vld [vmem:[%s4488_s22 + $0x90] sm:$0xff]   ;;  %v8565_v40 = vunpack.c.l.bf16 %v4504_v19  ;;  %v4547_v41 = vunpack.c.h.bf16 %v4504_v19 }
  0x17   : > { %8767 = vst [vmem:[#allocation4_spill] sm:$0xff] %v4517_v25  ;;  %8770 = vst [vmem:[#allocation7_spill] sm:$0xff] %v4525_v30  ;;  %v4530_v32 = vld [vmem:[%s4488_s22 + $0x24] sm:$0xff]   ;;  %v4538_v36 = vld [vmem:[%s4488_s22 + $0x3c] sm:$0xff]   ;;  %v4540_v37 = vunpack.c.l.bf16 %v4009_v20  ;;  %v4542_v38 = vunpack.c.h.bf16 %v4009_v20  ;;  %v4552_v43 = vunpack.c.l.bf16 %v4010_v26  ;;  %v4554_v44 = vunpack.c.h.bf16 %v4010_v26 }
  0x18   : > { %8771 = vst [vmem:[#allocation8_spill] sm:$0xff] %v4527_v31  ;;  %8772 = vst [vmem:[#allocation9_spill] sm:$0xff] %v4532_v33  ;;  %v4013_v39 = vld [vmem:[%s4488_s22 + $0xa8] sm:$0xff]   ;;  %v4550_v42 = vld [vmem:[%s4488_s22 + $0x54] sm:$0xff]   ;;  %v4559_v46 = vunpack.c.l.bf16 %v4011_v27  ;;  %v4561_v47 = vunpack.c.h.bf16 %v4011_v27  ;;  %v4566_v49 = vunpack.c.l.bf16 %v4012_v35  ;;  %v4568_v50 = vunpack.c.h.bf16 %v4012_v35 }
  0x19   : > { %8773 = vst [vmem:[#allocation10_spill] sm:$0xff] %v4534_v34  ;;  %8774 = vst [vmem:[#allocation11_spill] sm:$0xff] %v4540_v37  ;;  %v4557_v45 = vld [vmem:[%s4488_s22 + $0x6c] sm:$0xff]   ;;  %v4564_v48 = vld [vmem:[%s4488_s22 + $0x84] sm:$0xff]   ;;  %v8564_v52 = vunpack.c.l.bf16 %v4530_v32  ;;  %v4575_v53 = vunpack.c.h.bf16 %v4530_v32  ;;  %v4577_v54 = vunpack.c.l.bf16 %v4013_v39  ;;  %v4579_v55 = vunpack.c.h.bf16 %v4013_v39 }
  0x1a   : > { %8775 = vst [vmem:[#allocation12_spill] sm:$0xff] %v4542_v38  ;;  %8776 = vst [vmem:[#allocation13_spill] sm:$0xff] %v4547_v41  ;;  %v4571_v51 = vld [vmem:[%s4488_s22 + $0x9c] sm:$0xff]   ;;  %v4582_v56 = vld [vmem:[%s4488_s22 + $0xb4] sm:$0xff]   ;;  %v8563_v57 = vunpack.c.l.bf16 %v4538_v36  ;;  %v4586_v58 = vunpack.c.h.bf16 %v4538_v36  ;;  %v8566_v59 = vunpack.c.l.bf16 %v4550_v42  ;;  %v4590_v60 = vunpack.c.h.bf16 %v4550_v42 }
  0x1b   : > { %8777 = vst [vmem:[#allocation14_spill] sm:$0xff] %v4552_v43  ;;  %8778 = vst [vmem:[#allocation15_spill] sm:$0xff] %v4554_v44  ;;  %v8570_v61 = vunpack.c.l.bf16 %v4557_v45  ;;  %v4594_v62 = vunpack.c.h.bf16 %v4557_v45  ;;  %v4598_v0 = vunpack.c.h.bf16 %v4564_v48  ;;  %v4602_v2 = vunpack.c.h.bf16 %v4571_v51  ;;  %v4709_v63 = vld [vmem:[%s4488_s22 + $0x20] sm:$0x1]  ;;  %v4712_v9 = vld [vmem:[%s4488_s22 + $0x2c] sm:$0x1] }
  0x1c   : > { %8779 = vst [vmem:[#allocation16_spill] sm:$0xff] %v4559_v46  ;;  %8780 = vst [vmem:[#allocation17_spill] sm:$0xff] %v4561_v47  ;;  %v4606_v4 = vunpack.c.h.bf16 %v4582_v56  ;;  %v4611_v5 = vmul.f32 %v8567_v24, %v4509_v21  ;;  %v4615_v7 = vmul.f32 %v4517_v25, %v4509_v21  ;;  %v4620_v8 = vmul.f32 %v4509_v21, %v8565_v40  ;;  %v4689_v40 = vld [vmem:[%s4488_s22 + $0x14] sm:$0x1] }
  0x1d   : > { %8781 = vst [vmem:[#allocation18_spill] sm:$0xff] %v4566_v49  ;;  %8782 = vst [vmem:[#allocation19_spill] sm:$0xff] %v4568_v50  ;;  %v4624_v11 = vmul.f32 %v4509_v21, %v4547_v41  ;;  %v4628_v12 = vmul.f32 %v4525_v30, %v4509_v21  ;;  %v4632_v13 = vmul.f32 %v4527_v31, %v4509_v21  ;;  %v8814_v29 = vunpack.c.l.bf16 %v4564_v48 }
  0x1e   : > { %8783 = vst [vmem:[#allocation20_spill] sm:$0xff] %v4575_v53  ;;  %8784 = vst [vmem:[#allocation21_spill] sm:$0xff] %v4577_v54  ;;  %v4637_v14 = vmul.f32 %v4509_v21, %v8564_v52  ;;  %v4641_v15 = vmul.f32 %v4509_v21, %v4575_v53  ;;  %v4645_v17 = vmul.f32 %v4532_v33, %v4509_v21  ;;  %v4686_v52 = vld [vmem:[%s4488_s22 + $0x8] sm:$0x1] }
  0x1f   : > { %8785 = vst [vmem:[#allocation22_spill] sm:$0xff] %v4579_v55  ;;  %8786 = vst [vmem:[#allocation23_spill] sm:$0xff] %v4586_v58  ;;  %v4649_v18 = vmul.f32 %v4534_v34, %v4509_v21  ;;  %v4654_v20 = vmul.f32 %v4509_v21, %v8563_v57  ;;  %v4658_v26 = vmul.f32 %v4509_v21, %v4586_v58 }
  0x20   : > { %8787 = vst [vmem:[#allocation24_spill] sm:$0xff] %v4590_v60  ;;  %8788 = vst [vmem:[#allocation25_spill] sm:$0xff] %v4594_v62  ;;  %v4662_v27 = vmul.f32 %v4540_v37, %v4509_v21  ;;  %v4666_v35 = vmul.f32 %v4542_v38, %v4509_v21  ;;  %v4671_v39 = vmul.f32 %v4509_v21, %v8566_v59 }
  0x21   : > { %8789 = vst [vmem:[#allocation26_spill] sm:$0xff] %v4598_v0  ;;  %8790 = vst [vmem:[#allocation27_spill] sm:$0xff] %v4602_v2  ;;  %v4675_v10 = vmul.f32 %v4509_v21, %v4590_v60  ;;  %v4679_v6 = vmul.f32 %v4552_v43, %v4509_v21  ;;  %v4683_v57 = vmul.f32 %v4554_v44, %v4509_v21 }
  0x22   : > { %8791 = vst [vmem:[#allocation28_spill] sm:$0xff] %v4606_v4  ;;  %8792 = vst [vmem:[#allocation29_spill] sm:$0xff] %v4632_v13  ;;  %v4694_v59 = vmul.f32 %v4509_v21, %v8570_v61  ;;  %v4698_v24 = vmul.f32 %v4509_v21, %v4594_v62  ;;  %v4702_v3 = vmul.f32 %v4559_v46, %v4509_v21  ;;  %v4715_v61 = vld [vmem:[%s4488_s22 + $0x38] sm:$0x1]  ;;  %v8839_v13 = vunpack.c.l.bf16 %v4504_v19 }
  0x23   : > { %8793 = vst [vmem:[#allocation30_spill] sm:$0xff] %v4637_v14  ;;  %8794 = vst [vmem:[#allocation31_spill] sm:$0xff] %v4641_v15  ;;  %v4706_v1 = vmul.f32 %v4561_v47, %v4509_v21  ;;  %v4720_v28 = vmul.f32 %v4509_v21, %v8814_v29  ;;  %v4724_v23 = vmul.f32 %v4509_v21, %v4598_v0  ;;  %v4741_v29 = vld [vmem:[%s4488_s22 + $0x5c] sm:$0x1]  ;;  %v8841_v19 = vunpack.c.l.bf16 %v4709_v63 }
  0x24   : > { %8795 = vst [vmem:[#allocation32_spill] sm:$0xff] %v4645_v17  ;;  %8796 = vst [vmem:[#allocation33_spill] sm:$0xff] %v4649_v18  ;;  %v4793_v18 = vld [vmem:[%s4488_s22 + $0xbc] sm:$0x1]  ;;  %v8837_v17 = vunpack.c.l.bf16 %v4499_v16 }
  0x25   : > { %8797 = vst [vmem:[#allocation34_spill] sm:$0xff] %v4654_v20  ;;  %8798 = vst [vmem:[#allocation35_spill] sm:$0xff] %v4658_v26  ;;  %v4790_v20 = vld [vmem:[%s4488_s22 + $0xb0] sm:$0x1]  ;;  %v8838_v26 = vunpack.c.l.bf16 %v4686_v52 }
  0x26   : > { %8799 = vst [vmem:[#allocation36_spill] sm:$0xff] %v4662_v27  ;;  %8800 = vst [vmem:[#allocation37_spill] sm:$0xff] %v4666_v35  ;;  %v4782_v35 = vld [vmem:[%s4488_s22 + $0x98] sm:$0x1]  ;;  %v504_v15 = vmul.f32 %v8837_v17, %v4511_v22  ;;  %v505_v27 = vmul.f32 %v4517_v25, %v4511_v22  ;;  %v4833_v17 = vmul.f32 %v4525_v30, %v4511_v22  ;;  %v8843_v30 = vunpack.c.l.bf16 %v4712_v9 }
  0x27   : > { %8801 = vst [vmem:[#allocation38_spill] sm:$0xff] %v4671_v39  ;;  %8802 = vst [vmem:[#allocation39_spill] sm:$0xff] %v4675_v10  ;;  %v4764_v10 = vld [vmem:[%s4488_s22 + $0x74] sm:$0x1]  ;;  %v4767_v39 = vld [vmem:[%s4488_s22 + $0x80] sm:$0x1]  ;;  %v506_v14 = vmul.f32 %v4511_v22, %v8838_v26  ;;  %v4837_v26 = vmul.f32 %v4527_v31, %v4511_v22 }
  0x28   : > { %8803 = vst [vmem:[#allocation40_spill] sm:$0xff] %v4679_v6  ;;  %8804 = vst [vmem:[#allocation41_spill] sm:$0xff] %v4683_v57  ;;  %v4758_v57 = vmul.f32 %v4579_v55, %v4509_v21  ;;  %v4761_v6 = vld [vmem:[%s4488_s22 + $0x68] sm:$0x1] }
  0x29   : > { %8805 = vst [vmem:[#allocation42_spill] sm:$0xff] %v4686_v52  ;;  %8806 = vst [vmem:[#allocation43_spill] sm:$0xff] %v4689_v40  ;;  %v604_v52 = vrot.slane %v506_v14, 1  ;;  %v4999_v14 = vmul.f32 %v4579_v55, %v4511_v22 }
  0x2a   : > { %8807 = vst [vmem:[#allocation44_spill] sm:$0xff] %v4694_v59  ;;  %8808 = vst [vmem:[#allocation45_spill] sm:$0xff] %v4698_v24  ;;  %v4735_v24 = vld [vmem:[%s4488_s22 + $0x44] sm:$0x1]  ;;  %v4738_v59 = vld [vmem:[%s4488_s22 + $0x50] sm:$0x1] }
  0x2b   : > { %8809 = vst [vmem:[#allocation46_spill] sm:$0xff] %v4702_v3  ;;  %8810 = vst [vmem:[#allocation47_spill] sm:$0xff] %v4706_v1  ;;  %v4728_v1 = vmul.f32 %v4566_v49, %v4509_v21  ;;  %v4732_v3 = vmul.f32 %v4568_v50, %v4509_v21 }
  0x2c   : > { %8811 = vst [vmem:[#allocation48_spill] sm:$0xff] %v4709_v63  ;;  %8812 = vst [vmem:[#allocation49_spill] sm:$0xff] %v4712_v9  ;;  %v4860_v63 = vmul.f32 %v4532_v33, %v4511_v22  ;;  %v8846_v33 = vunpack.c.l.bf16 %v4735_v24 }
  0x2d   : > { %8813 = vst [vmem:[#allocation50_spill] sm:$0xff] %v4715_v61  ;;  %8815 = vst [vmem:[#allocation51_spill] sm:$0xff] %v4720_v28  ;;  %v8822_v28 = vunpack.c.l.bf16 %v4571_v51 }
  0x2e   : > { %8816 = vst [vmem:[#allocation52_spill] sm:$0xff] %v4724_v23  ;;  %8817 = vst [vmem:[#allocation53_spill] sm:$0xff] %v4728_v1  ;;  %v4750_v1 = vmul.f32 %v4509_v21, %v4602_v2 }
  0x2f   : > { %8818 = vst [vmem:[#allocation54_spill] sm:$0xff] %v4732_v3  ;;  %8819 = vst [vmem:[#allocation55_spill] sm:$0xff] %v4735_v24  ;;  %v4746_v23 = vmul.f32 %v4509_v21, %v8822_v28  ;;  %v4754_v3 = vmul.f32 %v4577_v54, %v4509_v21  ;;  %v8830_v28 = vunpack.c.l.bf16 %v4582_v56 }
  0x30   : > { %8820 = vst [vmem:[#allocation56_spill] sm:$0xff] %v4738_v59  ;;  %8821 = vst [vmem:[#allocation57_spill] sm:$0xff] %v4741_v29 }
  0x31   : > { %8823 = vst [vmem:[#allocation58_spill] sm:$0xff] %v4746_v23  ;;  %8824 = vst [vmem:[#allocation59_spill] sm:$0xff] %v4750_v1  ;;  %v4772_v23 = vmul.f32 %v4509_v21, %v8830_v28  ;;  %v4776_v1 = vmul.f32 %v4509_v21, %v4606_v4  ;;  %v4820_v28 = vmul.f32 %v4511_v22, %v8839_v13 }
  0x32   : > { %8825 = vst [vmem:[#allocation60_spill] sm:$0xff] %v4754_v3  ;;  %8826 = vst [vmem:[#allocation61_spill] sm:$0xff] %v4758_v57  ;;  %v4779_v3 = vld [vmem:[%s4488_s22 + $0x8c] sm:$0x1]  ;;  %v4785_v57 = vld [vmem:[%s4488_s22 + $0xa4] sm:$0x1]  ;;  %v4824_v21 = vmul.f32 %v4511_v22, %v4547_v41  ;;  %v4842_v13 = vmul.f32 %v4511_v22, %v8841_v19  ;;  %v4856_v41 = vmul.f32 %v4511_v22, %v8843_v30 }
  0x33   : > { %8827 = vst [vmem:[#allocation62_spill] sm:$0xff] %v4761_v6  ;;  %8828 = vst [vmem:[#allocation63_spill] sm:$0xff] %v4764_v10  ;;  %v4864_v19 = vmul.f32 %v4534_v34, %v4511_v22  ;;  %v4878_v30 = vmul.f32 %v4511_v22, %v4586_v58  ;;  %v4883_v34 = vmul.f32 %v4511_v22, %v8846_v33  ;;  %v8848_v58 = vunpack.c.l.bf16 %v4550_v42 }
  0x34   : > { %8829 = vst [vmem:[#allocation64_spill] sm:$0xff] %v4767_v39  ;;  %8831 = vst [vmem:[#allocation65_spill] sm:$0xff] %v4772_v23  ;;  %v8842_v23 = vunpack.c.l.bf16 %v4530_v32  ;;  %v4905_v33 = vmul.f32 %v4511_v22, %v4590_v60  ;;  %v8850_v42 = vunpack.c.l.bf16 %v4761_v6  ;;  %v8851_v60 = vunpack.c.l.bf16 %v4557_v45 }
  0x35   : > { %8832 = vst [vmem:[#allocation66_spill] sm:$0xff] %v4776_v1  ;;  %8833 = vst [vmem:[#allocation67_spill] sm:$0xff] %v4779_v3  ;;  %v8840_v1 = vunpack.c.l.bf16 %v4689_v40  ;;  %v4901_v24 = vmul.f32 %v4511_v22, %v8848_v58  ;;  %v4941_v6 = vmul.f32 %v4559_v46, %v4511_v22  ;;  %v8853_v45 = vunpack.c.l.bf16 %v4767_v39 }
  0x36   : > { %8834 = vst [vmem:[#allocation68_spill] sm:$0xff] %v4785_v57  ;;  %8835 = vst [vmem:[#allocation69_spill] sm:$0xff] %v4790_v20  ;;  %v4847_v40 = vmul.f32 %v4511_v22, %v8842_v23  ;;  %v8844_v23 = vunpack.c.l.bf16 %v4715_v61  ;;  %v4887_v61 = vmul.f32 %v4540_v37, %v4511_v22  ;;  %v8849_v37 = vunpack.c.l.bf16 %v4741_v29 }
  0x37   : > { %8836 = vst [vmem:[#allocation70_spill] sm:$0xff] %v4793_v18  ;;  %v4829_v16 = vmul.f32 %v4511_v22, %v8840_v1  ;;  %v4851_v1 = vmul.f32 %v4511_v22, %v4575_v53  ;;  %v8845_v53 = vunpack.c.l.bf16 %v4538_v36  ;;  %v8847_v36 = vunpack.c.l.bf16 %v4738_v59 }
  0x38   : > { %v4869_v32 = vmul.f32 %v4511_v22, %v8844_v23  ;;  %v4891_v23 = vmul.f32 %v4542_v38, %v4511_v22  ;;  %v4910_v31 = vmul.f32 %v4511_v22, %v8849_v37  ;;  %v4914_v59 = vmul.f32 %v4552_v43, %v4511_v22 }
  0x39   : > { %v4874_v9 = vmul.f32 %v4511_v22, %v8845_v53  ;;  %v4896_v53 = vmul.f32 %v4511_v22, %v8847_v36  ;;  %v4918_v36 = vmul.f32 %v4554_v44, %v4511_v22  ;;  %v4923_v58 = vmul.f32 %v4511_v22, %v8850_v42 }
  0x3a   : > { %v4928_v29 = vmul.f32 %v4511_v22, %v8851_v60  ;;  %v4932_v37 = vmul.f32 %v4511_v22, %v4594_v62  ;;  %v8852_v43 = vunpack.c.l.bf16 %v4764_v10  ;;  %v4945_v42 = vmul.f32 %v4561_v47, %v4511_v22 }
  0x3b   : > { %v4950_v60 = vmul.f32 %v4511_v22, %v8853_v45  ;;  %v8854_v62 = vunpack.c.l.bf16 %v4564_v48  ;;  %v8855_v46 = vunpack.c.l.bf16 %v4779_v3  ;;  %v4968_v39 = vmul.f32 %v4566_v49, %v4511_v22 }
  0x3c   : > { %v4937_v38 = vmul.f32 %v4511_v22, %v8852_v43  ;;  %v4959_v43 = vmul.f32 %v4511_v22, %v4598_v0  ;;  %v4972_v45 = vmul.f32 %v4568_v50, %v4511_v22  ;;  %v8856_v48 = vunpack.c.l.bf16 %v4782_v35 }
  0x3d   : > { %v4955_v10 = vmul.f32 %v4511_v22, %v8854_v62  ;;  %v4964_v44 = vmul.f32 %v4511_v22, %v8855_v46  ;;  %v601_v0 = vrot.slane %v504_v15, 1  ;;  %v602_v47 = vrot.slane %v505_v27, 1 }
  0x3e   : > { %v4977_v62 = vmul.f32 %v4511_v22, %v8856_v48  ;;  %v8857_v3 = vunpack.c.l.bf16 %v4571_v51  ;;  %v4986_v49 = vmul.f32 %v4511_v22, %v4602_v2  ;;  %v8858_v50 = vunpack.c.l.bf16 %v4785_v57 }
  0x3f   : > { %v4995_v48 = vmul.f32 %v4577_v54, %v4511_v22  ;;  %v8859_v51 = vunpack.c.l.bf16 %v4790_v20  ;;  %v8860_v15 = vunpack.c.l.bf16 %v4582_v56  ;;  %v8861_v54 = vunpack.c.l.bf16 %v4793_v18 }
  0x40   : > { %v4982_v46 = vmul.f32 %v4511_v22, %v8857_v3  ;;  %v4991_v25 = vmul.f32 %v4511_v22, %v8858_v50  ;;  %v5013_v50 = vmul.f32 %v4511_v22, %v4606_v4  ;;  %v606_v55 = vrot.slane %v4820_v28, 1 }
  0x41   : > { %v5004_v3 = vmul.f32 %v4511_v22, %v8859_v51  ;;  %v5009_v27 = vmul.f32 %v4511_v22, %v8860_v15  ;;  %v5018_v57 = vmul.f32 %v4511_v22, %v8861_v54  ;;  %v607_v20 = vrot.slane %v4824_v21, 1 }
  0x42   : > { %v609_v51 = vrot.slane %v4829_v16, 1  ;;  %v5024_v56 = vsel %vm600_vm1, %v601_v0, %v602_v47  ;;  %v5027_v15 = vsel %vm600_vm1, %v602_v47, %v604_v52  ;;  %v611_v4 = vrot.slane %v4833_v17, 1 }
  0x43   : > { %v612_v2 = vrot.slane %v4837_v26, 1  ;;  %v614_v18 = vrot.slane %v4842_v13, 1  ;;  %v616_v22 = vrot.slane %v4847_v40, 1  ;;  %v617_v54 = vrot.slane %v4851_v1, 1 }
  0x44   : > { %v619_v28 = vrot.slane %v4856_v41, 1  ;;  %v621_v21 = vrot.slane %v4860_v63, 1  ;;  %v622_v0 = vrot.slane %v4864_v19, 1  ;;  %v624_v16 = vrot.slane %v4869_v32, 1 }
  0x45   : > { %v626_v47 = vrot.slane %v4874_v9, 1  ;;  %v627_v52 = vrot.slane %v4878_v30, 1  ;;  %v629_v17 = vrot.slane %v4883_v34, 1  ;;  %v631_v26 = vrot.slane %v4887_v61, 1 }
  0x46   : > { %v632_v40 = vrot.slane %v4891_v23, 1  ;;  %v634_v13 = vrot.slane %v4896_v53, 1  ;;  %v636_v41 = vrot.slane %v4901_v24, 1  ;;  %v637_v63 = vrot.slane %v4905_v33, 1 }
  0x47   : > { %v639_v1 = vrot.slane %v4910_v31, 1  ;;  %v608_v19 = vsel %vm600_vm1, %v606_v55, %v607_v20  ;;  %v610_v9 = vsel %vm600_vm1, %v607_v20, %v609_v51  ;;  %v641_v32 = vrot.slane %v4914_v59, 1 }
  0x48   : > { %v642_v34 = vrot.slane %v4918_v36, 1  ;;  %v613_v61 = vsel %vm600_vm1, %v611_v4, %v612_v2  ;;  %v615_v30 = vsel %vm600_vm1, %v612_v2, %v614_v18  ;;  %v618_v23 = vsel %vm600_vm1, %v616_v22, %v617_v54 }
  0x49   : > { %v620_v24 = vsel %vm600_vm1, %v617_v54, %v619_v28  ;;  %v623_v53 = vsel %vm600_vm1, %v621_v21, %v622_v0  ;;  %v625_v31 = vsel %vm600_vm1, %v622_v0, %v624_v16  ;;  %v628_v55 = vsel %vm600_vm1, %v626_v47, %v627_v52 }
  0x4a   : > { %v630_v20 = vsel %vm600_vm1, %v627_v52, %v629_v17  ;;  %v633_v59 = vsel %vm600_vm1, %v631_v26, %v632_v40  ;;  %v635_v33 = vsel %vm600_vm1, %v632_v40, %v634_v13  ;;  %v638_v4 = vsel %vm600_vm1, %v636_v41, %v637_v63 }
  0x4b   : > { %v640_v2 = vsel %vm600_vm1, %v637_v63, %v639_v1  ;;  %v643_v18 = vsel %vm600_vm1, %v641_v32, %v642_v34  ;;  %v644_v36 = vrot.slane %v4923_v58, 1  ;;  %v646_v51 = vrot.slane %v4928_v29, 1 }
  0x4c   : > { %v647_v22 = vrot.slane %v4932_v37, 1  ;;  %v649_v54 = vrot.slane %v4937_v38, 1  ;;  %v651_v28 = vrot.slane %v4941_v6, 1  ;;  %v652_v21 = vrot.slane %v4945_v42, 1 }
  0x4d   : > { %v654_v0 = vrot.slane %v4950_v60, 1  ;;  %v656_v16 = vrot.slane %v4955_v10, 1  ;;  %v657_v47 = vrot.slane %v4959_v43, 1  ;;  %v659_v52 = vrot.slane %v4964_v44, 1 }
  0x4e   : > { %v661_v58 = vrot.slane %v4968_v39, 1  ;;  %v662_v29 = vrot.slane %v4972_v45, 1  ;;  %v664_v37 = vrot.slane %v4977_v62, 1  ;;  %v666_v38 = vrot.slane %v4982_v46, 1 }
  0x4f   : > { %v667_v6 = vrot.slane %v4986_v49, 1  ;;  %v669_v42 = vrot.slane %v4991_v25, 1  ;;  %v671_v60 = vrot.slane %v4995_v48, 1  ;;  %v672_v10 = vrot.slane %v4999_v14, 1 }
  0x50   : > { %v674_v43 = vrot.slane %v5004_v3, 1  ;;  %v645_v44 = vsel %vm600_vm1, %v642_v34, %v644_v36  ;;  %v676_v39 = vrot.slane %v5009_v27, 1  ;;  %v677_v45 = vrot.slane %v5013_v50, 1 }
  0x51   : > { %v679_v62 = vrot.slane %v5018_v57, 1  ;;  %v648_v46 = vsel %vm600_vm1, %v646_v51, %v647_v22  ;;  %v650_v49 = vsel %vm600_vm1, %v647_v22, %v649_v54  ;;  %v653_v25 = vsel %vm600_vm1, %v651_v28, %v652_v21  ;;  %v8862_v51 = vld [vmem:[#allocation29_spill] sm:$0xff]  ;;  %v8865_v54 = vld [vmem:[#allocation31_spill] sm:$0xff] }
  0x52   : > { %v655_v48 = vsel %vm600_vm1, %v652_v21, %v654_v0  ;;  %v658_v14 = vsel %vm600_vm1, %v656_v16, %v657_v47  ;;  %v660_v3 = vsel %vm600_vm1, %v657_v47, %v659_v52  ;;  %v663_v17 = vsel %vm600_vm1, %v661_v58, %v662_v29  ;;  %v8881_v16 = vld [vmem:[#allocation39_spill] sm:$0xff]  ;;  %v8883_v47 = vld [vmem:[#allocation40_spill] sm:$0xff]  ;;  %v8885_v52 = vld [vmem:[#allocation41_spill] sm:$0xff] }
  0x53   : > { %v665_v27 = vsel %vm600_vm1, %v662_v29, %v664_v37  ;;  %v668_v50 = vsel %vm600_vm1, %v666_v38, %v667_v6  ;;  %v670_v57 = vsel %vm600_vm1, %v667_v6, %v669_v42  ;;  %v673_v26 = vsel %vm600_vm1, %v671_v60, %v672_v10  ;;  %v746_v58 = vld [vmem:[%s4488_s22 + $0xc] sm:$0xe]  ;;  %v8887_v29 = vld [vmem:[#allocation44_spill] sm:$0xff]  ;;  %v8889_v37 = vld [vmem:[#allocation45_spill] sm:$0xff] }
  0x54   : > { %v675_v40 = vsel %vm600_vm1, %v672_v10, %v674_v43  ;;  %v678_v13 = vsel %vm600_vm1, %v676_v39, %v677_v45  ;;  %v680_v41 = vsel %vm600_vm1, %v677_v45, %v679_v62  ;;  %v5103_v63 = vadd.f32 %v5024_v56, %v4611_v5  ;;  %v8863_v5 = vld [vmem:[#allocation30_spill] sm:$0xff]  ;;  %v8893_v6 = vld [vmem:[#allocation47_spill] sm:$0xff]  ;;  %v747_v42 = vld [vmem:[%s4488_s22 + $0x18] sm:$0xe] }
  0x55   : > { %v5107_v1 = vadd.f32 %v5027_v15, %v4615_v7  ;;  %v5110_v32 = vadd.f32 %v608_v19, %v4620_v8  ;;  %v5113_v34 = vadd.f32 %v610_v9, %v4624_v11  ;;  %v5116_v36 = vadd.f32 %v613_v61, %v4628_v12  ;;  %v8867_v15 = vld [vmem:[#allocation32_spill] sm:$0xff]  ;;  %v8869_v19 = vld [vmem:[#allocation33_spill] sm:$0xff]  ;;  %v8871_v9 = vld [vmem:[#allocation34_spill] sm:$0xff] }
  0x56   : > { %v5119_v22 = vadd.f32 %v615_v30, %v8862_v51  ;;  %v5122_v56 = vadd.f32 %v618_v23, %v8863_v5  ;;  %v5125_v7 = vadd.f32 %v620_v24, %v8865_v54  ;;  %v5128_v8 = vadd.f32 %v623_v53, %v8867_v15  ;;  %v8873_v61 = vld [vmem:[#allocation35_spill] sm:$0xff]  ;;  %v8875_v23 = vld [vmem:[#allocation36_spill] sm:$0xff]  ;;  %v8877_v24 = vld [vmem:[#allocation37_spill] sm:$0xff] }
  0x57   : > { %v5131_v11 = vadd.f32 %v625_v31, %v8869_v19  ;;  %v5134_v12 = vadd.f32 %v628_v55, %v8871_v9  ;;  %v5137_v30 = vadd.f32 %v630_v20, %v8873_v61  ;;  %v5140_v28 = vadd.f32 %v633_v59, %v8875_v23  ;;  %v8879_v53 = vld [vmem:[#allocation38_spill] sm:$0xff]  ;;  %v749_v10 = vld [vmem:[%s4488_s22 + $0x30] sm:$0xe]  ;;  %v8895_v43 = vld [vmem:[#allocation51_spill] sm:$0xff] }
  0x58   : > { %8864 = vst [vmem:[#allocation29_spill] sm:$0xff] %v5122_v56  ;;  %8866 = vst [vmem:[#allocation30_spill] sm:$0xff] %v5125_v7  ;;  %v5143_v21 = vadd.f32 %v635_v33, %v8877_v24  ;;  %v5146_v0 = vadd.f32 %v638_v4, %v8879_v53  ;;  %v5149_v31 = vadd.f32 %v640_v2, %v8881_v16  ;;  %v745_v59 = vld [vmem:[%s4488_s22] sm:$0xe]  ;;  %v748_v60 = vld [vmem:[%s4488_s22 + $0x24] sm:$0xe] }
  0x59   : > { %8868 = vst [vmem:[#allocation31_spill] sm:$0xff] %v5128_v8  ;;  %8870 = vst [vmem:[#allocation32_spill] sm:$0xff] %v5131_v11  ;;  %v5152_v55 = vadd.f32 %v643_v18, %v8883_v47  ;;  %v5155_v20 = vadd.f32 %v645_v44, %v8885_v52  ;;  %v5160_v33 = vadd.f32 %v648_v46, %v8887_v29  ;;  %v8891_v38 = vld [vmem:[#allocation46_spill] sm:$0xff]  ;;  %v8897_v39 = vld [vmem:[#allocation52_spill] sm:$0xff] }
  0x5a   : > { %8872 = vst [vmem:[#allocation33_spill] sm:$0xff] %v5134_v12  ;;  %8874 = vst [vmem:[#allocation34_spill] sm:$0xff] %v5137_v30  ;;  %v5163_v4 = vadd.f32 %v650_v49, %v8889_v37  ;;  %v5166_v2 = vadd.f32 %v653_v25, %v8891_v38  ;;  %v5169_v18 = vadd.f32 %v655_v48, %v8893_v6  ;;  %v8899_v62 = vld [vmem:[#allocation53_spill] sm:$0xff]  ;;  %v8901_v49 = vld [vmem:[#allocation54_spill] sm:$0xff]  ;;  %v762_v38 = vunpack.c.l.bf16 %v746_v58 }
  0x5b   : > { %8876 = vst [vmem:[#allocation35_spill] sm:$0xff] %v5140_v28  ;;  %8878 = vst [vmem:[#allocation36_spill] sm:$0xff] %v5143_v21  ;;  %v5175_v44 = vadd.f32 %v658_v14, %v8895_v43  ;;  %v5178_v45 = vadd.f32 %v660_v3, %v8897_v39  ;;  %v5181_v46 = vadd.f32 %v663_v17, %v8899_v62  ;;  %v750_v48 = vld [vmem:[%s4488_s22 + $0x3c] sm:$0xe]  ;;  %v751_v51 = vld [vmem:[%s4488_s22 + $0x48] sm:$0xe]  ;;  %v764_v43 = vunpack.c.l.bf16 %v748_v60 }
  0x5c   : > { %8880 = vst [vmem:[#allocation37_spill] sm:$0xff] %v5146_v0  ;;  %8882 = vst [vmem:[#allocation38_spill] sm:$0xff] %v5149_v31  ;;  %v5184_v25 = vadd.f32 %v665_v27, %v8901_v49  ;;  %v752_v5 = vld [vmem:[%s4488_s22 + $0x54] sm:$0xe]  ;;  %v8903_v54 = vld [vmem:[#allocation58_spill] sm:$0xff]  ;;  %v765_v39 = vunpack.c.l.bf16 %v749_v10  ;;  %v766_v62 = vunpack.c.l.bf16 %v750_v48  ;;  %v767_v49 = vunpack.c.l.bf16 %v751_v51 }
  0x5d   : > { %8884 = vst [vmem:[#allocation39_spill] sm:$0xff] %v5152_v55  ;;  %8886 = vst [vmem:[#allocation40_spill] sm:$0xff] %v5155_v20  ;;  %v5190_v14 = vadd.f32 %v668_v50, %v8903_v54  ;;  %v8905_v15 = vld [vmem:[#allocation59_spill] sm:$0xff]  ;;  %v8907_v3 = vld [vmem:[#allocation60_spill] sm:$0xff] }
  0x5e   : > { %8888 = vst [vmem:[#allocation41_spill] sm:$0xff] %v5160_v33  ;;  %8890 = vst [vmem:[#allocation44_spill] sm:$0xff] %v5163_v4  ;;  %v5193_v19 = vadd.f32 %v670_v57, %v8905_v15  ;;  %v5196_v9 = vadd.f32 %v673_v26, %v8907_v3  ;;  %v8909_v17 = vld [vmem:[#allocation61_spill] sm:$0xff]  ;;  %v753_v23 = vld [vmem:[%s4488_s22 + $0x60] sm:$0xe]  ;;  %v761_v57 = vunpack.c.l.bf16 %v745_v59 }
  0x5f   : > { %8892 = vst [vmem:[#allocation45_spill] sm:$0xff] %v5166_v2  ;;  %8894 = vst [vmem:[#allocation46_spill] sm:$0xff] %v5169_v18  ;;  %v5199_v61 = vadd.f32 %v675_v40, %v8909_v17  ;;  %v754_v27 = vld [vmem:[%s4488_s22 + $0x6c] sm:$0xe]  ;;  %v755_v24 = vld [vmem:[%s4488_s22 + $0x78] sm:$0xe]  ;;  %v763_v40 = vunpack.c.l.bf16 %v747_v42  ;;  %v769_v54 = vunpack.c.l.bf16 %v753_v23 }
  0x60   : > { %8896 = vst [vmem:[#allocation47_spill] sm:$0xff] %v5175_v44  ;;  %8898 = vst [vmem:[#allocation51_spill] sm:$0xff] %v5178_v45  ;;  %v8911_v53 = vld [vmem:[#allocation65_spill] sm:$0xff]  ;;  %v8913_v47 = vld [vmem:[#allocation66_spill] sm:$0xff]  ;;  %v770_v15 = vunpack.c.l.bf16 %v754_v27 }
  0x61   : > { %8900 = vst [vmem:[#allocation52_spill] sm:$0xff] %v5181_v46  ;;  %8902 = vst [vmem:[#allocation53_spill] sm:$0xff] %v5184_v25  ;;  %v5205_v16 = vadd.f32 %v678_v13, %v8911_v53  ;;  %v5208_v52 = vadd.f32 %v680_v41, %v8913_v47  ;;  %v756_v50 = vld [vmem:[%s4488_s22 + $0x84] sm:$0xe]  ;;  %v757_v29 = vld [vmem:[%s4488_s22 + $0x90] sm:$0xe]  ;;  %v768_v13 = vunpack.c.l.bf16 %v752_v5  ;;  %v771_v41 = vunpack.c.l.bf16 %v755_v24 }
  0x62   : > { %8904 = vst [vmem:[#allocation54_spill] sm:$0xff] %v5190_v14  ;;  %8906 = vst [vmem:[#allocation58_spill] sm:$0xff] %v5193_v19  ;;  %v5213_v37 = vld [vmem:[%s4488_s22 + $0x9c] sm:$0xe]  ;;  %v5216_v26 = vld [vmem:[%s4488_s22 + $0xa8] sm:$0xe]  ;;  %v772_v3 = vunpack.c.l.bf16 %v756_v50  ;;  %v773_v17 = vunpack.c.l.bf16 %v757_v29 }
  0x63   : > { %8908 = vst [vmem:[#allocation59_spill] sm:$0xff] %v5196_v9  ;;  %8910 = vst [vmem:[#allocation60_spill] sm:$0xff] %v5199_v61  ;;  %v5219_v6 = vld [vmem:[%s4488_s22 + $0xb4] sm:$0xe]  ;;  %v774_v53 = vunpack.c.l.bf16 %v5213_v37  ;;  %v775_v59 = vunpack.c.l.bf16 %v5216_v26  ;;  %v8915_v47 = vld [vmem:[#allocation3_spill] sm:$0xff] }
  0x64   : > { %8912 = vst [vmem:[#allocation61_spill] sm:$0xff] %v5205_v16  ;;  %8914 = vst [vmem:[#allocation65_spill] sm:$0xff] %v5208_v52  ;;  %v776_v58 = vunpack.c.l.bf16 %v5219_v6  ;;  %v781_v52 = vmul.f32 %v8915_v47, %v761_v57  ;;  %v8916_v42 = vld [vmem:[#allocation4_spill] sm:$0xff]  ;;  %v8917_v10 = vld [vmem:[#allocation42_spill] sm:$0xff]  ;;  %v5231_v5 = vmul.f32 %v8915_v47, %v762_v38  ;;  %v5243_v37 = vmul.f32 %v8915_v47, %v763_v40 }
  0x65   : > { %v782_v60 = vmul.f32 %v8916_v42, %v8915_v47  ;;  %v8918_v48 = vunpack.c.l.bf16 %v8917_v10  ;;  %v8919_v23 = vld [vmem:[#allocation13_spill] sm:$0xff]  ;;  %v8920_v24 = vld [vmem:[#allocation43_spill] sm:$0xff]  ;;  %v8922_v57 = vld [vmem:[#allocation8_spill] sm:$0xff]  ;;  %v5255_v10 = vmul.f32 %v8915_v47, %v764_v43 }
  0x66   : > { %v5235_v27 = vmul.f32 %v8915_v47, %v8919_v23  ;;  %v8921_v50 = vunpack.c.l.bf16 %v8920_v24  ;;  %v5247_v26 = vmul.f32 %v8922_v57, %v8915_v47  ;;  %v8923_v6 = vld [vmem:[#allocation48_spill] sm:$0xff]  ;;  %v8926_v24 = vld [vmem:[#allocation49_spill] sm:$0xff]  ;;  %v5267_v57 = vmul.f32 %v8915_v47, %v765_v39  ;;  %v8932_v9 = vld [vmem:[#allocation55_spill] sm:$0xff] }
  0x67   : > { %v783_v51 = vmul.f32 %v8915_v47, %v8918_v48  ;;  %v8924_v42 = vunpack.c.l.bf16 %v8923_v6  ;;  %v8925_v48 = vld [vmem:[#allocation20_spill] sm:$0xff]  ;;  %v8928_v6 = vld [vmem:[#allocation10_spill] sm:$0xff]  ;;  %v8933_v39 = vunpack.c.l.bf16 %v8932_v9  ;;  %v8943_v2 = vld [vmem:[#allocation25_spill] sm:$0xff]  ;;  %v878_v21 = vrot.slane %v781_v52, 2 }
  0x68   : > { %v5240_v29 = vmul.f32 %v8915_v47, %v8921_v50  ;;  %v5259_v23 = vmul.f32 %v8915_v47, %v8925_v48  ;;  %v8927_v50 = vunpack.c.l.bf16 %v8926_v24  ;;  %v5271_v16 = vmul.f32 %v8928_v6, %v8915_v47  ;;  %v8931_v24 = vld [vmem:[#allocation23_spill] sm:$0xff]  ;;  %v8937_v46 = vld [vmem:[#allocation24_spill] sm:$0xff]  ;;  %v8949_v55 = vld [vmem:[#allocation26_spill] sm:$0xff] }
  0x69   : > { %v5252_v38 = vmul.f32 %v8915_v47, %v8924_v42  ;;  %v8929_v42 = vld [vmem:[#allocation50_spill] sm:$0xff]  ;;  %v5279_v48 = vmul.f32 %v8915_v47, %v766_v62  ;;  %v5288_v19 = vmul.f32 %v8915_v47, %v8933_v39  ;;  %v5291_v6 = vmul.f32 %v8915_v47, %v767_v49  ;;  %v8938_v39 = vld [vmem:[#allocation57_spill] sm:$0xff]  ;;  %v8960_v11 = vld [vmem:[#allocation28_spill] sm:$0xff] }
  0x6a   : > { %v5264_v40 = vmul.f32 %v8915_v47, %v8927_v50  ;;  %v8930_v43 = vunpack.c.l.bf16 %v8929_v42  ;;  %v5283_v50 = vmul.f32 %v8915_v47, %v8931_v24  ;;  %v8934_v42 = vld [vmem:[#allocation12_spill] sm:$0xff]  ;;  %v5303_v24 = vmul.f32 %v8915_v47, %v768_v13 }
  0x6b   : > { %v5295_v14 = vmul.f32 %v8934_v42, %v8915_v47  ;;  %v5307_v9 = vmul.f32 %v8915_v47, %v8937_v46  ;;  %v8939_v45 = vunpack.c.l.bf16 %v8938_v39  ;;  %v5315_v42 = vmul.f32 %v8915_v47, %v769_v54 }
  0x6c   : > { %v5276_v61 = vmul.f32 %v8915_v47, %v8930_v43  ;;  %v8935_v43 = vld [vmem:[#allocation56_spill] sm:$0xff]  ;;  %v5327_v46 = vmul.f32 %v8915_v47, %v770_v15  ;;  %v5331_v39 = vmul.f32 %v8915_v47, %v8943_v2  ;;  %v5351_v2 = vmul.f32 %v8915_v47, %v772_v3 }
  0x6d   : > { %v8936_v25 = vunpack.c.l.bf16 %v8935_v43  ;;  %v5312_v49 = vmul.f32 %v8915_v47, %v8939_v45  ;;  %v8940_v43 = vld [vmem:[#allocation15_spill] sm:$0xff]  ;;  %v881_v28 = vrot.slane %v783_v51, 2  ;;  %v884_v7 = vrot.slane %v5235_v27, 2 }
  0x6e   : > { %v5319_v44 = vmul.f32 %v8940_v43, %v8915_v47  ;;  %v8944_v45 = vld [vmem:[#allocation63_spill] sm:$0xff]  ;;  %v5339_v43 = vmul.f32 %v8915_v47, %v771_v41  ;;  %v889_v56 = vrot.slane %v5247_v26, 2  ;;  %v898_v27 = vrot.slane %v5267_v57, 2 }
  0x6f   : > { %v5300_v62 = vmul.f32 %v8915_v47, %v8936_v25  ;;  %v8941_v25 = vld [vmem:[#allocation62_spill] sm:$0xff]  ;;  %v8945_v4 = vunpack.c.l.bf16 %v8944_v45  ;;  %v5355_v45 = vmul.f32 %v8915_v47, %v8949_v55  ;;  %v879_v55 = vrot.slane %v782_v60, 2  ;;  %v8958_v60 = vld [vmem:[#allocation69_spill] sm:$0xff] }
  0x70   : > { %v8942_v18 = vunpack.c.l.bf16 %v8941_v25  ;;  %v8946_v25 = vld [vmem:[#allocation17_spill] sm:$0xff]  ;;  %v8959_v51 = vunpack.c.l.bf16 %v8958_v60  ;;  %v886_v60 = vrot.slane %v5240_v29, 2  ;;  %v901_v29 = vrot.slane %v5276_v61, 2 }
  0x71   : > { %v5336_v54 = vmul.f32 %v8915_v47, %v8945_v4  ;;  %v5343_v33 = vmul.f32 %v8946_v25, %v8915_v47  ;;  %v8950_v4 = vld [vmem:[#allocation67_spill] sm:$0xff]  ;;  %v5363_v25 = vmul.f32 %v8915_v47, %v773_v17  ;;  %v8955_v17 = vld [vmem:[#allocation68_spill] sm:$0xff]  ;;  %v906_v26 = vrot.slane %v5288_v19, 2 }
  0x72   : > { %v5324_v13 = vmul.f32 %v8915_v47, %v8942_v18  ;;  %v8947_v18 = vld [vmem:[#allocation64_spill] sm:$0xff]  ;;  %v8951_v31 = vunpack.c.l.bf16 %v8950_v4  ;;  %v5375_v4 = vmul.f32 %v8915_v47, %v774_v53  ;;  %v8956_v12 = vunpack.c.l.bf16 %v8955_v17 }
  0x73   : > { %v8948_v20 = vunpack.c.l.bf16 %v8947_v18  ;;  %v8952_v18 = vld [vmem:[#allocation19_spill] sm:$0xff]  ;;  %v5396_v53 = vmul.f32 %v8915_v47, %v8959_v51  ;;  %v5403_v17 = vmul.f32 %v8915_v47, %v8960_v11  ;;  %v5414_v51 = vsel %vm877_vm2, %v878_v21, %v879_v55 }
  0x74   : > { %v5360_v41 = vmul.f32 %v8915_v47, %v8951_v31  ;;  %v5367_v0 = vmul.f32 %v8952_v18, %v8915_v47  ;;  %v8954_v31 = vld [vmem:[#allocation27_spill] sm:$0xff]  ;;  %v5384_v18 = vmul.f32 %v8915_v47, %v8956_v12  ;;  %v8961_v12 = vld [vmem:[#allocation70_spill] sm:$0xff]  ;;  %v888_v11 = vrot.slane %v5243_v37, 2 }
  0x75   : > { %v5348_v15 = vmul.f32 %v8915_v47, %v8948_v20  ;;  %v8953_v20 = vunpack.c.l.bf16 %v4782_v35  ;;  %v5379_v30 = vmul.f32 %v8915_v47, %v8954_v31  ;;  %v5387_v35 = vmul.f32 %v8915_v47, %v775_v59 }
  0x76   : > { %v5399_v31 = vmul.f32 %v8915_v47, %v776_v58  ;;  %v8962_v8 = vunpack.c.l.bf16 %v8961_v12  ;;  %v5417_v58 = vsel %vm877_vm2, %v879_v55, %v881_v28  ;;  %v891_v12 = vrot.slane %v5252_v38, 2 }
  0x77   : > { %v5372_v3 = vmul.f32 %v8915_v47, %v8953_v20  ;;  %v8957_v20 = vld [vmem:[#allocation22_spill] sm:$0xff]  ;;  %v899_v21 = vrot.slane %v5271_v16, 2  ;;  %v903_v28 = vrot.slane %v5279_v48, 2  ;;  %v904_v37 = vrot.slane %v5283_v50, 2 }
  0x78   : > { %v5391_v52 = vmul.f32 %v8957_v20, %v8915_v47  ;;  %v5408_v59 = vmul.f32 %v8915_v47, %v8962_v8  ;;  %v883_v20 = vrot.slane %v5231_v5, 2  ;;  %v893_v8 = vrot.slane %v5255_v10, 2 }
  0x79   : > { %v894_v47 = vrot.slane %v5259_v23, 2  ;;  %v896_v5 = vrot.slane %v5264_v40, 2  ;;  %v908_v38 = vrot.slane %v5291_v6, 2  ;;  %v909_v10 = vrot.slane %v5295_v14, 2 }
  0x7a   : > { %v911_v23 = vrot.slane %v5300_v62, 2  ;;  %v913_v40 = vrot.slane %v5303_v24, 2  ;;  %v914_v57 = vrot.slane %v5307_v9, 2  ;;  %v916_v16 = vrot.slane %v5312_v49, 2 }
  0x7b   : > { %v885_v61 = vsel %vm877_vm2, %v883_v20, %v884_v7  ;;  %v887_v48 = vsel %vm877_vm2, %v884_v7, %v886_v60  ;;  %v918_v50 = vrot.slane %v5315_v42, 2  ;;  %v919_v19 = vrot.slane %v5319_v44, 2 }
  0x7c   : > { %v890_v6 = vsel %vm877_vm2, %v888_v11, %v889_v56  ;;  %v892_v14 = vsel %vm877_vm2, %v889_v56, %v891_v12  ;;  %v895_v62 = vsel %vm877_vm2, %v893_v8, %v894_v47  ;;  %v897_v24 = vsel %vm877_vm2, %v894_v47, %v896_v5 }
  0x7d   : > { %v900_v9 = vsel %vm877_vm2, %v898_v27, %v899_v21  ;;  %v902_v49 = vsel %vm877_vm2, %v899_v21, %v901_v29  ;;  %v905_v55 = vsel %vm877_vm2, %v903_v28, %v904_v37  ;;  %v907_v7 = vsel %vm877_vm2, %v904_v37, %v906_v26 }
  0x7e   : > { %v910_v42 = vsel %vm877_vm2, %v908_v38, %v909_v10  ;;  %v912_v44 = vsel %vm877_vm2, %v909_v10, %v911_v23  ;;  %v915_v20 = vsel %vm877_vm2, %v913_v40, %v914_v57  ;;  %v917_v56 = vsel %vm877_vm2, %v914_v57, %v916_v16 }
  0x7f   : > { %v920_v60 = vsel %vm877_vm2, %v918_v50, %v919_v19  ;;  %v921_v11 = vrot.slane %v5324_v13, 2  ;;  %v923_v12 = vrot.slane %v5327_v46, 2  ;;  %v924_v8 = vrot.slane %v5331_v39, 2 }
  0x80   : > { %v926_v47 = vrot.slane %v5336_v54, 2  ;;  %v928_v5 = vrot.slane %v5339_v43, 2  ;;  %v929_v27 = vrot.slane %v5343_v33, 2  ;;  %v931_v21 = vrot.slane %v5348_v15, 2 }
  0x81   : > { %v933_v29 = vrot.slane %v5351_v2, 2  ;;  %v934_v28 = vrot.slane %v5355_v45, 2  ;;  %v936_v37 = vrot.slane %v5360_v41, 2  ;;  %v938_v13 = vrot.slane %v5363_v25, 2 }
  0x82   : > { %v939_v46 = vrot.slane %v5367_v0, 2  ;;  %v941_v39 = vrot.slane %v5372_v3, 2  ;;  %v943_v54 = vrot.slane %v5375_v4, 2  ;;  %v944_v43 = vrot.slane %v5379_v30, 2 }
  0x83   : > { %v946_v33 = vrot.slane %v5384_v18, 2  ;;  %v948_v15 = vrot.slane %v5387_v35, 2  ;;  %v949_v2 = vrot.slane %v5391_v52, 2  ;;  %v951_v45 = vrot.slane %v5396_v53, 2 }
  0x84   : > { %v922_v41 = vsel %vm877_vm2, %v919_v19, %v921_v11  ;;  %v953_v25 = vrot.slane %v5399_v31, 2  ;;  %v954_v0 = vrot.slane %v5403_v17, 2  ;;  %v956_v3 = vrot.slane %v5408_v59, 2 }
  0x85   : > { %v925_v4 = vsel %vm877_vm2, %v923_v12, %v924_v8  ;;  %v927_v30 = vsel %vm877_vm2, %v924_v8, %v926_v47  ;;  %v930_v18 = vsel %vm877_vm2, %v928_v5, %v929_v27  ;;  %v932_v35 = vsel %vm877_vm2, %v929_v27, %v931_v21  ;;  %v8963_v8 = vld [vmem:[#allocation29_spill] sm:$0xff]  ;;  %v8972_v27 = vld [vmem:[#allocation38_spill] sm:$0xff]  ;;  %v8973_v21 = vld [vmem:[#allocation39_spill] sm:$0xff] }
  0x86   : > { %v935_v52 = vsel %vm877_vm2, %v933_v29, %v934_v28  ;;  %v937_v53 = vsel %vm877_vm2, %v934_v28, %v936_v37  ;;  %v940_v26 = vsel %vm877_vm2, %v938_v13, %v939_v46  ;;  %v942_v31 = vsel %vm877_vm2, %v939_v46, %v941_v39  ;;  %v8971_v5 = vld [vmem:[#allocation37_spill] sm:$0xff]  ;;  %v8974_v29 = vld [vmem:[#allocation40_spill] sm:$0xff]  ;;  %v8978_v46 = vld [vmem:[#allocation46_spill] sm:$0xff] }
  0x87   : > { %v945_v17 = vsel %vm877_vm2, %v943_v54, %v944_v43  ;;  %v947_v59 = vsel %vm877_vm2, %v944_v43, %v946_v33  ;;  %v950_v38 = vsel %vm877_vm2, %v948_v15, %v949_v2  ;;  %v952_v10 = vsel %vm877_vm2, %v949_v2, %v951_v45  ;;  %v8975_v28 = vld [vmem:[#allocation41_spill] sm:$0xff]  ;;  %v8976_v37 = vld [vmem:[#allocation44_spill] sm:$0xff]  ;;  %v8979_v39 = vld [vmem:[#allocation47_spill] sm:$0xff] }
  0x88   : > { %v955_v23 = vsel %vm877_vm2, %v953_v25, %v954_v0  ;;  %v957_v40 = vsel %vm877_vm2, %v954_v0, %v956_v3  ;;  %v5493_v57 = vadd.f32 %v5414_v51, %v5103_v63  ;;  %v5497_v16 = vadd.f32 %v5417_v58, %v5107_v1  ;;  %v8964_v63 = vld [vmem:[#allocation30_spill] sm:$0xff]  ;;  %v8965_v1 = vld [vmem:[#allocation31_spill] sm:$0xff]  ;;  %v8977_v13 = vld [vmem:[#allocation45_spill] sm:$0xff] }
  0x89   : > { %v5500_v50 = vadd.f32 %v885_v61, %v5110_v32  ;;  %v5503_v19 = vadd.f32 %v887_v48, %v5113_v34  ;;  %v5506_v11 = vadd.f32 %v890_v6, %v5116_v36  ;;  %v5509_v12 = vadd.f32 %v892_v14, %v5119_v22  ;;  %v8966_v32 = vld [vmem:[#allocation32_spill] sm:$0xff]  ;;  %v8967_v34 = vld [vmem:[#allocation33_spill] sm:$0xff]  ;;  %v8968_v36 = vld [vmem:[#allocation34_spill] sm:$0xff] }
  0x8a   : > { %v5512_v47 = vadd.f32 %v895_v62, %v8963_v8  ;;  %v5515_v51 = vadd.f32 %v897_v24, %v8964_v63  ;;  %v5518_v58 = vadd.f32 %v900_v9, %v8965_v1  ;;  %v5521_v61 = vadd.f32 %v902_v49, %v8966_v32  ;;  %v8969_v22 = vld [vmem:[#allocation35_spill] sm:$0xff]  ;;  %v8970_v62 = vld [vmem:[#allocation36_spill] sm:$0xff]  ;;  %v8984_v45 = vld [vmem:[#allocation53_spill] sm:$0xff] }
  0x8b   : > { %v5524_v48 = vadd.f32 %v905_v55, %v8967_v34  ;;  %v5527_v6 = vadd.f32 %v907_v7, %v8968_v36  ;;  %v5530_v14 = vadd.f32 %v910_v42, %v8969_v22  ;;  %v5533_v24 = vadd.f32 %v912_v44, %v8970_v62  ;;  %v8980_v43 = vld [vmem:[#allocation51_spill] sm:$0xff]  ;;  %v8982_v15 = vld [vmem:[#allocation52_spill] sm:$0xff]  ;;  %v8988_v3 = vld [vmem:[#allocation54_spill] sm:$0xff] }
  0x8c   : > { %v5536_v9 = vadd.f32 %v915_v20, %v8971_v5  ;;  %v5539_v49 = vadd.f32 %v917_v56, %v8972_v27  ;;  %v5542_v55 = vadd.f32 %v920_v60, %v8973_v21  ;;  %v5545_v7 = vadd.f32 %v922_v41, %v8974_v29  ;;  %v4021_v60 = vld [vmem:[%s4488_s22 + $0xc0] sm:$0xff]   ;;  %v5573_v25 = vld [vmem:[%s4488_s22 + $0xc] sm:$0xff]   ;;  %v8998_v63 = vld [vmem:[#allocation61_spill] sm:$0xff] }
  0x8d   : > { %v5548_v42 = vadd.f32 %v925_v4, %v8975_v28  ;;  %v5551_v44 = vadd.f32 %v927_v30, %v8976_v37  ;;  %v5554_v20 = vadd.f32 %v930_v18, %v8977_v13  ;;  %v5557_v56 = vadd.f32 %v932_v35, %v8978_v46  ;;  %8986 = vst [vmem:[#allocation42_spill] sm:$0xff] %v5573_v25  ;;  %v5576_v0 = vld [vmem:[%s4488_s22 + $0x24] sm:$0xff]   ;;  %v5591_v8 = vld [vmem:[%s4488_s22 + $0x3c] sm:$0xff]   ;;  %v5616_v22 = vld [vmem:[%s4488_s22 + $0xb4] sm:$0xff]  }
  0x8e   : > { %v5561_v54 = vadd.f32 %v935_v52, %v8979_v39  ;;  %v5564_v33 = vadd.f32 %v937_v53, %v8980_v43  ;;  %v5567_v2 = vadd.f32 %v940_v26, %v8982_v15  ;;  %v5570_v41 = vadd.f32 %v942_v31, %v8984_v45  ;;  %8987 = vst [vmem:[#allocation13_spill] sm:$0xff] %v5576_v0  ;;  %v8990_v30 = vld [vmem:[#allocation58_spill] sm:$0xff]  ;;  %v8992_v35 = vld [vmem:[#allocation59_spill] sm:$0xff]  ;;  %v8994_v53 = vld [vmem:[#allocation60_spill] sm:$0xff] }
  0x8f   : > { %v5579_v4 = vadd.f32 %v945_v17, %v8988_v3  ;;  %v5582_v18 = vadd.f32 %v947_v59, %v8990_v30  ;;  %v5585_v52 = vadd.f32 %v950_v38, %v8992_v35  ;;  %v5588_v26 = vadd.f32 %v952_v10, %v8994_v53  ;;  %8996 = vst [vmem:[#allocation50_spill] sm:$0xff] %v5591_v8  ;;  %v5594_v31 = vld [vmem:[%s4488_s22 + $0x54] sm:$0xff]   ;;  %v5603_v17 = vld [vmem:[%s4488_s22 + $0x6c] sm:$0xff]   ;;  %v5606_v59 = vld [vmem:[%s4488_s22 + $0x84] sm:$0xff]  }
  0x90   : > { %8981 = vst [vmem:[#allocation66_spill] sm:$0xff] %v5564_v33  ;;  %8983 = vst [vmem:[#allocation3_spill] sm:$0xff] %v5567_v2  ;;  %v5597_v1 = vadd.f32 %v955_v23, %v8998_v63  ;;  %v9000_v32 = vld [vmem:[#allocation65_spill] sm:$0xff]  ;;  %v5608_v36 = vunpack.c.l.bf16 %v4021_v60  ;;  %v5610_v38 = vunpack.c.h.bf16 %v4021_v60  ;;  %v8626_v62 = vunpack.c.l.bf16 %v5573_v25  ;;  %v9017_v53 = vld [vmem:[#allocation7_spill] sm:$0xff] }
  0x91   : > { %8985 = vst [vmem:[#allocation4_spill] sm:$0xff] %v5570_v41  ;;  %8989 = vst [vmem:[#allocation43_spill] sm:$0xff] %v5579_v4  ;;  %v5600_v34 = vadd.f32 %v957_v40, %v9000_v32  ;;  %v5613_v10 = vld [vmem:[%s4488_s22 + $0x9c] sm:$0xff]   ;;  %v5620_v23 = vunpack.c.h.bf16 %v5573_v25  ;;  %v8631_v40 = vunpack.c.l.bf16 %v5576_v0  ;;  %v5624_v5 = vunpack.c.h.bf16 %v5576_v0  ;;  %v9018_v32 = vld [vmem:[#allocation8_spill] sm:$0xff] }
  0x92   : > { %8991 = vst [vmem:[#allocation48_spill] sm:$0xff] %v5582_v18  ;;  %8993 = vst [vmem:[#allocation20_spill] sm:$0xff] %v5585_v52  ;;  %v5628_v21 = vunpack.c.h.bf16 %v5591_v8  ;;  %v5632_v28 = vunpack.c.h.bf16 %v5594_v31  ;;  %v5636_v13 = vunpack.c.h.bf16 %v5603_v17  ;;  %v5640_v60 = vunpack.c.h.bf16 %v5606_v59  ;;  %v9016_v3 = vld [vmem:[#allocation5_spill] sm:$0xff]  ;;  %v9022_v0 = vld [vmem:[#allocation11_spill] sm:$0xff] }
  0x93   : > { %8995 = vst [vmem:[#allocation49_spill] sm:$0xff] %v5588_v26  ;;  %8997 = vst [vmem:[#allocation23_spill] sm:$0xff] %v5594_v31  ;;  %v5644_v43 = vunpack.c.h.bf16 %v5613_v10  ;;  %v5648_v45 = vunpack.c.h.bf16 %v5616_v22  ;;  %v1091_v30 = vmul.f32 %v9016_v3, %v8626_v62  ;;  %v1092_v35 = vmul.f32 %v9016_v3, %v5620_v23  ;;  %v9019_v37 = vld [vmem:[#allocation9_spill] sm:$0xff]  ;;  %v9020_v62 = vld [vmem:[#allocation10_spill] sm:$0xff] }
  0x94   : > { %8999 = vst [vmem:[#allocation55_spill] sm:$0xff] %v5597_v1  ;;  %9001 = vst [vmem:[#allocation56_spill] sm:$0xff] %v5600_v34  ;;  %v1093_v63 = vmul.f32 %v9017_v53, %v9016_v3  ;;  %v1094_v39 = vmul.f32 %v9018_v32, %v9016_v3  ;;  %v1095_v15 = vmul.f32 %v9016_v3, %v8631_v40  ;;  %v9023_v40 = vld [vmem:[#allocation12_spill] sm:$0xff] }
  0x95   : > { %9002 = vst [vmem:[#allocation24_spill] sm:$0xff] %v5603_v17  ;;  %9003 = vst [vmem:[#allocation57_spill] sm:$0xff] %v5606_v59  ;;  %v1096_v46 = vmul.f32 %v9016_v3, %v5624_v5  ;;  %v1097_v29 = vmul.f32 %v9019_v37, %v9016_v3  ;;  %v1098_v27 = vmul.f32 %v9020_v62, %v9016_v3 }
  0x96   : > { %9004 = vst [vmem:[#allocation62_spill] sm:$0xff] %v5608_v36  ;;  %9005 = vst [vmem:[#allocation25_spill] sm:$0xff] %v5610_v38  ;;  %v1100_v32 = vmul.f32 %v9016_v3, %v5628_v21  ;;  %v1101_v25 = vmul.f32 %v9022_v0, %v9016_v3  ;;  %v1102_v34 = vmul.f32 %v9023_v40, %v9016_v3 }
  0x97   : > { %9006 = vst [vmem:[#allocation63_spill] sm:$0xff] %v5613_v10  ;;  %9007 = vst [vmem:[#allocation64_spill] sm:$0xff] %v5616_v22  ;;  %v1104_v62 = vmul.f32 %v9016_v3, %v5632_v28  ;;  %v1108_v40 = vmul.f32 %v9016_v3, %v5636_v13 }
  0x98   : > { %9008 = vst [vmem:[#allocation26_spill] sm:$0xff] %v5620_v23  ;;  %9009 = vst [vmem:[#allocation67_spill] sm:$0xff] %v5624_v5  ;;  %v9021_v23 = vunpack.c.l.bf16 %v5591_v8  ;;  %v9024_v5 = vunpack.c.l.bf16 %v5594_v31  ;;  %v9025_v8 = vld [vmem:[#allocation14_spill] sm:$0xff]  ;;  %v9028_v31 = vld [vmem:[#allocation16_spill] sm:$0xff] }
  0x99   : > { %9010 = vst [vmem:[#allocation27_spill] sm:$0xff] %v5628_v21  ;;  %9011 = vst [vmem:[#allocation68_spill] sm:$0xff] %v5632_v28  ;;  %v1105_v1 = vmul.f32 %v9025_v8, %v9016_v3  ;;  %v9027_v21 = vunpack.c.l.bf16 %v5603_v17  ;;  %v1109_v52 = vmul.f32 %v9028_v31, %v9016_v3  ;;  %v9030_v28 = vunpack.c.l.bf16 %v5606_v59  ;;  %v9031_v17 = vld [vmem:[#allocation18_spill] sm:$0xff]  ;;  %v9034_v59 = vld [vmem:[#allocation21_spill] sm:$0xff] }
  0x9a   : > { %9012 = vst [vmem:[#allocation69_spill] sm:$0xff] %v5636_v13  ;;  %9013 = vst [vmem:[#allocation28_spill] sm:$0xff] %v5640_v60  ;;  %v1099_v53 = vmul.f32 %v9016_v3, %v9021_v23  ;;  %v1103_v37 = vmul.f32 %v9016_v3, %v9024_v5  ;;  %v9026_v23 = vld [vmem:[#allocation15_spill] sm:$0xff]  ;;  %v9029_v5 = vld [vmem:[#allocation17_spill] sm:$0xff]  ;;  %v1113_v4 = vmul.f32 %v9031_v17, %v9016_v3  ;;  %v9033_v13 = vunpack.c.l.bf16 %v5613_v10 }
  0x9b   : > { %9014 = vst [vmem:[#allocation70_spill] sm:$0xff] %v5644_v43  ;;  %9015 = vst [vmem:[#allocation29_spill] sm:$0xff] %v5648_v45  ;;  %v1106_v26 = vmul.f32 %v9026_v23, %v9016_v3  ;;  %v1107_v0 = vmul.f32 %v9016_v3, %v9027_v21  ;;  %v1110_v18 = vmul.f32 %v9029_v5, %v9016_v3  ;;  %v9032_v21 = vld [vmem:[#allocation19_spill] sm:$0xff] }
  0x9c   : > { %v1111_v8 = vmul.f32 %v9016_v3, %v9030_v28  ;;  %v1112_v23 = vmul.f32 %v9016_v3, %v5640_v60  ;;  %v1114_v41 = vmul.f32 %v9032_v21, %v9016_v3  ;;  %v1115_v31 = vmul.f32 %v9016_v3, %v9033_v13  ;;  %v9035_v28 = vld [vmem:[#allocation22_spill] sm:$0xff] }
  0x9d   : > { %v1116_v5 = vmul.f32 %v9016_v3, %v5644_v43  ;;  %v1117_v2 = vmul.f32 %v9034_v59, %v9016_v3  ;;  %v1118_v33 = vmul.f32 %v9035_v28, %v9016_v3  ;;  %v9036_v60 = vunpack.c.l.bf16 %v5616_v22 }
  0x9e   : > { %v1120_v21 = vmul.f32 %v9016_v3, %v5648_v45  ;;  %v1121_v10 = vmul.f32 %v5608_v36, %v9016_v3  ;;  %v1122_v13 = vmul.f32 %v5610_v38, %v9016_v3  ;;  %v5723_v43 = vadd.f32 %v1091_v30, %v5493_v57 }
  0x9f   : > { %v1119_v17 = vmul.f32 %v9016_v3, %v9036_v60  ;;  %v5726_v59 = vadd.f32 %v1092_v35, %v5497_v16  ;;  %v5729_v22 = vadd.f32 %v1093_v63, %v5500_v50  ;;  %v5732_v60 = vadd.f32 %v1094_v39, %v5503_v19  ;;  %v5852_v35 = vld [vmem:[%s4488_s22 + $0x98] sm:$0x1]  ;;  %v5858_v63 = vld [vmem:[%s4488_s22 + $0xb0] sm:$0x1] }
  0xa0   : > { %v5735_v45 = vadd.f32 %v1095_v15, %v5506_v11  ;;  %v5738_v36 = vadd.f32 %v1096_v46, %v5509_v12  ;;  %v5741_v57 = vadd.f32 %v1097_v29, %v5512_v47  ;;  %v5744_v16 = vadd.f32 %v1098_v27, %v5515_v51  ;;  %v5831_v27 = vld [vmem:[%s4488_s22 + $0x74] sm:$0x1]  ;;  %v5834_v29 = vld [vmem:[%s4488_s22 + $0x80] sm:$0x1]  ;;  %v9077_v15 = vld [vmem:[#allocation55_spill] sm:$0xff]  ;;  %9082 = vst [vmem:[#allocation72_spill] sm:$0xff] %v5852_v35 }
  0xa1   : > { %v5747_v50 = vadd.f32 %v1099_v53, %v5518_v58  ;;  %v5750_v19 = vadd.f32 %v1100_v32, %v5521_v61  ;;  %v5753_v11 = vadd.f32 %v1101_v25, %v5524_v48  ;;  %v5756_v12 = vadd.f32 %v1102_v34, %v5527_v6  ;;  %v5771_v48 = vld [vmem:[%s4488_s22 + $0x14] sm:$0x1]  ;;  %v5855_v53 = vld [vmem:[%s4488_s22 + $0xa4] sm:$0x1]  ;;  %9084 = vst [vmem:[#allocation74_spill] sm:$0xff] %v5858_v63 }
  0xa2   : > { %9037 = vst [vmem:[#allocation30_spill] sm:$0xff] %v5744_v16  ;;  %v5759_v47 = vadd.f32 %v1103_v37, %v5530_v14  ;;  %v5762_v51 = vadd.f32 %v1104_v62, %v5533_v24  ;;  %v5765_v58 = vadd.f32 %v1105_v1, %v5536_v9  ;;  %v5768_v61 = vadd.f32 %v1106_v26, %v5539_v49  ;;  %v5786_v9 = vld [vmem:[%s4488_s22 + $0x20] sm:$0x1]  ;;  %v5789_v49 = vld [vmem:[%s4488_s22 + $0x2c] sm:$0x1]  ;;  %v9068_v34 = vld [vmem:[#allocation48_spill] sm:$0xff] }
  0xa3   : > { %9038 = vst [vmem:[#allocation31_spill] sm:$0xff] %v5747_v50  ;;  %9039 = vst [vmem:[#allocation32_spill] sm:$0xff] %v5750_v19  ;;  %v5774_v6 = vadd.f32 %v1107_v0, %v5542_v55  ;;  %v5777_v14 = vadd.f32 %v1108_v40, %v5545_v7  ;;  %v5780_v25 = vadd.f32 %v1109_v52, %v5548_v42  ;;  %v5792_v26 = vld [vmem:[%s4488_s22 + $0x38] sm:$0x1]  ;;  %v9057_v0 = vld [vmem:[#allocation66_spill] sm:$0xff] }
  0xa4   : > { %9040 = vst [vmem:[#allocation33_spill] sm:$0xff] %v5753_v11  ;;  %9041 = vst [vmem:[#allocation34_spill] sm:$0xff] %v5756_v12  ;;  %v5783_v24 = vadd.f32 %v1110_v18, %v5551_v44  ;;  %v5795_v55 = vadd.f32 %v1111_v8, %v5554_v20  ;;  %v5798_v7 = vadd.f32 %v1112_v23, %v5557_v56  ;;  %v5807_v18 = vld [vmem:[%s4488_s22 + $0x44] sm:$0x1]  ;;  %v5810_v52 = vld [vmem:[%s4488_s22 + $0x50] sm:$0x1]  ;;  %v8655_v23 = vunpack.c.l.bf16 %v5771_v48 }
  0xa5   : > { %9042 = vst [vmem:[#allocation35_spill] sm:$0xff] %v5759_v47  ;;  %9043 = vst [vmem:[#allocation36_spill] sm:$0xff] %v5762_v51  ;;  %v5801_v42 = vadd.f32 %v1113_v4, %v5561_v54  ;;  %v5804_v44 = vadd.f32 %v1114_v41, %v9057_v0  ;;  %v5813_v1 = vld [vmem:[%s4488_s22 + $0x5c] sm:$0x1]  ;;  %v9062_v20 = vld [vmem:[#allocation3_spill] sm:$0xff]  ;;  %v5825_v62 = vadd.f32 %v1118_v33, %v9068_v34  ;;  %v9132_v11 = vunpack.c.l.bf16 %v5855_v53 }
  0xa6   : > { %9044 = vst [vmem:[#allocation37_spill] sm:$0xff] %v5765_v58  ;;  %9045 = vst [vmem:[#allocation38_spill] sm:$0xff] %v5768_v61  ;;  %v5816_v56 = vadd.f32 %v1115_v31, %v9062_v20  ;;  %v9064_v8 = vld [vmem:[#allocation4_spill] sm:$0xff]  ;;  %v9066_v4 = vld [vmem:[#allocation43_spill] sm:$0xff]  ;;  %v5843_v3 = vadd.f32 %v1121_v10, %v9077_v15 }
  0xa7   : > { %9046 = vst [vmem:[#allocation39_spill] sm:$0xff] %v5771_v48  ;;  %9047 = vst [vmem:[#allocation40_spill] sm:$0xff] %v5774_v6  ;;  %v5819_v54 = vadd.f32 %v1116_v5, %v9064_v8  ;;  %v5822_v41 = vadd.f32 %v1117_v2, %v9066_v4  ;;  %v5828_v40 = vld [vmem:[%s4488_s22 + $0x68] sm:$0x1]  ;;  %v9073_v37 = vld [vmem:[#allocation20_spill] sm:$0xff] }
  0xa8   : > { %9048 = vst [vmem:[#allocation41_spill] sm:$0xff] %v5777_v14  ;;  %9049 = vst [vmem:[#allocation44_spill] sm:$0xff] %v5780_v25  ;;  %v5837_v46 = vadd.f32 %v1119_v17, %v9073_v37  ;;  %v9075_v31 = vld [vmem:[#allocation49_spill] sm:$0xff]  ;;  %v9079_v2 = vld [vmem:[#allocation56_spill] sm:$0xff] }
  0xa9   : > { %9050 = vst [vmem:[#allocation45_spill] sm:$0xff] %v5783_v24  ;;  %9051 = vst [vmem:[#allocation46_spill] sm:$0xff] %v5786_v9  ;;  %v5840_v39 = vadd.f32 %v1120_v21, %v9075_v31  ;;  %v5846_v30 = vadd.f32 %v1122_v13, %v9079_v2  ;;  %v5849_v33 = vld [vmem:[%s4488_s22 + $0x8c] sm:$0x1]  ;;  %v5861_v32 = vld [vmem:[%s4488_s22 + $0xbc] sm:$0x1]  ;;  %v9093_v13 = vunpack.c.l.bf16 %v5786_v9 }
  0xaa   : > { %9052 = vst [vmem:[#allocation47_spill] sm:$0xff] %v5789_v49  ;;  %9053 = vst [vmem:[#allocation51_spill] sm:$0xff] %v5792_v26  ;;  %v5864_v17 = vld [vmem:[%s4488_s22 + $0xc8] sm:$0x1]  ;;  %v9087_v21 = vld [vmem:[#allocation42_spill] sm:$0xff] }
  0xab   : > { %9054 = vst [vmem:[#allocation52_spill] sm:$0xff] %v5795_v55  ;;  %9055 = vst [vmem:[#allocation53_spill] sm:$0xff] %v5798_v7  ;;  %v9088_v20 = vunpack.c.l.bf16 %v9087_v21  ;;  %v9089_v5 = vld [vmem:[#allocation6_spill] sm:$0xff]  ;;  %v9091_v31 = vld [vmem:[#allocation7_spill] sm:$0xff] }
  0xac   : > { %9056 = vst [vmem:[#allocation54_spill] sm:$0xff] %v5801_v42  ;;  %9058 = vst [vmem:[#allocation58_spill] sm:$0xff] %v5804_v44  ;;  %v9090_v10 = vld [vmem:[#allocation26_spill] sm:$0xff]  ;;  %v1193_v37 = vmul.f32 %v9089_v5, %v8655_v23  ;;  %v1194_v15 = vmul.f32 %v9091_v31, %v9089_v5  ;;  %v9092_v2 = vld [vmem:[#allocation8_spill] sm:$0xff]  ;;  %v1196_v0 = vmul.f32 %v9089_v5, %v9093_v13  ;;  %v9097_v23 = vunpack.c.l.bf16 %v5789_v49 }
  0xad   : > { %9059 = vst [vmem:[#allocation59_spill] sm:$0xff] %v5807_v18  ;;  %9060 = vst [vmem:[#allocation60_spill] sm:$0xff] %v5810_v52  ;;  %v1191_v8 = vmul.f32 %v9089_v5, %v9088_v20  ;;  %v1192_v4 = vmul.f32 %v9089_v5, %v9090_v10  ;;  %v1195_v34 = vmul.f32 %v9092_v2, %v9089_v5  ;;  %v9094_v21 = vld [vmem:[#allocation13_spill] sm:$0xff]  ;;  %v9096_v10 = vld [vmem:[#allocation67_spill] sm:$0xff] }
  0xae   : > { %9061 = vst [vmem:[#allocation61_spill] sm:$0xff] %v5813_v1  ;;  %9063 = vst [vmem:[#allocation65_spill] sm:$0xff] %v5816_v56  ;;  %v5904_v48 = vmul.f32 %v9089_v5, %v9096_v10  ;;  %v5909_v31 = vmul.f32 %v9089_v5, %v9097_v23  ;;  %v9098_v2 = vld [vmem:[#allocation9_spill] sm:$0xff]  ;;  %v9099_v13 = vld [vmem:[#allocation10_spill] sm:$0xff]  ;;  %v1292_v19 = vrot.slane %v1194_v15, 1 }
  0xaf   : > { %9065 = vst [vmem:[#allocation5_spill] sm:$0xff] %v5819_v54  ;;  %9067 = vst [vmem:[#allocation66_spill] sm:$0xff] %v5822_v41  ;;  %v5917_v9 = vmul.f32 %v9099_v13, %v9089_v5  ;;  %v9101_v10 = vld [vmem:[#allocation50_spill] sm:$0xff]  ;;  %v9103_v23 = vld [vmem:[#allocation27_spill] sm:$0xff]  ;;  %v1288_v12 = vrot.slane %v1192_v4, 1  ;;  %v1295_v4 = vrot.slane %v1196_v0, 1  ;;  %v6079_v0 = vmul.f32 %v5610_v38, %v9089_v5 }
  0xb0   : > { %9069 = vst [vmem:[#allocation3_spill] sm:$0xff] %v5825_v62  ;;  %9070 = vst [vmem:[#allocation4_spill] sm:$0xff] %v5828_v40  ;;  %v9105_v13 = vld [vmem:[#allocation11_spill] sm:$0xff]  ;;  %v9133_v50 = vld [vmem:[#allocation21_spill] sm:$0xff]  ;;  %v1300_v38 = vrot.slane %v5909_v31, 1 }
  0xb1   : > { %9071 = vst [vmem:[#allocation43_spill] sm:$0xff] %v5831_v27  ;;  %9072 = vst [vmem:[#allocation48_spill] sm:$0xff] %v5834_v29 }
  0xb2   : > { %9074 = vst [vmem:[#allocation20_spill] sm:$0xff] %v5837_v46  ;;  %9076 = vst [vmem:[#allocation49_spill] sm:$0xff] %v5840_v39  ;;  %v9102_v39 = vunpack.c.l.bf16 %v9101_v10  ;;  %v5931_v46 = vmul.f32 %v9089_v5, %v9103_v23  ;;  %v9108_v23 = vld [vmem:[#allocation23_spill] sm:$0xff] }
  0xb3   : > { %9078 = vst [vmem:[#allocation55_spill] sm:$0xff] %v5843_v3  ;;  %9080 = vst [vmem:[#allocation56_spill] sm:$0xff] %v5846_v30  ;;  %v9095_v30 = vunpack.c.l.bf16 %v9094_v21  ;;  %v5913_v3 = vmul.f32 %v9098_v2, %v9089_v5  ;;  %v9104_v2 = vunpack.c.l.bf16 %v5807_v18  ;;  %v9109_v54 = vunpack.c.l.bf16 %v9108_v23 }
  0xb4   : > { %9081 = vst [vmem:[#allocation71_spill] sm:$0xff] %v5849_v33  ;;  %9083 = vst [vmem:[#allocation73_spill] sm:$0xff] %v5855_v53  ;;  %v5927_v49 = vmul.f32 %v9089_v5, %v9102_v39  ;;  %v9107_v39 = vunpack.c.l.bf16 %v5810_v52  ;;  %v9135_v53 = vld [vmem:[#allocation64_spill] sm:$0xff] }
  0xb5   : > { %9085 = vst [vmem:[#allocation75_spill] sm:$0xff] %v5861_v32  ;;  %9086 = vst [vmem:[#allocation76_spill] sm:$0xff] %v5864_v17  ;;  %v5900_v20 = vmul.f32 %v9089_v5, %v9095_v30  ;;  %v9100_v30 = vunpack.c.l.bf16 %v5792_v26  ;;  %v5936_v62 = vmul.f32 %v9089_v5, %v9104_v2  ;;  %v5940_v26 = vmul.f32 %v9105_v13, %v9089_v5  ;;  %v9110_v2 = vld [vmem:[#allocation68_spill] sm:$0xff] }
  0xb6   : > { %v5949_v10 = vmul.f32 %v9089_v5, %v9107_v39  ;;  %v5954_v18 = vmul.f32 %v9089_v5, %v9109_v54  ;;  %v5958_v56 = vmul.f32 %v9089_v5, %v9110_v2  ;;  %v9111_v13 = vunpack.c.l.bf16 %v5813_v1  ;;  %v9113_v39 = vld [vmem:[#allocation15_spill] sm:$0xff]  ;;  %v9115_v2 = vld [vmem:[#allocation24_spill] sm:$0xff] }
  0xb7   : > { %v5922_v21 = vmul.f32 %v9089_v5, %v9100_v30  ;;  %v9106_v30 = vld [vmem:[#allocation12_spill] sm:$0xff]  ;;  %v5971_v42 = vmul.f32 %v9113_v39, %v9089_v5  ;;  %v9114_v54 = vunpack.c.l.bf16 %v5828_v40  ;;  %v9116_v7 = vunpack.c.l.bf16 %v9115_v2 }
  0xb8   : > { %v5944_v41 = vmul.f32 %v9106_v30, %v9089_v5  ;;  %v5963_v44 = vmul.f32 %v9089_v5, %v9111_v13  ;;  %v9112_v30 = vld [vmem:[#allocation14_spill] sm:$0xff]  ;;  %v9117_v13 = vld [vmem:[#allocation69_spill] sm:$0xff]  ;;  %v9119_v39 = vld [vmem:[#allocation16_spill] sm:$0xff]  ;;  %v1315_v31 = vrot.slane %v5949_v10, 1 }
  0xb9   : > { %v5967_v52 = vmul.f32 %v9112_v30, %v9089_v5  ;;  %v5976_v23 = vmul.f32 %v9089_v5, %v9114_v54  ;;  %v5981_v1 = vmul.f32 %v9089_v5, %v9116_v7  ;;  %v5985_v55 = vmul.f32 %v9089_v5, %v9117_v13  ;;  %v9120_v54 = vld [vmem:[#allocation17_spill] sm:$0xff] }
  0xba   : > { %v9118_v30 = vunpack.c.l.bf16 %v5831_v27  ;;  %v5994_v40 = vmul.f32 %v9119_v39, %v9089_v5  ;;  %v5998_v25 = vmul.f32 %v9120_v54, %v9089_v5  ;;  %v9121_v7 = vunpack.c.l.bf16 %v5834_v29  ;;  %v9122_v13 = vld [vmem:[#allocation57_spill] sm:$0xff]  ;;  %v9126_v54 = vld [vmem:[#allocation18_spill] sm:$0xff] }
  0xbb   : > { %v9123_v14 = vunpack.c.l.bf16 %v9122_v13  ;;  %v9125_v39 = vunpack.c.l.bf16 %v5849_v33  ;;  %v6021_v29 = vmul.f32 %v9126_v54, %v9089_v5  ;;  %v1287_v54 = vrot.slane %v1191_v8, 1 }
  0xbc   : > { %v5990_v24 = vmul.f32 %v9089_v5, %v9118_v30  ;;  %v6003_v2 = vmul.f32 %v9089_v5, %v9121_v7  ;;  %v9124_v30 = vld [vmem:[#allocation28_spill] sm:$0xff]  ;;  %v9127_v7 = vld [vmem:[#allocation19_spill] sm:$0xff] }
  0xbd   : > { %v6008_v27 = vmul.f32 %v9089_v5, %v9123_v14  ;;  %v6012_v6 = vmul.f32 %v9089_v5, %v9124_v30  ;;  %v6017_v61 = vmul.f32 %v9089_v5, %v9125_v39  ;;  %v6025_v58 = vmul.f32 %v9127_v7, %v9089_v5  ;;  %v9129_v30 = vld [vmem:[#allocation63_spill] sm:$0xff]  ;;  %v9131_v39 = vld [vmem:[#allocation70_spill] sm:$0xff] }
  0xbe   : > { %v9128_v14 = vunpack.c.l.bf16 %v5852_v35  ;;  %v9130_v51 = vunpack.c.l.bf16 %v9129_v30  ;;  %v6039_v47 = vmul.f32 %v9089_v5, %v9131_v39  ;;  %v6044_v7 = vmul.f32 %v9089_v5, %v9132_v11 }
  0xbf   : > { %v1290_v35 = vrot.slane %v1193_v37, 1  ;;  %v6048_v30 = vmul.f32 %v9133_v50, %v9089_v5  ;;  %v9134_v39 = vunpack.c.l.bf16 %v5858_v63  ;;  %v9136_v11 = vunpack.c.l.bf16 %v9135_v53  ;;  %v9139_v63 = vld [vmem:[#allocation62_spill] sm:$0xff] }
  0xc0   : > { %v6030_v13 = vmul.f32 %v9089_v5, %v9128_v14  ;;  %v6035_v33 = vmul.f32 %v9089_v5, %v9130_v51  ;;  %v1293_v14 = vrot.slane %v1195_v34, 1  ;;  %v6052_v51 = vmul.f32 %v9035_v28, %v9089_v5  ;;  %v9137_v34 = vld [vmem:[#allocation29_spill] sm:$0xff] }
  0xc1   : > { %v6057_v8 = vmul.f32 %v9089_v5, %v9134_v39  ;;  %v6062_v37 = vmul.f32 %v9089_v5, %v9136_v11  ;;  %v6066_v15 = vmul.f32 %v9089_v5, %v9137_v34  ;;  %v9138_v50 = vunpack.c.l.bf16 %v5861_v32 }
  0xc2   : > { %v6075_v16 = vmul.f32 %v9139_v63, %v9089_v5  ;;  %v9140_v53 = vunpack.c.l.bf16 %v5864_v17  ;;  %v6087_v11 = vsel %vm600_vm1, %v1287_v54, %v1288_v12  ;;  %v1297_v32 = vrot.slane %v5900_v20, 1 }
  0xc3   : > { %v6071_v28 = vmul.f32 %v9089_v5, %v9138_v50  ;;  %v6091_v50 = vsel %vm600_vm1, %v1288_v12, %v1290_v35  ;;  %v6094_v63 = vsel %vm600_vm1, %v1292_v19, %v1293_v14  ;;  %v1298_v34 = vrot.slane %v5904_v48, 1 }
  0xc4   : > { %v6084_v39 = vmul.f32 %v9089_v5, %v9140_v53  ;;  %v6099_v17 = vsel %vm600_vm1, %v1293_v14, %v1295_v4  ;;  %v1302_v5 = vrot.slane %v5913_v3, 1  ;;  %v1303_v54 = vrot.slane %v5917_v9, 1 }
  0xc5   : > { %v1305_v53 = vrot.slane %v5922_v21, 1  ;;  %v1307_v20 = vrot.slane %v5927_v49, 1  ;;  %v1308_v12 = vrot.slane %v5931_v46, 1  ;;  %v1310_v19 = vrot.slane %v5936_v62, 1 }
  0xc6   : > { %v1312_v35 = vrot.slane %v5940_v26, 1  ;;  %v1313_v48 = vrot.slane %v5944_v41, 1  ;;  %v1317_v14 = vrot.slane %v5954_v18, 1  ;;  %v1318_v3 = vrot.slane %v5958_v56, 1 }
  0xc7   : > { %v1320_v9 = vrot.slane %v5963_v44, 1  ;;  %v1322_v21 = vrot.slane %v5967_v52, 1  ;;  %v1323_v49 = vrot.slane %v5971_v42, 1  ;;  %v1325_v46 = vrot.slane %v5976_v23, 1 }
  0xc8   : > { %v1299_v62 = vsel %vm600_vm1, %v1297_v32, %v1298_v34  ;;  %v1327_v26 = vrot.slane %v5981_v1, 1  ;;  %v1328_v41 = vrot.slane %v5985_v55, 1  ;;  %v1330_v10 = vrot.slane %v5990_v24, 1 }
  0xc9   : > { %v1301_v18 = vsel %vm600_vm1, %v1298_v34, %v1300_v38  ;;  %v1304_v56 = vsel %vm600_vm1, %v1302_v5, %v1303_v54  ;;  %v1306_v44 = vsel %vm600_vm1, %v1303_v54, %v1305_v53  ;;  %v1309_v52 = vsel %vm600_vm1, %v1307_v20, %v1308_v12 }
  0xca   : > { %v1311_v42 = vsel %vm600_vm1, %v1308_v12, %v1310_v19  ;;  %v1314_v23 = vsel %vm600_vm1, %v1312_v35, %v1313_v48  ;;  %v1316_v32 = vsel %vm600_vm1, %v1313_v48, %v1315_v31  ;;  %v1319_v1 = vsel %vm600_vm1, %v1317_v14, %v1318_v3 }
  0xcb   : > { %v1321_v55 = vsel %vm600_vm1, %v1318_v3, %v1320_v9  ;;  %v1324_v24 = vsel %vm600_vm1, %v1322_v21, %v1323_v49  ;;  %v1326_v38 = vsel %vm600_vm1, %v1323_v49, %v1325_v46  ;;  %v1332_v4 = vrot.slane %v5994_v40, 1 }
  0xcc   : > { %v1329_v34 = vsel %vm600_vm1, %v1327_v26, %v1328_v41  ;;  %v1331_v5 = vsel %vm600_vm1, %v1328_v41, %v1330_v10  ;;  %v1333_v54 = vrot.slane %v5998_v25, 1  ;;  %v1335_v53 = vrot.slane %v6003_v2, 1 }
  0xcd   : > { %v1337_v20 = vrot.slane %v6008_v27, 1  ;;  %v1338_v12 = vrot.slane %v6012_v6, 1  ;;  %v1340_v19 = vrot.slane %v6017_v61, 1  ;;  %v1342_v35 = vrot.slane %v6021_v29, 1 }
  0xce   : > { %v1343_v48 = vrot.slane %v6025_v58, 1  ;;  %v1345_v40 = vrot.slane %v6030_v13, 1  ;;  %v1347_v31 = vrot.slane %v6035_v33, 1  ;;  %v1348_v14 = vrot.slane %v6039_v47, 1 }
  0xcf   : > { %v1350_v25 = vrot.slane %v6044_v7, 1  ;;  %v1352_v2 = vrot.slane %v6048_v30, 1  ;;  %v1353_v27 = vrot.slane %v6052_v51, 1  ;;  %v1355_v6 = vrot.slane %v6057_v8, 1 }
  0xd0   : > { %v1334_v61 = vsel %vm600_vm1, %v1332_v4, %v1333_v54  ;;  %v1357_v29 = vrot.slane %v6062_v37, 1  ;;  %v1358_v58 = vrot.slane %v6066_v15, 1  ;;  %v1360_v13 = vrot.slane %v6071_v28, 1 }
  0xd1   : > { %v1336_v33 = vsel %vm600_vm1, %v1333_v54, %v1335_v53  ;;  %v1362_v47 = vrot.slane %v6075_v16, 1  ;;  %v1363_v7 = vrot.slane %v6079_v0, 1  ;;  %v1365_v30 = vrot.slane %v6084_v39, 1  ;;  %v9150_v54 = vld [vmem:[#allocation34_spill] sm:$0xff]  ;;  %v9156_v53 = vld [vmem:[#allocation37_spill] sm:$0xff] }
  0xd2   : > { %v1339_v51 = vsel %vm600_vm1, %v1337_v20, %v1338_v12  ;;  %v1341_v8 = vsel %vm600_vm1, %v1338_v12, %v1340_v19  ;;  %v1344_v3 = vsel %vm600_vm1, %v1342_v35, %v1343_v48  ;;  %v1346_v37 = vsel %vm600_vm1, %v1343_v48, %v1345_v40  ;;  %v9164_v35 = vld [vmem:[#allocation44_spill] sm:$0xff]  ;;  %v9166_v48 = vld [vmem:[#allocation45_spill] sm:$0xff]  ;;  %v6233_v40 = vld [vmem:[%s4488_s22 + $0xc] sm:$0xe] }
  0xd3   : > { %v1349_v15 = vsel %vm600_vm1, %v1347_v31, %v1348_v14  ;;  %v1351_v28 = vsel %vm600_vm1, %v1348_v14, %v1350_v25  ;;  %v1354_v9 = vsel %vm600_vm1, %v1352_v2, %v1353_v27  ;;  %v1356_v16 = vsel %vm600_vm1, %v1353_v27, %v1355_v6  ;;  %v9172_v25 = vld [vmem:[#allocation54_spill] sm:$0xff] }
  0xd4   : > { %v1359_v0 = vsel %vm600_vm1, %v1357_v29, %v1358_v58  ;;  %v1361_v39 = vsel %vm600_vm1, %v1358_v58, %v1360_v13  ;;  %v6168_v21 = vadd.f32 %v6087_v11, %v5723_v43  ;;  %v6172_v49 = vadd.f32 %v6091_v50, %v5726_v59  ;;  %v9142_v11 = vld [vmem:[#allocation30_spill] sm:$0xff]  ;;  %v6257_v29 = vld [vmem:[%s4488_s22 + $0x3c] sm:$0xe]  ;;  %v6260_v58 = vld [vmem:[%s4488_s22 + $0x48] sm:$0xe] }
  0xd5   : > { %v1364_v46 = vsel %vm600_vm1, %v1362_v47, %v1363_v7  ;;  %v1366_v26 = vsel %vm600_vm1, %v1363_v7, %v1365_v30  ;;  %v6178_v41 = vadd.f32 %v6094_v63, %v5729_v22  ;;  %v6182_v10 = vadd.f32 %v6099_v17, %v5732_v60  ;;  %v9144_v22 = vld [vmem:[#allocation31_spill] sm:$0xff]  ;;  %v9146_v60 = vld [vmem:[#allocation32_spill] sm:$0xff]  ;;  %v9174_v27 = vld [vmem:[#allocation58_spill] sm:$0xff] }
  0xd6   : > { %v6185_v4 = vadd.f32 %v1299_v62, %v5735_v45  ;;  %v6188_v43 = vadd.f32 %v1301_v18, %v5738_v36  ;;  %v6191_v59 = vadd.f32 %v1304_v56, %v5741_v57  ;;  %v6194_v50 = vadd.f32 %v1306_v44, %v9142_v11  ;;  %v9148_v45 = vld [vmem:[#allocation33_spill] sm:$0xff]  ;;  %v9152_v18 = vld [vmem:[#allocation35_spill] sm:$0xff]  ;;  %v9154_v56 = vld [vmem:[#allocation36_spill] sm:$0xff] }
  0xd7   : > { %v6197_v63 = vadd.f32 %v1309_v52, %v9144_v22  ;;  %v6200_v17 = vadd.f32 %v1311_v42, %v9146_v60  ;;  %v6203_v62 = vadd.f32 %v1314_v23, %v9148_v45  ;;  %v6206_v36 = vadd.f32 %v1316_v32, %v9150_v54  ;;  %v9158_v42 = vld [vmem:[#allocation38_spill] sm:$0xff]  ;;  %v9160_v23 = vld [vmem:[#allocation40_spill] sm:$0xff]  ;;  %v9162_v32 = vld [vmem:[#allocation41_spill] sm:$0xff] }
  0xd8   : > { %9141 = vst [vmem:[#allocation42_spill] sm:$0xff] %v6191_v59  ;;  %9143 = vst [vmem:[#allocation6_spill] sm:$0xff] %v6194_v50  ;;  %v6209_v57 = vadd.f32 %v1319_v1, %v9152_v18  ;;  %v6212_v44 = vadd.f32 %v1321_v55, %v9154_v56  ;;  %v6215_v52 = vadd.f32 %v1324_v24, %v9156_v53  ;;  %v6236_v24 = vld [vmem:[%s4488_s22 + $0x18] sm:$0xe]  ;;  %v9180_v30 = vld [vmem:[#allocation66_spill] sm:$0xff] }
  0xd9   : > { %9145 = vst [vmem:[#allocation7_spill] sm:$0xff] %v6197_v63  ;;  %9147 = vst [vmem:[#allocation13_spill] sm:$0xff] %v6200_v17  ;;  %v6218_v20 = vadd.f32 %v1326_v38, %v9158_v42  ;;  %v6221_v12 = vadd.f32 %v1329_v34, %v9160_v23  ;;  %v6224_v19 = vadd.f32 %v1331_v5, %v9162_v32  ;;  %v6239_v38 = vld [vmem:[%s4488_s22 + $0x24] sm:$0xe]  ;;  %v9168_v34 = vld [vmem:[#allocation52_spill] sm:$0xff] }
  0xda   : > { %9149 = vst [vmem:[#allocation9_spill] sm:$0xff] %v6203_v62  ;;  %9151 = vst [vmem:[#allocation50_spill] sm:$0xff] %v6206_v36  ;;  %v6227_v1 = vadd.f32 %v1334_v61, %v9164_v35  ;;  %v6230_v55 = vadd.f32 %v1336_v33, %v9166_v48  ;;  %v6242_v31 = vadd.f32 %v1339_v51, %v9168_v34  ;;  %v9170_v5 = vld [vmem:[#allocation53_spill] sm:$0xff]  ;;  %v6254_v61 = vld [vmem:[%s4488_s22 + $0x30] sm:$0xe]  ;;  %v1448_v35 = vunpack.c.l.bf16 %v6236_v24 }
  0xdb   : > { %9153 = vst [vmem:[#allocation11_spill] sm:$0xff] %v6209_v57  ;;  %9155 = vst [vmem:[#allocation23_spill] sm:$0xff] %v6212_v44  ;;  %v6245_v14 = vadd.f32 %v1341_v8, %v9170_v5  ;;  %v6248_v2 = vadd.f32 %v1344_v3, %v9172_v25  ;;  %v6251_v6 = vadd.f32 %v1346_v37, %v9174_v27  ;;  %v9176_v13 = vld [vmem:[#allocation65_spill] sm:$0xff]  ;;  %v9182_v8 = vld [vmem:[#allocation3_spill] sm:$0xff]  ;;  %v1449_v48 = vunpack.c.l.bf16 %v6239_v38 }
  0xdc   : > { %9157 = vst [vmem:[#allocation14_spill] sm:$0xff] %v6215_v52  ;;  %9159 = vst [vmem:[#allocation24_spill] sm:$0xff] %v6218_v20  ;;  %v6263_v33 = vadd.f32 %v1349_v15, %v9176_v13  ;;  %v9178_v47 = vld [vmem:[#allocation5_spill] sm:$0xff]  ;;  %v6269_v51 = vadd.f32 %v1354_v9, %v9180_v30  ;;  %v6272_v3 = vadd.f32 %v1356_v16, %v9182_v8  ;;  %v6275_v37 = vld [vmem:[%s4488_s22 + $0x54] sm:$0xe]  ;;  %v1451_v25 = vunpack.c.l.bf16 %v6257_v29 }
  0xdd   : > { %9161 = vst [vmem:[#allocation16_spill] sm:$0xff] %v6221_v12  ;;  %9163 = vst [vmem:[#allocation57_spill] sm:$0xff] %v6224_v19  ;;  %v6266_v7 = vadd.f32 %v1351_v28, %v9178_v47  ;;  %v6278_v11 = vld [vmem:[%s4488_s22 + $0x60] sm:$0xe]  ;;  %v6281_v22 = vld [vmem:[%s4488_s22 + $0x6c] sm:$0xe]  ;;  %v1452_v27 = vunpack.c.l.bf16 %v6260_v58  ;;  %v1453_v13 = vunpack.c.l.bf16 %v6275_v37 }
  0xde   : > { %9165 = vst [vmem:[#allocation18_spill] sm:$0xff] %v6227_v1  ;;  %9167 = vst [vmem:[#allocation63_spill] sm:$0xff] %v6230_v55  ;;  %v9184_v15 = vld [vmem:[#allocation20_spill] sm:$0xff]  ;;  %v9186_v45 = vld [vmem:[#allocation49_spill] sm:$0xff]  ;;  %v1455_v24 = vunpack.c.l.bf16 %v6281_v22 }
  0xdf   : > { %9169 = vst [vmem:[#allocation21_spill] sm:$0xff] %v6242_v31  ;;  %9171 = vst [vmem:[#allocation64_spill] sm:$0xff] %v6245_v14  ;;  %v6284_v60 = vadd.f32 %v1359_v0, %v9184_v15  ;;  %v6287_v28 = vadd.f32 %v1361_v39, %v9186_v45  ;;  %v9188_v54 = vld [vmem:[#allocation55_spill] sm:$0xff]  ;;  %v6293_v18 = vld [vmem:[%s4488_s22 + $0x78] sm:$0xe] }
  0xe0   : > { %9173 = vst [vmem:[#allocation30_spill] sm:$0xff] %v6248_v2  ;;  %9175 = vst [vmem:[#allocation31_spill] sm:$0xff] %v6251_v6  ;;  %v6290_v9 = vadd.f32 %v1364_v46, %v9188_v54  ;;  %v6296_v16 = vld [vmem:[%s4488_s22 + $0x84] sm:$0xe]  ;;  %v9191_v42 = vld [vmem:[#allocation56_spill] sm:$0xff]  ;;  %v1447_v46 = vunpack.c.l.bf16 %v6233_v40  ;;  %v1454_v40 = vunpack.c.l.bf16 %v6278_v11  ;;  %v1456_v38 = vunpack.c.l.bf16 %v6293_v18 }
  0xe1   : > { %9177 = vst [vmem:[#allocation32_spill] sm:$0xff] %v6263_v33  ;;  %9179 = vst [vmem:[#allocation33_spill] sm:$0xff] %v6266_v7  ;;  %v9190_v56 = vld [vmem:[#allocation2_spill] sm:$0xff]  ;;  %v6300_v23 = vadd.f32 %v1366_v26, %v9191_v42  ;;  %v6303_v32 = vld [vmem:[%s4488_s22 + $0x90] sm:$0xe]  ;;  %v1450_v26 = vunpack.c.l.bf16 %v6254_v61  ;;  %v1457_v30 = vunpack.c.l.bf16 %v6296_v16 }
  0xe2   : > { %9181 = vst [vmem:[#allocation34_spill] sm:$0xff] %v6269_v51  ;;  %9183 = vst [vmem:[#allocation35_spill] sm:$0xff] %v6272_v3  ;;  %v1465_v53 = vsub.s32 5, %v9190_v56  ;;  %v6306_v0 = vld [vmem:[%s4488_s22 + $0x9c] sm:$0xe]  ;;  %v6332_v61 = vld [vmem:[%s4488_s22 + $0x30] sm:$0xff]   ;;  %v1458_v29 = vunpack.c.l.bf16 %v6303_v32 }
  0xe3   : > { %9185 = vst [vmem:[#allocation36_spill] sm:$0xff] %v6284_v60  ;;  %9187 = vst [vmem:[#allocation37_spill] sm:$0xff] %v6287_v28  ;;  %v6309_v39 = vld [vmem:[%s4488_s22 + $0xa8] sm:$0xe]  ;;  %v6315_v34 = vld [vmem:[%s4488_s22 + $0xb4] sm:$0xe]  ;;  %v1459_v58 = vunpack.c.l.bf16 %v6306_v0 }
  0xe4   : > { %9189 = vst [vmem:[#allocation38_spill] sm:$0xff] %v6290_v9  ;;  %9192 = vst [vmem:[#allocation40_spill] sm:$0xff] %v6300_v23  ;;  %v6318_v5 = vld [vmem:[%s4488_s22 + $0xc0] sm:$0xe]  ;;  %v6325_v47 = vld [vmem:[%s4488_s22 + $0x18] sm:$0xff]   ;;  %v1460_v37 = vunpack.c.l.bf16 %v6309_v39  ;;  %v1461_v54 = vunpack.c.l.bf16 %v6315_v34 }
  0xe5   : > { %9193 = vst [vmem:[#allocation41_spill] sm:$0xff] %v6325_v47  ;;  %9194 = vst [vmem:[#allocation44_spill] sm:$0xff] %v6332_v61  ;;  %v6335_v8 = vld [vmem:[%s4488_s22 + $0x48] sm:$0xff]   ;;  %v6343_v11 = vld [vmem:[%s8552_s1] sm:$0xff]  ;;  %v1462_v18 = vunpack.c.l.bf16 %v6318_v5  ;;  %v6358_v42 = vunpack.c.h.bf16 %v6325_v47 }
  0xe6   : > { %9195 = vst [vmem:[#allocation45_spill] sm:$0xff] %v6335_v8  ;;  %9196 = vst [vmem:[#allocation52_spill] sm:$0xff] %v6343_v11  ;;  %v6346_v22 = vrot.slane %v6343_v11, %v1465_v53  ;;  %v6349_v15 = vld [vmem:[%s4488_s22 + $0x60] sm:$0xff]   ;;  %v6352_v45 = vld [vmem:[%s4488_s22 + $0x78] sm:$0xff]   ;;  %v6365_v53 = vunpack.c.h.bf16 %v6332_v61  ;;  %v6369_v11 = vunpack.c.h.bf16 %v6335_v8 }
  0xe7   : > { %9197 = vst [vmem:[#allocation53_spill] sm:$0xff] %v6349_v15  ;;  %9198 = vst [vmem:[#allocation54_spill] sm:$0xff] %v6352_v45  ;;  %v6361_v32 = vld [vmem:[%s4488_s22 + $0x90] sm:$0xff]   ;;  %v6373_v5 = vunpack.c.h.bf16 %v6349_v15  ;;  %v9205_v47 = vld [vmem:[#allocation26_spill] sm:$0xff] }
  0xe8   : > { %9199 = vst [vmem:[#allocation58_spill] sm:$0xff] %v6358_v42  ;;  %9200 = vst [vmem:[#allocation65_spill] sm:$0xff] %v6361_v32  ;;  %v6377_v42 = vunpack.c.h.bf16 %v6352_v45  ;;  %v1467_v0 = vmul.f32 %v6346_v22, %v1447_v46  ;;  %v6384_v8 = vunpack.c.h.bf16 %v6361_v32  ;;  %v9209_v16 = vld [vmem:[#allocation8_spill] sm:$0xff]  ;;  %v9210_v46 = vld [vmem:[#allocation46_spill] sm:$0xff]  ;;  %v6402_v39 = vmul.f32 %v6346_v22, %v1449_v48 }
  0xe9   : > { %9201 = vst [vmem:[#allocation5_spill] sm:$0xff] %v6365_v53  ;;  %9202 = vst [vmem:[#allocation66_spill] sm:$0xff] %v6369_v11  ;;  %v1468_v53 = vmul.f32 %v6346_v22, %v9205_v47  ;;  %v9207_v11 = vld [vmem:[#allocation39_spill] sm:$0xff]  ;;  %v9211_v45 = vunpack.c.l.bf16 %v9210_v46  ;;  %v9215_v46 = vld [vmem:[#allocation10_spill] sm:$0xff] }
  0xea   : > { %9203 = vst [vmem:[#allocation3_spill] sm:$0xff] %v6373_v5  ;;  %9204 = vst [vmem:[#allocation20_spill] sm:$0xff] %v6377_v42  ;;  %v9208_v34 = vunpack.c.l.bf16 %v9207_v11  ;;  %v6390_v5 = vmul.f32 %v6346_v22, %v1448_v35  ;;  %v6394_v42 = vmul.f32 %v9209_v16, %v6346_v22  ;;  %v6414_v16 = vmul.f32 %v6346_v22, %v1450_v26  ;;  %v9218_v23 = vld [vmem:[#allocation27_spill] sm:$0xff]  ;;  %v9224_v3 = vld [vmem:[#allocation68_spill] sm:$0xff] }
  0xeb   : > { %9206 = vst [vmem:[#allocation49_spill] sm:$0xff] %v6384_v8  ;;  %v6399_v47 = vmul.f32 %v6346_v22, %v9211_v45  ;;  %v9212_v8 = vld [vmem:[#allocation67_spill] sm:$0xff]  ;;  %v6418_v61 = vmul.f32 %v9215_v46, %v6346_v22  ;;  %v6438_v46 = vmul.f32 %v6346_v22, %v1452_v27  ;;  %v9230_v6 = vld [vmem:[#allocation69_spill] sm:$0xff]  ;;  %v9236_v55 = vld [vmem:[#allocation28_spill] sm:$0xff]  ;;  %v1563_v44 = vrot.slane %v1467_v0, 2 }
  0xec   : > { %v1469_v15 = vmul.f32 %v6346_v22, %v9208_v34  ;;  %v6406_v11 = vmul.f32 %v6346_v22, %v9212_v8  ;;  %v9213_v34 = vld [vmem:[#allocation47_spill] sm:$0xff]  ;;  %v6426_v8 = vmul.f32 %v6346_v22, %v1451_v25  ;;  %v9242_v20 = vld [vmem:[#allocation70_spill] sm:$0xff]  ;;  %v1569_v50 = vrot.slane %v6394_v42, 2 }
  0xed   : > { %v9214_v32 = vunpack.c.l.bf16 %v9213_v34  ;;  %v9216_v45 = vld [vmem:[#allocation51_spill] sm:$0xff]  ;;  %v6430_v34 = vmul.f32 %v6346_v22, %v9218_v23  ;;  %v6450_v23 = vmul.f32 %v6346_v22, %v1453_v13 }
  0xee   : > { %v9217_v56 = vunpack.c.l.bf16 %v9216_v45  ;;  %v9221_v45 = vld [vmem:[#allocation12_spill] sm:$0xff]  ;;  %v1566_v57 = vrot.slane %v1469_v15, 2  ;;  %v9249_v15 = vld [vmem:[#allocation75_spill] sm:$0xff]  ;;  %v1574_v59 = vrot.slane %v6406_v11, 2 }
  0xef   : > { %v6411_v35 = vmul.f32 %v6346_v22, %v9214_v32  ;;  %v9219_v32 = vld [vmem:[#allocation59_spill] sm:$0xff]  ;;  %v6442_v28 = vmul.f32 %v9221_v45, %v6346_v22  ;;  %v6462_v45 = vmul.f32 %v6346_v22, %v1454_v40 }
  0xf0   : > { %v6423_v48 = vmul.f32 %v6346_v22, %v9217_v56  ;;  %v9220_v9 = vunpack.c.l.bf16 %v9219_v32  ;;  %v9222_v56 = vld [vmem:[#allocation60_spill] sm:$0xff]  ;;  %v6454_v32 = vmul.f32 %v6346_v22, %v9224_v3  ;;  %v6474_v3 = vmul.f32 %v6346_v22, %v1455_v24 }
  0xf1   : > { %v9223_v60 = vunpack.c.l.bf16 %v9222_v56  ;;  %v9227_v56 = vld [vmem:[#allocation15_spill] sm:$0xff] }
  0xf2   : > { %v6435_v26 = vmul.f32 %v6346_v22, %v9220_v9  ;;  %v9225_v9 = vld [vmem:[#allocation61_spill] sm:$0xff]  ;;  %v6466_v7 = vmul.f32 %v9227_v56, %v6346_v22  ;;  %v6486_v56 = vmul.f32 %v6346_v22, %v1456_v38  ;;  %v1581_v42 = vrot.slane %v6423_v48, 2 }
  0xf3   : > { %v6447_v25 = vmul.f32 %v6346_v22, %v9223_v60  ;;  %v9226_v51 = vunpack.c.l.bf16 %v9225_v9  ;;  %v9228_v60 = vld [vmem:[#allocation4_spill] sm:$0xff]  ;;  %v6478_v9 = vmul.f32 %v6346_v22, %v9230_v6  ;;  %v6498_v6 = vmul.f32 %v6346_v22, %v1457_v30 }
  0xf4   : > { %v9229_v33 = vunpack.c.l.bf16 %v9228_v60  ;;  %v9233_v60 = vld [vmem:[#allocation17_spill] sm:$0xff]  ;;  %v1598_v48 = vrot.slane %v6462_v45, 2 }
  0xf5   : > { %v6459_v27 = vmul.f32 %v6346_v22, %v9226_v51  ;;  %v9231_v51 = vld [vmem:[#allocation43_spill] sm:$0xff]  ;;  %v6490_v14 = vmul.f32 %v9233_v60, %v6346_v22  ;;  %v6510_v60 = vmul.f32 %v6346_v22, %v1458_v29  ;;  %v1591_v11 = vrot.slane %v6447_v25, 2 }
  0xf6   : > { %v6471_v13 = vmul.f32 %v6346_v22, %v9229_v33  ;;  %v9232_v2 = vunpack.c.l.bf16 %v9231_v51  ;;  %v9234_v33 = vld [vmem:[#allocation48_spill] sm:$0xff]  ;;  %v6502_v51 = vmul.f32 %v6346_v22, %v9236_v55  ;;  %v6522_v55 = vmul.f32 %v6346_v22, %v1459_v58  ;;  %v9246_v58 = vld [vmem:[#allocation74_spill] sm:$0xff] }
  0xf7   : > { %v9235_v31 = vunpack.c.l.bf16 %v9234_v33  ;;  %v9239_v33 = vld [vmem:[#allocation19_spill] sm:$0xff]  ;;  %v9247_v62 = vunpack.c.l.bf16 %v9246_v58  ;;  %v9251_v58 = vld [vmem:[#allocation25_spill] sm:$0xff]  ;;  %v1604_v25 = vrot.slane %v6478_v9, 2 }
  0xf8   : > { %v6483_v40 = vmul.f32 %v6346_v22, %v9232_v2  ;;  %v9237_v2 = vld [vmem:[#allocation71_spill] sm:$0xff]  ;;  %v6514_v19 = vmul.f32 %v9239_v33, %v6346_v22  ;;  %v1564_v33 = vrot.slane %v1468_v53, 2  ;;  %v9250_v53 = vunpack.c.l.bf16 %v9249_v15 }
  0xf9   : > { %v6495_v24 = vmul.f32 %v6346_v22, %v9235_v31  ;;  %v9238_v1 = vunpack.c.l.bf16 %v9237_v2  ;;  %v9240_v31 = vld [vmem:[#allocation72_spill] sm:$0xff]  ;;  %v6526_v2 = vmul.f32 %v6346_v22, %v9242_v20  ;;  %v6543_v20 = vmul.f32 %v6346_v22, %v9247_v62 }
  0xfa   : > { %v9241_v12 = vunpack.c.l.bf16 %v9240_v31  ;;  %v6534_v31 = vmul.f32 %v6346_v22, %v1460_v37  ;;  %v6555_v37 = vmul.f32 %v6346_v22, %v9250_v53  ;;  %v6562_v17 = vmul.f32 %v9251_v58, %v6346_v22  ;;  %v9252_v62 = vld [vmem:[#allocation76_spill] sm:$0xff] }
  0xfb   : > { %v6507_v38 = vmul.f32 %v6346_v22, %v9238_v1  ;;  %v9243_v1 = vld [vmem:[#allocation73_spill] sm:$0xff]  ;;  %v9253_v63 = vunpack.c.l.bf16 %v9252_v62  ;;  %v1571_v15 = vrot.slane %v6399_v47, 2  ;;  %v6573_v53 = vsel %vm877_vm2, %v1563_v44, %v1564_v33 }
  0xfc   : > { %v6519_v30 = vmul.f32 %v6346_v22, %v9241_v12  ;;  %v9244_v52 = vunpack.c.l.bf16 %v9243_v1  ;;  %v9245_v12 = vld [vmem:[#allocation22_spill] sm:$0xff]  ;;  %v6546_v1 = vmul.f32 %v6346_v22, %v1461_v54  ;;  %v1573_v58 = vrot.slane %v6402_v39, 2 }
  0xfd   : > { %v6538_v36 = vmul.f32 %v9245_v12, %v6346_v22  ;;  %v6558_v12 = vmul.f32 %v6346_v22, %v1462_v18  ;;  %v6567_v54 = vmul.f32 %v6346_v22, %v9253_v63  ;;  %v6576_v18 = vsel %vm877_vm2, %v1564_v33, %v1566_v57 }
  0xfe   : > { %v6531_v29 = vmul.f32 %v6346_v22, %v9244_v52  ;;  %v9248_v52 = vld [vmem:[#allocation29_spill] sm:$0xff]  ;;  %v1576_v62 = vrot.slane %v6411_v35, 2  ;;  %v1578_v63 = vrot.slane %v6414_v16, 2  ;;  %v1584_v44 = vrot.slane %v6430_v34, 2 }
  0xff   : > { %v6550_v0 = vmul.f32 %v6346_v22, %v9248_v52  ;;  %v1568_v52 = vrot.slane %v6390_v5, 2  ;;  %v1579_v22 = vrot.slane %v6418_v61, 2  ;;  %v1583_v5 = vrot.slane %v6426_v8, 2 }
 0x100   : > { %v1586_v47 = vrot.slane %v6435_v26, 2  ;;  %v1588_v57 = vrot.slane %v6438_v46, 2  ;;  %v1589_v39 = vrot.slane %v6442_v28, 2  ;;  %v1593_v35 = vrot.slane %v6450_v23, 2 }
 0x101   : > { %v1594_v16 = vrot.slane %v6454_v32, 2  ;;  %v1596_v61 = vrot.slane %v6459_v27, 2  ;;  %v1599_v8 = vrot.slane %v6466_v7, 2  ;;  %v1601_v34 = vrot.slane %v6471_v13, 2 }
 0x102   : > { %v1570_v26 = vsel %vm877_vm2, %v1568_v52, %v1569_v50  ;;  %v1572_v46 = vsel %vm877_vm2, %v1569_v50, %v1571_v15  ;;  %v1603_v28 = vrot.slane %v6474_v3, 2  ;;  %v1575_v23 = vsel %vm877_vm2, %v1573_v58, %v1574_v59 }
 0x103   : > { %v1577_v32 = vsel %vm877_vm2, %v1574_v59, %v1576_v62  ;;  %v1580_v27 = vsel %vm877_vm2, %v1578_v63, %v1579_v22  ;;  %v1582_v45 = vsel %vm877_vm2, %v1579_v22, %v1581_v42  ;;  %v1585_v7 = vsel %vm877_vm2, %v1583_v5, %v1584_v44 }
 0x104   : > { %v1587_v13 = vsel %vm877_vm2, %v1584_v44, %v1586_v47  ;;  %v1590_v33 = vsel %vm877_vm2, %v1588_v57, %v1589_v39  ;;  %v1592_v50 = vsel %vm877_vm2, %v1589_v39, %v1591_v11  ;;  %v1595_v3 = vsel %vm877_vm2, %v1593_v35, %v1594_v16 }
 0x105   : > { %v1597_v9 = vsel %vm877_vm2, %v1594_v16, %v1596_v61  ;;  %v1600_v58 = vsel %vm877_vm2, %v1598_v48, %v1599_v8  ;;  %v1602_v59 = vsel %vm877_vm2, %v1599_v8, %v1601_v34  ;;  %v1605_v52 = vsel %vm877_vm2, %v1603_v28, %v1604_v25 }
 0x106   : > { %v1606_v15 = vrot.slane %v6483_v40, 2  ;;  %v1608_v62 = vrot.slane %v6486_v56, 2  ;;  %v1609_v63 = vrot.slane %v6490_v14, 2  ;;  %v1611_v22 = vrot.slane %v6495_v24, 2 }
 0x107   : > { %v1613_v42 = vrot.slane %v6498_v6, 2  ;;  %v1614_v5 = vrot.slane %v6502_v51, 2  ;;  %v1616_v44 = vrot.slane %v6507_v38, 2  ;;  %v1618_v47 = vrot.slane %v6510_v60, 2 }
 0x108   : > { %v1619_v57 = vrot.slane %v6514_v19, 2  ;;  %v1621_v39 = vrot.slane %v6519_v30, 2  ;;  %v1623_v40 = vrot.slane %v6522_v55, 2  ;;  %v1624_v56 = vrot.slane %v6526_v2, 2 }
 0x109   : > { %v1626_v14 = vrot.slane %v6531_v29, 2  ;;  %v1628_v24 = vrot.slane %v6534_v31, 2  ;;  %v1629_v6 = vrot.slane %v6538_v36, 2  ;;  %v1631_v51 = vrot.slane %v6543_v20, 2 }
 0x10a   : > { %v1633_v38 = vrot.slane %v6546_v1, 2  ;;  %v1634_v60 = vrot.slane %v6550_v0, 2  ;;  %v1636_v19 = vrot.slane %v6555_v37, 2  ;;  %v1607_v30 = vsel %vm877_vm2, %v1604_v25, %v1606_v15 }
 0x10b   : > { %v1638_v55 = vrot.slane %v6558_v12, 2  ;;  %v1639_v2 = vrot.slane %v6562_v17, 2  ;;  %v1641_v29 = vrot.slane %v6567_v54, 2  ;;  %v1610_v31 = vsel %vm877_vm2, %v1608_v62, %v1609_v63 }
 0x10c   : > { %v1612_v36 = vsel %vm877_vm2, %v1609_v63, %v1611_v22  ;;  %v1615_v20 = vsel %vm877_vm2, %v1613_v42, %v1614_v5  ;;  %v1617_v1 = vsel %vm877_vm2, %v1614_v5, %v1616_v44  ;;  %v1620_v0 = vsel %vm877_vm2, %v1618_v47, %v1619_v57  ;;  %v9254_v63 = vld [vmem:[#allocation42_spill] sm:$0xff]  ;;  %v9263_v5 = vld [vmem:[#allocation24_spill] sm:$0xff]  ;;  %v9265_v47 = vld [vmem:[#allocation57_spill] sm:$0xff] }
 0x10d   : > { %v1622_v37 = vsel %vm877_vm2, %v1619_v57, %v1621_v39  ;;  %v1625_v11 = vsel %vm877_vm2, %v1623_v40, %v1624_v56  ;;  %v1627_v12 = vsel %vm877_vm2, %v1624_v56, %v1626_v14  ;;  %v1630_v17 = vsel %vm877_vm2, %v1628_v24, %v1629_v6  ;;  %v9262_v42 = vld [vmem:[#allocation14_spill] sm:$0xff]  ;;  %v9264_v44 = vld [vmem:[#allocation16_spill] sm:$0xff]  ;;  %v9267_v39 = vld [vmem:[#allocation63_spill] sm:$0xff] }
 0x10e   : > { %v1632_v54 = vsel %vm877_vm2, %v1629_v6, %v1631_v51  ;;  %v1635_v35 = vsel %vm877_vm2, %v1633_v38, %v1634_v60  ;;  %v1637_v16 = vsel %vm877_vm2, %v1634_v60, %v1636_v19  ;;  %v1640_v61 = vsel %vm877_vm2, %v1638_v55, %v1639_v2  ;;  %v9266_v57 = vld [vmem:[#allocation18_spill] sm:$0xff]  ;;  %v9269_v40 = vld [vmem:[#allocation21_spill] sm:$0xff]  ;;  %v9271_v56 = vld [vmem:[#allocation64_spill] sm:$0xff] }
 0x10f   : > { %v1642_v48 = vsel %vm877_vm2, %v1639_v2, %v1641_v29  ;;  %v6652_v8 = vadd.f32 %v6573_v53, %v6168_v21  ;;  %v6656_v34 = vadd.f32 %v6576_v18, %v6172_v49  ;;  %v6659_v28 = vadd.f32 %v1570_v26, %v6178_v41  ;;  %v9255_v21 = vld [vmem:[#allocation6_spill] sm:$0xff]  ;;  %v9256_v49 = vld [vmem:[#allocation7_spill] sm:$0xff]  ;;  %v9257_v41 = vld [vmem:[#allocation13_spill] sm:$0xff] }
 0x110   : > { %v6662_v25 = vadd.f32 %v1572_v46, %v6182_v10  ;;  %v6665_v15 = vadd.f32 %v1575_v23, %v6185_v4  ;;  %v6668_v62 = vadd.f32 %v1577_v32, %v6188_v43  ;;  %v6671_v22 = vadd.f32 %v1580_v27, %v9254_v63  ;;  %v9258_v10 = vld [vmem:[#allocation9_spill] sm:$0xff]  ;;  %v9259_v4 = vld [vmem:[#allocation50_spill] sm:$0xff]  ;;  %v9260_v43 = vld [vmem:[#allocation11_spill] sm:$0xff] }
 0x111   : > { %v6674_v53 = vadd.f32 %v1582_v45, %v9255_v21  ;;  %v6677_v18 = vadd.f32 %v1585_v7, %v9256_v49  ;;  %v6680_v26 = vadd.f32 %v1587_v13, %v9257_v41  ;;  %v6683_v46 = vadd.f32 %v1590_v33, %v9258_v10  ;;  %v9261_v27 = vld [vmem:[#allocation23_spill] sm:$0xff]  ;;  %v9273_v14 = vld [vmem:[#allocation30_spill] sm:$0xff]  ;;  %v9277_v38 = vld [vmem:[#allocation32_spill] sm:$0xff] }
 0x112   : > { %v6686_v23 = vadd.f32 %v1592_v50, %v9259_v4  ;;  %v6689_v32 = vadd.f32 %v1595_v3, %v9260_v43  ;;  %v6692_v45 = vadd.f32 %v1597_v9, %v9261_v27  ;;  %v6695_v7 = vadd.f32 %v1600_v58, %v9262_v42  ;;  %v9275_v6 = vld [vmem:[#allocation31_spill] sm:$0xff]  ;;  %v9279_v19 = vld [vmem:[#allocation33_spill] sm:$0xff]  ;;  %v9283_v29 = vld [vmem:[#allocation34_spill] sm:$0xff] }
 0x113   : > { %v6698_v13 = vadd.f32 %v1602_v59, %v9263_v5  ;;  %v6701_v33 = vadd.f32 %v1605_v52, %v9264_v44  ;;  %v6704_v50 = vadd.f32 %v1607_v30, %v9265_v47  ;;  %v6707_v3 = vadd.f32 %v1610_v31, %v9266_v57  ;;  %v6719_v52 = vld [vmem:[%s4488_s22 + $0xa8] sm:$0xff]   ;;  %v6737_v2 = vld [vmem:[%s4488_s22 + $0x3c] sm:$0xff]   ;;  %v9295_v41 = vld [vmem:[#allocation40_spill] sm:$0xff] }
 0x114   : > { %v6710_v9 = vadd.f32 %v1612_v36, %v9267_v39  ;;  %v6713_v58 = vadd.f32 %v1615_v20, %v9269_v40  ;;  %v6716_v59 = vadd.f32 %v1617_v1, %v9271_v56  ;;  %v6722_v24 = vadd.f32 %v1620_v0, %v9273_v14  ;;  %v6734_v55 = vld [vmem:[%s4488_s22 + $0x24] sm:$0xff]   ;;  %9282 = vst [vmem:[#allocation10_spill] sm:$0xff] %v6737_v2  ;;  %v9287_v1 = vld [vmem:[#allocation36_spill] sm:$0xff]  ;;  %v6786_v44 = vld [vmem:[%s4488_s22 + $0x20] sm:$0x1] }
 0x115   : > { %v6725_v51 = vadd.f32 %v1622_v37, %v9275_v6  ;;  %v6728_v60 = vadd.f32 %v1625_v11, %v9277_v38  ;;  %v6731_v30 = vadd.f32 %v1627_v12, %v9279_v19  ;;  %9281 = vst [vmem:[#allocation47_spill] sm:$0xff] %v6734_v55  ;;  %v6740_v31 = vadd.f32 %v1630_v17, %v9283_v29  ;;  %v9285_v36 = vld [vmem:[#allocation35_spill] sm:$0xff]  ;;  %v9289_v37 = vld [vmem:[#allocation37_spill] sm:$0xff]  ;;  %v9293_v21 = vld [vmem:[#allocation38_spill] sm:$0xff] }
 0x116   : > { %9268 = vst [vmem:[#allocation55_spill] sm:$0xff] %v6710_v9  ;;  %9270 = vst [vmem:[#allocation56_spill] sm:$0xff] %v6713_v58  ;;  %v6743_v20 = vadd.f32 %v1632_v54, %v9285_v36  ;;  %v6746_v0 = vadd.f32 %v1635_v35, %v9287_v1  ;;  %v6749_v11 = vadd.f32 %v1637_v16, %v9289_v37  ;;  %v6752_v12 = vld [vmem:[%s4488_s22 + $0x54] sm:$0xff]   ;;  %v6755_v63 = vld [vmem:[%s4488_s22 + $0x6c] sm:$0xff]   ;;  %v6772_v43 = vunpack.c.h.bf16 %v6719_v52 }
 0x117   : > { %9272 = vst [vmem:[#allocation26_spill] sm:$0xff] %v6716_v59  ;;  %9274 = vst [vmem:[#allocation39_spill] sm:$0xff] %v6722_v24  ;;  %v6758_v49 = vadd.f32 %v1640_v61, %v9293_v21  ;;  %v6761_v17 = vadd.f32 %v1642_v48, %v9295_v41  ;;  %v6764_v54 = vld [vmem:[%s4488_s22 + $0x84] sm:$0xff]   ;;  %v6767_v35 = vld [vmem:[%s4488_s22 + $0x9c] sm:$0xff]   ;;  %v6782_v42 = vunpack.c.h.bf16 %v6734_v55  ;;  %v6789_v47 = vunpack.c.h.bf16 %v6737_v2 }
 0x118   : > { %9276 = vst [vmem:[#allocation8_spill] sm:$0xff] %v6725_v51  ;;  %9278 = vst [vmem:[#allocation46_spill] sm:$0xff] %v6728_v60  ;;  %v9299_v10 = vld [vmem:[#allocation2_spill] sm:$0xff]  ;;  %v6775_v27 = vld [vmem:[%s4488_s22 + $0xb4] sm:$0xff]   ;;  %v6793_v39 = vunpack.c.h.bf16 %v6752_v12  ;;  %v6806_v38 = vunpack.c.h.bf16 %v6755_v63  ;;  %v6810_v29 = vunpack.c.h.bf16 %v6764_v54  ;;  %v6823_v41 = vunpack.c.h.bf16 %v6767_v35 }
 0x119   : > { %9280 = vst [vmem:[#allocation67_spill] sm:$0xff] %v6731_v30  ;;  %9284 = vst [vmem:[#allocation51_spill] sm:$0xff] %v6740_v31  ;;  %v1774_v4 = vsub.s32 6, %v9299_v10  ;;  %v6778_v61 = vld [vmem:[%s4488_s22 + $0xcc] sm:$0xff]   ;;  %v6800_v14 = vld [vmem:[%s4488_s22 + $0x38] sm:$0x1]  ;;  %v6827_v40 = vunpack.c.h.bf16 %v6775_v27  ;;  %v9326_v31 = vunpack.c.l.bf16 %v6734_v55  ;;  %v9330_v24 = vunpack.c.l.bf16 %v6737_v2 }
 0x11a   : > { %9286 = vst [vmem:[#allocation27_spill] sm:$0xff] %v6743_v20  ;;  %9288 = vst [vmem:[#allocation59_spill] sm:$0xff] %v6746_v0  ;;  %v6797_v56 = vld [vmem:[%s4488_s22 + $0x2c] sm:$0x1]  ;;  %v6803_v6 = vld [vmem:[%s4488_s22 + $0x44] sm:$0x1]  ;;  %v9338_v2 = vunpack.c.l.bf16 %v6755_v63 }
 0x11b   : > { %9290 = vst [vmem:[#allocation12_spill] sm:$0xff] %v6749_v11  ;;  %9291 = vst [vmem:[#allocation60_spill] sm:$0xff] %v6752_v12  ;;  %v6814_v1 = vld [vmem:[%s4488_s22 + $0x50] sm:$0x1]  ;;  %v6817_v37 = vld [vmem:[%s4488_s22 + $0x5c] sm:$0x1] }
 0x11c   : > { %9292 = vst [vmem:[#allocation68_spill] sm:$0xff] %v6755_v63  ;;  %9294 = vst [vmem:[#allocation61_spill] sm:$0xff] %v6758_v49  ;;  %v6820_v21 = vld [vmem:[%s4488_s22 + $0x68] sm:$0x1]  ;;  %v9316_v19 = vld [vmem:[#allocation52_spill] sm:$0xff]  ;;  %v6841_v49 = vunpack.c.h.bf16 %v6778_v61  ;;  %v9346_v63 = vunpack.c.l.bf16 %v6767_v35 }
 0x11d   : > { %9296 = vst [vmem:[#allocation15_spill] sm:$0xff] %v6761_v17  ;;  %9297 = vst [vmem:[#allocation4_spill] sm:$0xff] %v6764_v54  ;;  %v1775_v57 = vrot.slane %v9316_v19, %v1774_v4  ;;  %v6831_v5 = vld [vmem:[%s4488_s22 + $0x74] sm:$0x1]  ;;  %v6834_v48 = vld [vmem:[%s4488_s22 + $0x80] sm:$0x1] }
 0x11e   : > { %9298 = vst [vmem:[#allocation69_spill] sm:$0xff] %v6767_v35  ;;  %9300 = vst [vmem:[#allocation43_spill] sm:$0xff] %v6772_v43  ;;  %v6837_v36 = vld [vmem:[%s4488_s22 + $0x8c] sm:$0x1]  ;;  %v6844_v11 = vld [vmem:[%s4488_s22 + $0x98] sm:$0x1] }
 0x11f   : > { %9301 = vst [vmem:[#allocation17_spill] sm:$0xff] %v6775_v27  ;;  %9302 = vst [vmem:[#allocation48_spill] sm:$0xff] %v6782_v42  ;;  %v6847_v0 = vld [vmem:[%s4488_s22 + $0xa4] sm:$0x1]  ;;  %v9323_v59 = vld [vmem:[#allocation41_spill] sm:$0xff]  ;;  %v1778_v30 = vmul.f32 %v1775_v57, %v9326_v31  ;;  %v1779_v17 = vmul.f32 %v1775_v57, %v6782_v42 }
 0x120   : > { %9303 = vst [vmem:[#allocation28_spill] sm:$0xff] %v6786_v44  ;;  %9304 = vst [vmem:[#allocation71_spill] sm:$0xff] %v6789_v47  ;;  %v9324_v16 = vunpack.c.l.bf16 %v9323_v59  ;;  %v9325_v20 = vld [vmem:[#allocation58_spill] sm:$0xff]  ;;  %v9329_v51 = vld [vmem:[#allocation5_spill] sm:$0xff] }
 0x121   : > { %9305 = vst [vmem:[#allocation19_spill] sm:$0xff] %v6793_v39  ;;  %9306 = vst [vmem:[#allocation72_spill] sm:$0xff] %v6797_v56  ;;  %v1777_v56 = vmul.f32 %v9325_v20, %v1775_v57  ;;  %v9337_v42 = vld [vmem:[#allocation3_spill] sm:$0xff]  ;;  %v9339_v55 = vld [vmem:[#allocation54_spill] sm:$0xff] }
 0x122   : > { %9307 = vst [vmem:[#allocation70_spill] sm:$0xff] %v6800_v14  ;;  %9308 = vst [vmem:[#allocation73_spill] sm:$0xff] %v6803_v6  ;;  %v1776_v44 = vmul.f32 %v9324_v16, %v1775_v57  ;;  %v1783_v16 = vmul.f32 %v1775_v57, %v6789_v47  ;;  %v1787_v6 = vmul.f32 %v1775_v57, %v6793_v39  ;;  %v9335_v14 = vld [vmem:[#allocation53_spill] sm:$0xff]  ;;  %v9341_v20 = vld [vmem:[#allocation20_spill] sm:$0xff] }
 0x123   : > { %9309 = vst [vmem:[#allocation22_spill] sm:$0xff] %v6806_v38  ;;  %9310 = vst [vmem:[#allocation74_spill] sm:$0xff] %v6810_v29  ;;  %v1791_v47 = vmul.f32 %v1775_v57, %v6806_v38  ;;  %v1795_v39 = vmul.f32 %v1775_v57, %v6810_v29  ;;  %v9343_v59 = vld [vmem:[#allocation65_spill] sm:$0xff]  ;;  %v1799_v38 = vmul.f32 %v1775_v57, %v6823_v41  ;;  %v9349_v58 = vld [vmem:[#allocation62_spill] sm:$0xff] }
 0x124   : > { %9311 = vst [vmem:[#allocation29_spill] sm:$0xff] %v6814_v1  ;;  %9312 = vst [vmem:[#allocation75_spill] sm:$0xff] %v6817_v37  ;;  %v9331_v37 = vld [vmem:[#allocation45_spill] sm:$0xff]  ;;  %v1803_v29 = vmul.f32 %v1775_v57, %v6827_v40 }
 0x125   : > { %9313 = vst [vmem:[#allocation76_spill] sm:$0xff] %v6820_v21  ;;  %9314 = vst [vmem:[#allocation42_spill] sm:$0xff] %v6823_v41  ;;  %v9327_v21 = vld [vmem:[#allocation44_spill] sm:$0xff]  ;;  %v9332_v1 = vunpack.c.l.bf16 %v9331_v37  ;;  %v9340_v37 = vunpack.c.l.bf16 %v9339_v55  ;;  %v9345_v10 = vld [vmem:[#allocation49_spill] sm:$0xff]  ;;  %v9347_v55 = vunpack.c.l.bf16 %v6719_v52  ;;  %v6909_v41 = vadd.f32 %v1776_v44, %v6652_v8 }
 0x126   : > { %9315 = vst [vmem:[#allocation6_spill] sm:$0xff] %v6827_v40  ;;  %9317 = vst [vmem:[#allocation7_spill] sm:$0xff] %v6831_v5  ;;  %v9328_v60 = vunpack.c.l.bf16 %v9327_v21  ;;  %v9336_v21 = vunpack.c.l.bf16 %v9335_v14  ;;  %v9344_v14 = vunpack.c.l.bf16 %v9343_v59  ;;  %v1804_v59 = vmul.f32 %v9349_v58, %v1775_v57 }
 0x127   : > { %9318 = vst [vmem:[#allocation13_spill] sm:$0xff] %v6834_v48  ;;  %9319 = vst [vmem:[#allocation9_spill] sm:$0xff] %v6837_v36  ;;  %v1781_v48 = vmul.f32 %v9329_v51, %v1775_v57  ;;  %v1782_v36 = vmul.f32 %v1775_v57, %v9330_v24  ;;  %v1784_v4 = vmul.f32 %v9332_v1, %v1775_v57 }
 0x128   : > { %9320 = vst [vmem:[#allocation50_spill] sm:$0xff] %v6841_v49  ;;  %9321 = vst [vmem:[#allocation11_spill] sm:$0xff] %v6844_v11  ;;  %v1780_v5 = vmul.f32 %v9328_v60, %v1775_v57  ;;  %v9333_v11 = vld [vmem:[#allocation66_spill] sm:$0xff]  ;;  %v1788_v60 = vmul.f32 %v9336_v21, %v1775_v57  ;;  %v1789_v51 = vmul.f32 %v9337_v42, %v1775_v57 }
 0x129   : > { %9322 = vst [vmem:[#allocation23_spill] sm:$0xff] %v6847_v0  ;;  %v1785_v19 = vmul.f32 %v9333_v11, %v1775_v57  ;;  %v9334_v0 = vunpack.c.l.bf16 %v6752_v12  ;;  %v1790_v24 = vmul.f32 %v1775_v57, %v9338_v2  ;;  %v1792_v1 = vmul.f32 %v9340_v37, %v1775_v57 }
 0x12a   : > { %v1793_v11 = vmul.f32 %v9341_v20, %v1775_v57  ;;  %v9342_v12 = vunpack.c.l.bf16 %v6764_v54  ;;  %v1796_v21 = vmul.f32 %v9344_v14, %v1775_v57  ;;  %v1797_v42 = vmul.f32 %v9345_v10, %v1775_v57  ;;  %v9350_v14 = vld [vmem:[#allocation25_spill] sm:$0xff] }
 0x12b   : > { %v1786_v31 = vmul.f32 %v1775_v57, %v9334_v0  ;;  %v1798_v2 = vmul.f32 %v1775_v57, %v9346_v63  ;;  %v1800_v37 = vmul.f32 %v9347_v55, %v1775_v57  ;;  %v1801_v20 = vmul.f32 %v6772_v43, %v1775_v57 }
 0x12c   : > { %v1794_v0 = vmul.f32 %v1775_v57, %v9342_v12  ;;  %v9348_v54 = vunpack.c.l.bf16 %v6775_v27  ;;  %v1805_v9 = vmul.f32 %v9350_v14, %v1775_v57  ;;  %v9351_v10 = vunpack.c.l.bf16 %v6778_v61 }
 0x12d   : > { %v1807_v63 = vmul.f32 %v1775_v57, %v6841_v49  ;;  %v6912_v55 = vadd.f32 %v1777_v56, %v6656_v34  ;;  %v6915_v27 = vadd.f32 %v1778_v30, %v6659_v28  ;;  %v6921_v14 = vadd.f32 %v1780_v5, %v6665_v15  ;;  %v9374_v5 = vld [vmem:[#allocation26_spill] sm:$0xff] }
 0x12e   : > { %v1802_v12 = vmul.f32 %v1775_v57, %v9348_v54  ;;  %v1806_v35 = vmul.f32 %v1775_v57, %v9351_v10  ;;  %v6918_v54 = vadd.f32 %v1779_v17, %v6662_v25  ;;  %v6924_v10 = vadd.f32 %v1781_v48, %v6668_v62  ;;  %v9378_v57 = vld [vmem:[#allocation8_spill] sm:$0xff]  ;;  %v9380_v56 = vld [vmem:[#allocation46_spill] sm:$0xff] }
 0x12f   : > { %v6927_v8 = vadd.f32 %v1782_v36, %v6671_v22  ;;  %v6930_v34 = vadd.f32 %v1783_v16, %v6674_v53  ;;  %v6933_v28 = vadd.f32 %v1784_v4, %v6677_v18  ;;  %v6936_v25 = vadd.f32 %v1785_v19, %v6680_v26  ;;  %v6997_v19 = vld [vmem:[%s4488_s22 + $0x18] sm:$0xe]  ;;  %v7000_v36 = vld [vmem:[%s4488_s22 + $0x24] sm:$0xe]  ;;  %v7003_v4 = vld [vmem:[%s4488_s22 + $0x30] sm:$0xe] }
 0x130   : > { %v6939_v15 = vadd.f32 %v1786_v31, %v6683_v46  ;;  %v6942_v62 = vadd.f32 %v1787_v6, %v6686_v23  ;;  %v6945_v22 = vadd.f32 %v1788_v60, %v6689_v32  ;;  %v6948_v53 = vadd.f32 %v1789_v51, %v6692_v45  ;;  %v6963_v23 = vld [vmem:[%s4488_s22 + $0xb0] sm:$0x1]  ;;  %v6966_v32 = vld [vmem:[%s4488_s22 + $0xbc] sm:$0x1]  ;;  %9382 = vst [vmem:[#allocation8_spill] sm:$0xff] %v6997_v19  ;;  %v9387_v31 = vld [vmem:[#allocation51_spill] sm:$0xff] }
 0x131   : > { %9352 = vst [vmem:[#allocation14_spill] sm:$0xff] %v6927_v8  ;;  %9353 = vst [vmem:[#allocation24_spill] sm:$0xff] %v6930_v34  ;;  %v6951_v30 = vadd.f32 %v1790_v24, %v6695_v7  ;;  %v6954_v18 = vadd.f32 %v1791_v47, %v6698_v13  ;;  %v6957_v26 = vadd.f32 %v1792_v1, %v6701_v33  ;;  %v9367_v7 = vld [vmem:[#allocation55_spill] sm:$0xff]  ;;  %v9369_v13 = vld [vmem:[#allocation56_spill] sm:$0xff] }
 0x132   : > { %9354 = vst [vmem:[#allocation16_spill] sm:$0xff] %v6933_v28  ;;  %9355 = vst [vmem:[#allocation57_spill] sm:$0xff] %v6936_v25  ;;  %v6960_v46 = vadd.f32 %v1793_v11, %v6704_v50  ;;  %v6969_v45 = vadd.f32 %v1794_v0, %v6707_v3  ;;  %v6972_v51 = vadd.f32 %v1795_v39, %v9367_v7  ;;  %v6978_v33 = vld [vmem:[%s4488_s22 + $0xc8] sm:$0x1]  ;;  %v6981_v50 = vld [vmem:[%s4488_s22 + $0xd4] sm:$0x1] }
 0x133   : > { %9356 = vst [vmem:[#allocation18_spill] sm:$0xff] %v6939_v15  ;;  %9357 = vst [vmem:[#allocation63_spill] sm:$0xff] %v6942_v62  ;;  %v6975_v17 = vadd.f32 %v1796_v21, %v9369_v13  ;;  %v9373_v11 = vld [vmem:[#allocation2_spill] sm:$0xff]  ;;  %v6985_v44 = vadd.f32 %v1797_v42, %v9374_v5  ;;  %v9376_v3 = vld [vmem:[#allocation39_spill] sm:$0xff]  ;;  %v6991_v39 = vadd.f32 %v1799_v38, %v9378_v57 }
 0x134   : > { %9358 = vst [vmem:[#allocation21_spill] sm:$0xff] %v6945_v22  ;;  %9359 = vst [vmem:[#allocation64_spill] sm:$0xff] %v6948_v53  ;;  %v1874_v48 = vsub.s32 7, %v9373_v11  ;;  %v6988_v47 = vadd.f32 %v1798_v2, %v9376_v3  ;;  %v6994_v6 = vadd.f32 %v1800_v37, %v9380_v56  ;;  %v9385_v42 = vld [vmem:[#allocation67_spill] sm:$0xff]  ;;  %v7009_v60 = vadd.f32 %v1802_v12, %v9387_v31  ;;  %v7018_v21 = vld [vmem:[%s4488_s22 + $0x3c] sm:$0xe] }
 0x135   : > { %9360 = vst [vmem:[#allocation30_spill] sm:$0xff] %v6951_v30  ;;  %9361 = vst [vmem:[#allocation31_spill] sm:$0xff] %v6954_v18  ;;  %v7006_v16 = vadd.f32 %v1801_v20, %v9385_v42  ;;  %v9389_v38 = vld [vmem:[#allocation27_spill] sm:$0xff]  ;;  %v7024_v37 = vld [vmem:[%s4488_s22 + $0x54] sm:$0xe] }
 0x136   : > { %9362 = vst [vmem:[#allocation32_spill] sm:$0xff] %v6957_v26  ;;  %9363 = vst [vmem:[#allocation33_spill] sm:$0xff] %v6960_v46  ;;  %v7012_v24 = vadd.f32 %v1803_v29, %v9389_v38  ;;  %v9391_v1 = vld [vmem:[#allocation59_spill] sm:$0xff]  ;;  %v9396_v20 = vld [vmem:[#allocation12_spill] sm:$0xff] }
 0x137   : > { %9364 = vst [vmem:[#allocation34_spill] sm:$0xff] %v6963_v23  ;;  %9365 = vst [vmem:[#allocation35_spill] sm:$0xff] %v6966_v32  ;;  %v7015_v0 = vadd.f32 %v1804_v59, %v9391_v1  ;;  %v7021_v2 = vld [vmem:[%s4488_s22 + $0x48] sm:$0xe]  ;;  %v7027_v12 = vadd.f32 %v1805_v9, %v9396_v20  ;;  %v9398_v7 = vld [vmem:[#allocation61_spill] sm:$0xff] }
 0x138   : > { %9366 = vst [vmem:[#allocation36_spill] sm:$0xff] %v6969_v45  ;;  %9368 = vst [vmem:[#allocation37_spill] sm:$0xff] %v6972_v51  ;;  %v7030_v29 = vadd.f32 %v1806_v35, %v9398_v7  ;;  %v9400_v13 = vld [vmem:[#allocation15_spill] sm:$0xff]  ;;  %v7037_v3 = vld [vmem:[%s4488_s22 + $0x60] sm:$0xe] }
 0x139   : > { %9370 = vst [vmem:[#allocation38_spill] sm:$0xff] %v6975_v17  ;;  %9371 = vst [vmem:[#allocation40_spill] sm:$0xff] %v6978_v33  ;;  %v7033_v5 = vadd.f32 %v1807_v63, %v9400_v13  ;;  %v7040_v57 = vld [vmem:[%s4488_s22 + $0x6c] sm:$0xe]  ;;  %v7043_v56 = vld [vmem:[%s4488_s22 + $0x78] sm:$0xe] }
 0x13a   : > { %9372 = vst [vmem:[#allocation62_spill] sm:$0xff] %v6981_v50  ;;  %9375 = vst [vmem:[#allocation55_spill] sm:$0xff] %v6985_v44  ;;  %v9405_v38 = vld [vmem:[#allocation52_spill] sm:$0xff]  ;;  %v7052_v1 = vld [vmem:[%s4488_s22 + $0x84] sm:$0xe] }
 0x13b   : > { %9377 = vst [vmem:[#allocation56_spill] sm:$0xff] %v6988_v47  ;;  %9379 = vst [vmem:[#allocation26_spill] sm:$0xff] %v6991_v39  ;;  %v7049_v35 = vrot.slane %v9405_v38, %v1874_v48  ;;  %v7055_v63 = vld [vmem:[%s4488_s22 + $0x90] sm:$0xe]  ;;  %v7058_v20 = vld [vmem:[%s4488_s22 + $0x9c] sm:$0xe] }
 0x13c   : > { %9381 = vst [vmem:[#allocation39_spill] sm:$0xff] %v6994_v6  ;;  %9383 = vst [vmem:[#allocation46_spill] sm:$0xff] %v7000_v36  ;;  %v7061_v7 = vld [vmem:[%s4488_s22 + $0xa8] sm:$0xe]  ;;  %v7064_v13 = vld [vmem:[%s4488_s22 + $0xb4] sm:$0xe] }
 0x13d   : > { %9384 = vst [vmem:[#allocation77_spill] sm:$0xff] %v7003_v4  ;;  %9386 = vst [vmem:[#allocation67_spill] sm:$0xff] %v7006_v16  ;;  %v9411_v31 = vld [vmem:[#allocation41_spill] sm:$0xff]  ;;  %v9413_v48 = vld [vmem:[#allocation58_spill] sm:$0xff] }
 0x13e   : > { %9388 = vst [vmem:[#allocation51_spill] sm:$0xff] %v7009_v60  ;;  %9390 = vst [vmem:[#allocation27_spill] sm:$0xff] %v7012_v24  ;;  %v9412_v4 = vunpack.c.l.bf16 %v9411_v31  ;;  %v9418_v42 = vld [vmem:[#allocation48_spill] sm:$0xff]  ;;  %v9473_v34 = vld [vmem:[#allocation17_spill] sm:$0xff] }
 0x13f   : > { %9392 = vst [vmem:[#allocation59_spill] sm:$0xff] %v7015_v0  ;;  %9393 = vst [vmem:[#allocation78_spill] sm:$0xff] %v7018_v21  ;;  %v7095_v31 = vmul.f32 %v7049_v35, %v9418_v42  ;;  %v9421_v11 = vld [vmem:[#allocation44_spill] sm:$0xff] }
 0x140   : > { %9394 = vst [vmem:[#allocation79_spill] sm:$0xff] %v7021_v2  ;;  %9395 = vst [vmem:[#allocation80_spill] sm:$0xff] %v7024_v37  ;;  %v1876_v9 = vmul.f32 %v9412_v4, %v7049_v35  ;;  %v1877_v2 = vmul.f32 %v9413_v48, %v7049_v35  ;;  %v9419_v4 = vld [vmem:[#allocation72_spill] sm:$0xff]  ;;  %v9422_v38 = vunpack.c.l.bf16 %v9421_v11  ;;  %v9429_v11 = vld [vmem:[#allocation73_spill] sm:$0xff] }
 0x141   : > { %9397 = vst [vmem:[#allocation12_spill] sm:$0xff] %v7027_v12  ;;  %9399 = vst [vmem:[#allocation61_spill] sm:$0xff] %v7030_v29  ;;  %v9416_v12 = vld [vmem:[#allocation47_spill] sm:$0xff] }
 0x142   : > { %9401 = vst [vmem:[#allocation15_spill] sm:$0xff] %v7033_v5  ;;  %9402 = vst [vmem:[#allocation81_spill] sm:$0xff] %v7037_v3  ;;  %v9414_v5 = vld [vmem:[#allocation28_spill] sm:$0xff]  ;;  %v9426_v3 = vld [vmem:[#allocation10_spill] sm:$0xff]  ;;  %v1973_v28 = vrot.slane %v1877_v2, 1 }
 0x143   : > { %9403 = vst [vmem:[#allocation82_spill] sm:$0xff] %v7040_v57  ;;  %9404 = vst [vmem:[#allocation83_spill] sm:$0xff] %v7043_v56  ;;  %v9415_v57 = vunpack.c.l.bf16 %v9414_v5  ;;  %v9427_v37 = vunpack.c.l.bf16 %v9426_v3  ;;  %v9476_v2 = vld [vmem:[#allocation25_spill] sm:$0xff] }
 0x144   : > { %9406 = vst [vmem:[#allocation52_spill] sm:$0xff] %v7052_v1  ;;  %9407 = vst [vmem:[#allocation84_spill] sm:$0xff] %v7055_v63  ;;  %v9417_v1 = vunpack.c.l.bf16 %v9416_v12 }
 0x145   : > { %9408 = vst [vmem:[#allocation85_spill] sm:$0xff] %v7058_v20  ;;  %9409 = vst [vmem:[#allocation86_spill] sm:$0xff] %v7061_v7  ;;  %v1878_v29 = vmul.f32 %v7049_v35, %v9415_v57  ;;  %v9420_v20 = vunpack.c.l.bf16 %v9419_v4  ;;  %v9423_v57 = vld [vmem:[#allocation5_spill] sm:$0xff]  ;;  %v7119_v21 = vmul.f32 %v7049_v35, %v9427_v37 }
 0x146   : > { %9410 = vst [vmem:[#allocation87_spill] sm:$0xff] %v7064_v13  ;;  %v7091_v59 = vmul.f32 %v7049_v35, %v9417_v1  ;;  %v7105_v13 = vmul.f32 %v9422_v38, %v7049_v35  ;;  %v7109_v12 = vmul.f32 %v9423_v57, %v7049_v35  ;;  %v9424_v1 = vld [vmem:[#allocation70_spill] sm:$0xff]  ;;  %v9430_v38 = vunpack.c.l.bf16 %v9429_v11  ;;  %v9431_v57 = vld [vmem:[#allocation45_spill] sm:$0xff] }
 0x147   : > { %v7100_v63 = vmul.f32 %v7049_v35, %v9420_v20  ;;  %v9425_v7 = vunpack.c.l.bf16 %v9424_v1  ;;  %v9428_v20 = vld [vmem:[#allocation71_spill] sm:$0xff]  ;;  %v9432_v1 = vunpack.c.l.bf16 %v9431_v57  ;;  %v9434_v37 = vld [vmem:[#allocation29_spill] sm:$0xff] }
 0x148   : > { %v7123_v4 = vmul.f32 %v7049_v35, %v9428_v20  ;;  %v7128_v42 = vmul.f32 %v7049_v35, %v9430_v38  ;;  %v9435_v5 = vunpack.c.l.bf16 %v9434_v37  ;;  %v9436_v20 = vld [vmem:[#allocation60_spill] sm:$0xff]  ;;  %v9438_v38 = vld [vmem:[#allocation19_spill] sm:$0xff] }
 0x149   : > { %v7114_v56 = vmul.f32 %v7049_v35, %v9425_v7  ;;  %v7133_v36 = vmul.f32 %v9432_v1, %v7049_v35  ;;  %v9433_v7 = vld [vmem:[#allocation66_spill] sm:$0xff]  ;;  %v9437_v19 = vunpack.c.l.bf16 %v9436_v20  ;;  %v7151_v0 = vmul.f32 %v7049_v35, %v9438_v38  ;;  %v9439_v57 = vld [vmem:[#allocation75_spill] sm:$0xff]  ;;  %v9446_v38 = vld [vmem:[#allocation68_spill] sm:$0xff] }
 0x14a   : > { %v7137_v3 = vmul.f32 %v9433_v7, %v7049_v35  ;;  %v7142_v48 = vmul.f32 %v7049_v35, %v9435_v5  ;;  %v9440_v1 = vunpack.c.l.bf16 %v9439_v57  ;;  %v9441_v7 = vld [vmem:[#allocation53_spill] sm:$0xff]  ;;  %v9443_v5 = vld [vmem:[#allocation3_spill] sm:$0xff]  ;;  %v9447_v39 = vunpack.c.l.bf16 %v9446_v38 }
 0x14b   : > { %v7147_v11 = vmul.f32 %v7049_v35, %v9437_v19  ;;  %v9442_v37 = vunpack.c.l.bf16 %v9441_v7  ;;  %v7165_v20 = vmul.f32 %v9443_v5, %v7049_v35  ;;  %v9444_v19 = vld [vmem:[#allocation76_spill] sm:$0xff]  ;;  %v9449_v7 = vld [vmem:[#allocation7_spill] sm:$0xff]  ;;  %v9451_v5 = vld [vmem:[#allocation54_spill] sm:$0xff] }
 0x14c   : > { %v7156_v24 = vmul.f32 %v7049_v35, %v9440_v1  ;;  %v9445_v16 = vunpack.c.l.bf16 %v9444_v19  ;;  %v7175_v57 = vmul.f32 %v7049_v35, %v9447_v39  ;;  %v9448_v1 = vld [vmem:[#allocation22_spill] sm:$0xff]  ;;  %v9452_v19 = vunpack.c.l.bf16 %v9451_v5  ;;  %v9454_v39 = vld [vmem:[#allocation13_spill] sm:$0xff] }
 0x14d   : > { %v7161_v60 = vmul.f32 %v9442_v37, %v7049_v35  ;;  %v7179_v47 = vmul.f32 %v7049_v35, %v9448_v1  ;;  %v9450_v37 = vunpack.c.l.bf16 %v9449_v7  ;;  %v9455_v51 = vunpack.c.l.bf16 %v9454_v39  ;;  %v9456_v1 = vld [vmem:[#allocation4_spill] sm:$0xff]  ;;  %v9459_v5 = vld [vmem:[#allocation9_spill] sm:$0xff] }
 0x14e   : > { %v7170_v6 = vmul.f32 %v7049_v35, %v9445_v16  ;;  %v7189_v17 = vmul.f32 %v9452_v19, %v7049_v35  ;;  %v9453_v16 = vld [vmem:[#allocation20_spill] sm:$0xff]  ;;  %v9457_v46 = vunpack.c.l.bf16 %v9456_v1  ;;  %v9460_v19 = vunpack.c.l.bf16 %v9459_v5 }
 0x14f   : > { %v7184_v44 = vmul.f32 %v7049_v35, %v9450_v37  ;;  %v7193_v38 = vmul.f32 %v9453_v16, %v7049_v35  ;;  %v7198_v45 = vmul.f32 %v7049_v35, %v9455_v51  ;;  %v9458_v37 = vld [vmem:[#allocation74_spill] sm:$0xff]  ;;  %v9461_v16 = vld [vmem:[#allocation65_spill] sm:$0xff] }
 0x150   : > { %v7203_v7 = vmul.f32 %v7049_v35, %v9457_v46  ;;  %v7207_v26 = vmul.f32 %v7049_v35, %v9458_v37  ;;  %v7212_v18 = vmul.f32 %v7049_v35, %v9460_v19  ;;  %v9462_v39 = vunpack.c.l.bf16 %v9461_v16  ;;  %v9463_v51 = vld [vmem:[#allocation49_spill] sm:$0xff]  ;;  %v9464_v46 = vld [vmem:[#allocation11_spill] sm:$0xff]  ;;  %v9468_v19 = vld [vmem:[#allocation42_spill] sm:$0xff] }
 0x151   : > { %v7221_v1 = vmul.f32 %v9463_v51, %v7049_v35  ;;  %v9465_v53 = vunpack.c.l.bf16 %v9464_v46  ;;  %v9466_v37 = vld [vmem:[#allocation69_spill] sm:$0xff]  ;;  %v7235_v15 = vmul.f32 %v7049_v35, %v9468_v19  ;;  %v9469_v16 = vld [vmem:[#allocation23_spill] sm:$0xff]  ;;  %v9471_v46 = vunpack.c.l.bf16 %v6719_v52 }
 0x152   : > { %v7217_v30 = vmul.f32 %v9462_v39, %v7049_v35  ;;  %v9467_v62 = vunpack.c.l.bf16 %v9466_v37  ;;  %v9470_v39 = vunpack.c.l.bf16 %v9469_v16  ;;  %v1972_v19 = vrot.slane %v1876_v9, 1 }
 0x153   : > { %v7226_v22 = vmul.f32 %v7049_v35, %v9465_v53  ;;  %v7245_v51 = vmul.f32 %v9471_v46, %v7049_v35  ;;  %v7249_v53 = vmul.f32 %v6772_v43, %v7049_v35  ;;  %v1975_v16 = vrot.slane %v1878_v29, 1 }
 0x154   : > { %v7231_v5 = vmul.f32 %v7049_v35, %v9467_v62  ;;  %v7240_v25 = vmul.f32 %v7049_v35, %v9470_v39  ;;  %v9472_v62 = vunpack.c.l.bf16 %v6963_v23  ;;  %v9474_v39 = vunpack.c.l.bf16 %v9473_v34 }
 0x155   : > { %v7263_v52 = vmul.f32 %v7049_v35, %v6827_v40  ;;  %v9475_v46 = vunpack.c.l.bf16 %v6966_v32  ;;  %v7276_v29 = vmul.f32 %v9476_v2, %v7049_v35  ;;  %v9477_v34 = vunpack.c.l.bf16 %v6978_v33 }
 0x156   : > { %v7254_v37 = vmul.f32 %v7049_v35, %v9472_v62  ;;  %v7259_v8 = vmul.f32 %v7049_v35, %v9474_v39  ;;  %v7272_v62 = vmul.f32 %v9349_v58, %v7049_v35  ;;  %v9478_v39 = vunpack.c.l.bf16 %v6778_v61 }
 0x157   : > { %v7268_v43 = vmul.f32 %v7049_v35, %v9475_v46  ;;  %v7281_v9 = vmul.f32 %v7049_v35, %v9477_v34  ;;  %v7290_v46 = vmul.f32 %v7049_v35, %v6841_v49  ;;  %v9479_v58 = vunpack.c.l.bf16 %v6981_v50 }
 0x158   : > { %v7286_v32 = vmul.f32 %v7049_v35, %v9478_v39  ;;  %v1977_v2 = vrot.slane %v7091_v59, 1  ;;  %v1978_v33 = vrot.slane %v7095_v31, 1  ;;  %v1980_v34 = vrot.slane %v7100_v63, 1 }
 0x159   : > { %v7295_v40 = vmul.f32 %v7049_v35, %v9479_v58  ;;  %v7301_v61 = vsel %vm600_vm1, %v1972_v19, %v1973_v28  ;;  %v7304_v39 = vsel %vm600_vm1, %v1973_v28, %v1975_v16  ;;  %v1982_v49 = vrot.slane %v7105_v13, 1 }
 0x15a   : > { %v1983_v23 = vrot.slane %v7109_v12, 1  ;;  %v1985_v50 = vrot.slane %v7114_v56, 1  ;;  %v1987_v35 = vrot.slane %v7119_v21, 1  ;;  %v1988_v59 = vrot.slane %v7123_v4, 1 }
 0x15b   : > { %v1990_v31 = vrot.slane %v7128_v42, 1  ;;  %v1992_v63 = vrot.slane %v7133_v36, 1  ;;  %v1993_v19 = vrot.slane %v7137_v3, 1  ;;  %v1995_v58 = vrot.slane %v7142_v48, 1 }
 0x15c   : > { %v1997_v28 = vrot.slane %v7147_v11, 1  ;;  %v1998_v13 = vrot.slane %v7151_v0, 1  ;;  %v2000_v12 = vrot.slane %v7156_v24, 1  ;;  %v2002_v56 = vrot.slane %v7161_v60, 1 }
 0x15d   : > { %v2003_v21 = vrot.slane %v7165_v20, 1  ;;  %v2005_v4 = vrot.slane %v7170_v6, 1  ;;  %v2007_v42 = vrot.slane %v7175_v57, 1  ;;  %v2008_v36 = vrot.slane %v7179_v47, 1 }
 0x15e   : > { %v2010_v3 = vrot.slane %v7184_v44, 1  ;;  %v1979_v48 = vsel %vm600_vm1, %v1977_v2, %v1978_v33  ;;  %v1981_v11 = vsel %vm600_vm1, %v1978_v33, %v1980_v34  ;;  %v2012_v0 = vrot.slane %v7189_v17, 1 }
 0x15f   : > { %v2013_v24 = vrot.slane %v7193_v38, 1  ;;  %v1984_v60 = vsel %vm600_vm1, %v1982_v49, %v1983_v23  ;;  %v1986_v20 = vsel %vm600_vm1, %v1983_v23, %v1985_v50  ;;  %v1989_v6 = vsel %vm600_vm1, %v1987_v35, %v1988_v59 }
 0x160   : > { %v1991_v57 = vsel %vm600_vm1, %v1988_v59, %v1990_v31  ;;  %v1994_v47 = vsel %vm600_vm1, %v1992_v63, %v1993_v19  ;;  %v1996_v44 = vsel %vm600_vm1, %v1993_v19, %v1995_v58  ;;  %v1999_v16 = vsel %vm600_vm1, %v1997_v28, %v1998_v13 }
 0x161   : > { %v2001_v33 = vsel %vm600_vm1, %v1998_v13, %v2000_v12  ;;  %v2004_v17 = vsel %vm600_vm1, %v2002_v56, %v2003_v21  ;;  %v2006_v38 = vsel %vm600_vm1, %v2003_v21, %v2005_v4  ;;  %v2009_v49 = vsel %vm600_vm1, %v2007_v42, %v2008_v36 }
 0x162   : > { %v2011_v23 = vsel %vm600_vm1, %v2008_v36, %v2010_v3  ;;  %v2014_v50 = vsel %vm600_vm1, %v2012_v0, %v2013_v24  ;;  %v2015_v2 = vrot.slane %v7198_v45, 1  ;;  %v2017_v34 = vrot.slane %v7203_v7, 1 }
 0x163   : > { %v2018_v35 = vrot.slane %v7207_v26, 1  ;;  %v2020_v59 = vrot.slane %v7212_v18, 1  ;;  %v2022_v31 = vrot.slane %v7217_v30, 1  ;;  %v2023_v63 = vrot.slane %v7221_v1, 1 }
 0x164   : > { %v2025_v19 = vrot.slane %v7226_v22, 1  ;;  %v2027_v58 = vrot.slane %v7231_v5, 1  ;;  %v2028_v28 = vrot.slane %v7235_v15, 1  ;;  %v2030_v13 = vrot.slane %v7240_v25, 1 }
 0x165   : > { %v2032_v45 = vrot.slane %v7245_v51, 1  ;;  %v2033_v7 = vrot.slane %v7249_v53, 1  ;;  %v2035_v26 = vrot.slane %v7254_v37, 1  ;;  %v2037_v18 = vrot.slane %v7259_v8, 1 }
 0x166   : > { %v2038_v30 = vrot.slane %v7263_v52, 1  ;;  %v2040_v1 = vrot.slane %v7268_v43, 1  ;;  %v2042_v22 = vrot.slane %v7272_v62, 1  ;;  %v2043_v5 = vrot.slane %v7276_v29, 1 }
 0x167   : > { %v2045_v15 = vrot.slane %v7281_v9, 1  ;;  %v2016_v25 = vsel %vm600_vm1, %v2013_v24, %v2015_v2  ;;  %v2047_v51 = vrot.slane %v7286_v32, 1  ;;  %v2048_v53 = vrot.slane %v7290_v46, 1 }
 0x168   : > { %v2050_v37 = vrot.slane %v7295_v40, 1  ;;  %v2019_v8 = vsel %vm600_vm1, %v2017_v34, %v2018_v35  ;;  %v2021_v52 = vsel %vm600_vm1, %v2018_v35, %v2020_v59  ;;  %v2024_v43 = vsel %vm600_vm1, %v2022_v31, %v2023_v63  ;;  %v9481_v35 = vld [vmem:[#allocation14_spill] sm:$0xff] }
 0x169   : > { %v2026_v62 = vsel %vm600_vm1, %v2023_v63, %v2025_v19  ;;  %v2029_v29 = vsel %vm600_vm1, %v2027_v58, %v2028_v28  ;;  %v2031_v9 = vsel %vm600_vm1, %v2028_v28, %v2030_v13  ;;  %v2034_v12 = vsel %vm600_vm1, %v2032_v45, %v2033_v7 }
 0x16a   : > { %v2036_v32 = vsel %vm600_vm1, %v2033_v7, %v2035_v26  ;;  %v2039_v46 = vsel %vm600_vm1, %v2037_v18, %v2038_v30  ;;  %v2041_v40 = vsel %vm600_vm1, %v2038_v30, %v2040_v1  ;;  %v2044_v56 = vsel %vm600_vm1, %v2042_v22, %v2043_v5  ;;  %v7448_v18 = vld [vmem:[%s4488_s22 + $0xcc] sm:$0xe]  ;;  %v9513_v30 = vld [vmem:[#allocation56_spill] sm:$0xff]  ;;  %v9515_v22 = vld [vmem:[#allocation26_spill] sm:$0xff] }
 0x16b   : > { %v2046_v21 = vsel %vm600_vm1, %v2043_v5, %v2045_v15  ;;  %v2049_v4 = vsel %vm600_vm1, %v2047_v51, %v2048_v53  ;;  %v2051_v42 = vsel %vm600_vm1, %v2048_v53, %v2050_v37  ;;  %v7380_v36 = vadd.f32 %v7301_v61, %v6909_v41  ;;  %v9483_v41 = vld [vmem:[#allocation24_spill] sm:$0xff]  ;;  %v9517_v15 = vld [vmem:[#allocation39_spill] sm:$0xff] }
 0x16c   : > { %v7384_v3 = vadd.f32 %v7304_v39, %v6912_v55  ;;  %v7387_v0 = vadd.f32 %v1979_v48, %v6915_v27  ;;  %v7390_v24 = vadd.f32 %v1981_v11, %v6918_v54  ;;  %v7393_v2 = vadd.f32 %v1984_v60, %v6921_v14  ;;  %v9485_v55 = vld [vmem:[#allocation16_spill] sm:$0xff]  ;;  %v9487_v39 = vld [vmem:[#allocation57_spill] sm:$0xff]  ;;  %v9489_v48 = vld [vmem:[#allocation18_spill] sm:$0xff] }
 0x16d   : > { %v7396_v34 = vadd.f32 %v1986_v20, %v6924_v10  ;;  %v7399_v59 = vadd.f32 %v1989_v6, %v9481_v35  ;;  %v7402_v61 = vadd.f32 %v1991_v57, %v9483_v41  ;;  %v7405_v27 = vadd.f32 %v1994_v47, %v9485_v55  ;;  %v9491_v11 = vld [vmem:[#allocation63_spill] sm:$0xff]  ;;  %v9493_v60 = vld [vmem:[#allocation21_spill] sm:$0xff]  ;;  %v9495_v6 = vld [vmem:[#allocation64_spill] sm:$0xff] }
 0x16e   : > { %v7408_v54 = vadd.f32 %v1996_v44, %v9487_v39  ;;  %v7411_v14 = vadd.f32 %v1999_v16, %v9489_v48  ;;  %v7414_v10 = vadd.f32 %v2001_v33, %v9491_v11  ;;  %v7417_v20 = vadd.f32 %v2004_v17, %v9493_v60  ;;  %v9497_v57 = vld [vmem:[#allocation30_spill] sm:$0xff]  ;;  %v9499_v47 = vld [vmem:[#allocation31_spill] sm:$0xff]  ;;  %v9501_v44 = vld [vmem:[#allocation32_spill] sm:$0xff] }
 0x16f   : > { %9480 = vst [vmem:[#allocation41_spill] sm:$0xff] %v7396_v34  ;;  %9482 = vst [vmem:[#allocation47_spill] sm:$0xff] %v7399_v59  ;;  %v7420_v31 = vadd.f32 %v2006_v38, %v9495_v6  ;;  %v7423_v63 = vadd.f32 %v2009_v49, %v9497_v57  ;;  %v7426_v19 = vadd.f32 %v2011_v23, %v9499_v47  ;;  %v9503_v16 = vld [vmem:[#allocation33_spill] sm:$0xff]  ;;  %v9505_v33 = vld [vmem:[#allocation36_spill] sm:$0xff]  ;;  %v2147_v48 = vunpack.c.l.bf16 %v7448_v18 }
 0x170   : > { %9484 = vst [vmem:[#allocation44_spill] sm:$0xff] %v7402_v61  ;;  %9486 = vst [vmem:[#allocation10_spill] sm:$0xff] %v7405_v27  ;;  %v7429_v58 = vadd.f32 %v2014_v50, %v9501_v44  ;;  %v7432_v28 = vadd.f32 %v2016_v25, %v9503_v16  ;;  %v7435_v13 = vadd.f32 %v2019_v8, %v9505_v33  ;;  %v9507_v17 = vld [vmem:[#allocation37_spill] sm:$0xff]  ;;  %v9509_v38 = vld [vmem:[#allocation38_spill] sm:$0xff] }
 0x171   : > { %9488 = vst [vmem:[#allocation45_spill] sm:$0xff] %v7408_v54  ;;  %9490 = vst [vmem:[#allocation60_spill] sm:$0xff] %v7411_v14  ;;  %v7438_v45 = vadd.f32 %v2021_v52, %v9507_v17  ;;  %v7441_v7 = vadd.f32 %v2024_v43, %v9509_v38  ;;  %v9511_v49 = vld [vmem:[#allocation55_spill] sm:$0xff]  ;;  %v3753_v23 = vld [vmem:[%s4488_s22 + $0xc0] sm:$0xe]  ;;  %v7456_v1 = vadd.f32 %v2029_v29, %v9513_v30 }
 0x172   : > { %9492 = vst [vmem:[#allocation53_spill] sm:$0xff] %v7414_v10  ;;  %9494 = vst [vmem:[#allocation68_spill] sm:$0xff] %v7417_v20  ;;  %v7444_v26 = vadd.f32 %v2026_v62, %v9511_v49  ;;  %v7453_v50 = vld [vmem:[%s8552_s1 + $0x8] ss:$0 sm:$0xff]  ;;  %v7459_v5 = vadd.f32 %v2031_v9, %v9515_v22  ;;  %v7462_v25 = vadd.f32 %v2034_v12, %v9517_v15  ;;  %v9527_v29 = vld [vmem:[#allocation12_spill] sm:$0xff] }
 0x173   : > { %9496 = vst [vmem:[#allocation54_spill] sm:$0xff] %v7420_v31  ;;  %9498 = vst [vmem:[#allocation4_spill] sm:$0xff] %v7423_v63  ;;  %v9519_v51 = vld [vmem:[#allocation67_spill] sm:$0xff]  ;;  %v7477_v41 = vadd.f32 %v2046_v21, %v9527_v29  ;;  %v9529_v9 = vld [vmem:[#allocation61_spill] sm:$0xff] }
 0x174   : > { %9500 = vst [vmem:[#allocation65_spill] sm:$0xff] %v7426_v19  ;;  %9502 = vst [vmem:[#allocation69_spill] sm:$0xff] %v7429_v58  ;;  %v7465_v53 = vadd.f32 %v2036_v32, %v9519_v51  ;;  %v9521_v37 = vld [vmem:[#allocation51_spill] sm:$0xff]  ;;  %v7480_v55 = vadd.f32 %v2049_v4, %v9529_v9  ;;  %v2146_v32 = vunpack.c.l.bf16 %v3753_v23  ;;  %v9536_v21 = vld [vmem:[#allocation28_spill] sm:$0xff] }
 0x175   : > { %9504 = vst [vmem:[#allocation17_spill] sm:$0xff] %v7432_v28  ;;  %9506 = vst [vmem:[#allocation14_spill] sm:$0xff] %v7435_v13  ;;  %v7468_v8 = vadd.f32 %v2039_v46, %v9521_v37  ;;  %v9523_v52 = vld [vmem:[#allocation27_spill] sm:$0xff]  ;;  %v9533_v46 = vld [vmem:[#allocation8_spill] sm:$0xff]  ;;  %v9537_v6 = vunpack.c.l.bf16 %v9536_v21 }
 0x176   : > { %9508 = vst [vmem:[#allocation24_spill] sm:$0xff] %v7438_v45  ;;  %9510 = vst [vmem:[#allocation16_spill] sm:$0xff] %v7441_v7  ;;  %v7471_v43 = vadd.f32 %v2041_v40, %v9523_v52  ;;  %v9525_v62 = vld [vmem:[#allocation59_spill] sm:$0xff]  ;;  %v9534_v11 = vunpack.c.l.bf16 %v9533_v46  ;;  %v9538_v57 = vld [vmem:[#allocation46_spill] sm:$0xff] }
 0x177   : > { %9512 = vst [vmem:[#allocation57_spill] sm:$0xff] %v7444_v26  ;;  %9514 = vst [vmem:[#allocation18_spill] sm:$0xff] %v7456_v1  ;;  %v7474_v35 = vadd.f32 %v2044_v56, %v9525_v62  ;;  %v9531_v12 = vld [vmem:[#allocation15_spill] sm:$0xff]  ;;  %v9535_v56 = vld [vmem:[#allocation58_spill] sm:$0xff]  ;;  %v7498_v4 = vmul.f32 %v7453_v50, %v9537_v6 }
 0x178   : > { %9516 = vst [vmem:[#allocation63_spill] sm:$0xff] %v7459_v5  ;;  %9518 = vst [vmem:[#allocation21_spill] sm:$0xff] %v7462_v25  ;;  %v7483_v39 = vadd.f32 %v2051_v42, %v9531_v12  ;;  %v7489_v40 = vmul.f32 %v7453_v50, %v9534_v11  ;;  %v7493_v60 = vmul.f32 %v9535_v56, %v7453_v50  ;;  %v9539_v42 = vunpack.c.l.bf16 %v9538_v57  ;;  %v9540_v44 = vld [vmem:[#allocation48_spill] sm:$0xff]  ;;  %v9543_v49 = vld [vmem:[#allocation77_spill] sm:$0xff] }
 0x179   : > { %9520 = vst [vmem:[#allocation64_spill] sm:$0xff] %v7465_v53  ;;  %9522 = vst [vmem:[#allocation30_spill] sm:$0xff] %v7468_v8  ;;  %v7507_v16 = vmul.f32 %v7453_v50, %v9540_v44  ;;  %v9541_v33 = vld [vmem:[#allocation72_spill] sm:$0xff]  ;;  %v9544_v23 = vunpack.c.l.bf16 %v9543_v49  ;;  %v9545_v30 = vld [vmem:[#allocation5_spill] sm:$0xff] }
 0x17a   : > { %9524 = vst [vmem:[#allocation31_spill] sm:$0xff] %v7471_v43  ;;  %9526 = vst [vmem:[#allocation32_spill] sm:$0xff] %v7474_v35  ;;  %v7503_v47 = vmul.f32 %v7453_v50, %v9539_v42  ;;  %v9542_v17 = vunpack.c.l.bf16 %v9541_v33  ;;  %v7521_v22 = vmul.f32 %v9545_v30, %v7453_v50  ;;  %v9546_v15 = vld [vmem:[#allocation70_spill] sm:$0xff]  ;;  %v9550_v9 = vld [vmem:[#allocation71_spill] sm:$0xff]  ;;  %v2249_v54 = vrot.slane %v7493_v60, 2 }
 0x17b   : > { %9528 = vst [vmem:[#allocation33_spill] sm:$0xff] %v7477_v41  ;;  %9530 = vst [vmem:[#allocation36_spill] sm:$0xff] %v7480_v55  ;;  %v7517_v18 = vmul.f32 %v7453_v50, %v9544_v23  ;;  %v9547_v51 = vunpack.c.l.bf16 %v9546_v15  ;;  %v9548_v52 = vld [vmem:[#allocation78_spill] sm:$0xff]  ;;  %v7535_v12 = vmul.f32 %v7453_v50, %v9550_v9  ;;  %v9551_v46 = vld [vmem:[#allocation73_spill] sm:$0xff] }
 0x17c   : > { %9532 = vst [vmem:[#allocation37_spill] sm:$0xff] %v7483_v39  ;;  %v7512_v38 = vmul.f32 %v7453_v50, %v9542_v17  ;;  %v9549_v62 = vunpack.c.l.bf16 %v9548_v52  ;;  %v9552_v11 = vunpack.c.l.bf16 %v9551_v46  ;;  %v9553_v21 = vld [vmem:[#allocation79_spill] sm:$0xff]  ;;  %v9555_v42 = vld [vmem:[#allocation66_spill] sm:$0xff]  ;;  %v9556_v33 = vld [vmem:[#allocation29_spill] sm:$0xff]  ;;  %v2259_v61 = vrot.slane %v7521_v22, 2 }
 0x17d   : > { %v7526_v37 = vmul.f32 %v7453_v50, %v9547_v51  ;;  %v9554_v6 = vunpack.c.l.bf16 %v9553_v21  ;;  %v7549_v44 = vmul.f32 %v9555_v42, %v7453_v50  ;;  %v9557_v17 = vunpack.c.l.bf16 %v9556_v33  ;;  %v9558_v23 = vld [vmem:[#allocation80_spill] sm:$0xff]  ;;  %v9560_v51 = vld [vmem:[#allocation19_spill] sm:$0xff]  ;;  %v9606_v59 = vld [vmem:[#allocation50_spill] sm:$0xff] }
 0x17e   : > { %v7531_v29 = vmul.f32 %v7453_v50, %v9549_v62  ;;  %v7540_v56 = vmul.f32 %v7453_v50, %v9552_v11  ;;  %v9559_v30 = vunpack.c.l.bf16 %v9558_v23  ;;  %v7563_v52 = vmul.f32 %v7453_v50, %v9560_v51  ;;  %v9561_v62 = vld [vmem:[#allocation75_spill] sm:$0xff]  ;;  %v9563_v11 = vld [vmem:[#allocation81_spill] sm:$0xff]  ;;  %v9568_v51 = vld [vmem:[#allocation82_spill] sm:$0xff] }
 0x17f   : > { %v7545_v57 = vmul.f32 %v7453_v50, %v9554_v6  ;;  %v7554_v49 = vmul.f32 %v7453_v50, %v9557_v17  ;;  %v9562_v9 = vunpack.c.l.bf16 %v9561_v62  ;;  %v9564_v21 = vunpack.c.l.bf16 %v9563_v11  ;;  %v9565_v42 = vld [vmem:[#allocation3_spill] sm:$0xff]  ;;  %v9566_v17 = vld [vmem:[#allocation76_spill] sm:$0xff] }
 0x180   : > { %v7559_v15 = vmul.f32 %v7453_v50, %v9559_v30  ;;  %v7575_v33 = vmul.f32 %v9565_v42, %v7453_v50  ;;  %v9567_v23 = vunpack.c.l.bf16 %v9566_v17  ;;  %v9569_v39 = vunpack.c.l.bf16 %v9568_v51  ;;  %v9573_v42 = vld [vmem:[#allocation83_spill] sm:$0xff] }
 0x181   : > { %v2169_v46 = vmul.f32 %v7453_v50, %v9562_v9  ;;  %v7571_v6 = vmul.f32 %v7453_v50, %v9564_v21  ;;  %v9570_v9 = vld [vmem:[#allocation22_spill] sm:$0xff]  ;;  %v9571_v21 = vld [vmem:[#allocation7_spill] sm:$0xff]  ;;  %v9574_v35 = vunpack.c.l.bf16 %v9573_v42  ;;  %v2256_v27 = vrot.slane %v7512_v38, 2 }
 0x182   : > { %v7580_v30 = vmul.f32 %v7453_v50, %v9567_v23  ;;  %v7585_v62 = vmul.f32 %v7453_v50, %v9569_v39  ;;  %v7589_v11 = vmul.f32 %v7453_v50, %v9570_v9  ;;  %v9572_v55 = vunpack.c.l.bf16 %v9571_v21  ;;  %v9575_v23 = vld [vmem:[#allocation20_spill] sm:$0xff]  ;;  %v9576_v39 = vld [vmem:[#allocation13_spill] sm:$0xff] }
 0x183   : > { %v7599_v17 = vmul.f32 %v7453_v50, %v9574_v35  ;;  %v7603_v51 = vmul.f32 %v9575_v23, %v7453_v50  ;;  %v9577_v43 = vunpack.c.l.bf16 %v9576_v39  ;;  %v9578_v9 = vld [vmem:[#allocation52_spill] sm:$0xff]  ;;  %v9581_v35 = vld [vmem:[#allocation9_spill] sm:$0xff]  ;;  %v2266_v60 = vrot.slane %v7540_v56, 2 }
 0x184   : > { %v7594_v41 = vmul.f32 %v7453_v50, %v9572_v55  ;;  %v9579_v53 = vunpack.c.l.bf16 %v9578_v9  ;;  %v9580_v55 = vld [vmem:[#allocation74_spill] sm:$0xff]  ;;  %v9582_v25 = vunpack.c.l.bf16 %v9581_v35  ;;  %v9583_v23 = vld [vmem:[#allocation84_spill] sm:$0xff]  ;;  %v7708_v38 = vmul.f32 %v7453_v50, %v2147_v48 }
 0x185   : > { %v7608_v8 = vmul.f32 %v7453_v50, %v9577_v43  ;;  %v7617_v42 = vmul.f32 %v7453_v50, %v9580_v55  ;;  %v9584_v1 = vunpack.c.l.bf16 %v9583_v23  ;;  %v9585_v43 = vld [vmem:[#allocation49_spill] sm:$0xff]  ;;  %v2274_v22 = vrot.slane %v7563_v52, 2 }
 0x186   : > { %v7613_v21 = vmul.f32 %v7453_v50, %v9579_v53  ;;  %v7622_v5 = vmul.f32 %v7453_v50, %v9582_v25  ;;  %v7631_v9 = vmul.f32 %v9585_v43, %v7453_v50  ;;  %v9586_v53 = vld [vmem:[#allocation11_spill] sm:$0xff]  ;;  %v9588_v55 = vld [vmem:[#allocation85_spill] sm:$0xff]  ;;  %v9590_v25 = vld [vmem:[#allocation42_spill] sm:$0xff] }
 0x187   : > { %v7627_v39 = vmul.f32 %v7453_v50, %v9584_v1  ;;  %v9587_v26 = vunpack.c.l.bf16 %v9586_v53  ;;  %v9589_v45 = vunpack.c.l.bf16 %v9588_v55  ;;  %v7645_v23 = vmul.f32 %v7453_v50, %v9590_v25  ;;  %v9591_v1 = vld [vmem:[#allocation23_spill] sm:$0xff]  ;;  %v9593_v43 = vld [vmem:[#allocation86_spill] sm:$0xff] }
 0x188   : > { %v9592_v13 = vunpack.c.l.bf16 %v9591_v1  ;;  %v9594_v58 = vunpack.c.l.bf16 %v9593_v43  ;;  %v9598_v25 = vld [vmem:[#allocation87_spill] sm:$0xff] }
 0x189   : > { %v7636_v7 = vmul.f32 %v7453_v50, %v9587_v26  ;;  %v7641_v35 = vmul.f32 %v7453_v50, %v9589_v45  ;;  %v9595_v26 = vld [vmem:[#allocation43_spill] sm:$0xff]  ;;  %v9596_v45 = vld [vmem:[#allocation34_spill] sm:$0xff]  ;;  %v9599_v31 = vunpack.c.l.bf16 %v9598_v25  ;;  %v9604_v25 = vld [vmem:[#allocation40_spill] sm:$0xff] }
 0x18a   : > { %v7650_v28 = vmul.f32 %v7453_v50, %v9592_v13  ;;  %v7655_v53 = vmul.f32 %v7453_v50, %v9594_v58  ;;  %v7659_v55 = vmul.f32 %v9595_v26, %v7453_v50  ;;  %v9597_v19 = vunpack.c.l.bf16 %v9596_v45  ;;  %v9600_v13 = vld [vmem:[#allocation6_spill] sm:$0xff]  ;;  %v9601_v58 = vld [vmem:[#allocation35_spill] sm:$0xff] }
 0x18b   : > { %v7669_v1 = vmul.f32 %v7453_v50, %v9599_v31  ;;  %v7673_v43 = vmul.f32 %v7453_v50, %v9600_v13  ;;  %v9602_v20 = vunpack.c.l.bf16 %v9601_v58  ;;  %v7681_v26 = vmul.f32 %v7453_v50, %v2146_v32 }
 0x18c   : > { %v7664_v63 = vmul.f32 %v7453_v50, %v9597_v19  ;;  %v9603_v19 = vld [vmem:[#allocation25_spill] sm:$0xff]  ;;  %v9605_v14 = vunpack.c.l.bf16 %v9604_v25  ;;  %v2248_v13 = vrot.slane %v7489_v40, 2  ;;  %v2251_v58 = vrot.slane %v7498_v4, 2 }
 0x18d   : > { %v7678_v10 = vmul.f32 %v7453_v50, %v9602_v20  ;;  %v7685_v45 = vmul.f32 %v9603_v19, %v7453_v50  ;;  %v2253_v20 = vrot.slane %v7503_v47, 2  ;;  %v2254_v32 = vrot.slane %v7507_v16, 2 }
 0x18e   : > { %v7690_v31 = vmul.f32 %v7453_v50, %v9605_v14  ;;  %v2258_v19 = vrot.slane %v7517_v18, 2  ;;  %v2261_v25 = vrot.slane %v7526_v37, 2  ;;  %v2263_v14 = vrot.slane %v7531_v29, 2 }
 0x18f   : > { %v2264_v40 = vrot.slane %v7535_v12, 2  ;;  %v2268_v4 = vrot.slane %v7545_v57, 2  ;;  %v2269_v47 = vrot.slane %v7549_v44, 2  ;;  %v2271_v16 = vrot.slane %v7554_v49, 2  ;;  %v9607_v12 = vld [vmem:[#allocation62_spill] sm:$0xff] }
 0x190   : > { %v2273_v18 = vrot.slane %v7559_v15, 2  ;;  %v2276_v37 = vrot.slane %v2169_v46, 2  ;;  %v7714_v29 = vmul.f32 %v7453_v50, %v9606_v59  ;;  %v9608_v56 = vunpack.c.l.bf16 %v9607_v12 }
 0x191   : > { %v2250_v44 = vsel %vm877_vm2, %v2248_v13, %v2249_v54  ;;  %v2252_v49 = vsel %vm877_vm2, %v2249_v54, %v2251_v58  ;;  %v2255_v48 = vsel %vm877_vm2, %v2253_v20, %v2254_v32  ;;  %v2257_v15 = vsel %vm877_vm2, %v2254_v32, %v2256_v27 }
 0x192   : > { %v7719_v57 = vmul.f32 %v7453_v50, %v9608_v56  ;;  %v2260_v52 = vsel %vm877_vm2, %v2258_v19, %v2259_v61  ;;  %v2262_v46 = vsel %vm877_vm2, %v2259_v61, %v2261_v25  ;;  %v2265_v59 = vsel %vm877_vm2, %v2263_v14, %v2264_v40 }
 0x193   : > { %v2267_v34 = vsel %vm877_vm2, %v2264_v40, %v2266_v60  ;;  %v7730_v12 = vsel %vm877_vm2, %v2268_v4, %v2269_v47  ;;  %v7733_v50 = vsel %vm877_vm2, %v2269_v47, %v2271_v16  ;;  %v7736_v54 = vsel %vm877_vm2, %v2273_v18, %v2274_v22 }
 0x194   : > { %v7739_v13 = vsel %vm877_vm2, %v2274_v22, %v2276_v37  ;;  %v2278_v27 = vrot.slane %v7571_v6, 2  ;;  %v2279_v61 = vrot.slane %v7575_v33, 2  ;;  %v2281_v58 = vrot.slane %v7580_v30, 2 }
 0x195   : > { %v2283_v20 = vrot.slane %v7585_v62, 2  ;;  %v2284_v32 = vrot.slane %v7589_v11, 2  ;;  %v2286_v19 = vrot.slane %v7594_v41, 2  ;;  %v2288_v25 = vrot.slane %v7599_v17, 2 }
 0x196   : > { %v2289_v14 = vrot.slane %v7603_v51, 2  ;;  %v2291_v40 = vrot.slane %v7608_v8, 2  ;;  %v2293_v60 = vrot.slane %v7613_v21, 2  ;;  %v2294_v6 = vrot.slane %v7617_v42, 2 }
 0x197   : > { %v2296_v33 = vrot.slane %v7622_v5, 2  ;;  %v2298_v30 = vrot.slane %v7627_v39, 2  ;;  %v2299_v62 = vrot.slane %v7631_v9, 2  ;;  %v2301_v11 = vrot.slane %v7636_v7, 2 }
 0x198   : > { %v2303_v41 = vrot.slane %v7641_v35, 2  ;;  %v2304_v17 = vrot.slane %v7645_v23, 2  ;;  %v2306_v51 = vrot.slane %v7650_v28, 2  ;;  %v2280_v8 = vsel %vm877_vm2, %v2278_v27, %v2279_v61 }
 0x199   : > { %v2282_v21 = vsel %vm877_vm2, %v2279_v61, %v2281_v58  ;;  %v7762_v42 = vsel %vm877_vm2, %v2283_v20, %v2284_v32  ;;  %v7765_v5 = vsel %vm877_vm2, %v2284_v32, %v2286_v19  ;;  %v7768_v39 = vsel %vm877_vm2, %v2288_v25, %v2289_v14  ;;  %v9610_v32 = vld [vmem:[#allocation47_spill] sm:$0xff] }
 0x19a   : > { %v2308_v7 = vrot.slane %v7655_v53, 2  ;;  %v2309_v9 = vrot.slane %v7659_v55, 2  ;;  %v2311_v35 = vrot.slane %v7664_v63, 2  ;;  %v7774_v28 = vsel %vm877_vm2, %v2289_v14, %v2291_v40 }
 0x19b   : > { %v7777_v23 = vsel %vm877_vm2, %v2293_v60, %v2294_v6  ;;  %v7780_v4 = vsel %vm877_vm2, %v2294_v6, %v2296_v33  ;;  %v7783_v47 = vsel %vm877_vm2, %v2298_v30, %v2299_v62  ;;  %v7786_v16 = vsel %vm877_vm2, %v2299_v62, %v2301_v11  ;;  %v9613_v60 = vld [vmem:[#allocation45_spill] sm:$0xff]  ;;  %v9614_v30 = vld [vmem:[#allocation60_spill] sm:$0xff] }
 0x19c   : > { %v7789_v53 = vsel %vm877_vm2, %v2303_v41, %v2304_v17  ;;  %v7792_v63 = vsel %vm877_vm2, %v2304_v17, %v2306_v51  ;;  %v2313_v55 = vrot.slane %v7669_v1, 2  ;;  %v2314_v18 = vrot.slane %v7673_v43, 2  ;;  %v7810_v1 = vld [vmem:[%s8553_s2] ss:$0 sm:$0xff]  ;;  %v9615_v17 = vld [vmem:[#allocation53_spill] sm:$0xff] }
 0x19d   : > { %v2316_v22 = vrot.slane %v7678_v10, 2  ;;  %v2360_v37 = vadd.f32 %v2250_v44, %v7380_v36  ;;  %v2361_v56 = vadd.f32 %v2252_v49, %v7384_v3  ;;  %v7800_v27 = vsel %vm877_vm2, %v2308_v7, %v2309_v9 }
 0x19e   : > { %v7803_v61 = vsel %vm877_vm2, %v2309_v9, %v2311_v35  ;;  %v2362_v58 = vadd.f32 %v2255_v48, %v7387_v0  ;;  %v2363_v20 = vadd.f32 %v2257_v15, %v7390_v24  ;;  %v2318_v10 = vrot.slane %v7681_v26, 2  ;;  %v9609_v24 = vld [vmem:[#allocation41_spill] sm:$0xff]  ;;  %v9616_v35 = vld [vmem:[#allocation68_spill] sm:$0xff] }
 0x19f   : > { %v2319_v36 = vrot.slane %v7685_v45, 2  ;;  %v2321_v3 = vrot.slane %v7690_v31, 2  ;;  %v2364_v43 = vadd.f32 %v2260_v52, %v7393_v2  ;;  %v2323_v44 = vrot.slane %v7708_v38, 2  ;;  %v9611_v31 = vld [vmem:[#allocation44_spill] sm:$0xff] }
 0x1a0   : > { %v2324_v49 = vrot.slane %v7714_v29, 2  ;;  %v2326_v0 = vrot.slane %v7719_v57, 2  ;;  %v2365_v48 = vadd.f32 %v2262_v46, %v9609_v24  ;;  %v7821_v15 = vsel %vm877_vm2, %v2313_v55, %v2314_v18  ;;  %v9621_v24 = vld [vmem:[#allocation17_spill] sm:$0xff] }
 0x1a1   : > { %v2366_v19 = vadd.f32 %v2265_v59, %v9610_v32  ;;  %v7825_v26 = vadd.f32 %v7810_v1, %v2360_v37  ;;  %v7828_v45 = vadd.f32 %v7810_v1, %v2361_v56  ;;  %v7831_v2 = vsel %vm877_vm2, %v2314_v18, %v2316_v22  ;;  %v9612_v59 = vld [vmem:[#allocation10_spill] sm:$0xff] }
 0x1a2   : > { %v2367_v38 = vadd.f32 %v2267_v34, %v9611_v31  ;;  %v7835_v29 = vadd.f32 %v7810_v1, %v2362_v58  ;;  %v7838_v57 = vadd.f32 %v7810_v1, %v2363_v20  ;;  %v7841_v52 = vsel %vm877_vm2, %v2318_v10, %v2319_v36  ;;  %v9617_v22 = vld [vmem:[#allocation54_spill] sm:$0xff]  ;;  %v9618_v58 = vld [vmem:[#allocation4_spill] sm:$0xff] }
 0x1a3   : > { %v7844_v46 = vsel %vm877_vm2, %v2319_v36, %v2321_v3  ;;  %v2368_v25 = vadd.f32 %v7730_v12, %v9612_v59  ;;  %v7849_v14 = vadd.f32 %v7810_v1, %v2364_v43  ;;  %v7852_v34 = vsel %vm877_vm2, %v2323_v44, %v2324_v49  ;;  %v9619_v36 = vld [vmem:[#allocation65_spill] sm:$0xff]  ;;  %v9623_v59 = vld [vmem:[#allocation24_spill] sm:$0xff] }
 0x1a4   : > { %v7855_v40 = vsel %vm877_vm2, %v2324_v49, %v2326_v0  ;;  %v2369_v6 = vadd.f32 %v7733_v50, %v9613_v60  ;;  %v7860_v33 = vadd.f32 %v7810_v1, %v2365_v48  ;;  %v2370_v62 = vadd.f32 %v7736_v54, %v9614_v30  ;;  %v9620_v44 = vld [vmem:[#allocation69_spill] sm:$0xff] }
 0x1a5   : > { %v7865_v12 = vadd.f32 %v7810_v1, %v2366_v19  ;;  %v3757_v11 = vmul.f32 -1.442695, %v7825_v26  ;;  %v3758_v41 = vmul.f32 -1.442695, %v7828_v45  ;;  %v2371_v51 = vadd.f32 %v7739_v13, %v9615_v17  ;;  %v9622_v19 = vld [vmem:[#allocation14_spill] sm:$0xff] }
 0x1a6   : > { %v7872_v7 = vadd.f32 %v7810_v1, %v2367_v38  ;;  %v3759_v50 = vmul.f32 -1.442695, %v7835_v29  ;;  %v3760_v9 = vmul.f32 -1.442695, %v7838_v57  ;;  %v2372_v55 = vadd.f32 %v2280_v8, %v9616_v35 }
 0x1a7   : > { %v7878_v54 = vadd.f32 %v7810_v1, %v2368_v25  ;;  %4131 = vpow2.f32 %v3757_v11  ;;  %v3761_v18 = vmul.f32 -1.442695, %v7849_v14  ;;  %v2373_v37 = vadd.f32 %v2282_v21, %v9617_v22  ;;  %v9625_v11 = vld [vmem:[#allocation57_spill] sm:$0xff] }
 0x1a8   : > { %v7883_v56 = vadd.f32 %v7810_v1, %v2369_v6  ;;  %4133 = vpow2.f32 %v3758_v41  ;;  %v3762_v13 = vmul.f32 -1.442695, %v7860_v33  ;;  %v2374_v20 = vadd.f32 %v7762_v42, %v9618_v58  ;;  %v9624_v6 = vld [vmem:[#allocation16_spill] sm:$0xff] }
 0x1a9   : > { %v7889_v10 = vadd.f32 %v7810_v1, %v2370_v62  ;;  %4135 = vpow2.f32 %v3759_v50  ;;  %v3763_v8 = vmul.f32 -1.442695, %v7865_v12  ;;  %v2375_v3 = vadd.f32 %v7765_v5, %v9619_v36  ;;  %v9626_v50 = vld [vmem:[#allocation18_spill] sm:$0xff] }
 0x1aa   : > { %v7895_v21 = vadd.f32 %v7810_v1, %v2371_v51  ;;  %4137 = vpow2.f32 %v3760_v9  ;;  %v3764_v43 = vmul.f32 -1.442695, %v7872_v7  ;;  %v2376_v49 = vadd.f32 %v7768_v39, %v9620_v44 }
 0x1ab   : > { %v7901_v42 = vadd.f32 %v7810_v1, %v2372_v55  ;;  %4139 = vpow2.f32 %v3761_v18  ;;  %v3765_v0 = vmul.f32 -1.442695, %v7878_v54  ;;  %v2377_v48 = vadd.f32 %v7774_v28, %v9621_v24 }
 0x1ac   : > { %v7907_v5 = vadd.f32 %v7810_v1, %v2373_v37  ;;  %4141 = vpow2.f32 %v3762_v13  ;;  %v3766_v32 = vmul.f32 -1.442695, %v7883_v56  ;;  %v2378_v31 = vadd.f32 %v7777_v23, %v9622_v19 }
 0x1ad   : > { %v7913_v39 = vadd.f32 %v7810_v1, %v2374_v20  ;;  %4143 = vpow2.f32 %v3763_v8  ;;  %v3767_v38 = vmul.f32 -1.442695, %v7889_v10  ;;  %v2379_v25 = vadd.f32 %v7780_v4, %v9623_v59 }
 0x1ae   : > { %v7919_v28 = vadd.f32 %v7810_v1, %v2375_v3  ;;  %4145 = vpow2.f32 %v3764_v43  ;;  %v3768_v60 = vmul.f32 -1.442695, %v7895_v21  ;;  %v2380_v30 = vadd.f32 %v7783_v47, %v9624_v6 }
 0x1af   : > { %v7925_v23 = vadd.f32 %v7810_v1, %v2376_v49  ;;  %4147 = vpow2.f32 %v3765_v0  ;;  %v3769_v62 = vmul.f32 -1.442695, %v7901_v42  ;;  %v2381_v41 = vadd.f32 %v7786_v16, %v9625_v11  ;;  %v9627_v16 = vld [vmem:[#allocation63_spill] sm:$0xff] }
 0x1b0   : > { %v7931_v4 = vadd.f32 %v7810_v1, %v2377_v48  ;;  %4149 = vpow2.f32 %v3766_v32  ;;  %v3770_v17 = vmul.f32 -1.442695, %v7907_v5  ;;  %v2382_v47 = vadd.f32 %v7789_v53, %v9626_v50  ;;  %v9628_v53 = vld [vmem:[#allocation21_spill] sm:$0xff]  ;;  %v9635_v50 = vld [vmem:[#allocation36_spill] sm:$0xff] }
 0x1b1   : > { %v7934_v51 = vpop.eup %4131  ;;  %v7939_v9 = vadd.f32 %v7810_v1, %v2378_v31  ;;  %4151 = vpow2.f32 %v3767_v38  ;;  %v3771_v35 = vmul.f32 -1.442695, %v7913_v39  ;;  %v2383_v18 = vadd.f32 %v7792_v63, %v9627_v16  ;;  %v9629_v63 = vld [vmem:[#allocation64_spill] sm:$0xff] }
 0x1b2   : > { %v7942_v55 = vpop.eup %4133  ;;  %v7947_v22 = vadd.f32 %v7810_v1, %v2379_v25  ;;  %4153 = vpow2.f32 %v3768_v60  ;;  %v3772_v37 = vmul.f32 -1.442695, %v7919_v28  ;;  %v2384_v58 = vadd.f32 %v7800_v27, %v9628_v53  ;;  %v9630_v27 = vld [vmem:[#allocation30_spill] sm:$0xff] }
 0x1b3   : > { %v7950_v13 = vpop.eup %4135  ;;  %v7955_v20 = vadd.f32 %v7810_v1, %v2380_v30  ;;  %4155 = vpow2.f32 %v3769_v62  ;;  %v3773_v8 = vmul.f32 -1.442695, %v7925_v23  ;;  %v2385_v3 = vadd.f32 %v7803_v61, %v9629_v63  ;;  %v9631_v61 = vld [vmem:[#allocation31_spill] sm:$0xff] }
 0x1b4   : > { %v7958_v36 = vpop.eup %4137  ;;  %v7963_v43 = vadd.f32 %v7810_v1, %v2381_v41  ;;  %4157 = vpow2.f32 %v3770_v17  ;;  %v3774_v44 = vmul.f32 -1.442695, %v7931_v4  ;;  %v2386_v0 = vadd.f32 %v7821_v15, %v9630_v27  ;;  %v9632_v15 = vld [vmem:[#allocation32_spill] sm:$0xff] }
 0x1b5   : > { %v7966_v49 = vpop.eup %4139  ;;  %v7971_v24 = vadd.f32 %v7810_v1, %v2382_v47  ;;  %4159 = vpow2.f32 %v3771_v35  ;;  %v3775_v48 = vmul.f32 -1.442695, %v7939_v9  ;;  %v2387_v19 = vadd.f32 %v7831_v2, %v9631_v61  ;;  %v9633_v2 = vld [vmem:[#allocation33_spill] sm:$0xff] }
 0x1b6   : > { %v7974_v32 = vpop.eup %4141  ;;  %v7979_v31 = vadd.f32 %v7810_v1, %v2383_v18  ;;  %4161 = vpow2.f32 %v3772_v37  ;;  %v3776_v38 = vmul.f32 -1.442695, %v7947_v22  ;;  %v2388_v25 = vadd.f32 %v7841_v52, %v9632_v15  ;;  %v9637_v18 = vld [vmem:[#allocation37_spill] sm:$0xff] }
 0x1b7   : > { %v7982_v59 = vpop.eup %4143  ;;  %v7987_v60 = vadd.f32 %v7810_v1, %v2384_v58  ;;  %4163 = vpow2.f32 %v3773_v8  ;;  %v3777_v6 = vmul.f32 -1.442695, %v7955_v20  ;;  %v2389_v62 = vadd.f32 %v7844_v46, %v9633_v2 }
 0x1b8   : > { %v7990_v30 = vpop.eup %4145  ;;  %v7995_v11 = vadd.f32 %v7810_v1, %v2385_v3  ;;  %4165 = vpow2.f32 %v3774_v44  ;;  %v3778_v41 = vmul.f32 -1.442695, %v7963_v43  ;;  %v2390_v52 = vadd.f32 %v7852_v34, %v9635_v50 }
 0x1b9   : > { %v4148_v17 = vpop.eup %4147  ;;  %v8001_v47 = vadd.f32 %v7810_v1, %v2386_v0  ;;  %4167 = vpow2.f32 %v3775_v48  ;;  %v3779_v35 = vmul.f32 -1.442695, %v7971_v24  ;;  %v2391_v46 = vadd.f32 %v7855_v40, %v9637_v18 }
 0x1ba   : > { %9634 = vst [vmem:[#allocation38_spill] sm:$0xff] %v7995_v11  ;;  %v4150_v16 = vpop.eup %4149  ;;  %v8007_v37 = vadd.f32 %v7810_v1, %v2387_v19  ;;  %4169 = vpow2.f32 %v3776_v38  ;;  %v3780_v53 = vmul.f32 -1.442695, %v7979_v31  ;;  %v8011_v8 = vadd.f32 %v7810_v1, %v2388_v25 }
 0x1bb   : > { %9636 = vst [vmem:[#allocation55_spill] sm:$0xff] %v8001_v47  ;;  %v4152_v58 = vpop.eup %4151  ;;  %4171 = vpow2.f32 %v3777_v6  ;;  %v3781_v34 = vmul.f32 -1.442695, %v7987_v60  ;;  %v8015_v3 = vadd.f32 %v7810_v1, %v2389_v62  ;;  %v3782_v40 = vmul.f32 -1.442695, %v7995_v11 }
 0x1bc   : > { %9638 = vst [vmem:[#allocation56_spill] sm:$0xff] %v8007_v37  ;;  %9639 = vst [vmem:[#allocation26_spill] sm:$0xff] %v8011_v8  ;;  %v4154_v63 = vpop.eup %4153  ;;  %4173 = vpow2.f32 %v3778_v41  ;;  %v8019_v27 = vadd.f32 %v7810_v1, %v2390_v52  ;;  %v3783_v0 = vmul.f32 -1.442695, %v8001_v47  ;;  %v8023_v61 = vadd.f32 %v7810_v1, %v2391_v46 }
 0x1bd   : > { %9640 = vst [vmem:[#allocation39_spill] sm:$0xff] %v8015_v3  ;;  %v4156_v44 = vpop.eup %4155  ;;  %4175 = vpow2.f32 %v3779_v35  ;;  %v3784_v19 = vmul.f32 -1.442695, %v8007_v37  ;;  %v3785_v15 = vmul.f32 -1.442695, %v8011_v8  ;;  %v2527_v52 = vadd.f32 1.0, %v7934_v51 }
 0x1be   : > { %9641 = vst [vmem:[#allocation67_spill] sm:$0xff] %v8019_v27  ;;  %v4158_v48 = vpop.eup %4157  ;;  %9642 = vst [vmem:[#allocation51_spill] sm:$0xff] %v8023_v61  ;;  %4177 = vpow2.f32 %v3780_v53  ;;  %v3786_v6 = vmul.f32 -1.442695, %v8015_v3  ;;  %v3787_v62 = vmul.f32 -1.442695, %v8019_v27 }
 0x1bf   : > { %v4160_v38 = vpop.eup %4159  ;;  %4179 = vpow2.f32 %v3781_v34  ;;  %v3788_v1 = vmul.f32 -1.442695, %v8023_v61  ;;  %v2528_v18 = vadd.f32 1.0, %v7942_v55  ;;  %v2529_v53 = vadd.f32 1.0, %v7950_v13 }
 0x1c0   : > { %v4162_v25 = vpop.eup %4161  ;;  %4181 = vpow2.f32 %v3782_v40  ;;  %v2530_v40 = vadd.f32 1.0, %v7958_v36  ;;  %v2536_v27 = vadd.f32 1.0, %v4150_v16  ;;  %v2538_v3 = vadd.f32 1.0, %v4154_v63 }
 0x1c1   : > { %v4164_v2 = vpop.eup %4163  ;;  %4183 = vpow2.f32 %v3783_v0  ;;  %v2540_v8 = vadd.f32 1.0, %v4158_v48 }
 0x1c2   : > { %v4166_v41 = vpop.eup %4165  ;;  %4185 = vpow2.f32 %v3784_v19  ;;  %v2531_v19 = vadd.f32 1.0, %v7966_v49 }
 0x1c3   : > { %v4168_v50 = vpop.eup %4167  ;;  %4187 = vpow2.f32 %v3785_v15  ;;  %v2532_v15 = vadd.f32 1.0, %v7974_v32  ;;  %v2539_v32 = vadd.f32 1.0, %v4156_v44 }
 0x1c4   : > { %v4170_v35 = vpop.eup %4169  ;;  %4189 = vpow2.f32 %v3786_v6  ;;  %v2533_v6 = vadd.f32 1.0, %v7982_v59  ;;  %v2541_v59 = vadd.f32 1.0, %v4160_v38  ;;  %v2545_v47 = vadd.f32 1.0, %v4168_v50 }
 0x1c5   : > { %v4172_v46 = vpop.eup %4171  ;;  %4191 = vpow2.f32 %v3787_v62  ;;  %v2534_v62 = vadd.f32 1.0, %v7990_v30  ;;  %v2543_v30 = vadd.f32 1.0, %v4164_v2 }
 0x1c6   : > { %v4174_v34 = vpop.eup %4173  ;;  %4193 = vpow2.f32 %v3788_v1  ;;  %v2535_v1 = vadd.f32 1.0, %v4148_v17  ;;  %v2547_v16 = vadd.f32 1.0, %v4172_v46 }
 0x1c7   : > { %v4176_v0 = vpop.eup %4175  ;;  %4195 = vrcp.f32 %v2527_v52  ;;  %v2537_v52 = vadd.f32 1.0, %v4152_v58 }
 0x1c8   : > { %v4178_v61 = vpop.eup %4177  ;;  %4197 = vrcp.f32 %v2528_v18  ;;  %v2549_v58 = vadd.f32 1.0, %v4176_v0 }
 0x1c9   : > { %v4180_v51 = vpop.eup %4179  ;;  %4199 = vrcp.f32 %v2529_v53  ;;  %v2542_v53 = vadd.f32 1.0, %v4162_v25  ;;  %v8038_v63 = vadd.f32 1.0, %v4178_v61 }
 0x1ca   : > { %v4182_v55 = vpop.eup %4181  ;;  %4201 = vrcp.f32 %v2530_v40  ;;  %v2544_v40 = vadd.f32 1.0, %v4166_v41  ;;  %v8040_v44 = vadd.f32 1.0, %v4180_v51 }
 0x1cb   : > { %v4184_v13 = vpop.eup %4183  ;;  %4203 = vrcp.f32 %v2531_v19  ;;  %v2546_v19 = vadd.f32 1.0, %v4170_v35  ;;  %v8042_v38 = vadd.f32 1.0, %v4182_v55 }
 0x1cc   : > { %v4186_v36 = vpop.eup %4185  ;;  %4205 = vrcp.f32 %v2532_v15  ;;  %v2548_v15 = vadd.f32 1.0, %v4174_v34  ;;  %v8044_v25 = vadd.f32 1.0, %v4184_v13 }
 0x1cd   : > { %v4188_v49 = vpop.eup %4187  ;;  %4207 = vrcp.f32 %v2533_v6  ;;  %v8049_v50 = vadd.f32 1.0, %v4186_v36 }
 0x1ce   : > { %v4190_v18 = vpop.eup %4189  ;;  %4209 = vrcp.f32 %v2534_v62 }
 0x1cf   : > { %v4192_v37 = vpop.eup %4191  ;;  %4211 = vrcp.f32 %v2535_v1  ;;  %v8056_v46 = vadd.f32 1.0, %v4190_v18 }
 0x1d0   : > { %v4194_v17 = vpop.eup %4193  ;;  %4213 = vrcp.f32 %v2536_v27  ;;  %v8051_v27 = vadd.f32 1.0, %v4188_v49 }
 0x1d1   : > { %v4196_v11 = vpop.eup %4195  ;;  %4215 = vrcp.f32 %v2537_v52  ;;  %v8070_v6 = vadd.f32 1.0, %v4194_v17 }
 0x1d2   : > { %v4198_v48 = vpop.eup %4197  ;;  %4217 = vrcp.f32 %v2538_v3  ;;  %v8047_v2 = vmul.f32 %v4196_v11, %v7825_v26  ;;  %v8063_v3 = vadd.f32 1.0, %v4192_v37 }
 0x1d3   : > { %v4200_v41 = vpop.eup %4199  ;;  %4219 = vrcp.f32 %v2539_v32  ;;  %v8054_v61 = vmul.f32 %v4198_v48, %v7828_v45 }
 0x1d4   : > { %v4202_v35 = vpop.eup %4201  ;;  %4221 = vrcp.f32 %v2540_v8  ;;  %v8059_v34 = vmul.f32 %v4200_v41, %v7835_v29  ;;  %v2656_v26 = vsel %vm2655_vm3, %v8047_v2, 0.0 }
 0x1d5   : > { %v4204_v11 = vpop.eup %4203  ;;  %4223 = vrcp.f32 %v2541_v59  ;;  %v8066_v0 = vmul.f32 %v4202_v35, %v7838_v57  ;;  %v2687_v45 = vsel %vm2655_vm3, %v8054_v61, 0.0 }
 0x1d6   : > { %v4206_v51 = vpop.eup %4205  ;;  %4225 = vrcp.f32 %v2542_v53  ;;  %v8073_v29 = vmul.f32 %v4204_v11, %v7849_v14  ;;  %v2657_v8 = vsel %vm2655_vm3, %v8059_v34, 0.0 }
 0x1d7   : > { %v4208_v55 = vpop.eup %4207  ;;  %4227 = vrcp.f32 %v2543_v30  ;;  %v8078_v37 = vmul.f32 %v4206_v51, %v7860_v33  ;;  %v2658_v57 = vadd.f32 %v2657_v8, %v2656_v26  ;;  %v2688_v62 = vsel %vm2655_vm3, %v8066_v0, 0.0 }
 0x1d8   : > { %v4210_v13 = vpop.eup %4209  ;;  %4229 = vrcp.f32 %v2544_v40  ;;  %v8083_v1 = vmul.f32 %v4208_v55, %v7865_v12  ;;  %v2659_v14 = vsel %vm2655_vm3, %v8073_v29, 0.0  ;;  %v2689_v36 = vadd.f32 %v2688_v62, %v2687_v45 }
 0x1d9   : > { %v4212_v49 = vpop.eup %4211  ;;  %4231 = vrcp.f32 %v2545_v47  ;;  %v8088_v52 = vmul.f32 %v4210_v13, %v7872_v7  ;;  %v2660_v33 = vadd.f32 %v2659_v14, %v2658_v57  ;;  %v2690_v32 = vsel %vm2655_vm3, %v8078_v37, 0.0 }
 0x1da   : > { %v4214_v18 = vpop.eup %4213  ;;  %4233 = vrcp.f32 %v2546_v19  ;;  %v8093_v59 = vmul.f32 %v4212_v49, %v7878_v54  ;;  %v2661_v12 = vsel %vm2655_vm3, %v8083_v1, 0.0  ;;  %v2691_v53 = vadd.f32 %v2690_v32, %v2689_v36 }
 0x1db   : > { %v4216_v30 = vpop.eup %4215  ;;  %4235 = vrcp.f32 %v2547_v16  ;;  %v8098_v47 = vmul.f32 %v4214_v18, %v7883_v56  ;;  %v2662_v7 = vadd.f32 %v2661_v12, %v2660_v33  ;;  %v2692_v40 = vsel %vm2655_vm3, %v8088_v52, 0.0 }
 0x1dc   : > { %v4218_v17 = vpop.eup %4217  ;;  %4237 = vrcp.f32 %v2548_v15  ;;  %v8103_v19 = vmul.f32 %v4216_v30, %v7889_v10  ;;  %v2663_v54 = vsel %vm2655_vm3, %v8093_v59, 0.0  ;;  %v2693_v48 = vadd.f32 %v2692_v40, %v2691_v53 }
 0x1dd   : > { %v4220_v41 = vpop.eup %4219  ;;  %4239 = vrcp.f32 %v2549_v58  ;;  %v8108_v16 = vmul.f32 %v4218_v17, %v7895_v21  ;;  %v2664_v56 = vadd.f32 %v2663_v54, %v2662_v7  ;;  %v2694_v35 = vsel %vm2655_vm3, %v8098_v47, 0.0 }
 0x1de   : > { %v4222_v26 = vpop.eup %4221  ;;  %4241 = vrcp.f32 %v8038_v63  ;;  %v8114_v15 = vmul.f32 %v4220_v41, %v7901_v42  ;;  %v2665_v10 = vsel %vm2655_vm3, %v8103_v19, 0.0  ;;  %v2695_v11 = vadd.f32 %v2694_v35, %v2693_v48 }
 0x1df   : > { %v4224_v45 = vpop.eup %4223  ;;  %4243 = vrcp.f32 %v8040_v44  ;;  %v8120_v21 = vmul.f32 %v4222_v26, %v7907_v5  ;;  %v2666_v58 = vadd.f32 %v2665_v10, %v2664_v56  ;;  %v2696_v51 = vsel %vm2655_vm3, %v8108_v16, 0.0 }
 0x1e0   : > { %v4226_v8 = vpop.eup %4225  ;;  %4245 = vrcp.f32 %v8042_v38  ;;  %v8126_v42 = vmul.f32 %v4224_v45, %v7913_v39  ;;  %v2667_v63 = vsel %vm2655_vm3, %v8114_v15, 0.0  ;;  %v2697_v55 = vadd.f32 %v2696_v51, %v2695_v11  ;;  %v9643_v45 = vld [vmem:[#allocation38_spill] sm:$0xff] }
 0x1e1   : > { %v4228_v57 = vpop.eup %4227  ;;  %4247 = vrcp.f32 %v8044_v25  ;;  %v8132_v5 = vmul.f32 %v4226_v8, %v7919_v28  ;;  %v2668_v44 = vadd.f32 %v2667_v63, %v2666_v58  ;;  %v2698_v62 = vsel %vm2655_vm3, %v8120_v21, 0.0  ;;  %v9644_v63 = vld [vmem:[#allocation55_spill] sm:$0xff] }
 0x1e2   : > { %v4230_v13 = vpop.eup %4229  ;;  %4249 = vrcp.f32 %v8049_v50  ;;  %v8138_v39 = vmul.f32 %v4228_v57, %v7925_v23  ;;  %v2669_v38 = vsel %vm2655_vm3, %v8126_v42, 0.0  ;;  %v2699_v14 = vadd.f32 %v2698_v62, %v2697_v55  ;;  %v9645_v62 = vld [vmem:[#allocation56_spill] sm:$0xff] }
 0x1e3   : > { %v4232_v36 = vpop.eup %4231  ;;  %4251 = vrcp.f32 %v8051_v27  ;;  %v8144_v28 = vmul.f32 %v4230_v13, %v7931_v4  ;;  %v2670_v25 = vadd.f32 %v2669_v38, %v2668_v44  ;;  %v2700_v49 = vsel %vm2655_vm3, %v8132_v5, 0.0 }
 0x1e4   : > { %v4234_v33 = vpop.eup %4233  ;;  %4253 = vrcp.f32 %v8056_v46  ;;  %v8150_v23 = vmul.f32 %v4232_v36, %v7939_v9  ;;  %v2671_v50 = vsel %vm2655_vm3, %v8138_v39, 0.0  ;;  %v2701_v32 = vadd.f32 %v2700_v49, %v2699_v14 }
 0x1e5   : > { %v4236_v18 = vpop.eup %4235  ;;  %4255 = vrcp.f32 %v8063_v3  ;;  %v8156_v4 = vmul.f32 %v4234_v33, %v7947_v22  ;;  %v2672_v27 = vadd.f32 %v2671_v50, %v2670_v25  ;;  %v2702_v12 = vsel %vm2655_vm3, %v8144_v28, 0.0  ;;  %v9646_v25 = vld [vmem:[#allocation26_spill] sm:$0xff] }
 0x1e6   : > { %v4238_v53 = vpop.eup %4237  ;;  %4257 = vrcp.f32 %v8070_v6  ;;  %v8162_v9 = vmul.f32 %v4236_v18, %v7955_v20  ;;  %v2673_v46 = vsel %vm2655_vm3, %v8150_v23, 0.0  ;;  %v2703_v30 = vadd.f32 %v2702_v12, %v2701_v32  ;;  %v9647_v18 = vld [vmem:[#allocation39_spill] sm:$0xff] }
 0x1e7   : > { %v4240_v7 = vpop.eup %4239  ;;  %v8167_v3 = vmul.f32 %v4238_v53, %v7963_v43  ;;  %v2674_v22 = vadd.f32 %v2673_v46, %v2672_v27  ;;  %v2704_v40 = vsel %vm2655_vm3, %v8156_v4, 0.0 }
 0x1e8   : > { %v4242_v17 = vpop.eup %4241  ;;  %v8172_v54 = vmul.f32 %v4240_v7, %v7971_v24  ;;  %v2675_v20 = vsel %vm2655_vm3, %v8162_v9, 0.0  ;;  %v2705_v6 = vadd.f32 %v2704_v40, %v2703_v30  ;;  %v9648_v30 = vld [vmem:[#allocation67_spill] sm:$0xff] }
 0x1e9   : > { %v4244_v48 = vpop.eup %4243  ;;  %v8177_v41 = vmul.f32 %v4242_v17, %v7979_v31  ;;  %v2676_v56 = vadd.f32 %v2675_v20, %v2674_v22  ;;  %v2706_v43 = vsel %vm2655_vm3, %v8167_v3, 0.0  ;;  %v9649_v17 = vld [vmem:[#allocation51_spill] sm:$0xff] }
 0x1ea   : > { %v4246_v35 = vpop.eup %4245  ;;  %v8182_v26 = vmul.f32 %v4244_v48, %v7987_v60  ;;  %v2677_v24 = vsel %vm2655_vm3, %v8172_v54, 0.0  ;;  %v2707_v10 = vadd.f32 %v2706_v43, %v2705_v6 }
 0x1eb   : > { %v4248_v11 = vpop.eup %4247  ;;  %v8187_v58 = vmul.f32 %v4246_v35, %v9643_v45  ;;  %v2678_v51 = vadd.f32 %v2677_v24, %v2676_v56  ;;  %v2708_v31 = vsel %vm2655_vm3, %v8177_v41, 0.0 }
 0x1ec   : > { %v4250_v8 = vpop.eup %4249  ;;  %v8192_v55 = vmul.f32 %v4248_v11, %v9644_v63  ;;  %v2679_v60 = vsel %vm2655_vm3, %v8182_v26, 0.0  ;;  %v2709_v57 = vadd.f32 %v2708_v31, %v2707_v10 }
 0x1ed   : > { %v4252_v44 = vpop.eup %4251  ;;  %v8197_v13 = vmul.f32 %v4250_v8, %v9645_v62  ;;  %v2680_v38 = vadd.f32 %v2679_v60, %v2678_v51  ;;  %v2710_v14 = vsel %vm2655_vm3, %v8187_v58, 0.0 }
 0x1ee   : > { %v4254_v36 = vpop.eup %4253  ;;  %v8202_v49 = vmul.f32 %v4252_v44, %v9646_v25  ;;  %v2681_v33 = vsel %vm2655_vm3, %v8192_v55, 0.0  ;;  %v2711_v50 = vadd.f32 %v2710_v14, %v2709_v57  ;;  %v2813_v14 = vld [vmem:[%s8556_s5] sm:$0xff] }
 0x1ef   : > { %v4256_v32 = vpop.eup %4255  ;;  %v8207_v27 = vmul.f32 %v4254_v36, %v9647_v18  ;;  %v2682_v12 = vadd.f32 %v2681_v33, %v2680_v38  ;;  %v2712_v53 = vsel %vm2655_vm3, %v8197_v13, 0.0  ;;  %v9650_v38 = vmov 0.0   ;;  %v2732_v36 = vld [vmem:[%s8555_s4] sm:$0x1] }
 0x1f0   : > { %v4258_v46 = vpop.eup %4257  ;;  %v8212_v7 = vmul.f32 %v4256_v32, %v9648_v30  ;;  %v2683_v22 = vsel %vm2655_vm3, %v8202_v49, 0.0  ;;  %v2713_v40 = vadd.f32 %v2712_v53, %v2711_v50  ;;  %v4129_v30 = vld [vmem:[%s8558_s7] sm:$0xff]  }
 0x1f1   : > { %v8217_v20 = vmul.f32 %v4258_v46, %v9649_v17  ;;  %v2684_v6 = vadd.f32 %v2683_v22, %v2682_v12  ;;  %v2714_v48 = vsel %vm2655_vm3, %v8207_v27, 0.0  ;;  %4113 = vmatprep.subr.bf16.mxu1 %v4129_v30  ;;  %v4130_v22 = vld [vmem:[%s8558_s7 + $0x8] sm:$0xff]  }
 0x1f2   : > { %v2685_v56 = vsel %vm2655_vm3, %v8212_v7, 0.0  ;;  %v2715_v43 = vadd.f32 %v2714_v48, %v2713_v40  ;;  %4115 = vmatpush3.bf16.msra.mxu1 %v4129_v30  ;;  %v2814_v40 = vld [vmem:[%s8557_s6] sm:$0x1] }
 0x1f3   : > { %v2686_v35 = vadd.f32 %v2685_v56, %v2684_v6  ;;  %v2716_v24 = vsel %vm2655_vm3, %v8217_v20, 0.0  ;;  %4114 = vmatprep.subr.bf16.mxu1 %v4130_v22 }
 0x1f4   : > { %v2717_v10 = vadd.f32 %v2716_v24, %v2715_v43 }
 0x1f5   : > { %v2718_v11 = vsel %vm2655_vm3, %v2686_v35, 0.0 }
 0x1f6   : > { %v2719_v45 = vsel %vm2655_vm3, %v2717_v10, 0.0  ;;  %4116 = vmatpush3.bf16.msra.mxu1 %v4130_v22  ;;  %v9651_v10 = vld [vmem:[#allocation2_spill] sm:$0xff] }
 0x1f7   : > { %v2720_v51 = vadd.f32 %v2719_v45, %v2718_v11  ;;  %v9652_v11 = vsub.s32 0, %v9651_v10 }
 0x1f9   : > { %v2721_v31 = vrot.slane %v2720_v51, 4 }
 0x1fb   : > { %v2722_v8 = vadd.f32 %v2721_v31, %v2720_v51 }
 0x1fd   : > { %v2723_v63 = vrot.slane %v2722_v8, 2 }
 0x1ff   : > { %v2724_v60 = vadd.f32 %v2723_v63, %v2722_v8 }
 0x201   : > { %v2725_v57 = vrot.slane %v2724_v60, 1 }
 0x203   : > { %v2726_v44 = vadd.f32 %v2725_v57, %v2724_v60 }
 0x205   : > { %v2727_v62 = vmul.f32 0.00390625, %v2726_v44 }
 0x207   : > { %4064 = vmatmul.mubr.msk.f32.vlgmr.msra.gmra.mrb[0].mxu0 %vm2655_vm3, %v2727_v62 }
 0x208   : > { %4068 = vmatprep.mubr.msk.f32.mxu0 %vm4405_vm0, %v9650_v38  ;;  %4067 = vmatpush3.msra.mxu0 %v2813_v14 }
 0x209   : > { %4071 = vmatprep.subr.bf16.mxu0 %v4129_v30 }
 0x2da   : > { %v2802_v25 = vpop.f32.mrb[0].mxu0 }
 0x2db   : > { %v2803_v33 = vadd.f32 %v2802_v25, %v2732_v36  ;;  %v4065_v50 = vpop.f32.mrb[1].mxu0 }
 0x2dd   : > { %v3790_v32 = vmul.f32 -1.442695, %v2803_v33 }
 0x2df   : > { %4259 = vpow2.f32 %v3790_v32 }
 0x2e9   : > { %v4260_v18 = vpop.eup %4259 }
 0x2ea   : > { %v2809_v12 = vadd.f32 1.0, %v4260_v18 }
 0x2ec   : > { %4261 = vrcp.f32 %v2809_v12 }
 0x2f6   : > { %v4262_v53 = vpop.eup %4261 }
 0x2f7   : > { %v2812_v46 = vmul.f32 %v4262_v53, %v2803_v33 }
 0x2f9   : > { %4069 = vmatmul.mubr.msk.f32.vlgmr.msra.gmra.mrb[2].mxu0 %vm2815_vm4, %v2812_v46 }
 0x2fa   : > { %4072 = vmatpush3.bf16.msra.mxu0 %v4129_v30 }
 0x2fb   : > { %4073 = vmatprep.subr.bf16.mxu0 %v4130_v22 }
 0x2fe   : > { %4074 = vmatpush3.bf16.msra.mxu0 %v4130_v22 }
 0x3cc   : > { %v2885_v17 = vpop.f32.mrb[2].mxu0 }
 0x3cd   : > { %v2886_v6 = vadd.f32 %v2885_v17, %v2814_v40  ;;  %v4070_v48 = vpop.f32.mrb[3].mxu0 }
 0x3cf   : > { %v3792_v56 = vmul.f32 -1.442695, %v2886_v6 }
 0x3d1   : > { %4263 = vpow2.f32 %v3792_v56 }
 0x3db   : > { %v4264_v43 = vpop.eup %4263 }
 0x3dc   : > { %v2892_v35 = vadd.f32 1.0, %v4264_v43 }
 0x3de   : > { %4265 = vrcp.f32 %v2892_v35 }
 0x3e8   : > { %v4266_v24 = vpop.eup %4265 }
 0x3e9   : > { %v2898_v45 = vrot.slane %v4266_v24, %v9652_v11 }
 0x3eb   : > { %v2899_v51 = vmul.f32 %v2898_v45, %v8047_v2  ;;  %v2900_v31 = vmul.f32 %v2898_v45, %v8054_v61  ;;  %v2911_v8 = vmul.f32 %v2898_v45, %v8114_v15  ;;  %v2912_v63 = vmul.f32 %v2898_v45, %v8120_v21 }
 0x3ec   : > { %v2901_v60 = vmul.f32 %v2898_v45, %v8059_v34  ;;  %v2902_v57 = vmul.f32 %v2898_v45, %v8066_v0  ;;  %v2913_v44 = vmul.f32 %v2898_v45, %v8126_v42  ;;  %v2914_v62 = vmul.f32 %v2898_v45, %v8132_v5 }
 0x3ed   : > { %v2931_v38 = vpack.c.bf16 %v2900_v31, %v2899_v51  ;;  %v2937_v14 = vpack.c.bf16 %v2912_v63, %v2911_v8  ;;  %v2903_v36 = vmul.f32 %v2898_v45, %v8073_v29  ;;  %v2904_v2 = vmul.f32 %v2898_v45, %v8078_v37 }
 0x3ee   : > { %v2932_v25 = vpack.c.bf16 %v2902_v57, %v2901_v60  ;;  %v2938_v61 = vpack.c.bf16 %v2914_v62, %v2913_v44  ;;  %v2915_v15 = vmul.f32 %v2898_v45, %v8138_v39  ;;  %v2916_v21 = vmul.f32 %v2898_v45, %v8144_v28 }
 0x3ef   : > { %4075 = vmatprep.mubr.msk.bf16.mxu0 %vm2655_vm3, %v2931_v38  ;;  %4087 = vmatprep.mubr.msk.bf16.mxu1 %vm2655_vm3, %v2937_v14  ;;  %v2933_v34 = vpack.c.bf16 %v2904_v2, %v2903_v36  ;;  %v2905_v29 = vmul.f32 %v2898_v45, %v8083_v1  ;;  %v2906_v37 = vmul.f32 %v2898_v45, %v8088_v52 }
 0x3f0   : > { %4076 = vmatmul.mubr.msk.bf16.vlgmr.msra.gmra.mrb[4].mxu0 %vm2655_vm3, %v2932_v25  ;;  %4088 = vmatmul.mubr.msk.bf16.vlgmr.msra.gmra.mrb[0].mxu1 %vm2655_vm3, %v2938_v61  ;;  %v2939_v0 = vpack.c.bf16 %v2916_v21, %v2915_v15  ;;  %v2917_v42 = vmul.f32 %v2898_v45, %v8150_v23  ;;  %v2918_v5 = vmul.f32 %v2898_v45, %v8156_v4 }
 0x3f1   : > { %4079 = vmatprep.mubr.msk.bf16.mxu0 %vm2655_vm3, %v2933_v34  ;;  %v2907_v39 = vmul.f32 %v2898_v45, %v8093_v59  ;;  %v2908_v28 = vmul.f32 %v2898_v45, %v8098_v47  ;;  %v2919_v33 = vmul.f32 %v2898_v45, %v8162_v9  ;;  %v2920_v50 = vmul.f32 %v2898_v45, %v8167_v3 }
 0x3f2   : > { %4091 = vmatprep.mubr.msk.bf16.mxu1 %vm2655_vm3, %v2939_v0  ;;  %v2934_v32 = vpack.c.bf16 %v2906_v37, %v2905_v29  ;;  %v2940_v18 = vpack.c.bf16 %v2918_v5, %v2917_v42  ;;  %v2909_v1 = vmul.f32 %v2898_v45, %v8103_v19  ;;  %v2910_v52 = vmul.f32 %v2898_v45, %v8108_v16 }
 0x3f3   : > { %v2935_v12 = vpack.c.bf16 %v2908_v28, %v2907_v39  ;;  %v2941_v53 = vpack.c.bf16 %v2920_v50, %v2919_v33  ;;  %v2921_v59 = vmul.f32 %v2898_v45, %v8172_v54  ;;  %v2922_v47 = vmul.f32 %v2898_v45, %v8177_v41 }
 0x3f4   : > { %v2923_v23 = vmul.f32 %v2898_v45, %v8182_v26  ;;  %v2924_v4 = vmul.f32 %v2898_v45, %v8187_v58  ;;  %v2936_v9 = vpack.c.bf16 %v2910_v52, %v2909_v1  ;;  %v2925_v19 = vmul.f32 %v2898_v45, %v8192_v55  ;;  %v8298_v55 = vld [vmem:[%s8559_s8] ss:$0 sm:$0xff] }
 0x3f5   : > { %v2942_v3 = vpack.c.bf16 %v2922_v47, %v2921_v59  ;;  %v2926_v16 = vmul.f32 %v2898_v45, %v8197_v13  ;;  %v2927_v54 = vmul.f32 %v2898_v45, %v8202_v49  ;;  %v2928_v41 = vmul.f32 %v2898_v45, %v8207_v27 }
 0x3f6   : > { %v2943_v46 = vpack.c.bf16 %v2924_v4, %v2923_v23  ;;  %v2929_v58 = vmul.f32 %v2898_v45, %v8212_v7  ;;  %v2930_v22 = vmul.f32 %v2898_v45, %v8217_v20 }
 0x3f7   : > { %v2944_v26 = vpack.c.bf16 %v2926_v16, %v2925_v19  ;;  %v2945_v30 = vpack.c.bf16 %v2928_v41, %v2927_v54 }
 0x3f8   : > { %4080 = vmatmul.mubr.msk.bf16.gmra.mrb[8].mxu0 %vm2655_vm3, %v2934_v32  ;;  %4092 = vmatmul.mubr.msk.bf16.gmra.mrb[4].mxu1 %vm2655_vm3, %v2940_v18  ;;  %v2946_v40 = vpack.c.bf16 %v2930_v22, %v2929_v58 }
 0x3f9   : > { %4083 = vmatprep.mubr.msk.bf16.mxu0 %vm2655_vm3, %v2935_v12  ;;  %4095 = vmatprep.mubr.msk.bf16.mxu1 %vm2655_vm3, %v2941_v53 }
 0x400   : > { %4084 = vmatmul.mubr.msk.bf16.gmra.mrb[12].mxu0 %vm2655_vm3, %v2936_v9  ;;  %4096 = vmatmul.mubr.msk.bf16.gmra.mrb[8].mxu1 %vm2655_vm3, %v2942_v3 }
 0x401   : > { %4099 = vmatprep.mubr.msk.bf16.mxu1 %vm2655_vm3, %v2943_v46 }
 0x408   : > { %4100 = vmatmul.mubr.msk.bf16.gmra.mrb[12].mxu1 %vm2655_vm3, %v2944_v26 }
 0x409   : > { %4103 = vmatprep.mubr.msk.bf16.mxu1 %vm2655_vm3, %v2945_v30 }
 0x410   : > { %4104 = vmatmul.mubr.msk.bf16.gmra.mrb[16].mxu1 %vm2655_vm3, %v2946_v40 }
 0x4c3   : > { %v4077_v13 = vpop.f32.mrb[4].mxu0  ;;  %v4089_v49 = vpop.f32.mrb[0].mxu1 }
 0x4c4   : > { %v8301_v27 = vadd.f32 %v4077_v13, %v8298_v55  ;;  %v8304_v17 = vadd.f32 %v4089_v49, %v8298_v55  ;;  %v3052_v6 = vpop.f32.mrb[5].mxu0  ;;  %v3100_v7 = vpop.f32.mrb[1].mxu1 }
 0x4c5   : > { %v8307_v20 = vadd.f32 %v8298_v55, %v3052_v6  ;;  %v8310_v48 = vadd.f32 %v8298_v55, %v3100_v7  ;;  %v4078_v56 = vpop.f32.mrb[6].mxu0  ;;  %v4090_v43 = vpop.f32.mrb[2].mxu1 }
 0x4c6   : > { %v3814_v35 = vmul.f32 -1.442695, %v8301_v27  ;;  %v3826_v24 = vmul.f32 -1.442695, %v8304_v17  ;;  %v8315_v10 = vadd.f32 %v4078_v56, %v8298_v55  ;;  %v8318_v11 = vadd.f32 %v4090_v43, %v8298_v55  ;;  %v3055_v45 = vpop.f32.mrb[7].mxu0  ;;  %v3103_v51 = vpop.f32.mrb[3].mxu1 }
 0x4c7   : > { %v3812_v31 = vmul.f32 -1.442695, %v8307_v20  ;;  %v3824_v8 = vmul.f32 -1.442695, %v8310_v48  ;;  %v8323_v63 = vadd.f32 %v8298_v55, %v3055_v45  ;;  %v8326_v60 = vadd.f32 %v8298_v55, %v3103_v51 }
 0x4c8   : > { %4267 = vpow2.f32 %v3814_v35  ;;  %v3815_v57 = vmul.f32 -1.442695, %v8315_v10  ;;  %v3827_v44 = vmul.f32 -1.442695, %v8318_v11 }
 0x4c9   : > { %4269 = vpow2.f32 %v3826_v24  ;;  %v3813_v62 = vmul.f32 -1.442695, %v8323_v63  ;;  %v3825_v38 = vmul.f32 -1.442695, %v8326_v60 }
 0x4ca   : > { %4271 = vpow2.f32 %v3812_v31 }
 0x4cb   : > { %4273 = vpow2.f32 %v3824_v8  ;;  %v4081_v14 = vpop.f32.mrb[8].mxu0  ;;  %v4093_v36 = vpop.f32.mrb[4].mxu1 }
 0x4cc   : > { %4275 = vpow2.f32 %v3815_v57  ;;  %v8333_v2 = vadd.f32 %v4081_v14, %v8298_v55  ;;  %v8336_v25 = vadd.f32 %v4093_v36, %v8298_v55  ;;  %v3068_v61 = vpop.f32.mrb[9].mxu0  ;;  %v3116_v15 = vpop.f32.mrb[5].mxu1 }
 0x4cd   : > { %4277 = vpow2.f32 %v3827_v44  ;;  %v8339_v21 = vadd.f32 %v8298_v55, %v3068_v61  ;;  %v8342_v34 = vadd.f32 %v8298_v55, %v3116_v15  ;;  %v4082_v0 = vpop.f32.mrb[10].mxu0  ;;  %v4094_v29 = vpop.f32.mrb[6].mxu1 }
 0x4ce   : > { %4279 = vpow2.f32 %v3813_v62  ;;  %v3818_v37 = vmul.f32 -1.442695, %v8333_v2  ;;  %v3830_v42 = vmul.f32 -1.442695, %v8336_v25  ;;  %v8347_v5 = vadd.f32 %v4082_v0, %v8298_v55  ;;  %v3071_v39 = vpop.f32.mrb[11].mxu0  ;;  %v3119_v28 = vpop.f32.mrb[7].mxu1 }
 0x4cf   : > { %4281 = vpow2.f32 %v3825_v38  ;;  %v3816_v33 = vmul.f32 -1.442695, %v8339_v21  ;;  %v3828_v50 = vmul.f32 -1.442695, %v8342_v34  ;;  %v8353_v13 = vadd.f32 %v4094_v29, %v8298_v55 }
 0x4d0   : > { %4283 = vpow2.f32 %v3818_v37  ;;  %v3819_v32 = vmul.f32 -1.442695, %v8347_v5  ;;  %v8356_v7 = vadd.f32 %v8298_v55, %v3071_v39  ;;  %v8359_v35 = vadd.f32 %v8298_v55, %v3119_v28 }
 0x4d1   : > { %4285 = vpow2.f32 %v3830_v42  ;;  %v3831_v62 = vmul.f32 -1.442695, %v8353_v13 }
 0x4d2   : > { %v4268_v18 = vpop.eup %4267  ;;  %4287 = vpow2.f32 %v3816_v33  ;;  %v3817_v15 = vmul.f32 -1.442695, %v8356_v7  ;;  %v3829_v39 = vmul.f32 -1.442695, %v8359_v35 }
 0x4d3   : > { %v4270_v12 = vpop.eup %4269  ;;  %v3277_v53 = vadd.f32 1.0, %v4268_v18  ;;  %4289 = vpow2.f32 %v3828_v50  ;;  %v4085_v1 = vpop.f32.mrb[12].mxu0 }
 0x4d4   : > { %v4097_v52 = vpop.f32.mrb[8].mxu1  ;;  %v4272_v59 = vpop.eup %4271  ;;  %v3289_v47 = vadd.f32 1.0, %v4270_v12  ;;  %4291 = vpow2.f32 %v3819_v32  ;;  %v8362_v24 = vadd.f32 %v4085_v1, %v8298_v55 }
 0x4d5   : > { %v3084_v23 = vpop.f32.mrb[13].mxu0  ;;  %v3132_v4 = vpop.f32.mrb[9].mxu1  ;;  %4293 = vrcp.f32 %v3277_v53  ;;  %v3275_v3 = vadd.f32 1.0, %v4272_v59  ;;  %v8365_v31 = vadd.f32 %v4097_v52, %v8298_v55 }
 0x4d6   : > { %v4274_v9 = vpop.eup %4273  ;;  %v4086_v46 = vpop.f32.mrb[14].mxu0  ;;  %4295 = vrcp.f32 %v3289_v47  ;;  %v8369_v38 = vadd.f32 %v8298_v55, %v3084_v23  ;;  %v8374_v0 = vadd.f32 %v8298_v55, %v3132_v4  ;;  %v3822_v28 = vmul.f32 -1.442695, %v8362_v24 }
 0x4d7   : > { %v4098_v19 = vpop.f32.mrb[10].mxu1  ;;  %v4276_v16 = vpop.eup %4275  ;;  %v3287_v54 = vadd.f32 1.0, %v4274_v9  ;;  %4297 = vrcp.f32 %v3275_v3  ;;  %v3834_v18 = vmul.f32 -1.442695, %v8365_v31  ;;  %v8384_v12 = vadd.f32 %v4086_v46, %v8298_v55 }
 0x4d8   : > { %v3087_v41 = vpop.f32.mrb[15].mxu0  ;;  %v4278_v26 = vpop.eup %4277  ;;  %v3278_v30 = vadd.f32 1.0, %v4276_v16  ;;  %v3820_v52 = vmul.f32 -1.442695, %v8369_v38  ;;  %v8389_v59 = vadd.f32 %v4098_v19, %v8298_v55  ;;  %v3832_v4 = vmul.f32 -1.442695, %v8374_v0 }
 0x4d9   : > { %v3135_v58 = vpop.f32.mrb[11].mxu1  ;;  %v4280_v22 = vpop.eup %4279  ;;  %4299 = vrcp.f32 %v3287_v54  ;;  %v3290_v40 = vadd.f32 1.0, %v4278_v26  ;;  %v3823_v26 = vmul.f32 -1.442695, %v8384_v12 }
 0x4da   : > { %v4282_v49 = vpop.eup %4281  ;;  %4301 = vrcp.f32 %v3278_v30  ;;  %v3276_v6 = vadd.f32 1.0, %v4280_v22  ;;  %v8403_v19 = vadd.f32 %v8298_v55, %v3135_v58  ;;  %v3835_v58 = vmul.f32 -1.442695, %v8389_v59 }
 0x4db   : > { %v4284_v56 = vpop.eup %4283  ;;  %4303 = vrcp.f32 %v3290_v40  ;;  %v3288_v43 = vadd.f32 1.0, %v4282_v49  ;;  %v4101_v8 = vpop.f32.mrb[12].mxu1 }
 0x4dc   : > { %v4286_v45 = vpop.eup %4285  ;;  %4305 = vrcp.f32 %v3276_v6  ;;  %v3281_v51 = vadd.f32 1.0, %v4284_v56  ;;  %v3148_v14 = vpop.f32.mrb[13].mxu1  ;;  %v8419_v56 = vadd.f32 %v4101_v8, %v8298_v55 }
 0x4dd   : > { %v4288_v57 = vpop.eup %4287  ;;  %4307 = vrcp.f32 %v3288_v43  ;;  %v3293_v44 = vadd.f32 1.0, %v4286_v45  ;;  %v8376_v29 = vpop.f32.mrb[14].mxu1 }
 0x4de   : > { %v4290_v36 = vpop.eup %4289  ;;  %4309 = vrcp.f32 %v3281_v51  ;;  %v3279_v61 = vadd.f32 1.0, %v4288_v57  ;;  %v8380_v33 = vpop.f32.mrb[15].mxu1  ;;  %v8427_v57 = vadd.f32 %v8298_v55, %v3148_v14  ;;  %v3833_v14 = vmul.f32 -1.442695, %v8403_v19 }
 0x4df   : > { %v4292_v37 = vpop.eup %4291  ;;  %4311 = vrcp.f32 %v3293_v44  ;;  %v3291_v42 = vadd.f32 1.0, %v4290_v36 }
 0x4e0   : > { %v4294_v50 = vpop.eup %4293  ;;  %4313 = vrcp.f32 %v3279_v61  ;;  %v3282_v32 = vadd.f32 1.0, %v4292_v37 }
 0x4e1   : > { %v4296_v53 = vpop.eup %4295  ;;  %v3373_v1 = vmul.f32 %v4294_v50, %v8301_v27  ;;  %4315 = vrcp.f32 %v3291_v42  ;;  %v8399_v27 = vadd.f32 %v8298_v55, %v3087_v41 }
 0x4e2   : > { %v4298_v47 = vpop.eup %4297  ;;  %v3385_v23 = vmul.f32 %v4296_v53, %v8304_v17  ;;  %4317 = vrcp.f32 %v3282_v32  ;;  %v3836_v32 = vmul.f32 -1.442695, %v8427_v57 }
 0x4e3   : > { %v4300_v9 = vpop.eup %4299  ;;  %v3881_v3 = vpack.c.bf16 %v3373_v1, %v3373_v1  ;;  %v3371_v46 = vmul.f32 %v4298_v47, %v8307_v20  ;;  %4319 = vpow2.f32 %v3831_v62  ;;  %v8407_v30 = vpop.f32.mrb[16].mxu1  ;;  %v3821_v36 = vmul.f32 -1.442695, %v8399_v27 }
 0x4e4   : > { %v4302_v16 = vpop.eup %4301  ;;  %v3893_v54 = vpack.c.bf16 %v3385_v23, %v3385_v23  ;;  %v3383_v17 = vmul.f32 %v4300_v9, %v8310_v48  ;;  %4321 = vpow2.f32 %v3817_v15  ;;  %v8413_v40 = vpop.f32.mrb[17].mxu1 }
 0x4e5   : > { %v4304_v41 = vpop.eup %4303  ;;  %3534 = vst.msk [vmem:[%s8394_s26 + $0x8] sm:$0xf] %vm3531_vm5, %v3881_v3  ;;  %v3879_v22 = vpack.c.bf16 %v3371_v46, %v3371_v46  ;;  %v3374_v20 = vmul.f32 %v4302_v16, %v8315_v10  ;;  %4323 = vpow2.f32 %v3829_v39  ;;  %v8421_v43 = vpop.f32.mrb[18].mxu1  ;;  %v3838_v39 = vmul.f32 -1.442695, %v8419_v56 }
 0x4e6   : > { %v4306_v49 = vpop.eup %4305  ;;  %3546 = vst.msk [vmem:[%s8394_s26 + $0x38] sm:$0xf] %vm3531_vm5, %v3893_v54  ;;  %v3891_v48 = vpack.c.bf16 %v3383_v17, %v3383_v17  ;;  %v3386_v6 = vmul.f32 %v4304_v41, %v8318_v11  ;;  %4325 = vpow2.f32 %v3822_v28  ;;  %v8429_v44 = vpop.f32.mrb[19].mxu1 }
 0x4e7   : > { %v4308_v10 = vpop.eup %4307  ;;  %3532 = vst.msk [vmem:[%s8394_s26] sm:$0xf] %vm3531_vm5, %v3879_v22  ;;  %v3882_v45 = vpack.c.bf16 %v3374_v20, %v3374_v20  ;;  %v3372_v51 = vmul.f32 %v4306_v49, %v8323_v63  ;;  %4327 = vpow2.f32 %v3834_v18 }
 0x4e8   : > { %v4310_v11 = vpop.eup %4309  ;;  %3544 = vst.msk [vmem:[%s8394_s26 + $0x30] sm:$0xf] %vm3531_vm5, %v3891_v48  ;;  %v3894_v8 = vpack.c.bf16 %v3386_v6, %v3386_v6  ;;  %v3384_v62 = vmul.f32 %v4308_v10, %v8326_v60  ;;  %4329 = vpow2.f32 %v3820_v52  ;;  %v8463_v6 = vadd.f32 %v8376_v29, %v8298_v55 }
 0x4e9   : > { %v4312_v61 = vpop.eup %4311  ;;  %3535 = vst.msk [vmem:[%s8394_s26 + $0xc] sm:$0xf] %vm3531_vm5, %v3882_v45  ;;  %v3880_v63 = vpack.c.bf16 %v3372_v51, %v3372_v51  ;;  %v3377_v15 = vmul.f32 %v4310_v11, %v8333_v2  ;;  %4331 = vpow2.f32 %v3832_v4  ;;  %v8467_v51 = vadd.f32 %v8298_v55, %v8380_v33 }
 0x4ea   : > { %v4314_v37 = vpop.eup %4313  ;;  %3547 = vst.msk [vmem:[%s8394_s26 + $0x3c] sm:$0xf] %vm3531_vm5, %v3894_v8  ;;  %v3892_v42 = vpack.c.bf16 %v3384_v62, %v3384_v62  ;;  %v3389_v60 = vmul.f32 %v4312_v61, %v8336_v25  ;;  %4333 = vpow2.f32 %v3823_v26  ;;  %v8471_v62 = vadd.f32 %v8407_v30, %v8298_v55 }
 0x4eb   : > { %v4316_v28 = vpop.eup %4315  ;;  %3533 = vst.msk [vmem:[%s8394_s26 + $0x4] sm:$0xf] %vm3531_vm5, %v3880_v63  ;;  %v3885_v50 = vpack.c.bf16 %v3377_v15, %v3377_v15  ;;  %v3375_v2 = vmul.f32 %v4314_v37, %v8339_v21  ;;  %4335 = vpow2.f32 %v3835_v58  ;;  %v8475_v29 = vadd.f32 %v8298_v55, %v8413_v40 }
 0x4ec   : > { %v4318_v18 = vpop.eup %4317  ;;  %3545 = vst.msk [vmem:[%s8394_s26 + $0x34] sm:$0xf] %vm3531_vm5, %v3892_v42  ;;  %v3897_v53 = vpack.c.bf16 %v3389_v60, %v3389_v60  ;;  %v3387_v25 = vmul.f32 %v4316_v28, %v8342_v34  ;;  %4337 = vpow2.f32 %v3821_v36  ;;  %v3839_v33 = vmul.f32 -1.442695, %v8463_v6 }
 0x4ed   : > { %v4320_v1 = vpop.eup %4319  ;;  %3538 = vst.msk [vmem:[%s8394_s26 + $0x18] sm:$0xf] %vm3531_vm5, %v3885_v50  ;;  %v3883_v52 = vpack.c.bf16 %v3375_v2, %v3375_v2  ;;  %v3378_v47 = vmul.f32 %v4318_v18, %v8347_v5  ;;  %4339 = vpow2.f32 %v3833_v14  ;;  %v8480_v14 = vadd.f32 %v8421_v43, %v8298_v55 }
 0x4ee   : > { %v4322_v21 = vpop.eup %4321  ;;  %3550 = vst.msk [vmem:[%s8394_s26 + $0x48] sm:$0xf] %vm3531_vm5, %v3897_v53  ;;  %v3895_v23 = vpack.c.bf16 %v3387_v25, %v3387_v25  ;;  %v3294_v4 = vadd.f32 1.0, %v4320_v1  ;;  %4341 = vpow2.f32 %v3838_v39  ;;  %v3837_v42 = vmul.f32 -1.442695, %v8467_v51 }
 0x4ef   : > { %v4324_v9 = vpop.eup %4323  ;;  %3536 = vst.msk [vmem:[%s8394_s26 + $0x10] sm:$0xf] %vm3531_vm5, %v3883_v52  ;;  %v3886_v34 = vpack.c.bf16 %v3378_v47, %v3378_v47  ;;  %v3280_v3 = vadd.f32 1.0, %v4322_v21  ;;  %4343 = vpow2.f32 %v3836_v32  ;;  %v8485_v60 = vadd.f32 %v8298_v55, %v8429_v44 }
 0x4f0   : > { %v4326_v46 = vpop.eup %4325  ;;  %3548 = vst.msk [vmem:[%s8394_s26 + $0x40] sm:$0xf] %vm3531_vm5, %v3895_v23  ;;  %4345 = vrcp.f32 %v3294_v4  ;;  %v3292_v16 = vadd.f32 1.0, %v4324_v9  ;;  %v3842_v28 = vmul.f32 -1.442695, %v8471_v62 }
 0x4f1   : > { %v4328_v5 = vpop.eup %4327  ;;  %3539 = vst.msk [vmem:[%s8394_s26 + $0x1c] sm:$0xf] %vm3531_vm5, %v3886_v34  ;;  %4347 = vrcp.f32 %v3280_v3  ;;  %v3285_v54 = vadd.f32 1.0, %v4326_v46  ;;  %v3840_v2 = vmul.f32 -1.442695, %v8475_v29 }
 0x4f2   : > { %v4330_v17 = vpop.eup %4329  ;;  %4349 = vrcp.f32 %v3292_v16  ;;  %v3297_v26 = vadd.f32 1.0, %v4328_v5  ;;  %v3843_v55 = vmul.f32 -1.442695, %v8480_v14  ;;  %v3841_v1 = vmul.f32 -1.442695, %v8485_v60 }
 0x4f3   : > { %v4332_v41 = vpop.eup %4331  ;;  %4351 = vrcp.f32 %v3285_v54  ;;  %v3283_v22 = vadd.f32 1.0, %v4330_v17 }
 0x4f4   : > { %v4334_v20 = vpop.eup %4333  ;;  %4353 = vrcp.f32 %v3297_v26  ;;  %v3295_v58 = vadd.f32 1.0, %v4332_v41 }
 0x4f5   : > { %v4336_v49 = vpop.eup %4335  ;;  %4355 = vrcp.f32 %v3283_v22  ;;  %v3286_v48 = vadd.f32 1.0, %v4334_v20 }
 0x4f6   : > { %v4338_v10 = vpop.eup %4337  ;;  %4357 = vrcp.f32 %v3295_v58  ;;  %v3298_v45 = vadd.f32 1.0, %v4336_v49 }
 0x4f7   : > { %v4340_v11 = vpop.eup %4339  ;;  %4359 = vrcp.f32 %v3286_v48  ;;  %v3284_v8 = vadd.f32 1.0, %v4338_v10 }
 0x4f8   : > { %v4342_v36 = vpop.eup %4341  ;;  %4361 = vrcp.f32 %v3298_v45  ;;  %v3296_v61 = vadd.f32 1.0, %v4340_v11 }
 0x4f9   : > { %v4344_v63 = vpop.eup %4343  ;;  %4363 = vrcp.f32 %v3284_v8  ;;  %v3301_v15 = vadd.f32 1.0, %v4342_v36 }
 0x4fa   : > { %v4346_v37 = vpop.eup %4345  ;;  %4365 = vrcp.f32 %v3296_v61  ;;  %v3299_v30 = vadd.f32 1.0, %v4344_v63 }
 0x4fb   : > { %v4348_v40 = vpop.eup %4347  ;;  %v3390_v39 = vmul.f32 %v4346_v37, %v8353_v13  ;;  %4367 = vrcp.f32 %v3301_v15 }
 0x4fc   : > { %v4350_v50 = vpop.eup %4349  ;;  %v3376_v43 = vmul.f32 %v4348_v40, %v8356_v7  ;;  %4369 = vrcp.f32 %v3299_v30 }
 0x4fd   : > { %v4352_v32 = vpop.eup %4351  ;;  %v3898_v18 = vpack.c.bf16 %v3390_v39, %v3390_v39  ;;  %v3388_v53 = vmul.f32 %v4350_v50, %v8359_v35  ;;  %4371 = vpow2.f32 %v3839_v33 }
 0x4fe   : > { %v4354_v44 = vpop.eup %4353  ;;  %v3884_v13 = vpack.c.bf16 %v3376_v43, %v3376_v43  ;;  %v3381_v25 = vmul.f32 %v4352_v32, %v8362_v24  ;;  %4373 = vpow2.f32 %v3837_v42 }
 0x4ff   : > { %v4356_v7 = vpop.eup %4355  ;;  %3551 = vst.msk [vmem:[%s8394_s26 + $0x4c] sm:$0xf] %vm3531_vm5, %v3898_v18  ;;  %v3896_v52 = vpack.c.bf16 %v3388_v53, %v3388_v53  ;;  %v3393_v47 = vmul.f32 %v4354_v44, %v8365_v31  ;;  %4375 = vpow2.f32 %v3842_v28 }
 0x500   : > { %v4358_v35 = vpop.eup %4357  ;;  %3537 = vst.msk [vmem:[%s8394_s26 + $0x14] sm:$0xf] %vm3531_vm5, %v3884_v13  ;;  %v3889_v21 = vpack.c.bf16 %v3381_v25, %v3381_v25  ;;  %v3379_v23 = vmul.f32 %v4356_v7, %v8369_v38  ;;  %4377 = vpow2.f32 %v3840_v2 }
 0x501   : > { %v4360_v24 = vpop.eup %4359  ;;  %3549 = vst.msk [vmem:[%s8394_s26 + $0x44] sm:$0xf] %vm3531_vm5, %v3896_v52  ;;  %v3901_v4 = vpack.c.bf16 %v3393_v47, %v3393_v47  ;;  %v3391_v9 = vmul.f32 %v4358_v35, %v8374_v0  ;;  %4379 = vpow2.f32 %v3843_v55 }
 0x502   : > { %v4362_v34 = vpop.eup %4361  ;;  %3542 = vst.msk [vmem:[%s8394_s26 + $0x28] sm:$0xf] %vm3531_vm5, %v3889_v21  ;;  %v3887_v31 = vpack.c.bf16 %v3379_v23, %v3379_v23  ;;  %v3382_v3 = vmul.f32 %v4360_v24, %v8384_v12  ;;  %4381 = vpow2.f32 %v3841_v1 }
 0x503   : > { %v4364_v46 = vpop.eup %4363  ;;  %3554 = vst.msk [vmem:[%s8394_s26 + $0x58] sm:$0xf] %vm3531_vm5, %v3901_v4  ;;  %v3899_v38 = vpack.c.bf16 %v3391_v9, %v3391_v9  ;;  %v3394_v16 = vmul.f32 %v4362_v34, %v8389_v59 }
 0x504   : > { %v4366_v5 = vpop.eup %4365  ;;  %3540 = vst.msk [vmem:[%s8394_s26 + $0x20] sm:$0xf] %vm3531_vm5, %v3887_v31  ;;  %v3890_v0 = vpack.c.bf16 %v3382_v3, %v3382_v3  ;;  %v3380_v54 = vmul.f32 %v4364_v46, %v8399_v27 }
 0x505   : > { %v4368_v17 = vpop.eup %4367  ;;  %3552 = vst.msk [vmem:[%s8394_s26 + $0x50] sm:$0xf] %vm3531_vm5, %v3899_v38  ;;  %v3902_v12 = vpack.c.bf16 %v3394_v16, %v3394_v16  ;;  %v3392_v26 = vmul.f32 %v4366_v5, %v8403_v19 }
 0x506   : > { %v4370_v41 = vpop.eup %4369  ;;  %3543 = vst.msk [vmem:[%s8394_s26 + $0x2c] sm:$0xf] %vm3531_vm5, %v3890_v0  ;;  %v3888_v22 = vpack.c.bf16 %v3380_v54, %v3380_v54  ;;  %v3397_v59 = vmul.f32 %v4368_v17, %v8419_v56 }
 0x507   : > { %v4372_v20 = vpop.eup %4371  ;;  %3555 = vst.msk [vmem:[%s8394_s26 + $0x5c] sm:$0xf] %vm3531_vm5, %v3902_v12  ;;  %v3900_v58 = vpack.c.bf16 %v3392_v26, %v3392_v26  ;;  %v3395_v27 = vmul.f32 %v4370_v41, %v8427_v57 }
 0x508   : > { %v4374_v49 = vpop.eup %4373  ;;  %3541 = vst.msk [vmem:[%s8394_s26 + $0x24] sm:$0xf] %vm3531_vm5, %v3888_v22  ;;  %v3905_v48 = vpack.c.bf16 %v3397_v59, %v3397_v59  ;;  %v3302_v10 = vadd.f32 1.0, %v4372_v20 }
 0x509   : > { %v4376_v19 = vpop.eup %4375  ;;  %3553 = vst.msk [vmem:[%s8394_s26 + $0x54] sm:$0xf] %vm3531_vm5, %v3900_v58  ;;  %v3903_v45 = vpack.c.bf16 %v3395_v27, %v3395_v27  ;;  %v3300_v11 = vadd.f32 1.0, %v4374_v49 }
 0x50a   : > { %v4378_v8 = vpop.eup %4377  ;;  %3558 = vst.msk [vmem:[%s8394_s26 + $0x68] sm:$0xf] %vm3531_vm5, %v3905_v48  ;;  %4383 = vrcp.f32 %v3302_v10  ;;  %v3305_v56 = vadd.f32 1.0, %v4376_v19 }
 0x50b   : > { %v4380_v36 = vpop.eup %4379  ;;  %3556 = vst.msk [vmem:[%s8394_s26 + $0x60] sm:$0xf] %vm3531_vm5, %v3903_v45  ;;  %4385 = vrcp.f32 %v3300_v11  ;;  %v3303_v57 = vadd.f32 1.0, %v4378_v8 }
 0x50c   : > { %v4382_v61 = vpop.eup %4381  ;;  %4387 = vrcp.f32 %v3305_v56  ;;  %v3306_v63 = vadd.f32 1.0, %v4380_v36 }
 0x50d   : > { %4389 = vrcp.f32 %v3303_v57  ;;  %v3304_v15 = vadd.f32 1.0, %v4382_v61 }
 0x50e   : > { %4391 = vrcp.f32 %v3306_v63 }
 0x50f   : > { %4393 = vrcp.f32 %v3304_v15 }
 0x514   : > { %v4384_v33 = vpop.eup %4383 }
 0x515   : > { %v4386_v37 = vpop.eup %4385  ;;  %v3398_v30 = vmul.f32 %v4384_v33, %v8463_v6 }
 0x516   : > { %v4388_v42 = vpop.eup %4387  ;;  %v3396_v40 = vmul.f32 %v4386_v37, %v8467_v51 }
 0x517   : > { %v4390_v39 = vpop.eup %4389  ;;  %v3906_v28 = vpack.c.bf16 %v3398_v30, %v3398_v30  ;;  %v3401_v50 = vmul.f32 %v4388_v42, %v8471_v62 }
 0x518   : > { %v4392_v43 = vpop.eup %4391  ;;  %v3904_v2 = vpack.c.bf16 %v3396_v40, %v3396_v40  ;;  %v3399_v32 = vmul.f32 %v4390_v39, %v8475_v29 }
 0x519   : > { %v4394_v18 = vpop.eup %4393  ;;  %3559 = vst.msk [vmem:[%s8394_s26 + $0x6c] sm:$0xf] %vm3531_vm5, %v3906_v28  ;;  %v3909_v53 = vpack.c.bf16 %v3401_v50, %v3401_v50  ;;  %v3402_v6 = vmul.f32 %v4392_v43, %v8480_v14 }
 0x51a   : > { %3557 = vst.msk [vmem:[%s8394_s26 + $0x64] sm:$0xf] %vm3531_vm5, %v3904_v2  ;;  %v3907_v51 = vpack.c.bf16 %v3399_v32, %v3399_v32  ;;  %v3400_v55 = vmul.f32 %v4394_v18, %v8485_v60 }
 0x51b   : > { %3562 = vst.msk [vmem:[%s8394_s26 + $0x78] sm:$0xf] %vm3531_vm5, %v3909_v53  ;;  %v3910_v44 = vpack.c.bf16 %v3402_v6, %v3402_v6 }
 0x51c   : > { %3560 = vst.msk [vmem:[%s8394_s26 + $0x70] sm:$0xf] %vm3531_vm5, %v3907_v51  ;;  %v3908_v62 = vpack.c.bf16 %v3400_v55, %v3400_v55 }
 0x51d   : > { %3563 = vst.msk [vmem:[%s8394_s26 + $0x7c] sm:$0xf] %vm3531_vm5, %v3910_v44 }
 0x51e   : > { %3561 = vst.msk [vmem:[%s8394_s26 + $0x74] sm:$0xf] %vm3531_vm5, %v3908_v62 }
 0x51f PF: > { %s19_s30 = sadd.s32 1, %s4402_s30  }
 0x520   : > { %p16_p4 = scmp.ge.s32.totalorder %s19_s30, 4  }
 0x522   :  { %18 = sbr.rel (!%p16_p4) target bundleno = 1 (0x1), region = 88 }

// kernel: efficientnet_forward.5
= control target key start
LH: loop header
LB: loop body
LE: loop exit
PB: predicated region body
PF: predicated region fallthrough
CT: control target
= control target key end

     0   :  { %s3746_s21 = smov 0   ;;  %s5219_s0 = inlined_call_operand.vmem [shape: bf16[2,9,9,96], index: 0, kind: input, shape index: {}]   ;;  %s5220_s1 = inlined_call_operand.vmem [shape: bf16[2,9,9,96], index: 1, kind: input, shape index: {}]   ;;  %s5221_s2 = inlined_call_operand.vmem [shape: bf16[2,9,9,96], index: 2, kind: input, shape index: {}]   ;;  %s5222_s3 = inlined_call_operand.vmem [shape: bf16[2,9,9,96], index: 3, kind: input, shape index: {}]   ;;  %s5223_s4 = inlined_call_operand.vmem [shape: f32[9,96], index: 4, kind: input, shape index: {}]   ;;  %s5224_s5 = inlined_call_operand.vmem [shape: f32[1,96], index: 5, kind: input, shape index: {}]   ;;  %s5225_s6 = inlined_call_operand.vmem [shape: f32[96,24], index: 6, kind: input, shape index: {}]   ;;  %s5226_s7 = inlined_call_operand.vmem [shape: f32[1,24], index: 7, kind: input, shape index: {}]   ;;  %s5227_s8 = inlined_call_operand.vmem [shape: f32[24,96], index: 8, kind: input, shape index: {}]   ;;  %s5228_s9 = inlined_call_operand.vmem [shape: f32[1,96], index: 9, kind: input, shape index: {}]   ;;  %s5229_s10 = inlined_call_operand.vmem [shape: bf16[96,1280], index: 10, kind: input, shape index: {}]   ;;  %s5230_s11 = inlined_call_operand.vmem [shape: f32[1,1280], index: 11, kind: input, shape index: {}]   ;;  %s5231_s12 = inlined_call_operand.vmem [shape: f32[2,1,1280], index: 12, kind: output, shape index: {}]  }
   0x1 LB: > { %s2920_s22 = sadd.s32 4294967295, %s3674_s21   ;;  %p2924_p0 = scmp.ge.s32.totalorder %s3674_s21, 1  ;;  %s3674_s21 = sphi %s3746_s21, %s22_s21  }
   0x2   : > { %p392_p1 = scmp.lt.s32.totalorder %s3674_s21, 3 }
   0x4   : > { %p393_p2 = pnand %p2924_p0, %p392_p1 }
   0x6   : > { %396 = sbr.rel (%p393_p2) target bundleno = 1071 (0x42f), region = 68 }
   0xd   : > { %v1065_v0 = vld [vmem:[%s5225_s6] sm:$0xff]  ;;  %v1066_v1 = vld [vmem:[%s5225_s6 + $0x8] sm:$0xff]  ;;  %v1067_v2 = vld [vmem:[%s5225_s6 + $0x10] sm:$0xff]  ;;  %v5232_v3 = vlaneseq  ;;  %v3676_v4 = vmov 0.0|0.0   ;;  %vm3677_vm0 = vmmov 0   ;;  %v3678_v9 = vmov 0.0  }
   0xe   : > { %3182 = vmatprep.subr.bf16.mxu0 %v3676_v4  ;;  %v3183_v5 = vpack.c.bf16 %v1066_v1, %v1065_v0  ;;  %v1068_v6 = vld [vmem:[%s5225_s6 + $0x18] sm:$0xff]  ;;  %v1069_v7 = vld [vmem:[%s5225_s6 + $0x20] sm:$0xff]  ;;  %v1070_v8 = vld [vmem:[%s5225_s6 + $0x28] sm:$0xff]  ;;  %3170 = vmatprep.mubr.msk.f32.mxu0 %vm3677_vm0, %v3678_v9  ;;  %p448_p3 = scmp.lt.s32.totalorder %s2920_s22, 1  ;;  %vm599_vm1 = vcmask 1046528   ;;  %vm1041_vm2 = vcmask 785408  }
   0xf   : > { %v3778_v10 = vld [vmem:[%s5225_s6 + $0x30] sm:$0xff]  ;;  %v3783_v11 = vld [vmem:[%s5225_s6 + $0x38] sm:$0xff]  ;;  %v3788_v12 = vld [vmem:[%s5225_s6 + $0x40] sm:$0xff]  ;;  %v3791_v13 = vshrl.u32 %v5232_v3, 7  ;;  %v3186_v14 = vpack.c.bf16 %v1068_v6, %v1067_v2  ;;  %v3189_v18 = vpack.c.bf16 %v1070_v8, %v1069_v7  ;;  %vm1162_vm3 = vcmask 195584  }
  0x10   : > { %3184 = vmatpush3.bf16.msra.mxu0 %v3183_v5  ;;  %v3796_v15 = vld [vmem:[%s5225_s6 + $0x48] sm:$0xff]  ;;  %v3801_v16 = vld [vmem:[%s5225_s6 + $0x50] sm:$0xff]  ;;  %v3806_v17 = vld [vmem:[%s5225_s6 + $0x58] sm:$0xff]  ;;  %s5310_s22 = smov (!%p448_p3, %s2920_s22), 1  ;;  %v3192_v19 = vpack.c.bf16 %v3783_v11, %v3778_v10 }
  0x11   : > { %3185 = vmatprep.subr.bf16.mxu0 %v3676_v4  ;;  %v473_v20 = vld [vmem:[%s5223_s4] sm:$0xff]  ;;  %v3817_v21 = vsub.s32 0, %v3791_v13  ;;  %v3820_v22 = vsub.s32 1, %v3791_v13  ;;  %s3823_s15 = smul.u32 72, %s5310_s22  ;;  %v565_v23 = vsub.s32 2, %v3791_v13  ;;  %v5237_v24 = vsub.s32 3, %v3791_v13 }
  0x12   : > { %v5236_v25 = vsub.s32 4, %v3791_v13  ;;  %v5234_v26 = vsub.s32 5, %v3791_v13  ;;  %v3195_v27 = vpack.c.bf16 %v3796_v15, %v3788_v12  ;;  %v3198_v28 = vpack.c.bf16 %v3806_v17, %v3801_v16  ;;  %s3204_s24 = smul.u32 10, %s5310_s22 }
  0x13   : > { %5247 = vst [vmem:[#allocation2_spill] sm:$0xff] %v3817_v21  ;;  %5248 = vst [vmem:[#allocation3_spill] sm:$0xff] %v3820_v22  ;;  %v5235_v29 = vsub.s32 6, %v3791_v13  ;;  %v5233_v30 = vsub.s32 7, %v3791_v13  ;;  %s3839_s18 = scalar_lea.vmem %s5219_s0, %s3823_s15  ;;  %s3845_s23 = scalar_lea.vmem %s5220_s1, %s3823_s15  ;;  %v494_v31 = vrot.slane %v473_v20, %v3817_v21  ;;  %v530_v32 = vrot.slane %v473_v20, %v3820_v22 }
  0x14   : > { %3187 = vmatpush3.bf16.msra.mxu0 %v3186_v14  ;;  %v3851_v33 = vrot.slane %v473_v20, %v565_v23  ;;  %v3855_v34 = vrot.slane %v473_v20, %v5237_v24  ;;  %v3859_v35 = vld [vmem:[%s3839_s18] ss:$8 sps:$4 sm:$0xff]   ;;  %v3862_v36 = vld [vmem:[%s3839_s18 + $0x10] ss:$8 sps:$4 sm:$0xff]   ;;  %v3869_v38 = vrot.slane %v473_v20, %v5236_v25  ;;  %v3873_v39 = vrot.slane %v473_v20, %v5234_v26  ;;  %v550_v26 = vld [vmem:[%s3839_s18 + $0x1c] sm:$0x1]  ;;  %s3975_s26 = scalar_lea.vmem %s5221_s2, %s3823_s15  ;;  %s467_s29 = scalar_lea.vmem %s5222_s3, %s3823_s15 }
  0x15   : > { %3188 = vmatprep.subr.bf16.mxu0 %v3676_v4  ;;  %v3865_v37 = vld [vmem:[%s3839_s18 + $0x20] ss:$8 sps:$4 sm:$0xff]   ;;  %v3877_v40 = vrot.slane %v473_v20, %v5235_v29  ;;  %v3881_v41 = vrot.slane %v473_v20, %v5233_v30  ;;  %v3884_v42 = vld [vmem:[%s3839_s18 + $0x30] ss:$8 sps:$4 sm:$0xff]   ;;  %v483_v43 = vunpack.c.l.bf16 %v3859_v35  ;;  %v484_v44 = vunpack.c.h.bf16 %v3859_v35  ;;  %v547_v20 = vld [vmem:[%s3839_s18 + $0x4] sm:$0x1]  ;;  %s5204_s27 = scalar_lea.vmem %s5231_s12, %s3204_s24 }
  0x16   : > { %v485_v45 = vunpack.c.l.bf16 %v3862_v36  ;;  %v486_v46 = vunpack.c.h.bf16 %v3862_v36  ;;  %v487_v47 = vunpack.c.l.bf16 %v3865_v37  ;;  %v488_v48 = vunpack.c.h.bf16 %v3865_v37  ;;  %v511_v51 = vld [vmem:[%s3845_s23] ss:$8 sps:$4 sm:$0xff]   ;;  %v513_v52 = vld [vmem:[%s3845_s23 + $0x10] ss:$8 sps:$4 sm:$0xff]   ;;  %v549_v30 = vld [vmem:[%s3839_s18 + $0x14] sm:$0x1] }
  0x17   : > { %v489_v49 = vunpack.c.l.bf16 %v3884_v42  ;;  %v490_v50 = vunpack.c.h.bf16 %v3884_v42  ;;  %v495_v53 = vmul.f32 %v494_v31, %v483_v43  ;;  %v496_v54 = vmul.f32 %v494_v31, %v484_v44  ;;  %v515_v57 = vld [vmem:[%s3845_s23 + $0x20] ss:$8 sps:$4 sm:$0xff]   ;;  %v517_v58 = vld [vmem:[%s3845_s23 + $0x30] ss:$8 sps:$4 sm:$0xff]   ;;  %v551_v29 = vld [vmem:[%s3839_s18 + $0x24] sm:$0x1] }
  0x18   : > { %3190 = vmatpush3.bf16.msra.mxu0 %v3189_v18  ;;  %v497_v55 = vmul.f32 %v494_v31, %v485_v45  ;;  %v498_v56 = vmul.f32 %v494_v31, %v486_v46  ;;  %v499_v59 = vmul.f32 %v494_v31, %v487_v47  ;;  %v500_v60 = vmul.f32 %v494_v31, %v488_v48  ;;  %v554_v25 = vld [vmem:[%s3839_s18 + $0x3c] sm:$0x1] }
  0x19   : > { %3191 = vmatprep.subr.bf16.mxu0 %v3676_v4  ;;  %v501_v61 = vmul.f32 %v494_v31, %v489_v49  ;;  %v502_v62 = vmul.f32 %v494_v31, %v490_v50  ;;  %v519_v63 = vunpack.c.l.bf16 %v511_v51  ;;  %v520_v0 = vunpack.c.h.bf16 %v511_v51  ;;  %v548_v31 = vld [vmem:[%s3839_s18 + $0xc] sm:$0x1] }
  0x1a   : > { %v521_v1 = vunpack.c.l.bf16 %v513_v52  ;;  %v522_v2 = vunpack.c.h.bf16 %v513_v52  ;;  %v523_v5 = vunpack.c.l.bf16 %v515_v57  ;;  %v524_v6 = vunpack.c.h.bf16 %v515_v57 }
  0x1b   : > { %v525_v7 = vunpack.c.l.bf16 %v517_v58  ;;  %v526_v8 = vunpack.c.h.bf16 %v517_v58  ;;  %v531_v10 = vmul.f32 %v530_v32, %v519_v63  ;;  %v532_v11 = vmul.f32 %v530_v32, %v520_v0 }
  0x1c   : > { %3193 = vmatpush3.bf16.msra.mxu0 %v3192_v19  ;;  %v533_v14 = vmul.f32 %v530_v32, %v521_v1  ;;  %v534_v18 = vmul.f32 %v530_v32, %v522_v2  ;;  %v535_v51 = vmul.f32 %v530_v32, %v523_v5  ;;  %v536_v52 = vmul.f32 %v530_v32, %v524_v6  ;;  %v552_v1 = vld [vmem:[%s3839_s18 + $0x2c] sm:$0x1]  ;;  %v553_v2 = vld [vmem:[%s3839_s18 + $0x34] sm:$0x1] }
  0x1d   : > { %3194 = vmatprep.subr.bf16.mxu0 %v3676_v4  ;;  %v537_v3 = vmul.f32 %v530_v32, %v525_v7  ;;  %v538_v57 = vmul.f32 %v530_v32, %v526_v8  ;;  %v3921_v19 = vadd.f32 %v531_v10, %v495_v53  ;;  %v3923_v58 = vadd.f32 %v532_v11, %v496_v54 }
  0x1e   : > { %v3925_v63 = vadd.f32 %v533_v14, %v497_v55  ;;  %v3927_v0 = vadd.f32 %v534_v18, %v498_v56  ;;  %v3932_v24 = vadd.f32 %v535_v51, %v499_v59  ;;  %v3934_v5 = vadd.f32 %v536_v52, %v500_v60  ;;  %v3994_v51 = vld [vmem:[%s3975_s26 + $0x10] ss:$8 sps:$4 sm:$0xff]  }
  0x1f   : > { %v3936_v32 = vadd.f32 %v537_v3, %v501_v61  ;;  %v3938_v6 = vadd.f32 %v538_v57, %v502_v62  ;;  %v555_v53 = vunpack.c.l.bf16 %v547_v20  ;;  %v556_v54 = vunpack.c.l.bf16 %v548_v31 }
  0x20   : > { %3196 = vmatpush3.bf16.msra.mxu0 %v3195_v27  ;;  %v557_v55 = vunpack.c.l.bf16 %v549_v30  ;;  %v558_v56 = vunpack.c.l.bf16 %v550_v26  ;;  %v559_v7 = vunpack.c.l.bf16 %v551_v29  ;;  %v560_v8 = vunpack.c.l.bf16 %v552_v1 }
  0x21   : > { %3197 = vmatprep.subr.bf16.mxu0 %v3676_v4  ;;  %v561_v59 = vunpack.c.l.bf16 %v553_v2  ;;  %v562_v60 = vunpack.c.l.bf16 %v554_v25  ;;  %v567_v3 = vmul.f32 %v3851_v33, %v483_v43  ;;  %v568_v61 = vmul.f32 %v3851_v33, %v555_v53  ;;  %v3998_v53 = vld [vmem:[%s3975_s26 + $0x20] ss:$8 sps:$4 sm:$0xff]  }
  0x22   : > { %v569_v12 = vmul.f32 %v3851_v33, %v484_v44  ;;  %v570_v15 = vmul.f32 %v3851_v33, %v556_v54  ;;  %v571_v26 = vmul.f32 %v3851_v33, %v485_v45  ;;  %v572_v27 = vmul.f32 %v3851_v33, %v557_v55  ;;  %v4001_v54 = vld [vmem:[%s3975_s26 + $0x30] ss:$8 sps:$4 sm:$0xff]  }
  0x23   : > { %v573_v25 = vmul.f32 %v3851_v33, %v486_v46  ;;  %v574_v29 = vmul.f32 %v3851_v33, %v558_v56  ;;  %v575_v30 = vmul.f32 %v3851_v33, %v487_v47  ;;  %v576_v35 = vmul.f32 %v3851_v33, %v559_v7 }
  0x24   : > { %3199 = vmatpush3.bf16.msra.mxu0 %v3198_v28  ;;  %v577_v43 = vmul.f32 %v3851_v33, %v488_v48  ;;  %v578_v36 = vmul.f32 %v3851_v33, %v560_v8  ;;  %v579_v16 = vmul.f32 %v3851_v33, %v489_v49  ;;  %v580_v17 = vmul.f32 %v3851_v33, %v561_v59 }
  0x25   : > { %v581_v28 = vmul.f32 %v3851_v33, %v490_v50  ;;  %v582_v37 = vmul.f32 %v3851_v33, %v562_v60  ;;  %3200 = vmatprep.subr.bf16.mxu0 %v3676_v4  ;;  %v600_v44 = vrot.slane %v567_v3, 1  ;;  %v601_v45 = vrot.slane %v568_v61, 1  ;;  %v3989_v33 = vld [vmem:[%s3975_s26] ss:$8 sps:$4 sm:$0xff]  }
  0x26   : > { %v603_v46 = vrot.slane %v569_v12, 1  ;;  %v604_v47 = vrot.slane %v570_v15, 1  ;;  %v606_v48 = vrot.slane %v571_v26, 1  ;;  %v607_v62 = vrot.slane %v572_v27, 1 }
  0x27   : > { %v609_v10 = vrot.slane %v573_v25, 1  ;;  %v610_v49 = vrot.slane %v574_v29, 1  ;;  %v602_v42 = vsel %vm599_vm1, %v600_v44, %v601_v45  ;;  %v612_v50 = vrot.slane %v575_v30, 1  ;;  %v676_v30 = vld [vmem:[%s467_s29] ss:$8 sps:$4 sm:$0xff]  }
  0x28   : > { %v605_v11 = vsel %vm599_vm1, %v603_v46, %v604_v47  ;;  %v613_v14 = vrot.slane %v576_v35, 1  ;;  %v608_v4 = vsel %vm599_vm1, %v606_v48, %v607_v62  ;;  %v615_v20 = vrot.slane %v577_v43, 1 }
  0x29   : > { %v611_v18 = vsel %vm599_vm1, %v609_v10, %v610_v49  ;;  %v616_v31 = vrot.slane %v578_v36, 1  ;;  %v618_v57 = vrot.slane %v579_v16, 1  ;;  %v619_v1 = vrot.slane %v580_v17, 1  ;;  %v680_v16 = vld [vmem:[%s467_s29 + $0x20] ss:$8 sps:$4 sm:$0xff]  }
  0x2a   : > { %v614_v52 = vsel %vm599_vm1, %v612_v50, %v613_v14  ;;  %v621_v2 = vrot.slane %v581_v28, 1  ;;  %v622_v56 = vrot.slane %v582_v37, 1  ;;  %v632_v7 = vadd.f32 %v602_v42, %v3921_v19  ;;  %v682_v17 = vld [vmem:[%s467_s29 + $0x30] ss:$8 sps:$4 sm:$0xff]  }
  0x2b   : > { %v617_v55 = vsel %vm599_vm1, %v615_v20, %v616_v31  ;;  %v633_v8 = vadd.f32 %v605_v11, %v3923_v58  ;;  %v620_v59 = vsel %vm599_vm1, %v618_v57, %v619_v1  ;;  %v634_v60 = vadd.f32 %v608_v4, %v3925_v63  ;;  %v712_v57 = vld [vmem:[%s3975_s26 + $0x4] sm:$0x1]  ;;  %v713_v1 = vld [vmem:[%s3975_s26 + $0xc] sm:$0x1] }
  0x2c   : > { %v635_v3 = vadd.f32 %v611_v18, %v3927_v0  ;;  %v636_v61 = vadd.f32 %v614_v52, %v3932_v24  ;;  %v623_v12 = vsel %vm599_vm1, %v621_v2, %v622_v56  ;;  %v637_v15 = vadd.f32 %v617_v55, %v3934_v5  ;;  %v714_v2 = vld [vmem:[%s3975_s26 + $0x14] sm:$0x1]  ;;  %v715_v55 = vld [vmem:[%s3975_s26 + $0x1c] sm:$0x1] }
  0x2d   : > { %v638_v19 = vadd.f32 %v620_v59, %v3936_v32  ;;  %v648_v58 = vunpack.c.l.bf16 %v3989_v33  ;;  %v639_v26 = vadd.f32 %v623_v12, %v3938_v6  ;;  %v649_v27 = vunpack.c.h.bf16 %v3989_v33  ;;  %v678_v32 = vld [vmem:[%s467_s29 + $0x10] ss:$8 sps:$4 sm:$0xff]  }
  0x2e   : > { %v650_v25 = vunpack.c.l.bf16 %v3994_v51  ;;  %v651_v63 = vunpack.c.h.bf16 %v3994_v51  ;;  %v652_v0 = vunpack.c.l.bf16 %v3998_v53  ;;  %v653_v24 = vunpack.c.h.bf16 %v3998_v53 }
  0x2f   : > { %v654_v29 = vunpack.c.l.bf16 %v4001_v54  ;;  %v655_v5 = vunpack.c.h.bf16 %v4001_v54  ;;  %v660_v6 = vmul.f32 %v3855_v34, %v648_v58  ;;  %v661_v35 = vmul.f32 %v3855_v34, %v649_v27 }
  0x30   : > { %v662_v43 = vmul.f32 %v3855_v34, %v650_v25  ;;  %v663_v36 = vmul.f32 %v3855_v34, %v651_v63  ;;  %v664_v28 = vmul.f32 %v3855_v34, %v652_v0  ;;  %v665_v37 = vmul.f32 %v3855_v34, %v653_v24 }
  0x31   : > { %v666_v44 = vmul.f32 %v3855_v34, %v654_v29  ;;  %v667_v45 = vmul.f32 %v3855_v34, %v655_v5  ;;  %v668_v46 = vadd.f32 %v660_v6, %v632_v7  ;;  %v669_v47 = vadd.f32 %v661_v35, %v633_v8  ;;  %v717_v6 = vld [vmem:[%s3975_s26 + $0x2c] sm:$0x1]  ;;  %v718_v35 = vld [vmem:[%s3975_s26 + $0x34] sm:$0x1] }
  0x32   : > { %v670_v48 = vadd.f32 %v662_v43, %v634_v60  ;;  %v671_v62 = vadd.f32 %v663_v36, %v635_v3  ;;  %v672_v10 = vadd.f32 %v664_v28, %v636_v61  ;;  %v673_v49 = vadd.f32 %v665_v37, %v637_v15  ;;  %v716_v15 = vld [vmem:[%s3975_s26 + $0x24] sm:$0x1]  ;;  %v719_v43 = vld [vmem:[%s3975_s26 + $0x3c] sm:$0x1] }
  0x33   : > { %v674_v42 = vadd.f32 %v666_v44, %v638_v19  ;;  %v675_v11 = vadd.f32 %v667_v45, %v639_v26  ;;  %v684_v50 = vunpack.c.l.bf16 %v676_v30  ;;  %v685_v14 = vunpack.c.h.bf16 %v676_v30 }
  0x34   : > { %v686_v4 = vunpack.c.l.bf16 %v678_v32  ;;  %v687_v18 = vunpack.c.h.bf16 %v678_v32  ;;  %v688_v20 = vunpack.c.l.bf16 %v680_v16  ;;  %v689_v31 = vunpack.c.h.bf16 %v680_v16 }
  0x35   : > { %v690_v34 = vunpack.c.l.bf16 %v682_v17  ;;  %v691_v52 = vunpack.c.h.bf16 %v682_v17  ;;  %v696_v56 = vmul.f32 %v3869_v38, %v684_v50  ;;  %v697_v7 = vmul.f32 %v3869_v38, %v685_v14 }
  0x36   : > { %v698_v8 = vmul.f32 %v3869_v38, %v686_v4  ;;  %v699_v59 = vmul.f32 %v3869_v38, %v687_v18  ;;  %v700_v60 = vmul.f32 %v3869_v38, %v688_v20  ;;  %v701_v3 = vmul.f32 %v3869_v38, %v689_v31 }
  0x37   : > { %v702_v61 = vmul.f32 %v3869_v38, %v690_v34  ;;  %v703_v12 = vmul.f32 %v3869_v38, %v691_v52  ;;  %v704_v19 = vadd.f32 %v696_v56, %v668_v46  ;;  %v705_v26 = vadd.f32 %v697_v7, %v669_v47 }
  0x38   : > { %v706_v30 = vadd.f32 %v698_v8, %v670_v48  ;;  %v707_v32 = vadd.f32 %v699_v59, %v671_v62  ;;  %v708_v36 = vadd.f32 %v700_v60, %v672_v10  ;;  %v709_v16 = vadd.f32 %v701_v3, %v673_v49 }
  0x39   : > { %v710_v17 = vadd.f32 %v702_v61, %v674_v42  ;;  %v711_v28 = vadd.f32 %v703_v12, %v675_v11  ;;  %v720_v37 = vunpack.c.l.bf16 %v712_v57  ;;  %v721_v44 = vunpack.c.l.bf16 %v713_v1  ;;  %v4104_v12 = vld [vmem:[%s3839_s18 + $0x8] ss:$8 sps:$4 sm:$0xff]  }
  0x3a   : > { %v722_v45 = vunpack.c.l.bf16 %v714_v2  ;;  %v723_v50 = vunpack.c.l.bf16 %v715_v55  ;;  %v724_v14 = vunpack.c.l.bf16 %v716_v15  ;;  %v725_v4 = vunpack.c.l.bf16 %v717_v6 }
  0x3b   : > { %v726_v18 = vunpack.c.l.bf16 %v718_v35  ;;  %v727_v38 = vunpack.c.l.bf16 %v719_v43  ;;  %v732_v46 = vmul.f32 %v3873_v39, %v648_v58  ;;  %v733_v47 = vmul.f32 %v3873_v39, %v720_v37  ;;  %v4108_v37 = vld [vmem:[%s3839_s18 + $0x18] ss:$8 sps:$4 sm:$0xff]  }
  0x3c   : > { %v734_v48 = vmul.f32 %v3873_v39, %v649_v27  ;;  %v735_v62 = vmul.f32 %v3873_v39, %v721_v44  ;;  %v736_v10 = vmul.f32 %v3873_v39, %v650_v25  ;;  %v737_v49 = vmul.f32 %v3873_v39, %v722_v45 }
  0x3d   : > { %v738_v42 = vmul.f32 %v3873_v39, %v651_v63  ;;  %v739_v58 = vmul.f32 %v3873_v39, %v723_v50  ;;  %v740_v33 = vmul.f32 %v3873_v39, %v652_v0  ;;  %v741_v27 = vmul.f32 %v3873_v39, %v724_v14 }
  0x3e   : > { %v742_v11 = vmul.f32 %v3873_v39, %v653_v24  ;;  %v743_v25 = vmul.f32 %v3873_v39, %v725_v4  ;;  %v744_v51 = vmul.f32 %v3873_v39, %v654_v29  ;;  %v745_v63 = vmul.f32 %v3873_v39, %v726_v18  ;;  %v4112_v4 = vld [vmem:[%s3839_s18 + $0x28] ss:$8 sps:$4 sm:$0xff]   ;;  %v4115_v18 = vld [vmem:[%s3839_s18 + $0x38] ss:$8 sps:$4 sm:$0xff]  }
  0x3f   : > { %v746_v20 = vmul.f32 %v3873_v39, %v655_v5  ;;  %v747_v0 = vmul.f32 %v3873_v39, %v727_v38  ;;  %v764_v31 = vrot.slane %v732_v46, 1  ;;  %v765_v34 = vrot.slane %v733_v47, 1 }
  0x40   : > { %v767_v52 = vrot.slane %v734_v48, 1  ;;  %v768_v53 = vrot.slane %v735_v62, 1  ;;  %v770_v57 = vrot.slane %v736_v10, 1  ;;  %v771_v24 = vrot.slane %v737_v49, 1 }
  0x41   : > { %v773_v1 = vrot.slane %v738_v42, 1  ;;  %v774_v2 = vrot.slane %v739_v58, 1  ;;  %v766_v55 = vsel %vm599_vm1, %v764_v31, %v765_v34  ;;  %v776_v56 = vrot.slane %v740_v33, 1  ;;  %v2941_v34 = vld [vmem:[%s3845_s23 + $0x28] ss:$8 sps:$4 sm:$0xff]  }
  0x42   : > { %v769_v29 = vsel %vm599_vm1, %v767_v52, %v768_v53  ;;  %v777_v54 = vrot.slane %v741_v27, 1  ;;  %v772_v5 = vsel %vm599_vm1, %v770_v57, %v771_v24  ;;  %v779_v7 = vrot.slane %v742_v11, 1  ;;  %v2943_v52 = vld [vmem:[%s3845_s23 + $0x38] ss:$8 sps:$4 sm:$0xff]  }
  0x43   : > { %v775_v39 = vsel %vm599_vm1, %v773_v1, %v774_v2  ;;  %v780_v8 = vrot.slane %v743_v25, 1  ;;  %v782_v60 = vrot.slane %v744_v51, 1  ;;  %v783_v3 = vrot.slane %v745_v63, 1  ;;  %v2937_v25 = vld [vmem:[%s3845_s23 + $0x8] ss:$8 sps:$4 sm:$0xff]  }
  0x44   : > { %v778_v59 = vsel %vm599_vm1, %v776_v56, %v777_v54  ;;  %v785_v61 = vrot.slane %v746_v20, 1  ;;  %v786_v6 = vrot.slane %v747_v0, 1  ;;  %v796_v35 = vadd.f32 %v766_v55, %v704_v19  ;;  %v2939_v51 = vld [vmem:[%s3845_s23 + $0x18] ss:$8 sps:$4 sm:$0xff]  }
  0x45   : > { %v781_v15 = vsel %vm599_vm1, %v779_v7, %v780_v8  ;;  %v797_v43 = vadd.f32 %v769_v29, %v705_v26  ;;  %v784_v44 = vsel %vm599_vm1, %v782_v60, %v783_v3  ;;  %v798_v45 = vadd.f32 %v772_v5, %v706_v30  ;;  %v2945_v3 = vld [vmem:[%s3839_s18 + $0xc] sm:$0x1] }
  0x46   : > { %v799_v50 = vadd.f32 %v775_v39, %v707_v32  ;;  %v800_v14 = vadd.f32 %v778_v59, %v708_v36  ;;  %v787_v38 = vsel %vm599_vm1, %v785_v61, %v786_v6  ;;  %v801_v46 = vadd.f32 %v781_v15, %v709_v16  ;;  %v2946_v61 = vld [vmem:[%s3839_s18 + $0x14] sm:$0x1] }
  0x47   : > { %v802_v47 = vadd.f32 %v784_v44, %v710_v17  ;;  %v813_v48 = vunpack.c.l.bf16 %v4104_v12  ;;  %v803_v62 = vadd.f32 %v787_v38, %v711_v28  ;;  %v814_v19 = vunpack.c.h.bf16 %v4104_v12  ;;  %v2947_v44 = vld [vmem:[%s3839_s18 + $0x1c] sm:$0x1] }
  0x48   : > { %v815_v26 = vunpack.c.l.bf16 %v4108_v37  ;;  %v816_v30 = vunpack.c.h.bf16 %v4108_v37  ;;  %v817_v32 = vunpack.c.l.bf16 %v4112_v4  ;;  %v818_v36 = vunpack.c.h.bf16 %v4112_v4 }
  0x49   : > { %v819_v10 = vunpack.c.l.bf16 %v4115_v18  ;;  %v820_v16 = vunpack.c.h.bf16 %v4115_v18  ;;  %v825_v17 = vmul.f32 %v3877_v40, %v813_v48  ;;  %v826_v28 = vmul.f32 %v3877_v40, %v814_v19 }
  0x4a   : > { %v827_v49 = vmul.f32 %v3877_v40, %v815_v26  ;;  %v828_v42 = vmul.f32 %v3877_v40, %v816_v30  ;;  %v829_v58 = vmul.f32 %v3877_v40, %v817_v32  ;;  %v830_v33 = vmul.f32 %v3877_v40, %v818_v36 }
  0x4b   : > { %v831_v27 = vmul.f32 %v3877_v40, %v819_v10  ;;  %v832_v11 = vmul.f32 %v3877_v40, %v820_v16  ;;  %v833_v63 = vadd.f32 %v825_v17, %v796_v35  ;;  %v834_v20 = vadd.f32 %v826_v28, %v797_v43  ;;  %v2951_v17 = vld [vmem:[%s3839_s18 + $0x3c] sm:$0x1]  ;;  %v2952_v28 = vld [vmem:[%s3839_s18 + $0x44] sm:$0x1] }
  0x4c   : > { %v835_v0 = vadd.f32 %v827_v49, %v798_v45  ;;  %v836_v31 = vadd.f32 %v828_v42, %v799_v50  ;;  %v837_v53 = vadd.f32 %v829_v58, %v800_v14  ;;  %v838_v57 = vadd.f32 %v830_v33, %v801_v46  ;;  %v2948_v45 = vld [vmem:[%s3839_s18 + $0x24] sm:$0x1]  ;;  %v2949_v50 = vld [vmem:[%s3839_s18 + $0x2c] sm:$0x1]  ;;  %v2953_v49 = vld [vmem:[%s5223_s4 + $0x8] ss:$0 sm:$0xff] }
  0x4d   : > { %v839_v24 = vadd.f32 %v831_v27, %v802_v47  ;;  %v840_v1 = vadd.f32 %v832_v11, %v803_v62  ;;  %v850_v2 = vunpack.c.l.bf16 %v2937_v25  ;;  %v851_v55 = vunpack.c.h.bf16 %v2937_v25  ;;  %v2950_v62 = vld [vmem:[%s3839_s18 + $0x34] sm:$0x1] }
  0x4e   : > { %v852_v29 = vunpack.c.l.bf16 %v2939_v51  ;;  %v853_v56 = vunpack.c.h.bf16 %v2939_v51  ;;  %v854_v40 = vunpack.c.l.bf16 %v2941_v34  ;;  %v855_v54 = vunpack.c.h.bf16 %v2941_v34 }
  0x4f   : > { %v856_v5 = vunpack.c.l.bf16 %v2943_v52  ;;  %v857_v39 = vunpack.c.h.bf16 %v2943_v52  ;;  %v862_v7 = vmul.f32 %v3881_v41, %v850_v2  ;;  %v863_v8 = vmul.f32 %v3881_v41, %v851_v55 }
  0x50   : > { %v864_v59 = vmul.f32 %v3881_v41, %v852_v29  ;;  %v865_v60 = vmul.f32 %v3881_v41, %v853_v56  ;;  %v866_v15 = vmul.f32 %v3881_v41, %v854_v40  ;;  %v867_v6 = vmul.f32 %v3881_v41, %v855_v54 }
  0x51   : > { %v868_v35 = vmul.f32 %v3881_v41, %v856_v5  ;;  %v869_v43 = vmul.f32 %v3881_v41, %v857_v39  ;;  %v870_v14 = vadd.f32 %v862_v7, %v833_v63  ;;  %v871_v38 = vadd.f32 %v863_v8, %v834_v20 }
  0x52   : > { %v872_v46 = vadd.f32 %v864_v59, %v835_v0  ;;  %v873_v47 = vadd.f32 %v865_v60, %v836_v31  ;;  %v874_v42 = vadd.f32 %v866_v15, %v837_v53  ;;  %v875_v58 = vadd.f32 %v867_v6, %v838_v57 }
  0x53   : > { %v876_v33 = vadd.f32 %v868_v35, %v839_v24  ;;  %v877_v27 = vadd.f32 %v869_v43, %v840_v1  ;;  %v886_v11 = vunpack.c.l.bf16 %v2945_v3  ;;  %v887_v41 = vunpack.c.l.bf16 %v2946_v61 }
  0x54   : > { %v888_v25 = vunpack.c.l.bf16 %v2947_v44  ;;  %v889_v51 = vunpack.c.l.bf16 %v2948_v45  ;;  %v890_v34 = vunpack.c.l.bf16 %v2949_v50  ;;  %v891_v63 = vunpack.c.l.bf16 %v2950_v62  ;;  %v2954_v44 = vld [vmem:[%s5224_s5] ss:$0 sm:$0xff] }
  0x55   : > { %v892_v20 = vunpack.c.l.bf16 %v2951_v17  ;;  %v893_v0 = vunpack.c.l.bf16 %v2952_v28  ;;  %v898_v31 = vmul.f32 %v2953_v49, %v813_v48  ;;  %v899_v52 = vmul.f32 %v2953_v49, %v886_v11 }
  0x56   : > { %v900_v2 = vmul.f32 %v2953_v49, %v814_v19  ;;  %v901_v55 = vmul.f32 %v2953_v49, %v887_v41  ;;  %v902_v53 = vmul.f32 %v2953_v49, %v815_v26  ;;  %v903_v57 = vmul.f32 %v2953_v49, %v888_v25 }
  0x57   : > { %v904_v24 = vmul.f32 %v2953_v49, %v816_v30  ;;  %v905_v1 = vmul.f32 %v2953_v49, %v889_v51  ;;  %v906_v29 = vmul.f32 %v2953_v49, %v817_v32  ;;  %v907_v56 = vmul.f32 %v2953_v49, %v890_v34 }
  0x58   : > { %v908_v48 = vmul.f32 %v2953_v49, %v818_v36  ;;  %v909_v40 = vmul.f32 %v2953_v49, %v891_v63  ;;  %v910_v12 = vmul.f32 %v2953_v49, %v819_v10  ;;  %v911_v19 = vmul.f32 %v2953_v49, %v892_v20 }
  0x59   : > { %v912_v26 = vmul.f32 %v2953_v49, %v820_v16  ;;  %v913_v54 = vmul.f32 %v2953_v49, %v893_v0  ;;  %v930_v5 = vrot.slane %v898_v31, 1  ;;  %v931_v37 = vrot.slane %v899_v52, 1 }
  0x5a   : > { %v933_v30 = vrot.slane %v900_v2, 1  ;;  %v934_v39 = vrot.slane %v901_v55, 1  ;;  %v936_v7 = vrot.slane %v902_v53, 1  ;;  %v937_v8 = vrot.slane %v903_v57, 1 }
  0x5b   : > { %v939_v32 = vrot.slane %v904_v24, 1  ;;  %v940_v59 = vrot.slane %v905_v1, 1  ;;  %v932_v4 = vsel %vm599_vm1, %v930_v5, %v931_v37  ;;  %v942_v60 = vrot.slane %v906_v29, 1 }
  0x5c   : > { %v935_v36 = vsel %vm599_vm1, %v933_v30, %v934_v39  ;;  %v943_v3 = vrot.slane %v907_v56, 1  ;;  %v938_v10 = vsel %vm599_vm1, %v936_v7, %v937_v8  ;;  %v945_v16 = vrot.slane %v908_v48, 1 }
  0x5d   : > { %v941_v18 = vsel %vm599_vm1, %v939_v32, %v940_v59  ;;  %v946_v61 = vrot.slane %v909_v40, 1  ;;  %v948_v6 = vrot.slane %v910_v12, 1  ;;  %v949_v35 = vrot.slane %v911_v19, 1 }
  0x5e   : > { %v944_v15 = vsel %vm599_vm1, %v942_v60, %v943_v3  ;;  %v951_v43 = vrot.slane %v912_v26, 1  ;;  %v952_v50 = vrot.slane %v913_v54, 1  ;;  %v962_v62 = vadd.f32 %v932_v4, %v870_v14 }
  0x5f   : > { %v947_v45 = vsel %vm599_vm1, %v945_v16, %v946_v61  ;;  %v963_v17 = vadd.f32 %v935_v36, %v871_v38  ;;  %v950_v28 = vsel %vm599_vm1, %v948_v6, %v949_v35  ;;  %v964_v49 = vadd.f32 %v938_v10, %v872_v46 }
  0x60   : > { %v965_v11 = vadd.f32 %v941_v18, %v873_v47  ;;  %v966_v41 = vadd.f32 %v944_v15, %v874_v42  ;;  %v953_v25 = vsel %vm599_vm1, %v951_v43, %v952_v50  ;;  %v967_v51 = vadd.f32 %v947_v45, %v875_v58 }
  0x61   : > { %v968_v34 = vadd.f32 %v950_v28, %v876_v33  ;;  %v977_v63 = vadd.f32 %v2954_v44, %v962_v62  ;;  %v969_v20 = vadd.f32 %v953_v25, %v877_v27  ;;  %v978_v0 = vadd.f32 %v2954_v44, %v963_v17 }
  0x62   : > { %v979_v31 = vadd.f32 %v2954_v44, %v964_v49  ;;  %v980_v52 = vadd.f32 %v2954_v44, %v965_v11  ;;  %v981_v2 = vadd.f32 %v2954_v44, %v966_v41  ;;  %v982_v55 = vadd.f32 %v2954_v44, %v967_v51 }
  0x63   : > { %v4200_v53 = vadd.f32 %v2954_v44, %v968_v34  ;;  %v2955_v14 = vmul.f32 -1.442695, %v977_v63  ;;  %v4202_v38 = vadd.f32 %v2954_v44, %v969_v20  ;;  %v2956_v57 = vmul.f32 -1.442695, %v978_v0 }
  0x64   : > { %v2957_v46 = vmul.f32 -1.442695, %v979_v31  ;;  %v2958_v47 = vmul.f32 -1.442695, %v980_v52  ;;  %v2959_v42 = vmul.f32 -1.442695, %v981_v2 }
  0x65   : > { %3308 = vpow2.f32 %v2955_v14  ;;  %v2960_v58 = vmul.f32 -1.442695, %v982_v55  ;;  %v2961_v33 = vmul.f32 -1.442695, %v4200_v53  ;;  %v2962_v27 = vmul.f32 -1.442695, %v4202_v38 }
  0x66   : > { %3310 = vpow2.f32 %v2956_v57 }
  0x67   : > { %3312 = vpow2.f32 %v2957_v46 }
  0x68   : > { %3314 = vpow2.f32 %v2958_v47 }
  0x69   : > { %3316 = vpow2.f32 %v2959_v42  ;;  %v1158_v42 = vld [vmem:[%s5227_s8] sm:$0xff] }
  0x6a   : > { %3318 = vpow2.f32 %v2960_v58  ;;  %v1159_v58 = vld [vmem:[%s5227_s8 + $0x8] sm:$0xff] }
  0x6b   : > { %3320 = vpow2.f32 %v2961_v33  ;;  %v3201_v33 = vpack.c.bf16 %v1159_v58, %v1158_v42  ;;  %v3259_v58 = vld [vmem:[%s5229_s10 + $0x64] ss:$40 sps:$4 sm:$0xff]  }
  0x6c   : > { %3322 = vpow2.f32 %v2962_v27  ;;  %v1160_v27 = vld [vmem:[%s5227_s8 + $0x10] sm:$0xff] }
  0x6f   : > { %v3309_v24 = vpop.eup %3308 }
  0x70   : > { %v3311_v1 = vpop.eup %3310  ;;  %v1009_v29 = vadd.f32 1.0, %v3309_v24  ;;  %v1077_v24 = vld [vmem:[%s5226_s7] sm:$0x1] }
  0x71   : > { %v3313_v56 = vpop.eup %3312  ;;  %v1010_v48 = vadd.f32 1.0, %v3311_v1 }
  0x72   : > { %v3315_v40 = vpop.eup %3314  ;;  %v1011_v12 = vadd.f32 1.0, %v3313_v56  ;;  %3324 = vrcp.f32 %v1009_v29 }
  0x73   : > { %v3317_v19 = vpop.eup %3316  ;;  %v1012_v26 = vadd.f32 1.0, %v3315_v40  ;;  %3326 = vrcp.f32 %v1010_v48 }
  0x74   : > { %v3319_v54 = vpop.eup %3318  ;;  %v1013_v5 = vadd.f32 1.0, %v3317_v19  ;;  %3328 = vrcp.f32 %v1011_v12 }
  0x75   : > { %v3321_v37 = vpop.eup %3320  ;;  %v1014_v30 = vadd.f32 1.0, %v3319_v54  ;;  %3330 = vrcp.f32 %v1012_v26  ;;  %v3218_v26 = vld [vmem:[%s5229_s10 + $0x4] ss:$40 sps:$4 sm:$0xff]  }
  0x76   : > { %v3323_v39 = vpop.eup %3322  ;;  %v1015_v7 = vadd.f32 1.0, %v3321_v37  ;;  %3332 = vrcp.f32 %v1013_v5  ;;  %v3223_v54 = vld [vmem:[%s5229_s10 + $0xc] ss:$40 sps:$4 sm:$0xff]   ;;  %v3220_v5 = vld [vmem:[%s5229_s10] ss:$40 sps:$4 sm:$0xff]   ;;  %1684 = vmatprep.subr.bf16.mxu1 %v3218_v26 }
  0x77   : > { %v1016_v8 = vadd.f32 1.0, %v3323_v39  ;;  %3334 = vrcp.f32 %v1014_v30  ;;  %v3221_v37 = vld [vmem:[%s5229_s10 + $0x8] ss:$40 sps:$4 sm:$0xff]   ;;  %1685 = vmatpush1.bf16.msra.mxu1 %v3220_v5  ;;  %v3224_v30 = vld [vmem:[%s5229_s10 + $0x54] ss:$40 sps:$4 sm:$0xff]  }
  0x78   : > { %3336 = vrcp.f32 %v1015_v7  ;;  %v3229_v39 = vld [vmem:[%s5229_s10 + $0x5c] ss:$40 sps:$4 sm:$0xff]   ;;  %v3226_v7 = vld [vmem:[%s5229_s10 + $0x50] ss:$40 sps:$4 sm:$0xff]   ;;  %1686 = vmatprep.subr.bf16.mxu1 %v3224_v30 }
  0x79   : > { %3338 = vrcp.f32 %v1016_v8  ;;  %v3227_v8 = vld [vmem:[%s5229_s10 + $0x58] ss:$40 sps:$4 sm:$0xff]   ;;  %v3275_v5 = vld [vmem:[%s5229_s10 + $0x108] ss:$40 sps:$4 sm:$0xff]  }
  0x7b   : > { %1687 = vmatpush1.bf16.msra.mxu1 %v3226_v7  ;;  %v3284_v7 = vld [vmem:[%s5229_s10 + $0x1a0] ss:$40 sps:$4 sm:$0xff]  }
  0x7c   : > { %v3325_v32 = vpop.eup %3324 }
  0x7d   : > { %v3327_v59 = vpop.eup %3326  ;;  %v4206_v4 = vmul.f32 %v3325_v32, %v977_v63  ;;  %v3230_v32 = vld [vmem:[%s5229_s10 + $0xa4] ss:$40 sps:$4 sm:$0xff]  }
  0x7e   : > { %v3329_v36 = vpop.eup %3328  ;;  %v4208_v60 = vmul.f32 %v3327_v59, %v978_v0  ;;  %v3235_v59 = vld [vmem:[%s5229_s10 + $0xac] ss:$40 sps:$4 sm:$0xff]   ;;  %1688 = vmatprep.subr.bf16.mxu1 %v3230_v32 }
  0x7f   : > { %v3331_v3 = vpop.eup %3330  ;;  %v4210_v10 = vmul.f32 %v3329_v36, %v979_v31  ;;  %v1042_v18 = vsel %vm1041_vm2, %v4206_v4, 0.0  ;;  %v3232_v36 = vld [vmem:[%s5229_s10 + $0xa0] ss:$40 sps:$4 sm:$0xff]  }
  0x80   : > { %v3333_v16 = vpop.eup %3332  ;;  %v4214_v61 = vmul.f32 %v3331_v3, %v980_v52  ;;  %v1043_v15 = vsel %vm1041_vm2, %v4208_v60, 0.0  ;;  %v3233_v3 = vld [vmem:[%s5229_s10 + $0xa8] ss:$40 sps:$4 sm:$0xff]   ;;  %1689 = vmatpush1.bf16.msra.mxu1 %v3232_v36  ;;  %v3292_v36 = vld [vmem:[%s5229_s10 + $0x24] ss:$40 sps:$4 sm:$0xff]  }
  0x81   : > { %v3335_v6 = vpop.eup %3334  ;;  %v4218_v35 = vmul.f32 %v3333_v16, %v981_v2  ;;  %v1044_v43 = vadd.f32 %v1043_v15, %v1042_v18  ;;  %v1045_v44 = vsel %vm1041_vm2, %v4210_v10, 0.0  ;;  %v3236_v18 = vld [vmem:[%s5229_s10 + $0xf4] ss:$40 sps:$4 sm:$0xff]   ;;  %v3238_v15 = vld [vmem:[%s5229_s10 + $0xf0] ss:$40 sps:$4 sm:$0xff]  }
  0x82   : > { %v3337_v45 = vpop.eup %3336  ;;  %v4222_v50 = vmul.f32 %v3335_v6, %v982_v55  ;;  %v1047_v62 = vsel %vm1041_vm2, %v4214_v61, 0.0  ;;  %v3241_v16 = vld [vmem:[%s5229_s10 + $0xfc] ss:$40 sps:$4 sm:$0xff]   ;;  %v3239_v6 = vld [vmem:[%s5229_s10 + $0xf8] ss:$40 sps:$4 sm:$0xff]   ;;  %1690 = vmatprep.subr.bf16.mxu1 %v3236_v18 }
  0x83   : > { %v3339_v17 = vpop.eup %3338  ;;  %v1046_v28 = vadd.f32 %v1045_v44, %v1044_v43  ;;  %v4227_v49 = vmul.f32 %v3337_v45, %v4200_v53  ;;  %v1049_v11 = vsel %vm1041_vm2, %v4218_v35, 0.0  ;;  %v3242_v43 = vld [vmem:[%s5229_s10 + $0x144] ss:$40 sps:$4 sm:$0xff]   ;;  %v3244_v45 = vld [vmem:[%s5229_s10 + $0x140] ss:$40 sps:$4 sm:$0xff]  }
  0x84   : > { %v4232_v25 = vmul.f32 %v3339_v17, %v4202_v38  ;;  %v1051_v51 = vsel %vm1041_vm2, %v4222_v50, 0.0  ;;  %1691 = vmatpush1.bf16.msra.mxu1 %v3238_v15  ;;  %v3247_v44 = vld [vmem:[%s5229_s10 + $0x14c] ss:$40 sps:$4 sm:$0xff]  }
  0x85   : > { %v1048_v41 = vadd.f32 %v1047_v62, %v1046_v28  ;;  %v1053_v63 = vsel %vm1041_vm2, %v4227_v49, 0.0  ;;  %v3245_v62 = vld [vmem:[%s5229_s10 + $0x148] ss:$40 sps:$4 sm:$0xff]   ;;  %1692 = vmatprep.subr.bf16.mxu1 %v3242_v43  ;;  %v3248_v17 = vld [vmem:[%s5229_s10 + $0x194] ss:$40 sps:$4 sm:$0xff]  }
  0x86   : > { %v1055_v0 = vsel %vm1041_vm2, %v4232_v25, 0.0  ;;  %v3250_v28 = vld [vmem:[%s5229_s10 + $0x190] ss:$40 sps:$4 sm:$0xff]   ;;  %v3298_v15 = vld [vmem:[%s5229_s10 + $0xc4] ss:$40 sps:$4 sm:$0xff]  }
  0x87   : > { %v1050_v34 = vadd.f32 %v1049_v11, %v1048_v41  ;;  %v3251_v11 = vld [vmem:[%s5229_s10 + $0x198] ss:$40 sps:$4 sm:$0xff]   ;;  %v3253_v41 = vld [vmem:[%s5229_s10 + $0x19c] ss:$40 sps:$4 sm:$0xff]  }
  0x88   : > { %1693 = vmatpush1.bf16.msra.mxu1 %v3244_v45  ;;  %v3301_v43 = vld [vmem:[%s5229_s10 + $0x114] ss:$40 sps:$4 sm:$0xff]   ;;  %v3304_v45 = vld [vmem:[%s5229_s10 + $0x164] ss:$40 sps:$4 sm:$0xff]  }
  0x89   : > { %v1052_v20 = vadd.f32 %v1051_v51, %v1050_v34  ;;  %1694 = vmatprep.subr.bf16.mxu1 %v3248_v17  ;;  %v3679_v51 = vmov 0   ;;  %v3256_v34 = vld [vmem:[%s5229_s10 + $0x14] ss:$40 sps:$4 sm:$0xff]  }
  0x8a   : > { %1716 = vmatprep.mubr.bf16.mxu1 %v3679_v51  ;;  %v3307_v17 = vld [vmem:[%s5229_s10 + $0x1b4] ss:$40 sps:$4 sm:$0xff]  }
  0x8b   : > { %v1054_v31 = vadd.f32 %v1053_v63, %v1052_v20  ;;  %v3262_v63 = vld [vmem:[%s5229_s10 + $0x1c] ss:$40 sps:$4 sm:$0xff]   ;;  %v1161_v20 = vld [vmem:[%s5228_s9] sm:$0x1] }
  0x8c   : > { %1695 = vmatpush1.bf16.msra.mxu1 %v3250_v28  ;;  %v3305_v28 = vld [vmem:[%s5229_s10 + $0x1b0] ss:$40 sps:$4 sm:$0xff]  }
  0x8d   : > { %v1056_v52 = vadd.f32 %v1055_v0, %v1054_v31  ;;  %1830 = vmatprep.subr.bf16.mxu1 %v3256_v34 }
  0x8f   : > { %v1057_v2 = vsel %vm1041_vm2, %v1056_v52, 0.0 }
  0x90   : > { %v1058_v55 = vrot.slane %v1057_v2, 4 }
  0x92   : > { %v1059_v53 = vadd.f32 %v1058_v55, %v1057_v2 }
  0x94   : > { %v1060_v14 = vrot.slane %v1059_v53, 2 }
  0x96   : > { %v1061_v38 = vadd.f32 %v1060_v14, %v1059_v53 }
  0x98   : > { %v1062_v57 = vrot.slane %v1061_v38, 1 }
  0x9a   : > { %v1063_v46 = vadd.f32 %v1062_v57, %v1061_v38 }
  0x9c   : > { %v1064_v47 = vmul.f32 0.015625, %v1063_v46 }
  0x9e   : > { %3171 = vmatmul.mubr.msk.f32.vlgmr.msra.gmra.mrb[0].mxu0 %vm1041_vm2, %v1064_v47  ;;  %v3254_v47 = vld [vmem:[%s5229_s10 + $0x10] ss:$40 sps:$4 sm:$0xff]  }
  0x9f   : > { %3179 = vmatprep.mubr.msk.f32.mxu0 %vm3677_vm0, %v3678_v9  ;;  %3202 = vmatpush3.bf16.msra.mxu0 %v3201_v33  ;;  %v3260_v33 = vld [vmem:[%s5229_s10 + $0x18] ss:$40 sps:$4 sm:$0xff]  }
  0xa0   : > { %3177 = vmatprep.subr.mxu0 %v3678_v9 }
  0xa3   : > { %3178 = vmatpush3.msra.mxu0 %v1160_v27 }
  0xa4   : > { %1757 = vmatprep.subr.bf16.mxu0 %v3223_v54  ;;  %v3280_v54 = vld [vmem:[%s5229_s10 + $0x154] ss:$40 sps:$4 sm:$0xff]  }
 0x171   : > { %v1147_v1 = vpop.f32.mrb[0].mxu0 }
 0x172   : > { %v1148_v29 = vadd.f32 %v1147_v1, %v1077_v24  ;;  %v3172_v56 = vpop.f32.mrb[1].mxu0  ;;  %v3265_v1 = vld [vmem:[%s5229_s10 + $0xb4] ss:$40 sps:$4 sm:$0xff]  }
 0x173   : > { %v3263_v56 = vld [vmem:[%s5229_s10 + $0xb0] ss:$40 sps:$4 sm:$0xff]  }
 0x174   : > { %v2964_v48 = vmul.f32 -1.442695, %v1148_v29 }
 0x176   : > { %3340 = vpow2.f32 %v2964_v48 }
 0x180   : > { %v3341_v40 = vpop.eup %3340 }
 0x181   : > { %v1154_v12 = vadd.f32 1.0, %v3341_v40  ;;  %v3272_v40 = vld [vmem:[%s5229_s10 + $0xb8] ss:$40 sps:$4 sm:$0xff]  }
 0x183   : > { %3342 = vrcp.f32 %v1154_v12  ;;  %v3269_v12 = vld [vmem:[%s5229_s10 + $0x100] ss:$40 sps:$4 sm:$0xff]  }
 0x18d   : > { %v3343_v19 = vpop.eup %3342 }
 0x18e   : > { %v1157_v9 = vmul.f32 %v3343_v19, %v1148_v29  ;;  %v3266_v29 = vld [vmem:[%s5229_s10 + $0x68] ss:$40 sps:$4 sm:$0xff]   ;;  %v3277_v19 = vld [vmem:[%s5229_s10 + $0x10c] ss:$40 sps:$4 sm:$0xff]  }
 0x190   : > { %3180 = vmatmul.mubr.msk.f32.vlgmr.msra.gmra.mrb[2].mxu0 %vm1162_vm3, %v1157_v9 }
 0x191   : > { %1758 = vmatpush1.bf16.msra.mxu0 %v3221_v37  ;;  %1789 = vmatprep.mubr.bf16.mxu0 %v3679_v51  ;;  %v3278_v37 = vld [vmem:[%s5229_s10 + $0x150] ss:$40 sps:$4 sm:$0xff]  }
 0x192   : > { %1759 = vmatprep.subr.bf16.mxu0 %v3229_v39  ;;  %v3281_v39 = vld [vmem:[%s5229_s10 + $0x158] ss:$40 sps:$4 sm:$0xff]  }
 0x195   : > { %1760 = vmatpush1.bf16.msra.mxu0 %v3227_v8 }
 0x196   : > { %1761 = vmatprep.subr.bf16.mxu0 %v3235_v59  ;;  %v3289_v59 = vld [vmem:[%s5229_s10 + $0x1ac] ss:$40 sps:$4 sm:$0xff]  }
 0x199   : > { %1762 = vmatpush1.bf16.msra.mxu0 %v3233_v3  ;;  %v3287_v3 = vld [vmem:[%s5229_s10 + $0x1a8] ss:$40 sps:$4 sm:$0xff]  }
 0x19a   : > { %1763 = vmatprep.subr.bf16.mxu0 %v3241_v16  ;;  %v3293_v16 = vld [vmem:[%s5229_s10 + $0x70] ss:$40 sps:$4 sm:$0xff]  }
 0x19d   : > { %1764 = vmatpush1.bf16.msra.mxu0 %v3239_v6  ;;  %v3296_v6 = vld [vmem:[%s5229_s10 + $0xc0] ss:$40 sps:$4 sm:$0xff]  }
 0x19e   : > { %1765 = vmatprep.subr.bf16.mxu0 %v3247_v44  ;;  %v3299_v44 = vld [vmem:[%s5229_s10 + $0x110] ss:$40 sps:$4 sm:$0xff]  }
 0x1a1   : > { %1766 = vmatpush1.bf16.msra.mxu0 %v3245_v62  ;;  %v3302_v62 = vld [vmem:[%s5229_s10 + $0x160] ss:$40 sps:$4 sm:$0xff]  }
 0x1a2   : > { %1767 = vmatprep.subr.bf16.mxu0 %v3253_v41 }
 0x1a5   : > { %1768 = vmatpush1.bf16.msra.mxu0 %v3251_v11  ;;  %v4513_v11 = vld [vmem:[%s5230_s11] sm:$0xff] }
 0x1a6   : > { %1903 = vmatprep.subr.bf16.mxu0 %v3262_v63  ;;  %v4517_v41 = vrot.slane %v4513_v11, %v3817_v21  ;;  %v4522_v34 = vrot.slane %v4513_v11, %v565_v23  ;;  %v4526_v63 = vrot.slane %v4513_v11, %v3820_v22 }
 0x263   : > { %v1232_v0 = vpop.f32.mrb[2].mxu0 }
 0x264   : > { %v1233_v31 = vadd.f32 %v1232_v0, %v1161_v20  ;;  %v3181_v52 = vpop.f32.mrb[3].mxu0 }
 0x266   : > { %v2966_v2 = vmul.f32 -1.442695, %v1233_v31 }
 0x268   : > { %3344 = vpow2.f32 %v2966_v2 }
 0x272   : > { %v3345_v55 = vpop.eup %3344 }
 0x273   : > { %v1239_v53 = vadd.f32 1.0, %v3345_v55 }
 0x275   : > { %3346 = vrcp.f32 %v1239_v53 }
 0x27f   : > { %v3347_v14 = vpop.eup %3346 }
 0x280   : > { %v1245_v38 = vrot.slane %v3347_v14, %v3817_v21 }
 0x282   : > { %v1246_v57 = vmul.f32 %v1245_v38, %v4206_v4  ;;  %v1247_v46 = vmul.f32 %v1245_v38, %v4208_v60  ;;  %v3268_v4 = vld [vmem:[%s5229_s10 + $0x6c] ss:$40 sps:$4 sm:$0xff]   ;;  %v3257_v60 = vld [vmem:[%s5229_s10 + $0x60] ss:$40 sps:$4 sm:$0xff]   ;;  %v1248_v27 = vmul.f32 %v1245_v38, %v4210_v10  ;;  %v1249_v24 = vmul.f32 %v1245_v38, %v4214_v61  ;;  %v3274_v61 = vld [vmem:[%s5229_s10 + $0xbc] ss:$40 sps:$4 sm:$0xff]  }
 0x283   : > { %v3271_v10 = vld [vmem:[%s5229_s10 + $0x104] ss:$40 sps:$4 sm:$0xff]   ;;  %v1250_v9 = vmul.f32 %v1245_v38, %v4218_v35  ;;  %v1251_v26 = vmul.f32 %v1245_v38, %v4222_v50  ;;  %v1252_v8 = vmul.f32 %v1245_v38, %v4227_v49  ;;  %v1253_v32 = vmul.f32 %v1245_v38, %v4232_v25  ;;  %v3290_v49 = vld [vmem:[%s5229_s10 + $0x20] ss:$40 sps:$4 sm:$0xff]   ;;  %v3295_v25 = vld [vmem:[%s5229_s10 + $0x74] ss:$40 sps:$4 sm:$0xff]  }
 0x284   : > { %v4346_v42 = vpack.c.bf16 %v1247_v46, %v1246_v57  ;;  %v4377_v48 = vpack.c.bf16 %v1249_v24, %v1248_v27  ;;  %v3283_v35 = vld [vmem:[%s5229_s10 + $0x15c] ss:$40 sps:$4 sm:$0xff]  }
 0x285   : > { %v4411_v30 = vpack.c.bf16 %v1251_v26, %v1250_v9  ;;  %v3286_v50 = vld [vmem:[%s5229_s10 + $0x1a4] ss:$40 sps:$4 sm:$0xff]   ;;  %v1257_v18 = vpack.c.bf16 %v1253_v32, %v1252_v8 }
 0x286   : > { %3027 = vmatmul.mubr.msk.bf16.vlgmr.msra.gmra.mrb[0].mxu1 %vm1041_vm2, %v4346_v42  ;;  %3031 = vmatmul.mubr.msk.bf16.vlgmr.msra.gmra.mrb[4].mxu0 %vm1041_vm2, %v4346_v42 }
 0x287   : > { %1831 = vmatpush1.bf16.msra.mxu1 %v3254_v47  ;;  %1726 = vmatprep.mubr.bf16.mxu1 %v3679_v51 }
 0x288   : > { %1832 = vmatprep.subr.bf16.mxu1 %v3259_v58  ;;  %1799 = vmatprep.mubr.bf16.mxu0 %v3679_v51 }
 0x289   : > { %1904 = vmatpush1.bf16.msra.mxu0 %v3260_v33 }
 0x28a   : > { %1905 = vmatprep.subr.bf16.mxu0 %v3268_v4 }
 0x28b   : > { %1833 = vmatpush1.bf16.msra.mxu1 %v3257_v60 }
 0x28c   : > { %1834 = vmatprep.subr.bf16.mxu1 %v3265_v1 }
 0x28d   : > { %1906 = vmatpush1.bf16.msra.mxu0 %v3266_v29 }
 0x28e   : > { %3028 = vmatmul.mubr.msk.bf16.gmra.mrb[4].mxu1 %vm1041_vm2, %v4377_v48  ;;  %3032 = vmatmul.mubr.msk.bf16.gmra.mrb[8].mxu0 %vm1041_vm2, %v4377_v48 }
 0x28f   : > { %1835 = vmatpush1.bf16.msra.mxu1 %v3263_v56  ;;  %1736 = vmatprep.mubr.bf16.mxu1 %v3679_v51 }
 0x290   : > { %1809 = vmatprep.mubr.bf16.mxu0 %v3679_v51  ;;  %1836 = vmatprep.subr.bf16.mxu1 %v3271_v10 }
 0x291   : > { %1907 = vmatprep.subr.bf16.mxu0 %v3274_v61 }
 0x292   : > { %1908 = vmatpush1.bf16.msra.mxu0 %v3272_v40 }
 0x293   : > { %1837 = vmatpush1.bf16.msra.mxu1 %v3269_v12  ;;  %1909 = vmatprep.subr.bf16.mxu0 %v3277_v19 }
 0x294   : > { %1838 = vmatprep.subr.bf16.mxu1 %v3280_v54 }
 0x296   : > { %3029 = vmatmul.mubr.msk.bf16.gmra.mrb[8].mxu1 %vm1041_vm2, %v4411_v30  ;;  %3033 = vmatmul.mubr.msk.bf16.gmra.mrb[12].mxu0 %vm1041_vm2, %v4411_v30 }
 0x297   : > { %1910 = vmatpush1.bf16.msra.mxu0 %v3275_v5  ;;  %1839 = vmatpush1.bf16.msra.mxu1 %v3278_v37 }
 0x298   : > { %1746 = vmatprep.mubr.bf16.mxu1 %v3679_v51  ;;  %1819 = vmatprep.mubr.bf16.mxu0 %v3679_v51 }
 0x299   : > { %1911 = vmatprep.subr.bf16.mxu0 %v3283_v35  ;;  %1840 = vmatprep.subr.bf16.mxu1 %v3286_v50 }
 0x29b   : > { %1912 = vmatpush1.bf16.msra.mxu0 %v3281_v39  ;;  %1841 = vmatpush1.bf16.msra.mxu1 %v3284_v7 }
 0x29c   : > { %1913 = vmatprep.subr.bf16.mxu0 %v3289_v59  ;;  %1976 = vmatprep.subr.bf16.mxu1 %v3292_v36 }
 0x29e   : > { %3030 = vmatmul.mubr.msk.bf16.gmra.mrb[12].mxu1 %vm1041_vm2, %v1257_v18  ;;  %3034 = vmatmul.mubr.msk.bf16.gmra.mrb[16].mxu0 %vm1041_vm2, %v1257_v18 }
 0x29f   : > { %1914 = vmatpush1.bf16.msra.mxu0 %v3287_v3  ;;  %1862 = vmatprep.mubr.bf16.mxu1 %v3679_v51 }
 0x2a0   : > { %1935 = vmatprep.mubr.bf16.mxu0 %v3679_v51 }
 0x2a6   : > { %3035 = vmatmul.mubr.msk.bf16.vlgmr.msra.gmra.mrb[16].mxu1 %vm1041_vm2, %v4346_v42  ;;  %3039 = vmatmul.mubr.msk.bf16.vlgmr.msra.gmra.mrb[20].mxu0 %vm1041_vm2, %v4346_v42 }
 0x2a7   : > { %1977 = vmatpush1.bf16.msra.mxu1 %v3290_v49  ;;  %1872 = vmatprep.mubr.bf16.mxu1 %v3679_v51 }
 0x2a8   : > { %1978 = vmatprep.subr.bf16.mxu1 %v3295_v25  ;;  %1945 = vmatprep.mubr.bf16.mxu0 %v3679_v51 }
 0x2ab   : > { %1979 = vmatpush1.bf16.msra.mxu1 %v3293_v16 }
 0x2ac   : > { %1980 = vmatprep.subr.bf16.mxu1 %v3298_v15 }
 0x2ae   : > { %3036 = vmatmul.mubr.msk.bf16.gmra.mrb[20].mxu1 %vm1041_vm2, %v4377_v48  ;;  %3040 = vmatmul.mubr.msk.bf16.gmra.mrb[24].mxu0 %vm1041_vm2, %v4377_v48 }
 0x2af   : > { %1981 = vmatpush1.bf16.msra.mxu1 %v3296_v6  ;;  %1882 = vmatprep.mubr.bf16.mxu1 %v3679_v51 }
 0x2b0   : > { %1955 = vmatprep.mubr.bf16.mxu0 %v3679_v51  ;;  %1982 = vmatprep.subr.bf16.mxu1 %v3301_v43 }
 0x2b3   : > { %1983 = vmatpush1.bf16.msra.mxu1 %v3299_v44 }
 0x2b4   : > { %1984 = vmatprep.subr.bf16.mxu1 %v3304_v45 }
 0x2b6   : > { %3037 = vmatmul.mubr.msk.bf16.gmra.mrb[24].mxu1 %vm1041_vm2, %v4411_v30  ;;  %3041 = vmatmul.mubr.msk.bf16.gmra.mrb[28].mxu0 %vm1041_vm2, %v4411_v30 }
 0x2b7   : > { %1985 = vmatpush1.bf16.msra.mxu1 %v3302_v62  ;;  %1892 = vmatprep.mubr.bf16.mxu1 %v3679_v51 }
 0x2b8   : > { %1965 = vmatprep.mubr.bf16.mxu0 %v3679_v51  ;;  %1986 = vmatprep.subr.bf16.mxu1 %v3307_v17 }
 0x2bb   : > { %1987 = vmatpush1.bf16.msra.mxu1 %v3305_v28 }
 0x2be   : > { %3038 = vmatmul.mubr.msk.bf16.gmra.mrb[28].mxu1 %vm1041_vm2, %v1257_v18  ;;  %3042 = vmatmul.mubr.msk.bf16.gmra.mrb[32].mxu0 %vm1041_vm2, %v1257_v18 }
 0x2bf   : > { %2008 = vmatprep.mubr.bf16.mxu1 %v3679_v51 }
 0x2c6   : > { %3043 = vmatmul.mubr.msk.bf16.vlgmr.msra.gmra.mrb[32].mxu1 %vm1041_vm2, %v4346_v42 }
 0x2c7   : > { %2018 = vmatprep.mubr.bf16.mxu1 %v3679_v51 }
 0x2ce   : > { %3044 = vmatmul.mubr.msk.bf16.gmra.mrb[36].mxu1 %vm1041_vm2, %v4377_v48 }
 0x2cf   : > { %2028 = vmatprep.mubr.bf16.mxu1 %v3679_v51 }
 0x2d6   : > { %3045 = vmatmul.mubr.msk.bf16.gmra.mrb[40].mxu1 %vm1041_vm2, %v4411_v30 }
 0x2d7   : > { %2038 = vmatprep.mubr.bf16.mxu1 %v3679_v51  ;;  %v5249_v51 = vsub.s32 3, %v3791_v13 }
 0x2d9   : > { %v4531_v20 = vrot.slane %v4513_v11, %v5249_v51 }
 0x2de   : > { %3046 = vmatmul.mubr.msk.bf16.gmra.mrb[44].mxu1 %vm1041_vm2, %v1257_v18 }
 0x359   : > { %v1718_v0 = vpop.f32.mrb[0].mxu1  ;;  %v1791_v31 = vpop.f32.mrb[4].mxu0 }
 0x35a   : > { %v4534_v52 = vadd.f32 %v1718_v0, %v4517_v41  ;;  %v4537_v2 = vadd.f32 %v1791_v31, %v4522_v34  ;;  %v1720_v55 = vpop.f32.mrb[1].mxu1  ;;  %v1793_v23 = vpop.f32.mrb[5].mxu0 }
 0x35b   : > { %v4540_v53 = vadd.f32 %v1720_v55, %v4526_v63  ;;  %v4543_v14 = vadd.f32 %v1793_v23, %v4531_v20  ;;  %v1722_v38 = vpop.f32.mrb[2].mxu1  ;;  %v1795_v57 = vpop.f32.mrb[6].mxu0 }
 0x35c   : > { %v3047_v46 = vmul.f32 -1.442695, %v4534_v52  ;;  %v3049_v47 = vmul.f32 -1.442695, %v4537_v2  ;;  %v4548_v42 = vadd.f32 %v1722_v38, %v4517_v41  ;;  %v4551_v58 = vadd.f32 %v1795_v57, %v4522_v34  ;;  %v1724_v33 = vpop.f32.mrb[3].mxu1  ;;  %v1797_v4 = vpop.f32.mrb[7].mxu0 }
 0x35d   : > { %v3048_v60 = vmul.f32 -1.442695, %v4540_v53  ;;  %v3050_v27 = vmul.f32 -1.442695, %v4543_v14  ;;  %v4556_v24 = vadd.f32 %v1724_v33, %v4526_v63  ;;  %v4559_v1 = vadd.f32 %v1797_v4, %v4531_v20 }
 0x35e   : > { %3348 = vpow2.f32 %v3047_v46  ;;  %v3057_v29 = vmul.f32 -1.442695, %v4548_v42  ;;  %v3059_v56 = vmul.f32 -1.442695, %v4551_v58 }
 0x35f   : > { %3350 = vpow2.f32 %v3049_v47  ;;  %v3058_v48 = vmul.f32 -1.442695, %v4556_v24  ;;  %v3060_v10 = vmul.f32 -1.442695, %v4559_v1 }
 0x360   : > { %3352 = vpow2.f32 %v3048_v60 }
 0x361   : > { %3354 = vpow2.f32 %v3050_v27  ;;  %v1728_v61 = vpop.f32.mrb[4].mxu1  ;;  %v1801_v40 = vpop.f32.mrb[8].mxu0 }
 0x362   : > { %3356 = vpow2.f32 %v3057_v29  ;;  %v4566_v12 = vadd.f32 %v1728_v61, %v4517_v41  ;;  %v4569_v19 = vadd.f32 %v1801_v40, %v4522_v34  ;;  %v1730_v9 = vpop.f32.mrb[5].mxu1  ;;  %v1803_v26 = vpop.f32.mrb[9].mxu0 }
 0x363   : > { %3358 = vpow2.f32 %v3059_v56  ;;  %v4572_v54 = vadd.f32 %v1730_v9, %v4526_v63  ;;  %v4575_v5 = vadd.f32 %v1803_v26, %v4531_v20  ;;  %v1732_v37 = vpop.f32.mrb[6].mxu1  ;;  %v1805_v30 = vpop.f32.mrb[10].mxu0 }
 0x364   : > { %3360 = vpow2.f32 %v3058_v48  ;;  %v3067_v35 = vmul.f32 -1.442695, %v4566_v12  ;;  %v3069_v50 = vmul.f32 -1.442695, %v4569_v19  ;;  %v4580_v39 = vadd.f32 %v1732_v37, %v4517_v41  ;;  %v1734_v7 = vpop.f32.mrb[7].mxu1  ;;  %v1807_v8 = vpop.f32.mrb[11].mxu0 }
 0x365   : > { %3362 = vpow2.f32 %v3060_v10  ;;  %v3068_v32 = vmul.f32 -1.442695, %v4572_v54  ;;  %v3070_v59 = vmul.f32 -1.442695, %v4575_v5  ;;  %v4586_v38 = vadd.f32 %v1805_v30, %v4522_v34 }
 0x366   : > { %3364 = vpow2.f32 %v3067_v35  ;;  %v3077_v36 = vmul.f32 -1.442695, %v4580_v39  ;;  %v4589_v33 = vadd.f32 %v1734_v7, %v4526_v63  ;;  %v4593_v61 = vadd.f32 %v1807_v8, %v4531_v20 }
 0x367   : > { %3366 = vpow2.f32 %v3069_v50  ;;  %v3079_v10 = vmul.f32 -1.442695, %v4586_v38 }
 0x368   : > { %v3349_v3 = vpop.eup %3348  ;;  %3368 = vpow2.f32 %v3068_v32  ;;  %v3078_v37 = vmul.f32 -1.442695, %v4589_v33 }
 0x369   : > { %v3351_v18 = vpop.eup %3350  ;;  %v2289_v49 = vadd.f32 1.0, %v3349_v3  ;;  %3370 = vpow2.f32 %v3070_v59  ;;  %v1738_v25 = vpop.f32.mrb[8].mxu1 }
 0x36a   : > { %v1811_v16 = vpop.f32.mrb[12].mxu0  ;;  %v3353_v15 = vpop.eup %3352  ;;  %v2291_v6 = vadd.f32 1.0, %v3351_v18  ;;  %3372 = vpow2.f32 %v3077_v36  ;;  %v4597_v30 = vadd.f32 %v1738_v25, %v4517_v41 }
 0x36b   : > { %v1740_v43 = vpop.f32.mrb[9].mxu1  ;;  %v1813_v44 = vpop.f32.mrb[13].mxu0  ;;  %3374 = vrcp.f32 %v2289_v49  ;;  %v2290_v62 = vadd.f32 1.0, %v3353_v15  ;;  %v4602_v59 = vadd.f32 %v1811_v16, %v4522_v34 }
 0x36c   : > { %v3355_v45 = vpop.eup %3354  ;;  %v1742_v17 = vpop.f32.mrb[10].mxu1  ;;  %3376 = vrcp.f32 %v2291_v6  ;;  %v4605_v8 = vadd.f32 %v1740_v43, %v4526_v63  ;;  %v4612_v25 = vadd.f32 %v1813_v44, %v4531_v20 }
 0x36d   : > { %v1815_v28 = vpop.f32.mrb[14].mxu0  ;;  %v3357_v51 = vpop.eup %3356  ;;  %v2292_v0 = vadd.f32 1.0, %v3355_v45  ;;  %3378 = vrcp.f32 %v2290_v62  ;;  %v4615_v15 = vadd.f32 %v1742_v17, %v4517_v41  ;;  %v3080_v17 = vmul.f32 -1.442695, %v4593_v61 }
 0x36e   : > { %v1744_v31 = vpop.f32.mrb[11].mxu1  ;;  %v3359_v55 = vpop.eup %3358  ;;  %v2299_v23 = vadd.f32 1.0, %v3357_v51  ;;  %v4622_v62 = vadd.f32 %v1815_v28, %v4522_v34  ;;  %v3088_v28 = vmul.f32 -1.442695, %v4605_v8 }
 0x36f   : > { %v1817_v57 = vpop.f32.mrb[15].mxu0  ;;  %v3361_v46 = vpop.eup %3360  ;;  %3380 = vrcp.f32 %v2292_v0  ;;  %v2301_v47 = vadd.f32 1.0, %v3359_v55  ;;  %v4625_v51 = vadd.f32 %v1744_v31, %v4526_v63  ;;  %v3097_v31 = vmul.f32 -1.442695, %v4615_v15 }
 0x370   : > { %v3363_v4 = vpop.eup %3362  ;;  %3382 = vrcp.f32 %v2299_v23  ;;  %v2300_v60 = vadd.f32 1.0, %v3361_v46  ;;  %5250 = vst [vmem:[#allocation4_spill] sm:$0xff] %v4622_v62  ;;  %v3087_v23 = vmul.f32 -1.442695, %v4597_v30  ;;  %v3089_v46 = vmul.f32 -1.442695, %v4602_v59 }
 0x371   : > { %v3365_v27 = vpop.eup %3364  ;;  %3384 = vrcp.f32 %v2301_v47  ;;  %v2302_v29 = vadd.f32 1.0, %v3363_v4  ;;  %v1748_v40 = vpop.f32.mrb[12].mxu1  ;;  %5251 = vst [vmem:[#allocation5_spill] sm:$0xff] %v4625_v51  ;;  %v3090_v4 = vmul.f32 -1.442695, %v4612_v25 }
 0x372   : > { %v3367_v56 = vpop.eup %3366  ;;  %3386 = vrcp.f32 %v2300_v60  ;;  %v2309_v48 = vadd.f32 1.0, %v3365_v27  ;;  %v1821_v35 = vpop.f32.mrb[16].mxu0  ;;  %v3099_v27 = vmul.f32 -1.442695, %v4622_v62 }
 0x373   : > { %v3369_v9 = vpop.eup %3368  ;;  %3388 = vrcp.f32 %v2302_v29  ;;  %v2311_v26 = vadd.f32 1.0, %v3367_v56  ;;  %v4599_v50 = vpop.f32.mrb[13].mxu1  ;;  %v3098_v29 = vmul.f32 -1.442695, %v4625_v51  ;;  %v4638_v56 = vadd.f32 %v1817_v57, %v4531_v20 }
 0x374   : > { %v3371_v7 = vpop.eup %3370  ;;  %3390 = vrcp.f32 %v2309_v48  ;;  %v2310_v32 = vadd.f32 1.0, %v3369_v9  ;;  %v4607_v36 = vpop.f32.mrb[17].mxu0  ;;  %v4656_v22 = vadd.f32 %v1821_v35, %v4522_v34 }
 0x375   : > { %v4609_v3 = vpop.f32.mrb[14].mxu1  ;;  %v3373_v18 = vpop.eup %3372  ;;  %3392 = vrcp.f32 %v2311_v26  ;;  %v2312_v49 = vadd.f32 1.0, %v3371_v7 }
 0x376   : > { %v4617_v6 = vpop.f32.mrb[18].mxu0  ;;  %v4619_v16 = vpop.f32.mrb[15].mxu1  ;;  %3394 = vrcp.f32 %v2310_v32  ;;  %v2319_v43 = vadd.f32 1.0, %v3373_v18  ;;  %v4647_v32 = vadd.f32 %v1748_v40, %v4517_v41 }
 0x377   : > { %v3375_v45 = vpop.eup %3374  ;;  %v4627_v0 = vpop.f32.mrb[19].mxu0  ;;  %3396 = vrcp.f32 %v2312_v49 }
 0x378   : > { %v3377_v44 = vpop.eup %3376  ;;  %3398 = vrcp.f32 %v2319_v43  ;;  %v2529_v26 = vmul.f32 %v3375_v45, %v4534_v52 }
 0x379   : > { %v3379_v55 = vpop.eup %3378  ;;  %3400 = vpow2.f32 %v3079_v10  ;;  %v4640_v48 = vpop.f32.mrb[16].mxu1  ;;  %v2531_v57 = vmul.f32 %v3377_v44, %v4537_v2 }
 0x37a   : > { %v3381_v47 = vpop.eup %3380  ;;  %3402 = vpow2.f32 %v3078_v37  ;;  %v4642_v9 = vpop.f32.mrb[20].mxu0  ;;  %v2530_v40 = vmul.f32 %v3379_v55, %v4540_v53  ;;  %v3100_v53 = vmul.f32 -1.442695, %v4638_v56 }
 0x37b   : > { %v3383_v60 = vpop.eup %3382  ;;  %3404 = vpow2.f32 %v3080_v17  ;;  %v4649_v37 = vpop.f32.mrb[17].mxu1  ;;  %v2532_v44 = vmul.f32 %v3381_v47, %v4543_v14 }
 0x37c   : > { %v3385_v10 = vpop.eup %3384  ;;  %v2539_v7 = vmul.f32 %v3383_v60, %v4548_v42  ;;  %v4651_v18 = vpop.f32.mrb[21].mxu0  ;;  %3406 = vpow2.f32 %v3087_v23 }
 0x37d   : > { %v3387_v49 = vpop.eup %3386  ;;  %v2541_v43 = vmul.f32 %v3385_v10, %v4551_v58  ;;  %v4658_v52 = vpop.f32.mrb[18].mxu1  ;;  %3408 = vpow2.f32 %v3089_v46 }
 0x37e   : > { %v4660_v42 = vpop.f32.mrb[22].mxu0  ;;  %v3389_v45 = vpop.eup %3388  ;;  %v2609_v17 = vadd.f32 %v2539_v7, %v2529_v26  ;;  %v2540_v60 = vmul.f32 %v3387_v49, %v4556_v24  ;;  %3410 = vpow2.f32 %v3088_v28  ;;  %v3107_v26 = vmul.f32 -1.442695, %v4647_v32 }
 0x37f   : > { %v4664_v21 = vpop.f32.mrb[19].mxu1  ;;  %v4666_v2 = vpop.f32.mrb[23].mxu0  ;;  %v2635_v35 = vadd.f32 %v2541_v43, %v2531_v57  ;;  %v2542_v23 = vmul.f32 %v3389_v45, %v4559_v1  ;;  %3412 = vpow2.f32 %v3090_v4  ;;  %v3109_v1 = vmul.f32 -1.442695, %v4656_v22 }
 0x380   : > { %v3391_v58 = vpop.eup %3390  ;;  %v2622_v51 = vadd.f32 %v2540_v60, %v2530_v40  ;;  %3414 = vpow2.f32 %v3097_v31 }
 0x381   : > { %v3393_v10 = vpop.eup %3392  ;;  %v2549_v62 = vmul.f32 %v3391_v58, %v4566_v12  ;;  %v2648_v55 = vadd.f32 %v2542_v23, %v2532_v44  ;;  %3416 = vpow2.f32 %v3099_v27  ;;  %v4679_v4 = vpop.f32.mrb[20].mxu1 }
 0x382   : > { %v3395_v24 = vpop.eup %3394  ;;  %v2551_v46 = vmul.f32 %v3393_v10, %v4569_v19  ;;  %3418 = vpow2.f32 %v3098_v29  ;;  %v4681_v57 = vpop.f32.mrb[24].mxu0 }
 0x383   : > { %v3397_v7 = vpop.eup %3396  ;;  %v2610_v14 = vadd.f32 %v2609_v17, %v2549_v62  ;;  %v2550_v47 = vmul.f32 %v3395_v24, %v4572_v54  ;;  %3420 = vpow2.f32 %v3100_v53  ;;  %v4686_v54 = vpop.f32.mrb[21].mxu1  ;;  %v4704_v53 = vadd.f32 %v4599_v50, %v4526_v63 }
 0x384   : > { %v3399_v28 = vpop.eup %3398  ;;  %v4676_v49 = vadd.f32 %v2635_v35, %v2551_v46  ;;  %v2552_v12 = vmul.f32 %v3397_v7, %v4575_v5  ;;  %v4688_v27 = vpop.f32.mrb[25].mxu0  ;;  %3422 = vpow2.f32 %v3107_v26  ;;  %v5252_v46 = vsub.s32 4, %v3791_v13 }
 0x385   : > { %v3401_v19 = vpop.eup %3400  ;;  %v4683_v31 = vadd.f32 %v2622_v51, %v2550_v47  ;;  %v2559_v62 = vmul.f32 %v3399_v28, %v4580_v39  ;;  %v4692_v5 = vpop.f32.mrb[22].mxu1  ;;  %3424 = vpow2.f32 %v3109_v1  ;;  %v5253_v47 = vsub.s32 6, %v3791_v13 }
 0x386   : > { %v3403_v43 = vpop.eup %3402  ;;  %v4690_v45 = vadd.f32 %v2648_v55, %v2552_v12  ;;  %v2321_v40 = vadd.f32 1.0, %v3401_v19  ;;  %v4694_v29 = vpop.f32.mrb[26].mxu0  ;;  %v4709_v26 = vrot.slane %v4513_v11, %v5252_v46  ;;  %v5254_v28 = vsub.s32 5, %v3791_v13 }
 0x387   : > { %v3405_v17 = vpop.eup %3404  ;;  %v4696_v60 = vadd.f32 %v2610_v14, %v2559_v62  ;;  %v2320_v51 = vadd.f32 1.0, %v3403_v43  ;;  %v4698_v39 = vpop.f32.mrb[23].mxu1  ;;  %v4714_v1 = vrot.slane %v4513_v11, %v5253_v47  ;;  %v3680_v62 = vmov 1966171168  }
 0x388   : > { %v4700_v58 = vpop.f32.mrb[27].mxu0  ;;  %v3407_v44 = vpop.eup %3406  ;;  %3426 = vrcp.f32 %v2321_v40  ;;  %v2322_v35 = vadd.f32 1.0, %v3405_v17  ;;  %v4719_v50 = vrot.slane %v4513_v11, %v5254_v28  ;;  %v4721_v43 = vunpack.c.l.s4 %v3680_v62 }
 0x389   : > { %v3409_v23 = vpop.eup %3408  ;;  %3428 = vrcp.f32 %v2320_v51  ;;  %v2329_v10 = vadd.f32 1.0, %v3407_v44  ;;  %v5255_v40 = vsub.s32 7, %v3791_v13  ;;  %v4728_v51 = vpop.f32.mrb[24].mxu1  ;;  %v4743_v47 = vadd.f32 %v4609_v3, %v4517_v41 }
 0x38a   : > { %v3411_v24 = vpop.eup %3410  ;;  %3430 = vrcp.f32 %v2322_v35  ;;  %v2331_v55 = vadd.f32 1.0, %v3409_v23  ;;  %v4730_v44 = vpop.f32.mrb[28].mxu0 }
 0x38b   : > { %v3413_v7 = vpop.eup %3412  ;;  %3432 = vrcp.f32 %v2329_v10  ;;  %v2330_v14 = vadd.f32 1.0, %v3411_v24  ;;  %v4726_v17 = vrot.slane %v4513_v11, %v5255_v40  ;;  %v3108_v10 = vmul.f32 -1.442695, %v4704_v53  ;;  %v4739_v46 = vpop.f32.mrb[29].mxu0 }
 0x38c   : > { %v3415_v12 = vpop.eup %3414  ;;  %3434 = vrcp.f32 %v2331_v55  ;;  %v2332_v19 = vadd.f32 1.0, %v3413_v7  ;;  %v4735_v24 = vadd.f32 %v4607_v36, %v4531_v20  ;;  %v4737_v55 = vpop.f32.mrb[25].mxu1  ;;  %v4755_v40 = vadd.f32 %v4619_v16, %v4526_v63 }
 0x38d   : > { %v3417_v35 = vpop.eup %3416  ;;  %3436 = vrcp.f32 %v2330_v14  ;;  %v2339_v23 = vadd.f32 1.0, %v3415_v12  ;;  %v4747_v14 = vadd.f32 %v4617_v6, %v4522_v34  ;;  %v4749_v28 = vpop.f32.mrb[26].mxu1 }
 0x38e   : > { %v3419_v7 = vpop.eup %3418  ;;  %3438 = vrcp.f32 %v2332_v19  ;;  %v2341_v11 = vadd.f32 1.0, %v3417_v35  ;;  %5257 = vst [vmem:[#allocation7_spill] sm:$0xff] %v4749_v28  ;;  %v4751_v12 = vpop.f32.mrb[30].mxu0  ;;  %v4759_v19 = vadd.f32 %v4627_v0, %v4531_v20  ;;  %v4767_v35 = vadd.f32 %v4640_v48, %v4709_v26 }
 0x38f   : > { %5256 = vst [vmem:[#allocation6_spill] sm:$0xff] %v4747_v14  ;;  %5258 = vst [vmem:[#allocation8_spill] sm:$0xff] %v4751_v12  ;;  %v3421_v36 = vpop.eup %3420  ;;  %3440 = vrcp.f32 %v2339_v23  ;;  %v2340_v62 = vadd.f32 1.0, %v3419_v7  ;;  %v4761_v41 = vpop.f32.mrb[27].mxu1  ;;  %v4771_v23 = vadd.f32 %v4642_v9, %v4714_v1  ;;  %v3110_v20 = vmul.f32 -1.442695, %v4735_v24 }
 0x390   : > { %5259 = vst [vmem:[#allocation9_spill] sm:$0xff] %v4759_v19  ;;  %5260 = vst [vmem:[#allocation10_spill] sm:$0xff] %v4761_v41  ;;  %v4763_v3 = vpop.f32.mrb[31].mxu0  ;;  %v3423_v34 = vpop.eup %3422  ;;  %3442 = vrcp.f32 %v2341_v11  ;;  %v2342_v6 = vadd.f32 1.0, %v3421_v36  ;;  %v4776_v0 = vadd.f32 %v4649_v37, %v4719_v50  ;;  %v3117_v36 = vmul.f32 -1.442695, %v4743_v47 }
 0x391   : > { %5261 = vst [vmem:[#allocation11_spill] sm:$0xff] %v4763_v3  ;;  %5262 = vst [vmem:[#allocation12_spill] sm:$0xff] %v4771_v23  ;;  %v3425_v63 = vpop.eup %3424  ;;  %3444 = vrcp.f32 %v2340_v62  ;;  %v2349_v16 = vadd.f32 1.0, %v3423_v34  ;;  %v3119_v48 = vmul.f32 -1.442695, %v4747_v14  ;;  %v4788_v28 = vpop.f32.mrb[32].mxu0 }
 0x392   : > { %v3427_v7 = vpop.eup %3426  ;;  %3446 = vrcp.f32 %v2342_v6  ;;  %v2351_v11 = vadd.f32 1.0, %v3425_v63  ;;  %v3118_v62 = vmul.f32 -1.442695, %v4755_v40  ;;  %v3120_v34 = vmul.f32 -1.442695, %v4759_v19  ;;  %v4786_v63 = vpop.f32.mrb[28].mxu1 }
 0x393   : > { %v3429_v3 = vpop.eup %3428  ;;  %v2561_v9 = vmul.f32 %v3427_v7, %v4586_v38  ;;  %3448 = vrcp.f32 %v2349_v16  ;;  %v3051_v37 = vmul.f32 -1.442695, %v4767_v35  ;;  %v3053_v6 = vmul.f32 -1.442695, %v4771_v23  ;;  %5263 = vst [vmem:[#allocation13_spill] sm:$0xff] %v4788_v28  ;;  %v4793_v19 = vpop.f32.mrb[29].mxu1 }
 0x394   : > { %v3431_v41 = vpop.eup %3430  ;;  %v2560_v12 = vmul.f32 %v3429_v3, %v4589_v33  ;;  %3450 = vrcp.f32 %v2351_v11  ;;  %v3052_v7 = vmul.f32 -1.442695, %v4776_v0  ;;  %v4795_v33 = vpop.f32.mrb[33].mxu0  ;;  %v4801_v28 = vadd.f32 %v4651_v18, %v4726_v17 }
 0x395   : > { %v3433_v14 = vpop.eup %3432  ;;  %v2637_v38 = vadd.f32 %v4676_v49, %v2561_v9  ;;  %v2562_v16 = vmul.f32 %v3431_v41, %v4593_v61  ;;  %3452 = vpow2.f32 %v3108_v10  ;;  %v4803_v49 = vpop.f32.mrb[30].mxu1 }
 0x396   : > { %v3435_v3 = vpop.eup %3434  ;;  %v2624_v11 = vadd.f32 %v4683_v31, %v2560_v12  ;;  %v2569_v23 = vmul.f32 %v3433_v14, %v4597_v30  ;;  %3454 = vpow2.f32 %v3110_v20  ;;  %v4805_v61 = vpop.f32.mrb[34].mxu0  ;;  %v4811_v31 = vadd.f32 %v4658_v52, %v4709_v26 }
 0x397   : > { %v3437_v10 = vpop.eup %3436  ;;  %v2650_v41 = vadd.f32 %v4690_v45, %v2562_v16  ;;  %v2571_v9 = vmul.f32 %v3435_v3, %v4602_v59  ;;  %3456 = vpow2.f32 %v3117_v36  ;;  %v4813_v30 = vpop.f32.mrb[31].mxu1  ;;  %v4821_v45 = vadd.f32 %v4660_v42, %v4714_v1  ;;  %v5265_v42 = vld [vmem:[#allocation4_spill] sm:$0xff] }
 0x398   : > { %v4815_v14 = vpop.f32.mrb[35].mxu0  ;;  %v3439_v18 = vpop.eup %3438  ;;  %v2612_v12 = vadd.f32 %v4696_v60, %v2569_v23  ;;  %v2570_v20 = vmul.f32 %v3437_v10, %v4605_v8  ;;  %3458 = vpow2.f32 %v3119_v48  ;;  %v4826_v52 = vadd.f32 %v4664_v21, %v4719_v50 }
 0x399   : > { %5264 = vst [vmem:[#allocation14_spill] sm:$0xff] %v4815_v14  ;;  %v3441_v59 = vpop.eup %3440  ;;  %v2638_v36 = vadd.f32 %v2637_v38, %v2571_v9  ;;  %v2572_v16 = vmul.f32 %v3439_v18, %v4612_v25  ;;  %3460 = vpow2.f32 %v3118_v62  ;;  %v3054_v8 = vmul.f32 -1.442695, %v4801_v28  ;;  %v5266_v9 = vld [vmem:[#allocation5_spill] sm:$0xff] }
 0x39a   : > { %v3443_v3 = vpop.eup %3442  ;;  %v2625_v14 = vadd.f32 %v2624_v11, %v2570_v20  ;;  %v2579_v60 = vmul.f32 %v3441_v59, %v4615_v15  ;;  %3462 = vpow2.f32 %v3120_v34  ;;  %v3061_v38 = vmul.f32 -1.442695, %v4811_v31  ;;  %v4834_v11 = vpop.f32.mrb[32].mxu1 }
 0x39b   : > { %v3445_v23 = vpop.eup %3444  ;;  %v2651_v48 = vadd.f32 %v2650_v41, %v2572_v16  ;;  %v2581_v10 = vmul.f32 %v3443_v3, %v5265_v42  ;;  %3464 = vpow2.f32 %v3051_v37  ;;  %v3063_v21 = vmul.f32 -1.442695, %v4821_v45  ;;  %v4838_v59 = vpop.f32.mrb[33].mxu1 }
 0x39c   : > { %v3447_v25 = vpop.eup %3446  ;;  %v2613_v62 = vadd.f32 %v2612_v12, %v2579_v60  ;;  %v2580_v18 = vmul.f32 %v3445_v23, %v5266_v9  ;;  %3466 = vpow2.f32 %v3053_v6  ;;  %v3062_v41 = vmul.f32 -1.442695, %v4826_v52  ;;  %v4843_v6 = vpop.f32.mrb[34].mxu1 }
 0x39d   : > { %v3449_v15 = vpop.eup %3448  ;;  %v2639_v34 = vadd.f32 %v2638_v36, %v2581_v10  ;;  %v2582_v20 = vmul.f32 %v3447_v25, %v4638_v56  ;;  %3468 = vpow2.f32 %v3052_v7  ;;  %5267 = vst [vmem:[#allocation4_spill] sm:$0xff] %v4843_v6  ;;  %v2765_v56 = vunpack.c.0.s8 %v4721_v43  ;;  %v4849_v7 = vpop.f32.mrb[35].mxu1 }
 0x39e   : > { %v3451_v37 = vpop.eup %3450  ;;  %v4840_v16 = vadd.f32 %v2625_v14, %v2580_v18  ;;  %v2589_v12 = vmul.f32 %v3449_v15, %v4647_v32  ;;  %3470 = vpow2.f32 %v3054_v8  ;;  %5268 = vst [vmem:[#allocation5_spill] sm:$0xff] %v4849_v7  ;;  %v4855_v32 = vadd.f32 %v4666_v2, %v4726_v17 }
 0x39f   : > { %v3453_v3 = vpop.eup %3452  ;;  %v4845_v60 = vadd.f32 %v2651_v48, %v2582_v20  ;;  %v2591_v36 = vmul.f32 %v3451_v37, %v4656_v22  ;;  %3472 = vpow2.f32 %v3061_v38  ;;  %v4861_v22 = vadd.f32 %v4679_v4, %v4709_v26 }
 0x3a0   : > { %v3455_v23 = vpop.eup %3454  ;;  %v4851_v42 = vadd.f32 %v2613_v62, %v2589_v12  ;;  %v2350_v14 = vadd.f32 1.0, %v3453_v3  ;;  %3474 = vpow2.f32 %v3063_v21  ;;  %v4865_v25 = vadd.f32 %v4681_v57, %v4714_v1 }
 0x3a1   : > { %v3457_v8 = vpop.eup %3456  ;;  %v4857_v10 = vadd.f32 %v2639_v34, %v2591_v36  ;;  %v2352_v48 = vadd.f32 1.0, %v3455_v23  ;;  %3476 = vpow2.f32 %v3062_v41  ;;  %v4869_v9 = vadd.f32 %v4686_v54, %v4719_v50  ;;  %v4874_v15 = vpop.f32.mrb[36].mxu1 }
 0x3a2   : > { %v3459_v43 = vpop.eup %3458  ;;  %3478 = vrcp.f32 %v2350_v14  ;;  %v2359_v38 = vadd.f32 1.0, %v3457_v8  ;;  %v4872_v4 = vsub.s32 %v2765_v56, %v3791_v13  ;;  %5269 = vst [vmem:[#allocation15_spill] sm:$0xff] %v4874_v15  ;;  %v3064_v57 = vmul.f32 -1.442695, %v4855_v32  ;;  %v4878_v37 = vpop.f32.mrb[37].mxu1 }
 0x3a3   : > { %v3461_v62 = vpop.eup %3460  ;;  %3480 = vrcp.f32 %v2352_v48  ;;  %v2361_v2 = vadd.f32 1.0, %v3459_v43  ;;  %v3071_v41 = vmul.f32 -1.442695, %v4861_v22  ;;  %5270 = vst [vmem:[#allocation16_spill] sm:$0xff] %v4878_v37  ;;  %v3073_v3 = vmul.f32 -1.442695, %v4865_v25 }
 0x3a4   : > { %v3463_v18 = vpop.eup %3462  ;;  %3482 = vrcp.f32 %v2359_v38  ;;  %v2360_v21 = vadd.f32 1.0, %v3461_v62  ;;  %v4883_v13 = vadd.f32 %v4688_v27, %v4726_v17  ;;  %v4885_v36 = vpop.f32.mrb[38].mxu1  ;;  %v3072_v14 = vmul.f32 -1.442695, %v4869_v9 }
 0x3a5   : > { %v3465_v34 = vpop.eup %3464  ;;  %3484 = vrcp.f32 %v2361_v2  ;;  %v2362_v20 = vadd.f32 1.0, %v3463_v18  ;;  %5271 = vst [vmem:[#allocation17_spill] sm:$0xff] %v4885_v36  ;;  %v4890_v8 = vadd.f32 %v4692_v5, %v4709_v26  ;;  %v4892_v48 = vpop.f32.mrb[39].mxu1  ;;  %v4896_v27 = vadd.f32 %v4694_v29, %v4714_v1 }
 0x3a6   : > { %v3467_v12 = vpop.eup %3466  ;;  %3486 = vrcp.f32 %v2360_v21  ;;  %v2293_v54 = vadd.f32 1.0, %v3465_v34  ;;  %5272 = vst [vmem:[#allocation18_spill] sm:$0xff] %v4892_v48  ;;  %v4900_v62 = vadd.f32 %v4698_v39, %v4719_v50  ;;  %v4904_v5 = vadd.f32 %v4700_v58, %v4726_v17 }
 0x3a7   : > { %v3469_v56 = vpop.eup %3468  ;;  %3488 = vrcp.f32 %v2362_v20  ;;  %v2295_v23 = vadd.f32 1.0, %v3467_v12  ;;  %v4908_v21 = vadd.f32 %v4728_v51, %v4709_v26  ;;  %v3074_v29 = vmul.f32 -1.442695, %v4883_v13 }
 0x3a8   : > { %v3471_v43 = vpop.eup %3470  ;;  %3490 = vrcp.f32 %v2293_v54  ;;  %v2294_v38 = vadd.f32 1.0, %v3469_v56  ;;  %v4913_v39 = vadd.f32 %v4730_v44, %v4714_v1  ;;  %v3081_v56 = vmul.f32 -1.442695, %v4890_v8 }
 0x3a9   : > { %v3473_v2 = vpop.eup %3472  ;;  %3492 = vrcp.f32 %v2295_v23  ;;  %v2296_v18 = vadd.f32 1.0, %v3471_v43  ;;  %v4918_v58 = vadd.f32 %v4737_v55, %v4719_v50  ;;  %v3083_v43 = vmul.f32 -1.442695, %v4896_v27 }
 0x3aa   : > { %v3475_v34 = vpop.eup %3474  ;;  %3494 = vrcp.f32 %v2294_v38  ;;  %v2303_v20 = vadd.f32 1.0, %v3473_v2  ;;  %5273 = vst [vmem:[#allocation19_spill] sm:$0xff] %v4913_v39  ;;  %v3082_v38 = vmul.f32 -1.442695, %v4900_v62  ;;  %v4922_v2 = vpop.f32.mrb[40].mxu1 }
 0x3ab   : > { %v3477_v12 = vpop.eup %3476  ;;  %3496 = vrcp.f32 %v2296_v18  ;;  %v2305_v54 = vadd.f32 1.0, %v3475_v34  ;;  %5274 = vst [vmem:[#allocation20_spill] sm:$0xff] %v4918_v58  ;;  %5275 = vst [vmem:[#allocation21_spill] sm:$0xff] %v4922_v2  ;;  %v3084_v18 = vmul.f32 -1.442695, %v4904_v5  ;;  %v4927_v36 = vpop.f32.mrb[41].mxu1  ;;  %v4935_v2 = vadd.f32 %v4739_v46, %v4726_v17 }
 0x3ac   : > { %v3479_v51 = vpop.eup %3478  ;;  %3498 = vrcp.f32 %v2303_v20  ;;  %v2304_v23 = vadd.f32 1.0, %v3477_v12  ;;  %v3091_v34 = vmul.f32 -1.442695, %v4908_v21  ;;  %5276 = vst [vmem:[#allocation22_spill] sm:$0xff] %v4927_v36  ;;  %v4931_v12 = vmul.f32 -1.442695, %v4913_v39 }
 0x3ad   : > { %v3481_v44 = vpop.eup %3480  ;;  %v2590_v48 = vmul.f32 %v3479_v51, %v4704_v53  ;;  %3500 = vrcp.f32 %v2305_v54  ;;  %v4937_v37 = vpop.f32.mrb[42].mxu1  ;;  %v4942_v36 = vmul.f32 -1.442695, %v4918_v58  ;;  %v5279_v39 = vld [vmem:[#allocation6_spill] sm:$0xff]  ;;  %v5280_v46 = vld [vmem:[#allocation7_spill] sm:$0xff] }
 0x3ae   : > { %v3483_v55 = vpop.eup %3482  ;;  %v2592_v20 = vmul.f32 %v3481_v44, %v4735_v24  ;;  %3502 = vrcp.f32 %v2304_v23  ;;  %5277 = vst [vmem:[#allocation23_spill] sm:$0xff] %v4937_v37  ;;  %v4944_v24 = vpop.f32.mrb[43].mxu1  ;;  %v4950_v37 = vadd.f32 %v5280_v46, %v4709_v26 }
 0x3af   : > { %v3485_v53 = vpop.eup %3484  ;;  %v2627_v54 = vadd.f32 %v4840_v16, %v2590_v48  ;;  %v2599_v51 = vmul.f32 %v3483_v55, %v4743_v47  ;;  %3504 = vpow2.f32 %v3064_v57  ;;  %5278 = vst [vmem:[#allocation24_spill] sm:$0xff] %v4944_v24  ;;  %v5281_v57 = vld [vmem:[#allocation8_spill] sm:$0xff] }
 0x3b0   : > { %v3487_v23 = vpop.eup %3486  ;;  %v2653_v44 = vadd.f32 %v4845_v60, %v2592_v20  ;;  %v2601_v15 = vmul.f32 %v3485_v53, %v5279_v39  ;;  %3506 = vpow2.f32 %v3071_v41  ;;  %v4956_v48 = vadd.f32 %v5281_v57, %v4714_v1  ;;  %v5282_v20 = vld [vmem:[#allocation9_spill] sm:$0xff]  ;;  %v5283_v41 = vld [vmem:[#allocation10_spill] sm:$0xff] }
 0x3b1   : > { %v3489_v7 = vpop.eup %3488  ;;  %v2615_v16 = vadd.f32 %v4851_v42, %v2599_v51  ;;  %v2600_v47 = vmul.f32 %v3487_v23, %v4755_v40  ;;  %3508 = vpow2.f32 %v3073_v3  ;;  %v4962_v53 = vadd.f32 %v5283_v41, %v4719_v50  ;;  %v5284_v40 = vld [vmem:[#allocation11_spill] sm:$0xff]  ;;  %v5285_v41 = vld [vmem:[#allocation12_spill] sm:$0xff] }
 0x3b2   : > { %v3491_v55 = vpop.eup %3490  ;;  %v2641_v60 = vadd.f32 %v4857_v10, %v2601_v15  ;;  %v2602_v39 = vmul.f32 %v3489_v7, %v5282_v20  ;;  %3510 = vpow2.f32 %v3072_v14  ;;  %v4966_v3 = vadd.f32 %v5284_v40, %v4726_v17  ;;  %v4969_v7 = vpop.f32.mrb[44].mxu1 }
 0x3b3   : > { %v3493_v46 = vpop.eup %3492  ;;  %v2616_v24 = vrot.slane %v2615_v16, 4  ;;  %v2628_v42 = vadd.f32 %v2627_v54, %v2600_v47  ;;  %3512 = vpow2.f32 %v3074_v29  ;;  %v2533_v10 = vmul.f32 %v3491_v55, %v4767_v35  ;;  %v4974_v29 = vpop.f32.mrb[45].mxu1 }
 0x3b4   : > { %v3495_v51 = vpop.eup %3494  ;;  %v2642_v23 = vrot.slane %v2641_v60, 4  ;;  %v2654_v57 = vadd.f32 %v2653_v44, %v2602_v39  ;;  %3514 = vpow2.f32 %v3081_v56  ;;  %v2535_v58 = vmul.f32 %v3493_v46, %v5285_v41  ;;  %5286 = vst [vmem:[#allocation6_spill] sm:$0xff] %v4974_v29  ;;  %v4977_v44 = vpop.f32.mrb[46].mxu1 }
 0x3b5   : > { %v4971_v15 = vpop.eup %3496  ;;  %v2617_v14 = vadd.f32 %v2616_v24, %v2615_v16  ;;  %v2629_v20 = vrot.slane %v2628_v42, 4  ;;  %3516 = vpow2.f32 %v3083_v43  ;;  %v2534_v6 = vmul.f32 %v3495_v51, %v4776_v0  ;;  %5287 = vst [vmem:[#allocation7_spill] sm:$0xff] %v4977_v44  ;;  %v4980_v24 = vpop.f32.mrb[47].mxu1 }
 0x3b6   : > { %v3499_v54 = vpop.eup %3498  ;;  %v2643_v47 = vadd.f32 %v2642_v23, %v2641_v60  ;;  %v2655_v40 = vrot.slane %v2654_v57, 4  ;;  %3518 = vpow2.f32 %v3082_v38  ;;  %5288 = vst [vmem:[#allocation8_spill] sm:$0xff] %v4980_v24 }
 0x3b7   : > { %v3501_v35 = vpop.eup %3500  ;;  %v2618_v56 = vrot.slane %v2617_v14, 2  ;;  %v2630_v55 = vadd.f32 %v2629_v20, %v2628_v42  ;;  %v2543_v39 = vmul.f32 %v3499_v54, %v4811_v31  ;;  %3520 = vpow2.f32 %v3084_v18 }
 0x3b8   : > { %v3503_v16 = vpop.eup %3502  ;;  %v2644_v43 = vrot.slane %v2643_v47, 2  ;;  %v2656_v46 = vadd.f32 %v2655_v40, %v2654_v57  ;;  %v2545_v41 = vmul.f32 %v3501_v35, %v4821_v45  ;;  %3522 = vpow2.f32 %v3091_v34 }
 0x3b9   : > { %v3505_v60 = vpop.eup %3504  ;;  %v2619_v23 = vadd.f32 %v2618_v56, %v2617_v14  ;;  %v2631_v0 = vrot.slane %v2630_v55, 2  ;;  %v4983_v38 = vadd.f32 %v2543_v39, %v2533_v10  ;;  %v2544_v51 = vmul.f32 %v3503_v16, %v4826_v52 }
 0x3ba   : > { %v3507_v44 = vpop.eup %3506  ;;  %v2645_v42 = vadd.f32 %v2644_v43, %v2643_v47  ;;  %v2657_v20 = vrot.slane %v2656_v46, 2  ;;  %v4986_v31 = vadd.f32 %v2545_v41, %v2535_v58  ;;  %v2306_v18 = vadd.f32 1.0, %v3505_v60 }
 0x3bb   : > { %v3509_v54 = vpop.eup %3508  ;;  %v2620_v24 = vrot.slane %v2619_v23, 1  ;;  %v2632_v29 = vadd.f32 %v2631_v0, %v2630_v55  ;;  %v4988_v57 = vadd.f32 %v2544_v51, %v2534_v6  ;;  %v2313_v45 = vadd.f32 1.0, %v3507_v44 }
 0x3bc   : > { %v3511_v34 = vpop.eup %3510  ;;  %v2646_v40 = vrot.slane %v2645_v42, 1  ;;  %v2658_v14 = vadd.f32 %v2657_v20, %v2656_v46  ;;  %3524 = vrcp.f32 %v2306_v18  ;;  %v2315_v10 = vadd.f32 1.0, %v3509_v54 }
 0x3bd   : > { %v3513_v35 = vpop.eup %3512  ;;  %v2621_v56 = vadd.f32 %v2620_v24, %v2619_v23  ;;  %v2633_v52 = vrot.slane %v2632_v29, 1  ;;  %3526 = vrcp.f32 %v2313_v45  ;;  %v2314_v47 = vadd.f32 1.0, %v3511_v34 }
 0x3be   : > { %v3515_v39 = vpop.eup %3514  ;;  %v2647_v58 = vadd.f32 %v2646_v40, %v2645_v42  ;;  %v2659_v16 = vrot.slane %v2658_v14, 1  ;;  %3528 = vrcp.f32 %v2315_v10  ;;  %v2316_v43 = vadd.f32 1.0, %v3513_v35 }
 0x3bf   : > { %v3517_v41 = vpop.eup %3516  ;;  %v2739_v55 = vmul.f32 0.015625, %v2621_v56  ;;  %v2634_v6 = vadd.f32 %v2633_v52, %v2632_v29  ;;  %3530 = vrcp.f32 %v2314_v47  ;;  %v2323_v44 = vadd.f32 1.0, %v3515_v39  ;;  %v5289_v29 = vld [vmem:[#allocation13_spill] sm:$0xff] }
 0x3c0   : > { %v3519_v60 = vpop.eup %3518  ;;  %v2741_v0 = vmul.f32 0.015625, %v2647_v58  ;;  %v2660_v46 = vadd.f32 %v2659_v16, %v2658_v14  ;;  %3532 = vrcp.f32 %v2316_v43  ;;  %v2325_v51 = vadd.f32 1.0, %v3517_v41 }
 0x3c1   : > { %v3521_v20 = vpop.eup %3520  ;;  %v2740_v24 = vmul.f32 0.015625, %v2634_v6  ;;  %3534 = vrcp.f32 %v2323_v44  ;;  %v2324_v23 = vadd.f32 1.0, %v3519_v60  ;;  %v4992_v42 = vadd.f32 %v4786_v63, %v4709_v26 }
 0x3c2   : > { %v3523_v18 = vpop.eup %3522  ;;  %v2742_v54 = vmul.f32 0.015625, %v2660_v46  ;;  %3536 = vrcp.f32 %v2325_v51  ;;  %v2326_v45 = vadd.f32 1.0, %v3521_v20  ;;  %v4996_v34 = vadd.f32 %v5289_v29, %v4714_v1 }
 0x3c3   : > { %v2759_v40 = vcombine.low %v2739_v55, %v2740_v24  ;;  %3538 = vrcp.f32 %v2324_v23  ;;  %v2333_v14 = vadd.f32 1.0, %v3523_v18  ;;  %v3094_v10 = vmul.f32 -1.442695, %v4935_v2 }
 0x3c4   : > { %v2760_v35 = vcombine.low %v2741_v0, %v2742_v54  ;;  %3540 = vrcp.f32 %v2326_v45  ;;  %v3101_v56 = vmul.f32 -1.442695, %v4950_v37  ;;  %v3103_v63 = vmul.f32 -1.442695, %v4956_v48 }
 0x3c5   : > { %v5002_v52 = vrot.slane %v2759_v40, %v4872_v4  ;;  %3542 = vrcp.f32 %v2333_v14  ;;  %v3102_v47 = vmul.f32 -1.442695, %v4962_v53  ;;  %v3104_v39 = vmul.f32 -1.442695, %v4966_v3 }
 0x3c6   : > { %v3525_v58 = vpop.eup %3524  ;;  %v5007_v16 = vrot.slane %v2760_v35, %v4872_v4  ;;  %3544 = vpow2.f32 %v4931_v12  ;;  %v3111_v43 = vmul.f32 -1.442695, %v4992_v42  ;;  %v3113_v41 = vmul.f32 -1.442695, %v4996_v34 }
 0x3c7   : > { %v3527_v55 = vpop.eup %3526  ;;  %v2536_v6 = vmul.f32 %v4971_v15, %v4801_v28  ;;  %v2546_v44 = vmul.f32 %v3525_v58, %v4855_v32  ;;  %3546 = vpow2.f32 %v4942_v36  ;;  %v5018_v60 = vadd.f32 %v4793_v19, %v4719_v50 }
 0x3c8   : > { %v3529_v0 = vpop.eup %3528  ;;  %v2791_v12 = vcombine.low %v5002_v52, %v5007_v16  ;;  %v2553_v46 = vmul.f32 %v3527_v55, %v4861_v22  ;;  %3548 = vpow2.f32 %v3094_v10  ;;  %v5025_v51 = vadd.f32 %v4795_v33, %v4726_v17 }
 0x3c9   : > { %v3531_v28 = vpop.eup %3530  ;;  %v2700_v15 = vadd.f32 %v2546_v44, %v2536_v6  ;;  %v2555_v32 = vmul.f32 %v3529_v0, %v4865_v25  ;;  %3550 = vpow2.f32 %v3101_v56  ;;  %v5030_v19 = vadd.f32 %v4803_v49, %v4709_v26  ;;  %v5290_v6 = vld [vmem:[#allocation2_spill] sm:$0xff] }
 0x3ca   : > { %v3533_v36 = vpop.eup %3532  ;;  %v2662_v20 = vadd.f32 %v4983_v38, %v2553_v46  ;;  %v2554_v24 = vmul.f32 %v3531_v28, %v4869_v9  ;;  %3552 = vpow2.f32 %v3103_v63  ;;  %v5036_v22 = vadd.f32 %v4805_v61, %v4714_v1 }
 0x3cb   : > { %v3535_v33 = vpop.eup %3534  ;;  %v2688_v23 = vadd.f32 %v4986_v31, %v2555_v32  ;;  %v2556_v25 = vmul.f32 %v3533_v36, %v4883_v13  ;;  %3554 = vpow2.f32 %v3102_v47  ;;  %v3112_v18 = vmul.f32 -1.442695, %v5018_v60 }
 0x3cc   : > { %v3537_v26 = vpop.eup %3536  ;;  %v2675_v49 = vadd.f32 %v4988_v57, %v2554_v24  ;;  %v2563_v38 = vmul.f32 %v3535_v33, %v4890_v8  ;;  %3556 = vpow2.f32 %v3104_v39  ;;  %v3114_v9 = vmul.f32 -1.442695, %v5025_v51 }
 0x3cd   : > { %v3539_v54 = vpop.eup %3538  ;;  %v2701_v45 = vadd.f32 %v2700_v15, %v2556_v25  ;;  %v2565_v1 = vmul.f32 %v3537_v26, %v4896_v27  ;;  %3558 = vpow2.f32 %v3111_v43  ;;  %v3121_v61 = vmul.f32 -1.442695, %v5030_v19  ;;  %v5291_v15 = vld [vmem:[#allocation3_spill] sm:$0xff] }
 0x3ce   : > { %v3541_v31 = vpop.eup %3540  ;;  %v2663_v13 = vadd.f32 %v2662_v20, %v2563_v38  ;;  %v2564_v29 = vmul.f32 %v3539_v54, %v4900_v62  ;;  %3560 = vpow2.f32 %v3113_v41  ;;  %v3123_v40 = vmul.f32 -1.442695, %v5036_v22  ;;  %v1319_v62 = vld [vmem:[%s5230_s11 + $0x8] sm:$0x3] }
 0x3cf   : > { %v3543_v57 = vpop.eup %3542  ;;  %v5048_v14 = vadd.f32 %v2688_v23, %v2565_v1  ;;  %v2566_v8 = vmul.f32 %v3541_v31, %v4904_v5  ;;  %3562 = vpow2.f32 %v3112_v18  ;;  %v5062_v44 = vrot.slane %v1319_v62, %v5290_v6  ;;  %v5292_v18 = vld [vmem:[#allocation14_spill] sm:$0xff]  ;;  %v5293_v1 = vld [vmem:[#allocation4_spill] sm:$0xff] }
 0x3d0   : > { %v3545_v10 = vpop.eup %3544  ;;  %v5051_v35 = vadd.f32 %v2675_v49, %v2564_v29  ;;  %v2573_v27 = vmul.f32 %v3543_v57, %v4908_v21  ;;  %3564 = vpow2.f32 %v3114_v9  ;;  %v5066_v28 = vadd.f32 %v4813_v30, %v4719_v50  ;;  %v5295_v29 = vld [vmem:[#allocation15_spill] sm:$0xff] }
 0x3d1   : > { %v3547_v56 = vpop.eup %3546  ;;  %v5054_v63 = vadd.f32 %v2701_v45, %v2566_v8  ;;  %v2335_v47 = vadd.f32 1.0, %v3545_v10  ;;  %3566 = vpow2.f32 %v3121_v61  ;;  %v5069_v32 = vrot.slane %v1319_v62, %v5291_v15  ;;  %v5294_v61 = vld [vmem:[#allocation5_spill] sm:$0xff]  ;;  %v5299_v15 = vld [vmem:[#allocation20_spill] sm:$0xff] }
 0x3d2   : > { %v3549_v39 = vpop.eup %3548  ;;  %v5059_v58 = vadd.f32 %v2663_v13, %v2573_v27  ;;  %v2334_v5 = vadd.f32 1.0, %v3547_v56  ;;  %3568 = vpow2.f32 %v3123_v40  ;;  %v5073_v26 = vadd.f32 %v5292_v18, %v4726_v17  ;;  %v5300_v18 = vld [vmem:[#allocation18_spill] sm:$0xff] }
 0x3d3   : > { %v3551_v43 = vpop.eup %3550  ;;  %3570 = vrcp.f32 %v2335_v47  ;;  %v2336_v41 = vadd.f32 1.0, %v3549_v39  ;;  %v5077_v50 = vadd.f32 %v4834_v11, %v5062_v44  ;;  %v3122_v38 = vmul.f32 -1.442695, %v5066_v28 }
 0x3d4   : > { %v3553_v55 = vpop.eup %3552  ;;  %3572 = vrcp.f32 %v2334_v5  ;;  %v2343_v21 = vadd.f32 1.0, %v3551_v43  ;;  %v5082_v9 = vadd.f32 %v4838_v59, %v5069_v32  ;;  %v5086_v17 = vadd.f32 %v5293_v1, %v5062_v44  ;;  %v5296_v59 = vld [vmem:[#allocation16_spill] sm:$0xff]  ;;  %v5297_v5 = vld [vmem:[#allocation17_spill] sm:$0xff] }
 0x3d5   : > { %v3555_v0 = vpop.eup %3554  ;;  %3574 = vrcp.f32 %v2336_v41  ;;  %v2345_v46 = vadd.f32 1.0, %v3553_v55  ;;  %v5090_v11 = vadd.f32 %v5294_v61, %v5069_v32  ;;  %v5094_v40 = vadd.f32 %v5295_v29, %v5062_v44  ;;  %v5298_v55 = vld [vmem:[#allocation19_spill] sm:$0xff] }
 0x3d6   : > { %v3557_v36 = vpop.eup %3556  ;;  %3576 = vrcp.f32 %v2343_v21  ;;  %v2344_v20 = vadd.f32 1.0, %v3555_v0  ;;  %v5098_v57 = vadd.f32 %v5296_v59, %v5069_v32  ;;  %v3124_v27 = vmul.f32 -1.442695, %v5073_v26 }
 0x3d7   : > { %v3559_v24 = vpop.eup %3558  ;;  %3578 = vrcp.f32 %v2345_v46  ;;  %v2346_v33 = vadd.f32 1.0, %v3557_v36  ;;  %v3055_v56 = vmul.f32 -1.442695, %v5077_v50  ;;  %v3056_v39 = vmul.f32 -1.442695, %v5082_v9 }
 0x3d8   : > { %v3561_v23 = vpop.eup %3560  ;;  %3580 = vrcp.f32 %v2344_v20  ;;  %v2353_v25 = vadd.f32 1.0, %v3559_v24  ;;  %v5105_v43 = vadd.f32 %v5297_v5, %v5062_v44  ;;  %v3065_v6 = vmul.f32 -1.442695, %v5086_v17 }
 0x3d9   : > { %v3563_v30 = vpop.eup %3562  ;;  %3582 = vrcp.f32 %v2346_v33  ;;  %v2355_v49 = vadd.f32 1.0, %v3561_v23  ;;  %v3066_v0 = vmul.f32 -1.442695, %v5090_v11  ;;  %v3075_v20 = vmul.f32 -1.442695, %v5094_v40 }
 0x3da   : > { %v3565_v54 = vpop.eup %3564  ;;  %3584 = vrcp.f32 %v2353_v25  ;;  %v2354_v45 = vadd.f32 1.0, %v3563_v30  ;;  %v3076_v24 = vmul.f32 -1.442695, %v5098_v57  ;;  %v5117_v30 = vadd.f32 %v5300_v18, %v5069_v32 }
 0x3db   : > { %v3567_v31 = vpop.eup %3566  ;;  %3586 = vrcp.f32 %v2355_v49  ;;  %v2356_v13 = vadd.f32 1.0, %v3565_v54  ;;  %v3085_v1 = vmul.f32 -1.442695, %v5105_v43 }
 0x3dc   : > { %v3569_v8 = vpop.eup %3568  ;;  %3588 = vrcp.f32 %v2354_v45  ;;  %v2363_v10 = vadd.f32 1.0, %v3567_v31 }
 0x3dd   : > { %v3571_v47 = vpop.eup %3570  ;;  %3590 = vrcp.f32 %v2356_v13  ;;  %v2365_v62 = vadd.f32 1.0, %v3569_v8 }
 0x3de   : > { %v3573_v41 = vpop.eup %3572  ;;  %v2575_v21 = vmul.f32 %v3571_v47, %v5298_v55  ;;  %3592 = vrcp.f32 %v2363_v10 }
 0x3df   : > { %v3575_v46 = vpop.eup %3574  ;;  %v2574_v36 = vmul.f32 %v3573_v41, %v5299_v15  ;;  %3594 = vrcp.f32 %v2365_v62 }
 0x3e0   : > { %v3577_v33 = vpop.eup %3576  ;;  %v2690_v23 = vadd.f32 %v5048_v14, %v2575_v21  ;;  %v2576_v25 = vmul.f32 %v3575_v46, %v4935_v2  ;;  %3596 = vpow2.f32 %v3122_v38  ;;  %v5301_v2 = vld [vmem:[#allocation21_spill] sm:$0xff] }
 0x3e1   : > { %v3579_v49 = vpop.eup %3578  ;;  %v2677_v54 = vadd.f32 %v5051_v35, %v2574_v36  ;;  %v2583_v45 = vmul.f32 %v3577_v33, %v4950_v37  ;;  %3598 = vpow2.f32 %v3124_v27  ;;  %v5126_v38 = vadd.f32 %v5301_v2, %v5062_v44  ;;  %v5302_v37 = vld [vmem:[#allocation22_spill] sm:$0xff] }
 0x3e2   : > { %v3581_v61 = vpop.eup %3580  ;;  %v2703_v31 = vadd.f32 %v5054_v63, %v2576_v25  ;;  %v2585_v14 = vmul.f32 %v3579_v49, %v4956_v48  ;;  %3600 = vpow2.f32 %v3055_v56  ;;  %v5132_v59 = vadd.f32 %v5302_v37, %v5069_v32  ;;  %v5303_v48 = vld [vmem:[#allocation23_spill] sm:$0xff] }
 0x3e3   : > { %v3583_v13 = vpop.eup %3582  ;;  %v2665_v29 = vadd.f32 %v5059_v58, %v2583_v45  ;;  %v2584_v35 = vmul.f32 %v3581_v61, %v4962_v53  ;;  %3602 = vpow2.f32 %v3056_v39  ;;  %v5137_v27 = vadd.f32 %v5303_v48, %v5062_v44 }
 0x3e4   : > { %v3585_v8 = vpop.eup %3584  ;;  %v2691_v10 = vadd.f32 %v2690_v23, %v2585_v14  ;;  %v2586_v63 = vmul.f32 %v3583_v13, %v4966_v3  ;;  %3604 = vpow2.f32 %v3065_v6  ;;  %v3086_v53 = vmul.f32 -1.442695, %v5117_v30 }
 0x3e5   : > { %v3587_v56 = vpop.eup %3586  ;;  %v2678_v47 = vadd.f32 %v2677_v54, %v2584_v35  ;;  %v2593_v58 = vmul.f32 %v3585_v8, %v4992_v42  ;;  %3606 = vpow2.f32 %v3066_v0  ;;  %v3095_v41 = vmul.f32 -1.442695, %v5126_v38 }
 0x3e6   : > { %v3589_v62 = vpop.eup %3588  ;;  %v2704_v39 = vadd.f32 %v2703_v31, %v2586_v63  ;;  %v2595_v5 = vmul.f32 %v3587_v56, %v4996_v34  ;;  %3608 = vpow2.f32 %v3075_v20  ;;  %v3096_v6 = vmul.f32 -1.442695, %v5132_v59 }
 0x3e7   : > { %v3591_v3 = vpop.eup %3590  ;;  %v2666_v55 = vadd.f32 %v2665_v29, %v2593_v58  ;;  %v2594_v21 = vmul.f32 %v3589_v62, %v5018_v60  ;;  %3610 = vpow2.f32 %v3076_v24  ;;  %v3105_v0 = vmul.f32 -1.442695, %v5137_v27 }
 0x3e8   : > { %v3593_v46 = vpop.eup %3592  ;;  %v2692_v15 = vadd.f32 %v2691_v10, %v2595_v5  ;;  %v2596_v42 = vmul.f32 %v3591_v3, %v5025_v51  ;;  %3612 = vpow2.f32 %v3085_v1  ;;  %v5304_v10 = vld [vmem:[#allocation24_spill] sm:$0xff]  ;;  %v5305_v3 = vld [vmem:[#allocation6_spill] sm:$0xff] }
 0x3e9   : > { %v3595_v36 = vpop.eup %3594  ;;  %v5147_v33 = vadd.f32 %v2678_v47, %v2594_v21  ;;  %v2603_v34 = vmul.f32 %v3593_v46, %v5030_v19  ;;  %3614 = vpow2.f32 %v3086_v53  ;;  %v5155_v63 = vadd.f32 %v5304_v10, %v5069_v32 }
 0x3ea   : > { %v3597_v20 = vpop.eup %3596  ;;  %v5150_v23 = vadd.f32 %v2704_v39, %v2596_v42  ;;  %v2605_v60 = vmul.f32 %v3595_v36, %v5036_v22  ;;  %3616 = vpow2.f32 %v3095_v41  ;;  %v5159_v47 = vadd.f32 %v4969_v7, %v5062_v44  ;;  %v5306_v7 = vld [vmem:[#allocation7_spill] sm:$0xff] }
 0x3eb   : > { %v3599_v24 = vpop.eup %3598  ;;  %v2667_v25 = vadd.f32 %v2666_v55, %v2603_v34  ;;  %v2364_v18 = vadd.f32 1.0, %v3597_v20  ;;  %3618 = vpow2.f32 %v3096_v6  ;;  %v5163_v55 = vadd.f32 %v5305_v3, %v5069_v32  ;;  %v5307_v34 = vld [vmem:[#allocation8_spill] sm:$0xff] }
 0x3ec   : > { %v3601_v51 = vpop.eup %3600  ;;  %v2693_v49 = vadd.f32 %v2692_v15, %v2605_v60  ;;  %v2366_v54 = vadd.f32 1.0, %v3599_v24  ;;  %3620 = vpow2.f32 %v3105_v0  ;;  %v3106_v46 = vmul.f32 -1.442695, %v5155_v63 }
 0x3ed   : > { %v3603_v45 = vpop.eup %3602  ;;  %v2668_v1 = vrot.slane %v2667_v25, 4  ;;  %3622 = vrcp.f32 %v2364_v18  ;;  %v2297_v61 = vadd.f32 1.0, %v3601_v51  ;;  %v5168_v15 = vadd.f32 %v5306_v7, %v5062_v44 }
 0x3ee   : > { %v3605_v19 = vpop.eup %3604  ;;  %3624 = vrcp.f32 %v2366_v54  ;;  %v2298_v31 = vadd.f32 1.0, %v3603_v45  ;;  %v2694_v13 = vrot.slane %v2693_v49, 4  ;;  %v3115_v36 = vmul.f32 -1.442695, %v5159_v47 }
 0x3ef   : > { %v3607_v14 = vpop.eup %3606  ;;  %v2669_v2 = vadd.f32 %v2668_v1, %v2667_v25  ;;  %3626 = vrcp.f32 %v2297_v61  ;;  %v2307_v22 = vadd.f32 1.0, %v3605_v19  ;;  %v5173_v20 = vadd.f32 %v5307_v34, %v5069_v32 }
 0x3f0   : > { %v3609_v29 = vpop.eup %3608  ;;  %3628 = vrcp.f32 %v2298_v31  ;;  %v2308_v35 = vadd.f32 1.0, %v3607_v14  ;;  %v2695_v62 = vadd.f32 %v2694_v13, %v2693_v49  ;;  %v3116_v44 = vmul.f32 -1.442695, %v5163_v55 }
 0x3f1   : > { %v3611_v37 = vpop.eup %3610  ;;  %3630 = vrcp.f32 %v2307_v22  ;;  %v2317_v8 = vadd.f32 1.0, %v3609_v29  ;;  %v2670_v53 = vrot.slane %v2669_v2, 2  ;;  %v3125_v1 = vmul.f32 -1.442695, %v5168_v15 }
 0x3f2   : > { %v3613_v48 = vpop.eup %3612  ;;  %3632 = vrcp.f32 %v2308_v35  ;;  %v2318_v56 = vadd.f32 1.0, %v3611_v37  ;;  %v2696_v25 = vrot.slane %v2695_v62, 2  ;;  %v3126_v19 = vmul.f32 -1.442695, %v5173_v20 }
 0x3f3   : > { %v3615_v58 = vpop.eup %3614  ;;  %3634 = vrcp.f32 %v2317_v8  ;;  %v2327_v39 = vadd.f32 1.0, %v3613_v48  ;;  %v2671_v24 = vadd.f32 %v2670_v53, %v2669_v2 }
 0x3f4   : > { %v3617_v5 = vpop.eup %3616  ;;  %3636 = vrcp.f32 %v2318_v56  ;;  %v2328_v41 = vadd.f32 1.0, %v3615_v58  ;;  %v2697_v2 = vadd.f32 %v2696_v25, %v2695_v62 }
 0x3f5   : > { %v3619_v21 = vpop.eup %3618  ;;  %3638 = vrcp.f32 %v2327_v39  ;;  %v2337_v6 = vadd.f32 1.0, %v3617_v5  ;;  %v2672_v14 = vrot.slane %v2671_v24, 1 }
 0x3f6   : > { %v3621_v42 = vpop.eup %3620  ;;  %3640 = vrcp.f32 %v2328_v41  ;;  %v2338_v0 = vadd.f32 1.0, %v3619_v21  ;;  %v2698_v53 = vrot.slane %v2697_v2, 1 }
 0x3f7   : > { %v3623_v60 = vpop.eup %3622  ;;  %3642 = vrcp.f32 %v2337_v6  ;;  %v2347_v18 = vadd.f32 1.0, %v3621_v42  ;;  %v2673_v7 = vadd.f32 %v2672_v14, %v2671_v24 }
 0x3f8   : > { %v3625_v51 = vpop.eup %3624  ;;  %v2604_v49 = vmul.f32 %v3623_v60, %v5066_v28  ;;  %3644 = vrcp.f32 %v2338_v0  ;;  %v2699_v34 = vadd.f32 %v2698_v53, %v2697_v2 }
 0x3f9   : > { %v3627_v54 = vpop.eup %3626  ;;  %v2606_v45 = vmul.f32 %v3625_v51, %v5073_v26  ;;  %3646 = vrcp.f32 %v2347_v18 }
 0x3fa   : > { %v3629_v61 = vpop.eup %3628  ;;  %v2680_v32 = vadd.f32 %v5147_v33, %v2604_v49  ;;  %3648 = vpow2.f32 %v3106_v46  ;;  %v2537_v29 = vmul.f32 %v3627_v54, %v5077_v50 }
 0x3fb   : > { %v3631_v31 = vpop.eup %3630  ;;  %v2706_v28 = vadd.f32 %v5150_v23, %v2606_v45  ;;  %3650 = vpow2.f32 %v3115_v36  ;;  %v2538_v33 = vmul.f32 %v3629_v61, %v5082_v9 }
 0x3fc   : > { %v3633_v13 = vpop.eup %3632  ;;  %v2681_v22 = vrot.slane %v2680_v32, 4  ;;  %v2547_v26 = vmul.f32 %v3631_v31, %v5086_v17  ;;  %3652 = vpow2.f32 %v3116_v44  ;;  %v2745_v31 = vmul.f32 0.015625, %v2699_v34 }
 0x3fd   : > { %v3635_v35 = vpop.eup %3634  ;;  %v2707_v37 = vrot.slane %v2706_v28, 4  ;;  %v2548_v8 = vmul.f32 %v3633_v13, %v5090_v11  ;;  %3654 = vpow2.f32 %v3125_v1  ;;  %v2743_v1 = vmul.f32 0.015625, %v2673_v7 }
 0x3fe   : > { %v3637_v10 = vpop.eup %3636  ;;  %v2682_v48 = vadd.f32 %v2681_v22, %v2680_v32  ;;  %v2713_v56 = vadd.f32 %v2547_v26, %v2537_v29  ;;  %v2557_v23 = vmul.f32 %v3635_v35, %v5094_v40  ;;  %3656 = vpow2.f32 %v3126_v19 }
 0x3ff   : > { %v3639_v58 = vpop.eup %3638  ;;  %v2708_v62 = vadd.f32 %v2707_v37, %v2706_v28  ;;  %v2726_v50 = vadd.f32 %v2548_v8, %v2538_v33  ;;  %v2558_v17 = vmul.f32 %v3637_v10, %v5098_v57  ;;  %v2799_v10 = vrot.slane %v2791_v12, %v4872_v4 }
 0x400   : > { %v3641_v39 = vpop.eup %3640  ;;  %v2683_v5 = vrot.slane %v2682_v48, 2  ;;  %v2714_v41 = vadd.f32 %v2713_v56, %v2557_v23  ;;  %v2567_v9 = vmul.f32 %v3639_v58, %v5105_v43 }
 0x401   : > { %v3643_v3 = vpop.eup %3642  ;;  %v2709_v11 = vrot.slane %v2708_v62, 2  ;;  %v2727_v21 = vadd.f32 %v2726_v50, %v2558_v17  ;;  %v2568_v6 = vmul.f32 %v3641_v39, %v5117_v30 }
 0x402   : > { %v3645_v46 = vpop.eup %3644  ;;  %v2684_v40 = vadd.f32 %v2683_v5, %v2682_v48  ;;  %v2715_v42 = vadd.f32 %v2714_v41, %v2567_v9  ;;  %v2577_v0 = vmul.f32 %v3643_v3, %v5126_v38 }
 0x403   : > { %v3647_v36 = vpop.eup %3646  ;;  %v2710_v60 = vadd.f32 %v2709_v11, %v2708_v62  ;;  %v2728_v57 = vadd.f32 %v2727_v21, %v2568_v6  ;;  %v2578_v25 = vmul.f32 %v3645_v46, %v5132_v59 }
 0x404   : > { %v3649_v18 = vpop.eup %3648  ;;  %v2685_v51 = vrot.slane %v2684_v40, 1  ;;  %v2716_v43 = vadd.f32 %v2715_v42, %v2577_v0  ;;  %v2587_v49 = vmul.f32 %v3647_v36, %v5137_v27 }
 0x405   : > { %v3651_v44 = vpop.eup %3650  ;;  %v2711_v54 = vrot.slane %v2710_v60, 1  ;;  %v2729_v30 = vadd.f32 %v2728_v57, %v2578_v25  ;;  %v2348_v45 = vadd.f32 1.0, %v3649_v18  ;;  %v5308_v57 = vlaneseq }
 0x406   : > { %v3653_v24 = vpop.eup %3652  ;;  %v2686_v61 = vadd.f32 %v2685_v51, %v2684_v40  ;;  %v2717_v32 = vadd.f32 %v2716_v43, %v2587_v49  ;;  %v2357_v38 = vadd.f32 1.0, %v3651_v44 }
 0x407   : > { %v3655_v19 = vpop.eup %3654  ;;  %v2712_v14 = vadd.f32 %v2711_v54, %v2710_v60  ;;  %3658 = vrcp.f32 %v2348_v45  ;;  %v2358_v59 = vadd.f32 1.0, %v3653_v24  ;;  %vm2828_vm4 = vcmp.lt.s32.totalorder %v5308_v57, 256 }
 0x408   : > { %v3657_v2 = vpop.eup %3656  ;;  %v2744_v28 = vmul.f32 0.015625, %v2686_v61  ;;  %3660 = vrcp.f32 %v2357_v38  ;;  %v2367_v13 = vadd.f32 1.0, %v3655_v19 }
 0x409   : > { %v2746_v27 = vmul.f32 0.015625, %v2712_v14  ;;  %3662 = vrcp.f32 %v2358_v59  ;;  %v2368_v22 = vadd.f32 1.0, %v3657_v2 }
 0x40a   : > { %v2761_v29 = vcombine.low %v2743_v1, %v2744_v28  ;;  %3664 = vrcp.f32 %v2367_v13 }
 0x40b   : > { %v2762_v26 = vcombine.low %v2745_v31, %v2746_v27  ;;  %3666 = vrcp.f32 %v2368_v22 }
 0x40c   : > { %v2783_v35 = vrot.slane %v2761_v29, %v4872_v4 }
 0x40d   : > { %v2790_v37 = vrot.slane %v2762_v26, %v4872_v4 }
 0x40f   : > { %v2792_v33 = vcombine.low %v2783_v35, %v2790_v37 }
 0x411   : > { %v3659_v8 = vpop.eup %3658  ;;  %v2806_v48 = vrot.slane %v2792_v33, %v4872_v4 }
 0x412   : > { %v3661_v56 = vpop.eup %3660  ;;  %v2588_v23 = vmul.f32 %v3659_v8, %v5155_v63 }
 0x413   : > { %v3663_v58 = vpop.eup %3662  ;;  %v2807_v53 = vcombine.low %v2799_v10, %v2806_v48  ;;  %v2597_v62 = vmul.f32 %v3661_v56, %v5159_v47 }
 0x414   : > { %v3665_v50 = vpop.eup %3664  ;;  %v2730_v17 = vadd.f32 %v2729_v30, %v2588_v23  ;;  %v2598_v52 = vmul.f32 %v3663_v58, %v5163_v55 }
 0x415   : > { %v3667_v16 = vpop.eup %3666  ;;  %2825 = vst [vmem:[%s5204_s27] sm:$0xff] %v2807_v53  ;;  %v2718_v12 = vadd.f32 %v2717_v32, %v2597_v62  ;;  %v2607_v39 = vmul.f32 %v3665_v50, %v5168_v15 }
 0x416   : > { %v2731_v5 = vadd.f32 %v2730_v17, %v2598_v52  ;;  %v2608_v41 = vmul.f32 %v3667_v16, %v5173_v20 }
 0x417   : > { %v2719_v9 = vadd.f32 %v2718_v12, %v2607_v39 }
 0x418   : > { %v2732_v3 = vadd.f32 %v2731_v5, %v2608_v41 }
 0x419   : > { %v2720_v11 = vrot.slane %v2719_v9, 4 }
 0x41a   : > { %v2733_v63 = vrot.slane %v2732_v3, 4 }
 0x41b   : > { %v2721_v21 = vadd.f32 %v2720_v11, %v2719_v9 }
 0x41c   : > { %v2734_v6 = vadd.f32 %v2733_v63, %v2732_v3 }
 0x41d   : > { %v2722_v47 = vrot.slane %v2721_v21, 2 }
 0x41e   : > { %v2735_v46 = vrot.slane %v2734_v6, 2 }
 0x41f   : > { %v2723_v7 = vadd.f32 %v2722_v47, %v2721_v21 }
 0x420   : > { %v2736_v40 = vadd.f32 %v2735_v46, %v2734_v6 }
 0x421   : > { %v2724_v55 = vrot.slane %v2723_v7, 1 }
 0x422   : > { %v2737_v42 = vrot.slane %v2736_v40, 1 }
 0x423   : > { %v2725_v0 = vadd.f32 %v2724_v55, %v2723_v7 }
 0x424   : > { %v2738_v36 = vadd.f32 %v2737_v42, %v2736_v40 }
 0x425   : > { %v2747_v34 = vmul.f32 0.015625, %v2725_v0 }
 0x426   : > { %v2748_v15 = vmul.f32 0.015625, %v2738_v36 }
 0x428   : > { %v2808_v60 = vcombine.low %v2747_v34, %v2748_v15 }
 0x42a   : > { %v2815_v20 = vrot.slane %v2808_v60, %v4872_v4 }
 0x42c   : > { %v2822_v25 = vrot.slane %v2815_v20, %v4872_v4 }
 0x42e   : > { %2830 = vst.msk [vmem:[%s5204_s27 + $0x8] sm:$0x3] %vm2828_vm4, %v2822_v25 }
 0x42f PF: > { %s22_s21 = sadd.s32 1, %s3674_s21  }
 0x430   : > { %p19_p4 = scmp.ge.s32.totalorder %s22_s21, 4  }
 0x432   :  { %21 = sbr.rel (!%p19_p4) target bundleno = 1 (0x1), region = 109 }

</bundles_post_ra>
